<compile_context>
chip_gen: v6e
topology: v6e:2x2x1
jax: 0.10.0
libtpu: 0.0.40
codegen_flags: <defaults>
</compile_context>

<pallas_src>
import functools
import numpy as np
import jax
import jax.numpy as jnp
from jax.experimental import pallas as pl
from jax.experimental.pallas import tpu as pltpu


def _round_up(x, m):
    return (x + m - 1) // m * m


# ---------------------------------------------------------------------------
# Adaptive tile selection
# ---------------------------------------------------------------------------
def _pick_tm(m):
    """Row tile: tight (multiple of 16, bf16 sublane) for small M, 256/128 otherwise."""
    if m <= 128:
        return _round_up(m, 16)
    if _round_up(m, 256) == _round_up(m, 128):
        return 256
    return 128


def _pick_tn(n):
    """Column tile: full width if <=128, else 256 when it adds no extra padding."""
    if n <= 128:
        return n
    if _round_up(n, 256) == _round_up(n, 128):
        return 256
    return 128


def _pick_tk(k):
    """Reduction tile: full width if <=128 (avoids 2x zero-pad on 1x1 convs)."""
    if k <= 128:
        return k
    if _round_up(k, 256) == _round_up(k, 128):
        return 256
    return 128


# ---------------------------------------------------------------------------
# Pallas kernels
# ---------------------------------------------------------------------------
def _fused_matmul_kernel(x_ref, w_ref, scale_ref, shift_ref, *refs, relu, has_res):
    """o = relu?((x @ w) * scale + shift [+ res]); K-axis accumulation in f32."""
    if has_res:
        res_ref, o_ref, acc_ref = refs
    else:
        o_ref, acc_ref = refs
        res_ref = None

    k = pl.program_id(2)

    @pl.when(k == 0)
    def _():
        acc_ref[...] = jnp.zeros_like(acc_ref)

    acc_ref[...] += jnp.dot(x_ref[...], w_ref[...],
                            preferred_element_type=jnp.float32)

    @pl.when(k == pl.num_programs(2) - 1)
    def _():
        y = acc_ref[...] * scale_ref[...] + shift_ref[...]
        if has_res:
            y = y + res_ref[...].astype(jnp.float32)
        if relu:
            y = jnp.maximum(y, 0.0)
        o_ref[...] = y.astype(o_ref.dtype)


def _max9_kernel(*refs):
    """Elementwise max over 9 equally-shaped row-tiled inputs."""
    o_ref = refs[-1]
    acc = refs[0][...]
    for r in refs[1:-1]:
        acc = jnp.maximum(acc, r[...])
    o_ref[...] = acc


def _gap_kernel(x_ref, o_ref):
    """x: [B, HW, C] -> mean over HW, accumulated in f32."""
    inv = 1.0 / x_ref.shape[1]
    o_ref[...] = jnp.sum(x_ref[...].astype(jnp.float32), axis=1) * inv


# ---------------------------------------------------------------------------
# Pallas wrappers
# ---------------------------------------------------------------------------
def fused_matmul(x, w, scale, shift, *, relu, res=None, out_dtype=jnp.float32):
    """x:[M,K] @ w:[K,N] (bf16 on MXU, f32 accum), per-column scale/shift,
    optional fused residual add and ReLU."""
    M, K = x.shape
    Kw, N = w.shape
    assert Kw == K
    TM, TN, TK = _pick_tm(M), _pick_tn(N), _pick_tk(K)
    Mp, Kp, Np = _round_up(M, TM), _round_up(K, TK), _round_up(N, TN)

    xp = jnp.pad(x.astype(jnp.bfloat16), ((0, Mp - M), (0, Kp - K)))
    wp = jnp.pad(w.astype(jnp.bfloat16), ((0, Kp - K), (0, Np - N)))
    sp = jnp.pad(scale.astype(jnp.float32).reshape(1, -1), ((0, 0), (0, Np - N)))
    bp = jnp.pad(shift.astype(jnp.float32).reshape(1, -1), ((0, 0), (0, Np - N)))

    inputs = [xp, wp, sp, bp]
    in_specs = [
        pl.BlockSpec((TM, TK), lambda i, j, k: (i, k)),
        pl.BlockSpec((TK, TN), lambda i, j, k: (k, j)),
        pl.BlockSpec((1, TN), lambda i, j, k: (0, j)),
        pl.BlockSpec((1, TN), lambda i, j, k: (0, j)),
    ]
    has_res = res is not None
    if has_res:
        rp = jnp.pad(res.astype(jnp.bfloat16), ((0, Mp - M), (0, Np - N)))
        inputs.append(rp)
        # Block index is independent of k, so Pallas skips re-DMA across K steps.
        in_specs.append(pl.BlockSpec((TM, TN), lambda i, j, k: (i, j)))

    out = pl.pallas_call(
        functools.partial(_fused_matmul_kernel, relu=relu, has_res=has_res),
        out_shape=jax.ShapeDtypeStruct((Mp, Np), out_dtype),
        grid_spec=pltpu.PrefetchScalarGridSpec(
            num_scalar_prefetch=0,
            grid=(Mp // TM, Np // TN, Kp // TK),
            in_specs=in_specs,
            out_specs=pl.BlockSpec((TM, TN), lambda i, j, k: (i, j)),
            scratch_shapes=[pltpu.VMEM((TM, TN), jnp.float32)],
        ),
        compiler_params=pltpu.CompilerParams(
            dimension_semantics=("parallel", "parallel", "arbitrary")),
    )(*inputs)

    if Mp != M or Np != N:
        out = out[:M, :N]
    return out


def maxpool3x3_s2(x):
    """PyTorch MaxPool2d(kernel_size=3, stride=2, padding=1), NHWC, bf16."""
    B, H, W, C = x.shape
    pad = 1
    xp = jnp.pad(x, ((0, 0), (pad, pad), (pad, pad), (0, 0)),
                 constant_values=-jnp.inf)
    oh = (H + 2 * pad - 3) // 2 + 1
    ow = (W + 2 * pad - 3) // 2 + 1
    rows = B * oh * ow
    views = []
    for i in range(3):
        for j in range(3):
            v = xp[:, i:i + 2 * (oh - 1) + 1:2, j:j + 2 * (ow - 1) + 1:2, :]
            views.append(v.reshape(rows, C))

    TR = min(512, _round_up(rows, 16))
    rows_p = _round_up(rows, TR)
    if rows_p != rows:
        views = [jnp.pad(v, ((0, rows_p - rows), (0, 0))) for v in views]

    out = pl.pallas_call(
        _max9_kernel,
        out_shape=jax.ShapeDtypeStruct((rows_p, C), x.dtype),
        grid_spec=pltpu.PrefetchScalarGridSpec(
            num_scalar_prefetch=0,
            grid=(rows_p // TR,),
            in_specs=[pl.BlockSpec((TR, C), lambda i: (i, 0))] * 9,
            out_specs=pl.BlockSpec((TR, C), lambda i: (i, 0)),
        ),
        compiler_params=pltpu.CompilerParams(dimension_semantics=("parallel",)),
    )(*views)
    return out[:rows].reshape(B, oh, ow, C)


def global_avg_pool(x):
    """Adaptive avg pool to 1x1 + flatten -> [B, C] (f32 accumulation)."""
    B, H, W, C = x.shape
    xr = x.reshape(B, H * W, C)
    return pl.pallas_call(
        _gap_kernel,
        out_shape=jax.ShapeDtypeStruct((B, C), jnp.float32),
    )(xr)


# ---------------------------------------------------------------------------
# Conv / BN / ResNet plumbing (im2col & reshapes are plain-JAX glue, in bf16)
# ---------------------------------------------------------------------------
def im2col(x, kh, kw, stride, padding):
    B, H, W, C = x.shape
    xp = jnp.pad(x, ((0, 0), (padding, padding), (padding, padding), (0, 0)))
    oh = (H + 2 * padding - kh) // stride + 1
    ow = (W + 2 * padding - kw) // stride + 1
    pieces = []
    for i in range(kh):
        for j in range(kw):
            pieces.append(
                xp[:, i:i + stride * (oh - 1) + 1:stride,
                      j:j + stride * (ow - 1) + 1:stride, :])
    patches = jnp.concatenate(pieces, axis=-1)  # [B, oh, ow, kh*kw*C]
    return patches.reshape(B * oh * ow, kh * kw * C), oh, ow


def conv_bn(x, p, kh, kw, stride, padding, relu, res=None,
            out_dtype=jnp.bfloat16):
    B = x.shape[0]
    patches, oh, ow = im2col(x, kh, kw, stride, padding)
    cout = p["w"].shape[1]
    res2 = None if res is None else res.reshape(-1, cout)
    y = fused_matmul(patches, p["w"], p["scale"], p["shift"],
                     relu=relu, res=res2, out_dtype=out_dtype)
    return y.reshape(B, oh, ow, cout)


def basic_block(x, p, stride):
    out = conv_bn(x, p["conv1"], 3, 3, stride, 1, relu=True)
    if "down" in p:
        identity = conv_bn(x, p["down"], 1, 1, stride, 0, relu=False)
    else:
        identity = x
    # conv2 + BN + residual add + ReLU fused into one matmul epilogue.
    out = conv_bn(out, p["conv2"], 3, 3, 1, 1, relu=True, res=identity)
    return out


# ---------------------------------------------------------------------------
# Deterministic parameter init (eval-mode BN folded; weights stored bf16 2D)
# ---------------------------------------------------------------------------
def conv_bn_params(key, kh, kw, cin, cout):
    k1, k2, k3, k4, k5 = jax.random.split(key, 5)
    w = jax.random.normal(k1, (kh, kw, cin, cout), jnp.float32) * np.sqrt(
        2.0 / (kh * kw * cin))
    gamma = 1.0 + 0.1 * jax.random.normal(k2, (cout,), jnp.float32)
    beta = 0.1 * jax.random.normal(k3, (cout,), jnp.float32)
    rmean = 0.1 * jax.random.normal(k4, (cout,), jnp.float32)
    rvar = 1.0 + 0.1 * jax.random.uniform(k5, (cout,), jnp.float32)
    scale = gamma / jnp.sqrt(rvar + 1e-5)           # eval-mode BN folded
    shift = beta - rmean * scale
    return {"w": w.reshape(kh * kw * cin, cout).astype(jnp.bfloat16),
            "scale": scale, "shift": shift}


def linear_params(key, nin, nout):
    k1, k2 = jax.random.split(key)
    bound = 1.0 / np.sqrt(nin)
    w = jax.random.uniform(k1, (nin, nout), jnp.float32, -bound, bound)
    b = jax.random.uniform(k2, (nout,), jnp.float32, -bound, bound)
    return {"w": w.astype(jnp.bfloat16), "b": b}


def init_encoder_params(key):
    keys = iter(jax.random.split(key, 32))
    P = {"conv1": conv_bn_params(next(keys), 7, 7, 3, 64)}

    def block(cin, cout, downsample):
        d = {"conv1": conv_bn_params(next(keys), 3, 3, cin, cout),
             "conv2": conv_bn_params(next(keys), 3, 3, cout, cout)}
        if downsample:
            d["down"] = conv_bn_params(next(keys), 1, 1, cin, cout)
        return d

    P["layer1"] = [block(64, 64, False), block(64, 64, False)]
    P["layer2"] = [block(64, 128, True), block(128, 128, False)]
    P["layer3"] = [block(128, 256, True), block(256, 256, False)]
    P["layer4"] = [block(256, 512, True), block(512, 512, False)]
    P["fc1"] = linear_params(next(keys), 512, 256)
    P["fc2"] = linear_params(next(keys), 256, 128)
    return P


# ---------------------------------------------------------------------------
# Encoder forward:  x (B, C, H, W)  ->  (h: [B, 512], z: [B, 128])
# ---------------------------------------------------------------------------
def encoder_forward(params, x_nchw):
    x = jnp.transpose(x_nchw, (0, 2, 3, 1)).astype(jnp.bfloat16)  # NCHW -> NHWC, bf16
    x = conv_bn(x, params["conv1"], 7, 7, stride=2, padding=3, relu=True)
    x = maxpool3x3_s2(x)
    for name, stride in (("layer1", 1), ("layer2", 2), ("layer3", 2), ("layer4", 2)):
        blocks = params[name]
        x = basic_block(x, blocks[0], stride)
        x = basic_block(x, blocks[1], 1)
    h = global_avg_pool(x)                                   # [B, 512] f32
    ones256 = jnp.ones((256,), jnp.float32)
    ones128 = jnp.ones((128,), jnp.float32)
    z = fused_matmul(h, params["fc1"]["w"], ones256, params["fc1"]["b"],
                     relu=True, out_dtype=jnp.float32)
    z = fused_matmul(z, params["fc2"]["w"], ones128, params["fc2"]["b"],
                     relu=False, out_dtype=jnp.float32)
    return h, z


if __name__ == "__main__":
    key = jax.random.PRNGKey(0)
    pkey, xkey = jax.random.split(key)
    params = init_encoder_params(pkey)
    x = jax.random.normal(xkey, (2, 3, 32, 32), jnp.float32)  # B x C x H x W

    fwd = jax.jit(encoder_forward)
    h, z = fwd(params, x)
    jax.block_until_ready((h, z))

    assert h.shape == (2, 512), h.shape
    assert z.shape == (2, 128), z.shape
    assert bool(jnp.all(jnp.isfinite(h))) and bool(jnp.all(jnp.isfinite(z)))
    print("KERNEL_OK")
</pallas_src>

<mosaic_0001>
module attributes {stable_mosaic.version = 11 : i64} {
  func.func @_fused_matmul_kernel(%arg0: i32, %arg1: i32, %arg2: i32, %arg3: memref<256x256xbf16, #tpu.memory_space<vmem>>, %arg4: memref<256x64xbf16, #tpu.memory_space<vmem>>, %arg5: memref<1x64xf32, #tpu.memory_space<vmem>>, %arg6: memref<1x64xf32, #tpu.memory_space<vmem>>, %arg7: memref<256x64xbf16, #tpu.memory_space<vmem>>, %arg8: memref<256x64xf32, #tpu.memory_space<vmem>>) attributes {dimension_semantics = [#tpu.dimension_semantics<parallel>, #tpu.dimension_semantics<parallel>, #tpu.dimension_semantics<arbitrary>], iteration_bounds = array<i64: 2, 1, 1>, scalar_prefetch = 0 : i64, scratch_operands = 1 : i64, tpu.core_type = #tpu.core_type<tc>, window_params = [{transform_indices = @transform_0, window_bounds = array<i64: 256, 256>}, {transform_indices = @transform_1, window_bounds = array<i64: 256, 64>}, {transform_indices = @transform_2, window_bounds = array<i64: 1, 64>}, {transform_indices = @transform_3, window_bounds = array<i64: 1, 64>}, {transform_indices = @transform_4, window_bounds = array<i64: 256, 64>}]} {
    %c0_i32 = arith.constant 0 : i32
    %0 = arith.cmpi eq, %arg2, %c0_i32 : i32
    %1 = arith.extui %0 : i1 to i32
    %c0_i32_0 = arith.constant 0 : i32
    %2 = arith.cmpi ne, %1, %c0_i32_0 : i32
    scf.if %2 {
      %cst_10 = arith.constant 0.000000e+00 : f32
      %12 = vector.broadcast %cst_10 : f32 to vector<256x64xf32>
      %c0_11 = arith.constant 0 : index
      %c0_12 = arith.constant 0 : index
      %13 = vector.load %arg8[%c0_11, %c0_12] : memref<256x64xf32, #tpu.memory_space<vmem>>, vector<256x64xf32>
      tpu.vector_store %arg8[%c0_11, %c0_12], %12 {strides = array<i32>} : memref<256x64xf32, #tpu.memory_space<vmem>>, vector<256x64xf32>,
    } else {
    }
    %c0 = arith.constant 0 : index
    %c0_1 = arith.constant 0 : index
    %3 = vector.load %arg8[%c0, %c0_1] : memref<256x64xf32, #tpu.memory_space<vmem>>, vector<256x64xf32>
    %c0_2 = arith.constant 0 : index
    %c0_3 = arith.constant 0 : index
    %4 = vector.load %arg3[%c0_2, %c0_3] : memref<256x256xbf16, #tpu.memory_space<vmem>>, vector<256x256xbf16>
    %c0_4 = arith.constant 0 : index
    %c0_5 = arith.constant 0 : index
    %5 = vector.load %arg4[%c0_4, %c0_5] : memref<256x64xbf16, #tpu.memory_space<vmem>>, vector<256x64xbf16>
    %cst = arith.constant dense<0.000000e+00> : vector<256x64xf32>
    %6 = tpu.matmul %4, %5, %cst {dimension_numbers = #tpu.dot_dimension_numbers<[1], [0], [0], [1], [0, 0, 1, 1], [], []>} : vector<256x256xbf16>, vector<256x64xbf16>, vector<256x64xf32> -> vector<256x64xf32>
    %7 = arith.addf %3, %6 : vector<256x64xf32>
    %c0_6 = arith.constant 0 : index
    %c0_7 = arith.constant 0 : index
    %8 = vector.load %arg8[%c0_6, %c0_7] : memref<256x64xf32, #tpu.memory_space<vmem>>, vector<256x64xf32>
    tpu.vector_store %arg8[%c0_6, %c0_7], %7 {strides = array<i32>} : memref<256x64xf32, #tpu.memory_space<vmem>>, vector<256x64xf32>,
    %c0_i32_8 = arith.constant 0 : i32
    %9 = arith.cmpi eq, %arg2, %c0_i32_8 : i32
    %10 = arith.extui %9 : i1 to i32
    %c0_i32_9 = arith.constant 0 : i32
    %11 = arith.cmpi ne, %10, %c0_i32_9 : i32
    scf.if %11 {
      %c0_10 = arith.constant 0 : index
      %c0_11 = arith.constant 0 : index
      %12 = vector.load %arg8[%c0_10, %c0_11] : memref<256x64xf32, #tpu.memory_space<vmem>>, vector<256x64xf32>
      %c0_12 = arith.constant 0 : index
      %c0_13 = arith.constant 0 : index
      %13 = vector.load %arg5[%c0_12, %c0_13] : memref<1x64xf32, #tpu.memory_space<vmem>>, vector<1x64xf32>
      %14 = vector.broadcast %13 : vector<1x64xf32> to vector<256x64xf32>
      %15 = arith.mulf %12, %14 : vector<256x64xf32>
      %c0_14 = arith.constant 0 : index
      %c0_15 = arith.constant 0 : index
      %16 = vector.load %arg6[%c0_14, %c0_15] : memref<1x64xf32, #tpu.memory_space<vmem>>, vector<1x64xf32>
      %17 = vector.broadcast %16 : vector<1x64xf32> to vector<256x64xf32>
      %18 = arith.addf %15, %17 : vector<256x64xf32>
      %cst_16 = arith.constant 0.000000e+00 : f32
      %19 = vector.broadcast %cst_16 : f32 to vector<256x64xf32>
      %20 = arith.maximumf %18, %19 : vector<256x64xf32>
      %21 = arith.truncf %20 : vector<256x64xf32> to vector<256x64xbf16>
      %c0_17 = arith.constant 0 : index
      %c0_18 = arith.constant 0 : index
      %22 = vector.load %arg7[%c0_17, %c0_18] : memref<256x64xbf16, #tpu.memory_space<vmem>>, vector<256x64xbf16>
      tpu.vector_store %arg7[%c0_17, %c0_18], %21 {strides = array<i32>} : memref<256x64xbf16, #tpu.memory_space<vmem>>, vector<256x64xbf16>,
    } else {
    }
    return
  }
  func.func @transform_0(%arg0: i32, %arg1: i32, %arg2: i32) -> (i32, i32) {
    %c0_i32 = arith.constant 0 : i32
    return %arg0, %arg2 : i32, i32
  }
  func.func @transform_1(%arg0: i32, %arg1: i32, %arg2: i32) -> (i32, i32) {
    %c0_i32 = arith.constant 0 : i32
    return %arg2, %arg1 : i32, i32
  }
  func.func @transform_2(%arg0: i32, %arg1: i32, %arg2: i32) -> (i32, i32) {
    %c0_i32 = arith.constant 0 : i32
    %c0_i32_0 = arith.constant 0 : i32
    return %c0_i32, %arg1 : i32, i32
  }
  func.func @transform_3(%arg0: i32, %arg1: i32, %arg2: i32) -> (i32, i32) {
    %c0_i32 = arith.constant 0 : i32
    %c0_i32_0 = arith.constant 0 : i32
    return %c0_i32, %arg1 : i32, i32
  }
  func.func @transform_4(%arg0: i32, %arg1: i32, %arg2: i32) -> (i32, i32) {
    %c0_i32 = arith.constant 0 : i32
    return %arg0, %arg1 : i32, i32
  }
}

module attributes {stable_mosaic.version = 11 : i64} {
  func.func @_max9_kernel(%arg0: i32, %arg1: memref<128x64xbf16, #tpu.memory_space<vmem>>, %arg2: memref<128x64xbf16, #tpu.memory_space<vmem>>, %arg3: memref<128x64xbf16, #tpu.memory_space<vmem>>, %arg4: memref<128x64xbf16, #tpu.memory_space<vmem>>, %arg5: memref<128x64xbf16, #tpu.memory_space<vmem>>, %arg6: memref<128x64xbf16, #tpu.memory_space<vmem>>, %arg7: memref<128x64xbf16, #tpu.memory_space<vmem>>, %arg8: memref<128x64xbf16, #tpu.memory_space<vmem>>, %arg9: memref<128x64xbf16, #tpu.memory_space<vmem>>, %arg10: memref<128x64xbf16, #tpu.memory_space<vmem>>) attributes {dimension_semantics = [#tpu.dimension_semantics<parallel>], iteration_bounds = array<i64: 1>, scalar_prefetch = 0 : i64, scratch_operands = 0 : i64, tpu.core_type = #tpu.core_type<tc>, window_params = [{transform_indices = @transform_0, window_bounds = array<i64: 128, 64>}, {transform_indices = @transform_1, window_bounds = array<i64: 128, 64>}, {transform_indices = @transform_2, window_bounds = array<i64: 128, 64>}, {transform_indices = @transform_3, window_bounds = array<i64: 128, 64>}, {transform_indices = @transform_4, window_bounds = array<i64: 128, 64>}, {transform_indices = @transform_5, window_bounds = array<i64: 128, 64>}, {transform_indices = @transform_6, window_bounds = array<i64: 128, 64>}, {transform_indices = @transform_7, window_bounds = array<i64: 128, 64>}, {transform_indices = @transform_8, window_bounds = array<i64: 128, 64>}, {transform_indices = @transform_9, window_bounds = array<i64: 128, 64>}]} {
    %c0 = arith.constant 0 : index
    %c0_0 = arith.constant 0 : index
    %0 = vector.load %arg1[%c0, %c0_0] : memref<128x64xbf16, #tpu.memory_space<vmem>>, vector<128x64xbf16>
    %c0_1 = arith.constant 0 : index
    %c0_2 = arith.constant 0 : index
    %1 = vector.load %arg2[%c0_1, %c0_2] : memref<128x64xbf16, #tpu.memory_space<vmem>>, vector<128x64xbf16>
    %2 = arith.maximumf %0, %1 : vector<128x64xbf16>
    %c0_3 = arith.constant 0 : index
    %c0_4 = arith.constant 0 : index
    %3 = vector.load %arg3[%c0_3, %c0_4] : memref<128x64xbf16, #tpu.memory_space<vmem>>, vector<128x64xbf16>
    %4 = arith.maximumf %2, %3 : vector<128x64xbf16>
    %c0_5 = arith.constant 0 : index
    %c0_6 = arith.constant 0 : index
    %5 = vector.load %arg4[%c0_5, %c0_6] : memref<128x64xbf16, #tpu.memory_space<vmem>>, vector<128x64xbf16>
    %6 = arith.maximumf %4, %5 : vector<128x64xbf16>
    %c0_7 = arith.constant 0 : index
    %c0_8 = arith.constant 0 : index
    %7 = vector.load %arg5[%c0_7, %c0_8] : memref<128x64xbf16, #tpu.memory_space<vmem>>, vector<128x64xbf16>
    %8 = arith.maximumf %6, %7 : vector<128x64xbf16>
    %c0_9 = arith.constant 0 : index
    %c0_10 = arith.constant 0 : index
    %9 = vector.load %arg6[%c0_9, %c0_10] : memref<128x64xbf16, #tpu.memory_space<vmem>>, vector<128x64xbf16>
    %10 = arith.maximumf %8, %9 : vector<128x64xbf16>
    %c0_11 = arith.constant 0 : index
    %c0_12 = arith.constant 0 : index
    %11 = vector.load %arg7[%c0_11, %c0_12] : memref<128x64xbf16, #tpu.memory_space<vmem>>, vector<128x64xbf16>
    %12 = arith.maximumf %10, %11 : vector<128x64xbf16>
    %c0_13 = arith.constant 0 : index
    %c0_14 = arith.constant 0 : index
    %13 = vector.load %arg8[%c0_13, %c0_14] : memref<128x64xbf16, #tpu.memory_space<vmem>>, vector<128x64xbf16>
    %14 = arith.maximumf %12, %13 : vector<128x64xbf16>
    %c0_15 = arith.constant 0 : index
    %c0_16 = arith.constant 0 : index
    %15 = vector.load %arg9[%c0_15, %c0_16] : memref<128x64xbf16, #tpu.memory_space<vmem>>, vector<128x64xbf16>
    %16 = arith.maximumf %14, %15 : vector<128x64xbf16>
    %c0_17 = arith.constant 0 : index
    %c0_18 = arith.constant 0 : index
    %17 = vector.load %arg10[%c0_17, %c0_18] : memref<128x64xbf16, #tpu.memory_space<vmem>>, vector<128x64xbf16>
    tpu.vector_store %arg10[%c0_17, %c0_18], %16 {strides = array<i32>} : memref<128x64xbf16, #tpu.memory_space<vmem>>, vector<128x64xbf16>,
    return
  }
  func.func @transform_0(%arg0: i32) -> (i32, i32) {
    %c0_i32 = arith.constant 0 : i32
    %c0_i32_0 = arith.constant 0 : i32
    return %arg0, %c0_i32 : i32, i32
  }
  func.func @transform_1(%arg0: i32) -> (i32, i32) {
    %c0_i32 = arith.constant 0 : i32
    %c0_i32_0 = arith.constant 0 : i32
    return %arg0, %c0_i32 : i32, i32
  }
  func.func @transform_2(%arg0: i32) -> (i32, i32) {
    %c0_i32 = arith.constant 0 : i32
    %c0_i32_0 = arith.constant 0 : i32
    return %arg0, %c0_i32 : i32, i32
  }
  func.func @transform_3(%arg0: i32) -> (i32, i32) {
    %c0_i32 = arith.constant 0 : i32
    %c0_i32_0 = arith.constant 0 : i32
    return %arg0, %c0_i32 : i32, i32
  }
  func.func @transform_4(%arg0: i32) -> (i32, i32) {
    %c0_i32 = arith.constant 0 : i32
    %c0_i32_0 = arith.constant 0 : i32
    return %arg0, %c0_i32 : i32, i32
  }
  func.func @transform_5(%arg0: i32) -> (i32, i32) {
    %c0_i32 = arith.constant 0 : i32
    %c0_i32_0 = arith.constant 0 : i32
    return %arg0, %c0_i32 : i32, i32
  }
  func.func @transform_6(%arg0: i32) -> (i32, i32) {
    %c0_i32 = arith.constant 0 : i32
    %c0_i32_0 = arith.constant 0 : i32
    return %arg0, %c0_i32 : i32, i32
  }
  func.func @transform_7(%arg0: i32) -> (i32, i32) {
    %c0_i32 = arith.constant 0 : i32
    %c0_i32_0 = arith.constant 0 : i32
    return %arg0, %c0_i32 : i32, i32
  }
  func.func @transform_8(%arg0: i32) -> (i32, i32) {
    %c0_i32 = arith.constant 0 : i32
    %c0_i32_0 = arith.constant 0 : i32
    return %arg0, %c0_i32 : i32, i32
  }
  func.func @transform_9(%arg0: i32) -> (i32, i32) {
    %c0_i32 = arith.constant 0 : i32
    %c0_i32_0 = arith.constant 0 : i32
    return %arg0, %c0_i32 : i32, i32
  }
}

module attributes {stable_mosaic.version = 11 : i64} {
  func.func @_fused_matmul_kernel(%arg0: i32, %arg1: i32, %arg2: i32, %arg3: memref<128x128xbf16, #tpu.memory_space<vmem>>, %arg4: memref<128x64xbf16, #tpu.memory_space<vmem>>, %arg5: memref<1x64xf32, #tpu.memory_space<vmem>>, %arg6: memref<1x64xf32, #tpu.memory_space<vmem>>, %arg7: memref<128x64xbf16, #tpu.memory_space<vmem>>, %arg8: memref<128x64xf32, #tpu.memory_space<vmem>>) attributes {dimension_semantics = [#tpu.dimension_semantics<parallel>, #tpu.dimension_semantics<parallel>, #tpu.dimension_semantics<arbitrary>], iteration_bounds = array<i64: 1, 1, 5>, scalar_prefetch = 0 : i64, scratch_operands = 1 : i64, tpu.core_type = #tpu.core_type<tc>, window_params = [{transform_indices = @transform_0, window_bounds = array<i64: 128, 128>}, {transform_indices = @transform_1, window_bounds = array<i64: 128, 64>}, {transform_indices = @transform_2, window_bounds = array<i64: 1, 64>}, {transform_indices = @transform_3, window_bounds = array<i64: 1, 64>}, {transform_indices = @transform_4, window_bounds = array<i64: 128, 64>}]} {
    %c0_i32 = arith.constant 0 : i32
    %0 = arith.cmpi eq, %arg2, %c0_i32 : i32
    %1 = arith.extui %0 : i1 to i32
    %c0_i32_0 = arith.constant 0 : i32
    %2 = arith.cmpi ne, %1, %c0_i32_0 : i32
    scf.if %2 {
      %cst_9 = arith.constant 0.000000e+00 : f32
      %12 = vector.broadcast %cst_9 : f32 to vector<128x64xf32>
      %c0_10 = arith.constant 0 : index
      %c0_11 = arith.constant 0 : index
      %13 = vector.load %arg8[%c0_10, %c0_11] : memref<128x64xf32, #tpu.memory_space<vmem>>, vector<128x64xf32>
      tpu.vector_store %arg8[%c0_10, %c0_11], %12 {strides = array<i32>} : memref<128x64xf32, #tpu.memory_space<vmem>>, vector<128x64xf32>,
    } else {
    }
    %c0 = arith.constant 0 : index
    %c0_1 = arith.constant 0 : index
    %3 = vector.load %arg8[%c0, %c0_1] : memref<128x64xf32, #tpu.memory_space<vmem>>, vector<128x64xf32>
    %c0_2 = arith.constant 0 : index
    %c0_3 = arith.constant 0 : index
    %4 = vector.load %arg3[%c0_2, %c0_3] : memref<128x128xbf16, #tpu.memory_space<vmem>>, vector<128x128xbf16>
    %c0_4 = arith.constant 0 : index
    %c0_5 = arith.constant 0 : index
    %5 = vector.load %arg4[%c0_4, %c0_5] : memref<128x64xbf16, #tpu.memory_space<vmem>>, vector<128x64xbf16>
    %cst = arith.constant dense<0.000000e+00> : vector<128x64xf32>
    %6 = tpu.matmul %4, %5, %cst {dimension_numbers = #tpu.dot_dimension_numbers<[1], [0], [0], [1], [0, 0, 1, 1], [], []>} : vector<128x128xbf16>, vector<128x64xbf16>, vector<128x64xf32> -> vector<128x64xf32>
    %7 = arith.addf %3, %6 : vector<128x64xf32>
    %c0_6 = arith.constant 0 : index
    %c0_7 = arith.constant 0 : index
    %8 = vector.load %arg8[%c0_6, %c0_7] : memref<128x64xf32, #tpu.memory_space<vmem>>, vector<128x64xf32>
    tpu.vector_store %arg8[%c0_6, %c0_7], %7 {strides = array<i32>} : memref<128x64xf32, #tpu.memory_space<vmem>>, vector<128x64xf32>,
    %c4_i32 = arith.constant 4 : i32
    %9 = arith.cmpi eq, %arg2, %c4_i32 : i32
    %10 = arith.extui %9 : i1 to i32
    %c0_i32_8 = arith.constant 0 : i32
    %11 = arith.cmpi ne, %10, %c0_i32_8 : i32
    scf.if %11 {
      %c0_9 = arith.constant 0 : index
      %c0_10 = arith.constant 0 : index
      %12 = vector.load %arg8[%c0_9, %c0_10] : memref<128x64xf32, #tpu.memory_space<vmem>>, vector<128x64xf32>
      %c0_11 = arith.constant 0 : index
      %c0_12 = arith.constant 0 : index
      %13 = vector.load %arg5[%c0_11, %c0_12] : memref<1x64xf32, #tpu.memory_space<vmem>>, vector<1x64xf32>
      %14 = vector.broadcast %13 : vector<1x64xf32> to vector<128x64xf32>
      %15 = arith.mulf %12, %14 : vector<128x64xf32>
      %c0_13 = arith.constant 0 : index
      %c0_14 = arith.constant 0 : index
      %16 = vector.load %arg6[%c0_13, %c0_14] : memref<1x64xf32, #tpu.memory_space<vmem>>, vector<1x64xf32>
      %17 = vector.broadcast %16 : vector<1x64xf32> to vector<128x64xf32>
      %18 = arith.addf %15, %17 : vector<128x64xf32>
      %cst_15 = arith.constant 0.000000e+00 : f32
      %19 = vector.broadcast %cst_15 : f32 to vector<128x64xf32>
      %20 = arith.maximumf %18, %19 : vector<128x64xf32>
      %21 = arith.truncf %20 : vector<128x64xf32> to vector<128x64xbf16>
      %c0_16 = arith.constant 0 : index
      %c0_17 = arith.constant 0 : index
      %22 = vector.load %arg7[%c0_16, %c0_17] : memref<128x64xbf16, #tpu.memory_space<vmem>>, vector<128x64xbf16>
      tpu.vector_store %arg7[%c0_16, %c0_17], %21 {strides = array<i32>} : memref<128x64xbf16, #tpu.memory_space<vmem>>, vector<128x64xbf16>,
    } else {
    }
    return
  }
  func.func @transform_0(%arg0: i32, %arg1: i32, %arg2: i32) -> (i32, i32) {
    %c0_i32 = arith.constant 0 : i32
    return %arg0, %arg2 : i32, i32
  }
  func.func @transform_1(%arg0: i32, %arg1: i32, %arg2: i32) -> (i32, i32) {
    %c0_i32 = arith.constant 0 : i32
    return %arg2, %arg1 : i32, i32
  }
  func.func @transform_2(%arg0: i32, %arg1: i32, %arg2: i32) -> (i32, i32) {
    %c0_i32 = arith.constant 0 : i32
    %c0_i32_0 = arith.constant 0 : i32
    return %c0_i32, %arg1 : i32, i32
  }
  func.func @transform_3(%arg0: i32, %arg1: i32, %arg2: i32) -> (i32, i32) {
    %c0_i32 = arith.constant 0 : i32
    %c0_i32_0 = arith.constant 0 : i32
    return %c0_i32, %arg1 : i32, i32
  }
  func.func @transform_4(%arg0: i32, %arg1: i32, %arg2: i32) -> (i32, i32) {
    %c0_i32 = arith.constant 0 : i32
    return %arg0, %arg1 : i32, i32
  }
}

module attributes {stable_mosaic.version = 11 : i64} {
  func.func @_fused_matmul_kernel(%arg0: i32, %arg1: i32, %arg2: i32, %arg3: memref<128x128xbf16, #tpu.memory_space<vmem>>, %arg4: memref<128x64xbf16, #tpu.memory_space<vmem>>, %arg5: memref<1x64xf32, #tpu.memory_space<vmem>>, %arg6: memref<1x64xf32, #tpu.memory_space<vmem>>, %arg7: memref<128x64xbf16, #tpu.memory_space<vmem>>, %arg8: memref<128x64xbf16, #tpu.memory_space<vmem>>, %arg9: memref<128x64xf32, #tpu.memory_space<vmem>>) attributes {dimension_semantics = [#tpu.dimension_semantics<parallel>, #tpu.dimension_semantics<parallel>, #tpu.dimension_semantics<arbitrary>], iteration_bounds = array<i64: 1, 1, 5>, scalar_prefetch = 0 : i64, scratch_operands = 1 : i64, tpu.core_type = #tpu.core_type<tc>, window_params = [{transform_indices = @transform_0, window_bounds = array<i64: 128, 128>}, {transform_indices = @transform_1, window_bounds = array<i64: 128, 64>}, {transform_indices = @transform_2, window_bounds = array<i64: 1, 64>}, {transform_indices = @transform_3, window_bounds = array<i64: 1, 64>}, {transform_indices = @transform_4, window_bounds = array<i64: 128, 64>}, {transform_indices = @transform_5, window_bounds = array<i64: 128, 64>}]} {
    %c0_i32 = arith.constant 0 : i32
    %0 = arith.cmpi eq, %arg2, %c0_i32 : i32
    %1 = arith.extui %0 : i1 to i32
    %c0_i32_0 = arith.constant 0 : i32
    %2 = arith.cmpi ne, %1, %c0_i32_0 : i32
    scf.if %2 {
      %cst_9 = arith.constant 0.000000e+00 : f32
      %12 = vector.broadcast %cst_9 : f32 to vector<128x64xf32>
      %c0_10 = arith.constant 0 : index
      %c0_11 = arith.constant 0 : index
      %13 = vector.load %arg9[%c0_10, %c0_11] : memref<128x64xf32, #tpu.memory_space<vmem>>, vector<128x64xf32>
      tpu.vector_store %arg9[%c0_10, %c0_11], %12 {strides = array<i32>} : memref<128x64xf32, #tpu.memory_space<vmem>>, vector<128x64xf32>,
    } else {
    }
    %c0 = arith.constant 0 : index
    %c0_1 = arith.constant 0 : index
    %3 = vector.load %arg9[%c0, %c0_1] : memref<128x64xf32, #tpu.memory_space<vmem>>, vector<128x64xf32>
    %c0_2 = arith.constant 0 : index
    %c0_3 = arith.constant 0 : index
    %4 = vector.load %arg3[%c0_2, %c0_3] : memref<128x128xbf16, #tpu.memory_space<vmem>>, vector<128x128xbf16>
    %c0_4 = arith.constant 0 : index
    %c0_5 = arith.constant 0 : index
    %5 = vector.load %arg4[%c0_4, %c0_5] : memref<128x64xbf16, #tpu.memory_space<vmem>>, vector<128x64xbf16>
    %cst = arith.constant dense<0.000000e+00> : vector<128x64xf32>
    %6 = tpu.matmul %4, %5, %cst {dimension_numbers = #tpu.dot_dimension_numbers<[1], [0], [0], [1], [0, 0, 1, 1], [], []>} : vector<128x128xbf16>, vector<128x64xbf16>, vector<128x64xf32> -> vector<128x64xf32>
    %7 = arith.addf %3, %6 : vector<128x64xf32>
    %c0_6 = arith.constant 0 : index
    %c0_7 = arith.constant 0 : index
    %8 = vector.load %arg9[%c0_6, %c0_7] : memref<128x64xf32, #tpu.memory_space<vmem>>, vector<128x64xf32>
    tpu.vector_store %arg9[%c0_6, %c0_7], %7 {strides = array<i32>} : memref<128x64xf32, #tpu.memory_space<vmem>>, vector<128x64xf32>,
    %c4_i32 = arith.constant 4 : i32
    %9 = arith.cmpi eq, %arg2, %c4_i32 : i32
    %10 = arith.extui %9 : i1 to i32
    %c0_i32_8 = arith.constant 0 : i32
    %11 = arith.cmpi ne, %10, %c0_i32_8 : i32
    scf.if %11 {
      %c0_9 = arith.constant 0 : index
      %c0_10 = arith.constant 0 : index
      %12 = vector.load %arg9[%c0_9, %c0_10] : memref<128x64xf32, #tpu.memory_space<vmem>>, vector<128x64xf32>
      %c0_11 = arith.constant 0 : index
      %c0_12 = arith.constant 0 : index
      %13 = vector.load %arg5[%c0_11, %c0_12] : memref<1x64xf32, #tpu.memory_space<vmem>>, vector<1x64xf32>
      %14 = vector.broadcast %13 : vector<1x64xf32> to vector<128x64xf32>
      %15 = arith.mulf %12, %14 : vector<128x64xf32>
      %c0_13 = arith.constant 0 : index
      %c0_14 = arith.constant 0 : index
      %16 = vector.load %arg6[%c0_13, %c0_14] : memref<1x64xf32, #tpu.memory_space<vmem>>, vector<1x64xf32>
      %17 = vector.broadcast %16 : vector<1x64xf32> to vector<128x64xf32>
      %18 = arith.addf %15, %17 : vector<128x64xf32>
      %c0_15 = arith.constant 0 : index
      %c0_16 = arith.constant 0 : index
      %19 = vector.load %arg7[%c0_15, %c0_16] : memref<128x64xbf16, #tpu.memory_space<vmem>>, vector<128x64xbf16>
      %20 = arith.extf %19 : vector<128x64xbf16> to vector<128x64xf32>
      %21 = arith.addf %18, %20 : vector<128x64xf32>
      %cst_17 = arith.constant 0.000000e+00 : f32
      %22 = vector.broadcast %cst_17 : f32 to vector<128x64xf32>
      %23 = arith.maximumf %21, %22 : vector<128x64xf32>
      %24 = arith.truncf %23 : vector<128x64xf32> to vector<128x64xbf16>
      %c0_18 = arith.constant 0 : index
      %c0_19 = arith.constant 0 : index
      %25 = vector.load %arg8[%c0_18, %c0_19] : memref<128x64xbf16, #tpu.memory_space<vmem>>, vector<128x64xbf16>
      tpu.vector_store %arg8[%c0_18, %c0_19], %24 {strides = array<i32>} : memref<128x64xbf16, #tpu.memory_space<vmem>>, vector<128x64xbf16>,
    } else {
    }
    return
  }
  func.func @transform_0(%arg0: i32, %arg1: i32, %arg2: i32) -> (i32, i32) {
    %c0_i32 = arith.constant 0 : i32
    return %arg0, %arg2 : i32, i32
  }
  func.func @transform_1(%arg0: i32, %arg1: i32, %arg2: i32) -> (i32, i32) {
    %c0_i32 = arith.constant 0 : i32
    return %arg2, %arg1 : i32, i32
  }
  func.func @transform_2(%arg0: i32, %arg1: i32, %arg2: i32) -> (i32, i32) {
    %c0_i32 = arith.constant 0 : i32
    %c0_i32_0 = arith.constant 0 : i32
    return %c0_i32, %arg1 : i32, i32
  }
  func.func @transform_3(%arg0: i32, %arg1: i32, %arg2: i32) -> (i32, i32) {
    %c0_i32 = arith.constant 0 : i32
    %c0_i32_0 = arith.constant 0 : i32
    return %c0_i32, %arg1 : i32, i32
  }
  func.func @transform_4(%arg0: i32, %arg1: i32, %arg2: i32) -> (i32, i32) {
    %c0_i32 = arith.constant 0 : i32
    return %arg0, %arg1 : i32, i32
  }
  func.func @transform_5(%arg0: i32, %arg1: i32, %arg2: i32) -> (i32, i32) {
    %c0_i32 = arith.constant 0 : i32
    return %arg0, %arg1 : i32, i32
  }
}

module attributes {stable_mosaic.version = 11 : i64} {
  func.func @_fused_matmul_kernel(%arg0: i32, %arg1: i32, %arg2: i32, %arg3: memref<32x128xbf16, #tpu.memory_space<vmem>>, %arg4: memref<128x128xbf16, #tpu.memory_space<vmem>>, %arg5: memref<1x128xf32, #tpu.memory_space<vmem>>, %arg6: memref<1x128xf32, #tpu.memory_space<vmem>>, %arg7: memref<32x128xbf16, #tpu.memory_space<vmem>>, %arg8: memref<32x128xf32, #tpu.memory_space<vmem>>) attributes {dimension_semantics = [#tpu.dimension_semantics<parallel>, #tpu.dimension_semantics<parallel>, #tpu.dimension_semantics<arbitrary>], iteration_bounds = array<i64: 1, 1, 5>, scalar_prefetch = 0 : i64, scratch_operands = 1 : i64, tpu.core_type = #tpu.core_type<tc>, window_params = [{transform_indices = @transform_0, window_bounds = array<i64: 32, 128>}, {transform_indices = @transform_1, window_bounds = array<i64: 128, 128>}, {transform_indices = @transform_2, window_bounds = array<i64: 1, 128>}, {transform_indices = @transform_3, window_bounds = array<i64: 1, 128>}, {transform_indices = @transform_4, window_bounds = array<i64: 32, 128>}]} {
    %c0_i32 = arith.constant 0 : i32
    %0 = arith.cmpi eq, %arg2, %c0_i32 : i32
    %1 = arith.extui %0 : i1 to i32
    %c0_i32_0 = arith.constant 0 : i32
    %2 = arith.cmpi ne, %1, %c0_i32_0 : i32
    scf.if %2 {
      %cst_9 = arith.constant 0.000000e+00 : f32
      %12 = vector.broadcast %cst_9 : f32 to vector<32x128xf32>
      %c0_10 = arith.constant 0 : index
      %c0_11 = arith.constant 0 : index
      %13 = vector.load %arg8[%c0_10, %c0_11] : memref<32x128xf32, #tpu.memory_space<vmem>>, vector<32x128xf32>
      tpu.vector_store %arg8[%c0_10, %c0_11], %12 {strides = array<i32>} : memref<32x128xf32, #tpu.memory_space<vmem>>, vector<32x128xf32>,
    } else {
    }
    %c0 = arith.constant 0 : index
    %c0_1 = arith.constant 0 : index
    %3 = vector.load %arg8[%c0, %c0_1] : memref<32x128xf32, #tpu.memory_space<vmem>>, vector<32x128xf32>
    %c0_2 = arith.constant 0 : index
    %c0_3 = arith.constant 0 : index
    %4 = vector.load %arg3[%c0_2, %c0_3] : memref<32x128xbf16, #tpu.memory_space<vmem>>, vector<32x128xbf16>
    %c0_4 = arith.constant 0 : index
    %c0_5 = arith.constant 0 : index
    %5 = vector.load %arg4[%c0_4, %c0_5] : memref<128x128xbf16, #tpu.memory_space<vmem>>, vector<128x128xbf16>
    %cst = arith.constant dense<0.000000e+00> : vector<32x128xf32>
    %6 = tpu.matmul %4, %5, %cst {dimension_numbers = #tpu.dot_dimension_numbers<[1], [0], [0], [1], [0, 0, 1, 1], [], []>} : vector<32x128xbf16>, vector<128x128xbf16>, vector<32x128xf32> -> vector<32x128xf32>
    %7 = arith.addf %3, %6 : vector<32x128xf32>
    %c0_6 = arith.constant 0 : index
    %c0_7 = arith.constant 0 : index
    %8 = vector.load %arg8[%c0_6, %c0_7] : memref<32x128xf32, #tpu.memory_space<vmem>>, vector<32x128xf32>
    tpu.vector_store %arg8[%c0_6, %c0_7], %7 {strides = array<i32>} : memref<32x128xf32, #tpu.memory_space<vmem>>, vector<32x128xf32>,
    %c4_i32 = arith.constant 4 : i32
    %9 = arith.cmpi eq, %arg2, %c4_i32 : i32
    %10 = arith.extui %9 : i1 to i32
    %c0_i32_8 = arith.constant 0 : i32
    %11 = arith.cmpi ne, %10, %c0_i32_8 : i32
    scf.if %11 {
      %c0_9 = arith.constant 0 : index
      %c0_10 = arith.constant 0 : index
      %12 = vector.load %arg8[%c0_9, %c0_10] : memref<32x128xf32, #tpu.memory_space<vmem>>, vector<32x128xf32>
      %c0_11 = arith.constant 0 : index
      %c0_12 = arith.constant 0 : index
      %13 = vector.load %arg5[%c0_11, %c0_12] : memref<1x128xf32, #tpu.memory_space<vmem>>, vector<1x128xf32>
      %14 = vector.broadcast %13 : vector<1x128xf32> to vector<32x128xf32>
      %15 = arith.mulf %12, %14 : vector<32x128xf32>
      %c0_13 = arith.constant 0 : index
      %c0_14 = arith.constant 0 : index
      %16 = vector.load %arg6[%c0_13, %c0_14] : memref<1x128xf32, #tpu.memory_space<vmem>>, vector<1x128xf32>
      %17 = vector.broadcast %16 : vector<1x128xf32> to vector<32x128xf32>
      %18 = arith.addf %15, %17 : vector<32x128xf32>
      %cst_15 = arith.constant 0.000000e+00 : f32
      %19 = vector.broadcast %cst_15 : f32 to vector<32x128xf32>
      %20 = arith.maximumf %18, %19 : vector<32x128xf32>
      %21 = arith.truncf %20 : vector<32x128xf32> to vector<32x128xbf16>
      %c0_16 = arith.constant 0 : index
      %c0_17 = arith.constant 0 : index
      %22 = vector.load %arg7[%c0_16, %c0_17] : memref<32x128xbf16, #tpu.memory_space<vmem>>, vector<32x128xbf16>
      tpu.vector_store %arg7[%c0_16, %c0_17], %21 {strides = array<i32>} : memref<32x128xbf16, #tpu.memory_space<vmem>>, vector<32x128xbf16>,
    } else {
    }
    return
  }
  func.func @transform_0(%arg0: i32, %arg1: i32, %arg2: i32) -> (i32, i32) {
    %c0_i32 = arith.constant 0 : i32
    return %arg0, %arg2 : i32, i32
  }
  func.func @transform_1(%arg0: i32, %arg1: i32, %arg2: i32) -> (i32, i32) {
    %c0_i32 = arith.constant 0 : i32
    return %arg2, %arg1 : i32, i32
  }
  func.func @transform_2(%arg0: i32, %arg1: i32, %arg2: i32) -> (i32, i32) {
    %c0_i32 = arith.constant 0 : i32
    %c0_i32_0 = arith.constant 0 : i32
    return %c0_i32, %arg1 : i32, i32
  }
  func.func @transform_3(%arg0: i32, %arg1: i32, %arg2: i32) -> (i32, i32) {
    %c0_i32 = arith.constant 0 : i32
    %c0_i32_0 = arith.constant 0 : i32
    return %c0_i32, %arg1 : i32, i32
  }
  func.func @transform_4(%arg0: i32, %arg1: i32, %arg2: i32) -> (i32, i32) {
    %c0_i32 = arith.constant 0 : i32
    return %arg0, %arg1 : i32, i32
  }
}

module attributes {stable_mosaic.version = 11 : i64} {
  func.func @_fused_matmul_kernel(%arg0: i32, %arg1: i32, %arg2: i32, %arg3: memref<32x64xbf16, #tpu.memory_space<vmem>>, %arg4: memref<64x128xbf16, #tpu.memory_space<vmem>>, %arg5: memref<1x128xf32, #tpu.memory_space<vmem>>, %arg6: memref<1x128xf32, #tpu.memory_space<vmem>>, %arg7: memref<32x128xbf16, #tpu.memory_space<vmem>>, %arg8: memref<32x128xf32, #tpu.memory_space<vmem>>) attributes {dimension_semantics = [#tpu.dimension_semantics<parallel>, #tpu.dimension_semantics<parallel>, #tpu.dimension_semantics<arbitrary>], iteration_bounds = array<i64: 1, 1, 1>, scalar_prefetch = 0 : i64, scratch_operands = 1 : i64, tpu.core_type = #tpu.core_type<tc>, window_params = [{transform_indices = @transform_0, window_bounds = array<i64: 32, 64>}, {transform_indices = @transform_1, window_bounds = array<i64: 64, 128>}, {transform_indices = @transform_2, window_bounds = array<i64: 1, 128>}, {transform_indices = @transform_3, window_bounds = array<i64: 1, 128>}, {transform_indices = @transform_4, window_bounds = array<i64: 32, 128>}]} {
    %c0_i32 = arith.constant 0 : i32
    %0 = arith.cmpi eq, %arg2, %c0_i32 : i32
    %1 = arith.extui %0 : i1 to i32
    %c0_i32_0 = arith.constant 0 : i32
    %2 = arith.cmpi ne, %1, %c0_i32_0 : i32
    scf.if %2 {
      %cst_10 = arith.constant 0.000000e+00 : f32
      %12 = vector.broadcast %cst_10 : f32 to vector<32x128xf32>
      %c0_11 = arith.constant 0 : index
      %c0_12 = arith.constant 0 : index
      %13 = vector.load %arg8[%c0_11, %c0_12] : memref<32x128xf32, #tpu.memory_space<vmem>>, vector<32x128xf32>
      tpu.vector_store %arg8[%c0_11, %c0_12], %12 {strides = array<i32>} : memref<32x128xf32, #tpu.memory_space<vmem>>, vector<32x128xf32>,
    } else {
    }
    %c0 = arith.constant 0 : index
    %c0_1 = arith.constant 0 : index
    %3 = vector.load %arg8[%c0, %c0_1] : memref<32x128xf32, #tpu.memory_space<vmem>>, vector<32x128xf32>
    %c0_2 = arith.constant 0 : index
    %c0_3 = arith.constant 0 : index
    %4 = vector.load %arg3[%c0_2, %c0_3] : memref<32x64xbf16, #tpu.memory_space<vmem>>, vector<32x64xbf16>
    %c0_4 = arith.constant 0 : index
    %c0_5 = arith.constant 0 : index
    %5 = vector.load %arg4[%c0_4, %c0_5] : memref<64x128xbf16, #tpu.memory_space<vmem>>, vector<64x128xbf16>
    %cst = arith.constant dense<0.000000e+00> : vector<32x128xf32>
    %6 = tpu.matmul %4, %5, %cst {dimension_numbers = #tpu.dot_dimension_numbers<[1], [0], [0], [1], [0, 0, 1, 1], [], []>} : vector<32x64xbf16>, vector<64x128xbf16>, vector<32x128xf32> -> vector<32x128xf32>
    %7 = arith.addf %3, %6 : vector<32x128xf32>
    %c0_6 = arith.constant 0 : index
    %c0_7 = arith.constant 0 : index
    %8 = vector.load %arg8[%c0_6, %c0_7] : memref<32x128xf32, #tpu.memory_space<vmem>>, vector<32x128xf32>
    tpu.vector_store %arg8[%c0_6, %c0_7], %7 {strides = array<i32>} : memref<32x128xf32, #tpu.memory_space<vmem>>, vector<32x128xf32>,
    %c0_i32_8 = arith.constant 0 : i32
    %9 = arith.cmpi eq, %arg2, %c0_i32_8 : i32
    %10 = arith.extui %9 : i1 to i32
    %c0_i32_9 = arith.constant 0 : i32
    %11 = arith.cmpi ne, %10, %c0_i32_9 : i32
    scf.if %11 {
      %c0_10 = arith.constant 0 : index
      %c0_11 = arith.constant 0 : index
      %12 = vector.load %arg8[%c0_10, %c0_11] : memref<32x128xf32, #tpu.memory_space<vmem>>, vector<32x128xf32>
      %c0_12 = arith.constant 0 : index
      %c0_13 = arith.constant 0 : index
      %13 = vector.load %arg5[%c0_12, %c0_13] : memref<1x128xf32, #tpu.memory_space<vmem>>, vector<1x128xf32>
      %14 = vector.broadcast %13 : vector<1x128xf32> to vector<32x128xf32>
      %15 = arith.mulf %12, %14 : vector<32x128xf32>
      %c0_14 = arith.constant 0 : index
      %c0_15 = arith.constant 0 : index
      %16 = vector.load %arg6[%c0_14, %c0_15] : memref<1x128xf32, #tpu.memory_space<vmem>>, vector<1x128xf32>
      %17 = vector.broadcast %16 : vector<1x128xf32> to vector<32x128xf32>
      %18 = arith.addf %15, %17 : vector<32x128xf32>
      %19 = arith.truncf %18 : vector<32x128xf32> to vector<32x128xbf16>
      %c0_16 = arith.constant 0 : index
      %c0_17 = arith.constant 0 : index
      %20 = vector.load %arg7[%c0_16, %c0_17] : memref<32x128xbf16, #tpu.memory_space<vmem>>, vector<32x128xbf16>
      tpu.vector_store %arg7[%c0_16, %c0_17], %19 {strides = array<i32>} : memref<32x128xbf16, #tpu.memory_space<vmem>>, vector<32x128xbf16>,
    } else {
    }
    return
  }
  func.func @transform_0(%arg0: i32, %arg1: i32, %arg2: i32) -> (i32, i32) {
    %c0_i32 = arith.constant 0 : i32
    return %arg0, %arg2 : i32, i32
  }
  func.func @transform_1(%arg0: i32, %arg1: i32, %arg2: i32) -> (i32, i32) {
    %c0_i32 = arith.constant 0 : i32
    return %arg2, %arg1 : i32, i32
  }
  func.func @transform_2(%arg0: i32, %arg1: i32, %arg2: i32) -> (i32, i32) {
    %c0_i32 = arith.constant 0 : i32
    %c0_i32_0 = arith.constant 0 : i32
    return %c0_i32, %arg1 : i32, i32
  }
  func.func @transform_3(%arg0: i32, %arg1: i32, %arg2: i32) -> (i32, i32) {
    %c0_i32 = arith.constant 0 : i32
    %c0_i32_0 = arith.constant 0 : i32
    return %c0_i32, %arg1 : i32, i32
  }
  func.func @transform_4(%arg0: i32, %arg1: i32, %arg2: i32) -> (i32, i32) {
    %c0_i32 = arith.constant 0 : i32
    return %arg0, %arg1 : i32, i32
  }
}

module attributes {stable_mosaic.version = 11 : i64} {
  func.func @_fused_matmul_kernel(%arg0: i32, %arg1: i32, %arg2: i32, %arg3: memref<32x128xbf16, #tpu.memory_space<vmem>>, %arg4: memref<128x128xbf16, #tpu.memory_space<vmem>>, %arg5: memref<1x128xf32, #tpu.memory_space<vmem>>, %arg6: memref<1x128xf32, #tpu.memory_space<vmem>>, %arg7: memref<32x128xbf16, #tpu.memory_space<vmem>>, %arg8: memref<32x128xbf16, #tpu.memory_space<vmem>>, %arg9: memref<32x128xf32, #tpu.memory_space<vmem>>) attributes {dimension_semantics = [#tpu.dimension_semantics<parallel>, #tpu.dimension_semantics<parallel>, #tpu.dimension_semantics<arbitrary>], iteration_bounds = array<i64: 1, 1, 9>, scalar_prefetch = 0 : i64, scratch_operands = 1 : i64, tpu.core_type = #tpu.core_type<tc>, window_params = [{transform_indices = @transform_0, window_bounds = array<i64: 32, 128>}, {transform_indices = @transform_1, window_bounds = array<i64: 128, 128>}, {transform_indices = @transform_2, window_bounds = array<i64: 1, 128>}, {transform_indices = @transform_3, window_bounds = array<i64: 1, 128>}, {transform_indices = @transform_4, window_bounds = array<i64: 32, 128>}, {transform_indices = @transform_5, window_bounds = array<i64: 32, 128>}]} {
    %c0_i32 = arith.constant 0 : i32
    %0 = arith.cmpi eq, %arg2, %c0_i32 : i32
    %1 = arith.extui %0 : i1 to i32
    %c0_i32_0 = arith.constant 0 : i32
    %2 = arith.cmpi ne, %1, %c0_i32_0 : i32
    scf.if %2 {
      %cst_9 = arith.constant 0.000000e+00 : f32
      %12 = vector.broadcast %cst_9 : f32 to vector<32x128xf32>
      %c0_10 = arith.constant 0 : index
      %c0_11 = arith.constant 0 : index
      %13 = vector.load %arg9[%c0_10, %c0_11] : memref<32x128xf32, #tpu.memory_space<vmem>>, vector<32x128xf32>
      tpu.vector_store %arg9[%c0_10, %c0_11], %12 {strides = array<i32>} : memref<32x128xf32, #tpu.memory_space<vmem>>, vector<32x128xf32>,
    } else {
    }
    %c0 = arith.constant 0 : index
    %c0_1 = arith.constant 0 : index
    %3 = vector.load %arg9[%c0, %c0_1] : memref<32x128xf32, #tpu.memory_space<vmem>>, vector<32x128xf32>
    %c0_2 = arith.constant 0 : index
    %c0_3 = arith.constant 0 : index
    %4 = vector.load %arg3[%c0_2, %c0_3] : memref<32x128xbf16, #tpu.memory_space<vmem>>, vector<32x128xbf16>
    %c0_4 = arith.constant 0 : index
    %c0_5 = arith.constant 0 : index
    %5 = vector.load %arg4[%c0_4, %c0_5] : memref<128x128xbf16, #tpu.memory_space<vmem>>, vector<128x128xbf16>
    %cst = arith.constant dense<0.000000e+00> : vector<32x128xf32>
    %6 = tpu.matmul %4, %5, %cst {dimension_numbers = #tpu.dot_dimension_numbers<[1], [0], [0], [1], [0, 0, 1, 1], [], []>} : vector<32x128xbf16>, vector<128x128xbf16>, vector<32x128xf32> -> vector<32x128xf32>
    %7 = arith.addf %3, %6 : vector<32x128xf32>
    %c0_6 = arith.constant 0 : index
    %c0_7 = arith.constant 0 : index
    %8 = vector.load %arg9[%c0_6, %c0_7] : memref<32x128xf32, #tpu.memory_space<vmem>>, vector<32x128xf32>
    tpu.vector_store %arg9[%c0_6, %c0_7], %7 {strides = array<i32>} : memref<32x128xf32, #tpu.memory_space<vmem>>, vector<32x128xf32>,
    %c8_i32 = arith.constant 8 : i32
    %9 = arith.cmpi eq, %arg2, %c8_i32 : i32
    %10 = arith.extui %9 : i1 to i32
    %c0_i32_8 = arith.constant 0 : i32
    %11 = arith.cmpi ne, %10, %c0_i32_8 : i32
    scf.if %11 {
      %c0_9 = arith.constant 0 : index
      %c0_10 = arith.constant 0 : index
      %12 = vector.load %arg9[%c0_9, %c0_10] : memref<32x128xf32, #tpu.memory_space<vmem>>, vector<32x128xf32>
      %c0_11 = arith.constant 0 : index
      %c0_12 = arith.constant 0 : index
      %13 = vector.load %arg5[%c0_11, %c0_12] : memref<1x128xf32, #tpu.memory_space<vmem>>, vector<1x128xf32>
      %14 = vector.broadcast %13 : vector<1x128xf32> to vector<32x128xf32>
      %15 = arith.mulf %12, %14 : vector<32x128xf32>
      %c0_13 = arith.constant 0 : index
      %c0_14 = arith.constant 0 : index
      %16 = vector.load %arg6[%c0_13, %c0_14] : memref<1x128xf32, #tpu.memory_space<vmem>>, vector<1x128xf32>
      %17 = vector.broadcast %16 : vector<1x128xf32> to vector<32x128xf32>
      %18 = arith.addf %15, %17 : vector<32x128xf32>
      %c0_15 = arith.constant 0 : index
      %c0_16 = arith.constant 0 : index
      %19 = vector.load %arg7[%c0_15, %c0_16] : memref<32x128xbf16, #tpu.memory_space<vmem>>, vector<32x128xbf16>
      %20 = arith.extf %19 : vector<32x128xbf16> to vector<32x128xf32>
      %21 = arith.addf %18, %20 : vector<32x128xf32>
      %cst_17 = arith.constant 0.000000e+00 : f32
      %22 = vector.broadcast %cst_17 : f32 to vector<32x128xf32>
      %23 = arith.maximumf %21, %22 : vector<32x128xf32>
      %24 = arith.truncf %23 : vector<32x128xf32> to vector<32x128xbf16>
      %c0_18 = arith.constant 0 : index
      %c0_19 = arith.constant 0 : index
      %25 = vector.load %arg8[%c0_18, %c0_19] : memref<32x128xbf16, #tpu.memory_space<vmem>>, vector<32x128xbf16>
      tpu.vector_store %arg8[%c0_18, %c0_19], %24 {strides = array<i32>} : memref<32x128xbf16, #tpu.memory_space<vmem>>, vector<32x128xbf16>,
    } else {
    }
    return
  }
  func.func @transform_0(%arg0: i32, %arg1: i32, %arg2: i32) -> (i32, i32) {
    %c0_i32 = arith.constant 0 : i32
    return %arg0, %arg2 : i32, i32
  }
  func.func @transform_1(%arg0: i32, %arg1: i32, %arg2: i32) -> (i32, i32) {
    %c0_i32 = arith.constant 0 : i32
    return %arg2, %arg1 : i32, i32
  }
  func.func @transform_2(%arg0: i32, %arg1: i32, %arg2: i32) -> (i32, i32) {
    %c0_i32 = arith.constant 0 : i32
    %c0_i32_0 = arith.constant 0 : i32
    return %c0_i32, %arg1 : i32, i32
  }
  func.func @transform_3(%arg0: i32, %arg1: i32, %arg2: i32) -> (i32, i32) {
    %c0_i32 = arith.constant 0 : i32
    %c0_i32_0 = arith.constant 0 : i32
    return %c0_i32, %arg1 : i32, i32
  }
  func.func @transform_4(%arg0: i32, %arg1: i32, %arg2: i32) -> (i32, i32) {
    %c0_i32 = arith.constant 0 : i32
    return %arg0, %arg1 : i32, i32
  }
  func.func @transform_5(%arg0: i32, %arg1: i32, %arg2: i32) -> (i32, i32) {
    %c0_i32 = arith.constant 0 : i32
    return %arg0, %arg1 : i32, i32
  }
}

module attributes {stable_mosaic.version = 11 : i64} {
  func.func @_fused_matmul_kernel(%arg0: i32, %arg1: i32, %arg2: i32, %arg3: memref<32x128xbf16, #tpu.memory_space<vmem>>, %arg4: memref<128x128xbf16, #tpu.memory_space<vmem>>, %arg5: memref<1x128xf32, #tpu.memory_space<vmem>>, %arg6: memref<1x128xf32, #tpu.memory_space<vmem>>, %arg7: memref<32x128xbf16, #tpu.memory_space<vmem>>, %arg8: memref<32x128xf32, #tpu.memory_space<vmem>>) attributes {dimension_semantics = [#tpu.dimension_semantics<parallel>, #tpu.dimension_semantics<parallel>, #tpu.dimension_semantics<arbitrary>], iteration_bounds = array<i64: 1, 1, 9>, scalar_prefetch = 0 : i64, scratch_operands = 1 : i64, tpu.core_type = #tpu.core_type<tc>, window_params = [{transform_indices = @transform_0, window_bounds = array<i64: 32, 128>}, {transform_indices = @transform_1, window_bounds = array<i64: 128, 128>}, {transform_indices = @transform_2, window_bounds = array<i64: 1, 128>}, {transform_indices = @transform_3, window_bounds = array<i64: 1, 128>}, {transform_indices = @transform_4, window_bounds = array<i64: 32, 128>}]} {
    %c0_i32 = arith.constant 0 : i32
    %0 = arith.cmpi eq, %arg2, %c0_i32 : i32
    %1 = arith.extui %0 : i1 to i32
    %c0_i32_0 = arith.constant 0 : i32
    %2 = arith.cmpi ne, %1, %c0_i32_0 : i32
    scf.if %2 {
      %cst_9 = arith.constant 0.000000e+00 : f32
      %12 = vector.broadcast %cst_9 : f32 to vector<32x128xf32>
      %c0_10 = arith.constant 0 : index
      %c0_11 = arith.constant 0 : index
      %13 = vector.load %arg8[%c0_10, %c0_11] : memref<32x128xf32, #tpu.memory_space<vmem>>, vector<32x128xf32>
      tpu.vector_store %arg8[%c0_10, %c0_11], %12 {strides = array<i32>} : memref<32x128xf32, #tpu.memory_space<vmem>>, vector<32x128xf32>,
    } else {
    }
    %c0 = arith.constant 0 : index
    %c0_1 = arith.constant 0 : index
    %3 = vector.load %arg8[%c0, %c0_1] : memref<32x128xf32, #tpu.memory_space<vmem>>, vector<32x128xf32>
    %c0_2 = arith.constant 0 : index
    %c0_3 = arith.constant 0 : index
    %4 = vector.load %arg3[%c0_2, %c0_3] : memref<32x128xbf16, #tpu.memory_space<vmem>>, vector<32x128xbf16>
    %c0_4 = arith.constant 0 : index
    %c0_5 = arith.constant 0 : index
    %5 = vector.load %arg4[%c0_4, %c0_5] : memref<128x128xbf16, #tpu.memory_space<vmem>>, vector<128x128xbf16>
    %cst = arith.constant dense<0.000000e+00> : vector<32x128xf32>
    %6 = tpu.matmul %4, %5, %cst {dimension_numbers = #tpu.dot_dimension_numbers<[1], [0], [0], [1], [0, 0, 1, 1], [], []>} : vector<32x128xbf16>, vector<128x128xbf16>, vector<32x128xf32> -> vector<32x128xf32>
    %7 = arith.addf %3, %6 : vector<32x128xf32>
    %c0_6 = arith.constant 0 : index
    %c0_7 = arith.constant 0 : index
    %8 = vector.load %arg8[%c0_6, %c0_7] : memref<32x128xf32, #tpu.memory_space<vmem>>, vector<32x128xf32>
    tpu.vector_store %arg8[%c0_6, %c0_7], %7 {strides = array<i32>} : memref<32x128xf32, #tpu.memory_space<vmem>>, vector<32x128xf32>,
    %c8_i32 = arith.constant 8 : i32
    %9 = arith.cmpi eq, %arg2, %c8_i32 : i32
    %10 = arith.extui %9 : i1 to i32
    %c0_i32_8 = arith.constant 0 : i32
    %11 = arith.cmpi ne, %10, %c0_i32_8 : i32
    scf.if %11 {
      %c0_9 = arith.constant 0 : index
      %c0_10 = arith.constant 0 : index
      %12 = vector.load %arg8[%c0_9, %c0_10] : memref<32x128xf32, #tpu.memory_space<vmem>>, vector<32x128xf32>
      %c0_11 = arith.constant 0 : index
      %c0_12 = arith.constant 0 : index
      %13 = vector.load %arg5[%c0_11, %c0_12] : memref<1x128xf32, #tpu.memory_space<vmem>>, vector<1x128xf32>
      %14 = vector.broadcast %13 : vector<1x128xf32> to vector<32x128xf32>
      %15 = arith.mulf %12, %14 : vector<32x128xf32>
      %c0_13 = arith.constant 0 : index
      %c0_14 = arith.constant 0 : index
      %16 = vector.load %arg6[%c0_13, %c0_14] : memref<1x128xf32, #tpu.memory_space<vmem>>, vector<1x128xf32>
      %17 = vector.broadcast %16 : vector<1x128xf32> to vector<32x128xf32>
      %18 = arith.addf %15, %17 : vector<32x128xf32>
      %cst_15 = arith.constant 0.000000e+00 : f32
      %19 = vector.broadcast %cst_15 : f32 to vector<32x128xf32>
      %20 = arith.maximumf %18, %19 : vector<32x128xf32>
      %21 = arith.truncf %20 : vector<32x128xf32> to vector<32x128xbf16>
      %c0_16 = arith.constant 0 : index
      %c0_17 = arith.constant 0 : index
      %22 = vector.load %arg7[%c0_16, %c0_17] : memref<32x128xbf16, #tpu.memory_space<vmem>>, vector<32x128xbf16>
      tpu.vector_store %arg7[%c0_16, %c0_17], %21 {strides = array<i32>} : memref<32x128xbf16, #tpu.memory_space<vmem>>, vector<32x128xbf16>,
    } else {
    }
    return
  }
  func.func @transform_0(%arg0: i32, %arg1: i32, %arg2: i32) -> (i32, i32) {
    %c0_i32 = arith.constant 0 : i32
    return %arg0, %arg2 : i32, i32
  }
  func.func @transform_1(%arg0: i32, %arg1: i32, %arg2: i32) -> (i32, i32) {
    %c0_i32 = arith.constant 0 : i32
    return %arg2, %arg1 : i32, i32
  }
  func.func @transform_2(%arg0: i32, %arg1: i32, %arg2: i32) -> (i32, i32) {
    %c0_i32 = arith.constant 0 : i32
    %c0_i32_0 = arith.constant 0 : i32
    return %c0_i32, %arg1 : i32, i32
  }
  func.func @transform_3(%arg0: i32, %arg1: i32, %arg2: i32) -> (i32, i32) {
    %c0_i32 = arith.constant 0 : i32
    %c0_i32_0 = arith.constant 0 : i32
    return %c0_i32, %arg1 : i32, i32
  }
  func.func @transform_4(%arg0: i32, %arg1: i32, %arg2: i32) -> (i32, i32) {
    %c0_i32 = arith.constant 0 : i32
    return %arg0, %arg1 : i32, i32
  }
}

module attributes {stable_mosaic.version = 11 : i64} {
  func.func @_fused_matmul_kernel(%arg0: i32, %arg1: i32, %arg2: i32, %arg3: memref<16x128xbf16, #tpu.memory_space<vmem>>, %arg4: memref<128x256xbf16, #tpu.memory_space<vmem>>, %arg5: memref<1x256xf32, #tpu.memory_space<vmem>>, %arg6: memref<1x256xf32, #tpu.memory_space<vmem>>, %arg7: memref<16x256xbf16, #tpu.memory_space<vmem>>, %arg8: memref<16x256xf32, #tpu.memory_space<vmem>>) attributes {dimension_semantics = [#tpu.dimension_semantics<parallel>, #tpu.dimension_semantics<parallel>, #tpu.dimension_semantics<arbitrary>], iteration_bounds = array<i64: 1, 1, 9>, scalar_prefetch = 0 : i64, scratch_operands = 1 : i64, tpu.core_type = #tpu.core_type<tc>, window_params = [{transform_indices = @transform_0, window_bounds = array<i64: 16, 128>}, {transform_indices = @transform_1, window_bounds = array<i64: 128, 256>}, {transform_indices = @transform_2, window_bounds = array<i64: 1, 256>}, {transform_indices = @transform_3, window_bounds = array<i64: 1, 256>}, {transform_indices = @transform_4, window_bounds = array<i64: 16, 256>}]} {
    %c0_i32 = arith.constant 0 : i32
    %0 = arith.cmpi eq, %arg2, %c0_i32 : i32
    %1 = arith.extui %0 : i1 to i32
    %c0_i32_0 = arith.constant 0 : i32
    %2 = arith.cmpi ne, %1, %c0_i32_0 : i32
    scf.if %2 {
      %cst_9 = arith.constant 0.000000e+00 : f32
      %12 = vector.broadcast %cst_9 : f32 to vector<16x256xf32>
      %c0_10 = arith.constant 0 : index
      %c0_11 = arith.constant 0 : index
      %13 = vector.load %arg8[%c0_10, %c0_11] : memref<16x256xf32, #tpu.memory_space<vmem>>, vector<16x256xf32>
      tpu.vector_store %arg8[%c0_10, %c0_11], %12 {strides = array<i32>} : memref<16x256xf32, #tpu.memory_space<vmem>>, vector<16x256xf32>,
    } else {
    }
    %c0 = arith.constant 0 : index
    %c0_1 = arith.constant 0 : index
    %3 = vector.load %arg8[%c0, %c0_1] : memref<16x256xf32, #tpu.memory_space<vmem>>, vector<16x256xf32>
    %c0_2 = arith.constant 0 : index
    %c0_3 = arith.constant 0 : index
    %4 = vector.load %arg3[%c0_2, %c0_3] : memref<16x128xbf16, #tpu.memory_space<vmem>>, vector<16x128xbf16>
    %c0_4 = arith.constant 0 : index
    %c0_5 = arith.constant 0 : index
    %5 = vector.load %arg4[%c0_4, %c0_5] : memref<128x256xbf16, #tpu.memory_space<vmem>>, vector<128x256xbf16>
    %cst = arith.constant dense<0.000000e+00> : vector<16x256xf32>
    %6 = tpu.matmul %4, %5, %cst {dimension_numbers = #tpu.dot_dimension_numbers<[1], [0], [0], [1], [0, 0, 1, 1], [], []>} : vector<16x128xbf16>, vector<128x256xbf16>, vector<16x256xf32> -> vector<16x256xf32>
    %7 = arith.addf %3, %6 : vector<16x256xf32>
    %c0_6 = arith.constant 0 : index
    %c0_7 = arith.constant 0 : index
    %8 = vector.load %arg8[%c0_6, %c0_7] : memref<16x256xf32, #tpu.memory_space<vmem>>, vector<16x256xf32>
    tpu.vector_store %arg8[%c0_6, %c0_7], %7 {strides = array<i32>} : memref<16x256xf32, #tpu.memory_space<vmem>>, vector<16x256xf32>,
    %c8_i32 = arith.constant 8 : i32
    %9 = arith.cmpi eq, %arg2, %c8_i32 : i32
    %10 = arith.extui %9 : i1 to i32
    %c0_i32_8 = arith.constant 0 : i32
    %11 = arith.cmpi ne, %10, %c0_i32_8 : i32
    scf.if %11 {
      %c0_9 = arith.constant 0 : index
      %c0_10 = arith.constant 0 : index
      %12 = vector.load %arg8[%c0_9, %c0_10] : memref<16x256xf32, #tpu.memory_space<vmem>>, vector<16x256xf32>
      %c0_11 = arith.constant 0 : index
      %c0_12 = arith.constant 0 : index
      %13 = vector.load %arg5[%c0_11, %c0_12] : memref<1x256xf32, #tpu.memory_space<vmem>>, vector<1x256xf32>
      %14 = vector.broadcast %13 : vector<1x256xf32> to vector<16x256xf32>
      %15 = arith.mulf %12, %14 : vector<16x256xf32>
      %c0_13 = arith.constant 0 : index
      %c0_14 = arith.constant 0 : index
      %16 = vector.load %arg6[%c0_13, %c0_14] : memref<1x256xf32, #tpu.memory_space<vmem>>, vector<1x256xf32>
      %17 = vector.broadcast %16 : vector<1x256xf32> to vector<16x256xf32>
      %18 = arith.addf %15, %17 : vector<16x256xf32>
      %cst_15 = arith.constant 0.000000e+00 : f32
      %19 = vector.broadcast %cst_15 : f32 to vector<16x256xf32>
      %20 = arith.maximumf %18, %19 : vector<16x256xf32>
      %21 = arith.truncf %20 : vector<16x256xf32> to vector<16x256xbf16>
      %c0_16 = arith.constant 0 : index
      %c0_17 = arith.constant 0 : index
      %22 = vector.load %arg7[%c0_16, %c0_17] : memref<16x256xbf16, #tpu.memory_space<vmem>>, vector<16x256xbf16>
      tpu.vector_store %arg7[%c0_16, %c0_17], %21 {strides = array<i32>} : memref<16x256xbf16, #tpu.memory_space<vmem>>, vector<16x256xbf16>,
    } else {
    }
    return
  }
  func.func @transform_0(%arg0: i32, %arg1: i32, %arg2: i32) -> (i32, i32) {
    %c0_i32 = arith.constant 0 : i32
    return %arg0, %arg2 : i32, i32
  }
  func.func @transform_1(%arg0: i32, %arg1: i32, %arg2: i32) -> (i32, i32) {
    %c0_i32 = arith.constant 0 : i32
    return %arg2, %arg1 : i32, i32
  }
  func.func @transform_2(%arg0: i32, %arg1: i32, %arg2: i32) -> (i32, i32) {
    %c0_i32 = arith.constant 0 : i32
    %c0_i32_0 = arith.constant 0 : i32
    return %c0_i32, %arg1 : i32, i32
  }
  func.func @transform_3(%arg0: i32, %arg1: i32, %arg2: i32) -> (i32, i32) {
    %c0_i32 = arith.constant 0 : i32
    %c0_i32_0 = arith.constant 0 : i32
    return %c0_i32, %arg1 : i32, i32
  }
  func.func @transform_4(%arg0: i32, %arg1: i32, %arg2: i32) -> (i32, i32) {
    %c0_i32 = arith.constant 0 : i32
    return %arg0, %arg1 : i32, i32
  }
}

module attributes {stable_mosaic.version = 11 : i64} {
  func.func @_fused_matmul_kernel(%arg0: i32, %arg1: i32, %arg2: i32, %arg3: memref<16x128xbf16, #tpu.memory_space<vmem>>, %arg4: memref<128x256xbf16, #tpu.memory_space<vmem>>, %arg5: memref<1x256xf32, #tpu.memory_space<vmem>>, %arg6: memref<1x256xf32, #tpu.memory_space<vmem>>, %arg7: memref<16x256xbf16, #tpu.memory_space<vmem>>, %arg8: memref<16x256xf32, #tpu.memory_space<vmem>>) attributes {dimension_semantics = [#tpu.dimension_semantics<parallel>, #tpu.dimension_semantics<parallel>, #tpu.dimension_semantics<arbitrary>], iteration_bounds = array<i64: 1, 1, 1>, scalar_prefetch = 0 : i64, scratch_operands = 1 : i64, tpu.core_type = #tpu.core_type<tc>, window_params = [{transform_indices = @transform_0, window_bounds = array<i64: 16, 128>}, {transform_indices = @transform_1, window_bounds = array<i64: 128, 256>}, {transform_indices = @transform_2, window_bounds = array<i64: 1, 256>}, {transform_indices = @transform_3, window_bounds = array<i64: 1, 256>}, {transform_indices = @transform_4, window_bounds = array<i64: 16, 256>}]} {
    %c0_i32 = arith.constant 0 : i32
    %0 = arith.cmpi eq, %arg2, %c0_i32 : i32
    %1 = arith.extui %0 : i1 to i32
    %c0_i32_0 = arith.constant 0 : i32
    %2 = arith.cmpi ne, %1, %c0_i32_0 : i32
    scf.if %2 {
      %cst_10 = arith.constant 0.000000e+00 : f32
      %12 = vector.broadcast %cst_10 : f32 to vector<16x256xf32>
      %c0_11 = arith.constant 0 : index
      %c0_12 = arith.constant 0 : index
      %13 = vector.load %arg8[%c0_11, %c0_12] : memref<16x256xf32, #tpu.memory_space<vmem>>, vector<16x256xf32>
      tpu.vector_store %arg8[%c0_11, %c0_12], %12 {strides = array<i32>} : memref<16x256xf32, #tpu.memory_space<vmem>>, vector<16x256xf32>,
    } else {
    }
    %c0 = arith.constant 0 : index
    %c0_1 = arith.constant 0 : index
    %3 = vector.load %arg8[%c0, %c0_1] : memref<16x256xf32, #tpu.memory_space<vmem>>, vector<16x256xf32>
    %c0_2 = arith.constant 0 : index
    %c0_3 = arith.constant 0 : index
    %4 = vector.load %arg3[%c0_2, %c0_3] : memref<16x128xbf16, #tpu.memory_space<vmem>>, vector<16x128xbf16>
    %c0_4 = arith.constant 0 : index
    %c0_5 = arith.constant 0 : index
    %5 = vector.load %arg4[%c0_4, %c0_5] : memref<128x256xbf16, #tpu.memory_space<vmem>>, vector<128x256xbf16>
    %cst = arith.constant dense<0.000000e+00> : vector<16x256xf32>
    %6 = tpu.matmul %4, %5, %cst {dimension_numbers = #tpu.dot_dimension_numbers<[1], [0], [0], [1], [0, 0, 1, 1], [], []>} : vector<16x128xbf16>, vector<128x256xbf16>, vector<16x256xf32> -> vector<16x256xf32>
    %7 = arith.addf %3, %6 : vector<16x256xf32>
    %c0_6 = arith.constant 0 : index
    %c0_7 = arith.constant 0 : index
    %8 = vector.load %arg8[%c0_6, %c0_7] : memref<16x256xf32, #tpu.memory_space<vmem>>, vector<16x256xf32>
    tpu.vector_store %arg8[%c0_6, %c0_7], %7 {strides = array<i32>} : memref<16x256xf32, #tpu.memory_space<vmem>>, vector<16x256xf32>,
    %c0_i32_8 = arith.constant 0 : i32
    %9 = arith.cmpi eq, %arg2, %c0_i32_8 : i32
    %10 = arith.extui %9 : i1 to i32
    %c0_i32_9 = arith.constant 0 : i32
    %11 = arith.cmpi ne, %10, %c0_i32_9 : i32
    scf.if %11 {
      %c0_10 = arith.constant 0 : index
      %c0_11 = arith.constant 0 : index
      %12 = vector.load %arg8[%c0_10, %c0_11] : memref<16x256xf32, #tpu.memory_space<vmem>>, vector<16x256xf32>
      %c0_12 = arith.constant 0 : index
      %c0_13 = arith.constant 0 : index
      %13 = vector.load %arg5[%c0_12, %c0_13] : memref<1x256xf32, #tpu.memory_space<vmem>>, vector<1x256xf32>
      %14 = vector.broadcast %13 : vector<1x256xf32> to vector<16x256xf32>
      %15 = arith.mulf %12, %14 : vector<16x256xf32>
      %c0_14 = arith.constant 0 : index
      %c0_15 = arith.constant 0 : index
      %16 = vector.load %arg6[%c0_14, %c0_15] : memref<1x256xf32, #tpu.memory_space<vmem>>, vector<1x256xf32>
      %17 = vector.broadcast %16 : vector<1x256xf32> to vector<16x256xf32>
      %18 = arith.addf %15, %17 : vector<16x256xf32>
      %19 = arith.truncf %18 : vector<16x256xf32> to vector<16x256xbf16>
      %c0_16 = arith.constant 0 : index
      %c0_17 = arith.constant 0 : index
      %20 = vector.load %arg7[%c0_16, %c0_17] : memref<16x256xbf16, #tpu.memory_space<vmem>>, vector<16x256xbf16>
      tpu.vector_store %arg7[%c0_16, %c0_17], %19 {strides = array<i32>} : memref<16x256xbf16, #tpu.memory_space<vmem>>, vector<16x256xbf16>,
    } else {
    }
    return
  }
  func.func @transform_0(%arg0: i32, %arg1: i32, %arg2: i32) -> (i32, i32) {
    %c0_i32 = arith.constant 0 : i32
    return %arg0, %arg2 : i32, i32
  }
  func.func @transform_1(%arg0: i32, %arg1: i32, %arg2: i32) -> (i32, i32) {
    %c0_i32 = arith.constant 0 : i32
    return %arg2, %arg1 : i32, i32
  }
  func.func @transform_2(%arg0: i32, %arg1: i32, %arg2: i32) -> (i32, i32) {
    %c0_i32 = arith.constant 0 : i32
    %c0_i32_0 = arith.constant 0 : i32
    return %c0_i32, %arg1 : i32, i32
  }
  func.func @transform_3(%arg0: i32, %arg1: i32, %arg2: i32) -> (i32, i32) {
    %c0_i32 = arith.constant 0 : i32
    %c0_i32_0 = arith.constant 0 : i32
    return %c0_i32, %arg1 : i32, i32
  }
  func.func @transform_4(%arg0: i32, %arg1: i32, %arg2: i32) -> (i32, i32) {
    %c0_i32 = arith.constant 0 : i32
    return %arg0, %arg1 : i32, i32
  }
}

module attributes {stable_mosaic.version = 11 : i64} {
  func.func @_fused_matmul_kernel(%arg0: i32, %arg1: i32, %arg2: i32, %arg3: memref<16x256xbf16, #tpu.memory_space<vmem>>, %arg4: memref<256x256xbf16, #tpu.memory_space<vmem>>, %arg5: memref<1x256xf32, #tpu.memory_space<vmem>>, %arg6: memref<1x256xf32, #tpu.memory_space<vmem>>, %arg7: memref<16x256xbf16, #tpu.memory_space<vmem>>, %arg8: memref<16x256xf32, #tpu.memory_space<vmem>>) attributes {dimension_semantics = [#tpu.dimension_semantics<parallel>, #tpu.dimension_semantics<parallel>, #tpu.dimension_semantics<arbitrary>], iteration_bounds = array<i64: 1, 1, 9>, scalar_prefetch = 0 : i64, scratch_operands = 1 : i64, tpu.core_type = #tpu.core_type<tc>, window_params = [{transform_indices = @transform_0, window_bounds = array<i64: 16, 256>}, {transform_indices = @transform_1, window_bounds = array<i64: 256, 256>}, {transform_indices = @transform_2, window_bounds = array<i64: 1, 256>}, {transform_indices = @transform_3, window_bounds = array<i64: 1, 256>}, {transform_indices = @transform_4, window_bounds = array<i64: 16, 256>}]} {
    %c0_i32 = arith.constant 0 : i32
    %0 = arith.cmpi eq, %arg2, %c0_i32 : i32
    %1 = arith.extui %0 : i1 to i32
    %c0_i32_0 = arith.constant 0 : i32
    %2 = arith.cmpi ne, %1, %c0_i32_0 : i32
    scf.if %2 {
      %cst_9 = arith.constant 0.000000e+00 : f32
      %12 = vector.broadcast %cst_9 : f32 to vector<16x256xf32>
      %c0_10 = arith.constant 0 : index
      %c0_11 = arith.constant 0 : index
      %13 = vector.load %arg8[%c0_10, %c0_11] : memref<16x256xf32, #tpu.memory_space<vmem>>, vector<16x256xf32>
      tpu.vector_store %arg8[%c0_10, %c0_11], %12 {strides = array<i32>} : memref<16x256xf32, #tpu.memory_space<vmem>>, vector<16x256xf32>,
    } else {
    }
    %c0 = arith.constant 0 : index
    %c0_1 = arith.constant 0 : index
    %3 = vector.load %arg8[%c0, %c0_1] : memref<16x256xf32, #tpu.memory_space<vmem>>, vector<16x256xf32>
    %c0_2 = arith.constant 0 : index
    %c0_3 = arith.constant 0 : index
    %4 = vector.load %arg3[%c0_2, %c0_3] : memref<16x256xbf16, #tpu.memory_space<vmem>>, vector<16x256xbf16>
    %c0_4 = arith.constant 0 : index
    %c0_5 = arith.constant 0 : index
    %5 = vector.load %arg4[%c0_4, %c0_5] : memref<256x256xbf16, #tpu.memory_space<vmem>>, vector<256x256xbf16>
    %cst = arith.constant dense<0.000000e+00> : vector<16x256xf32>
    %6 = tpu.matmul %4, %5, %cst {dimension_numbers = #tpu.dot_dimension_numbers<[1], [0], [0], [1], [0, 0, 1, 1], [], []>} : vector<16x256xbf16>, vector<256x256xbf16>, vector<16x256xf32> -> vector<16x256xf32>
    %7 = arith.addf %3, %6 : vector<16x256xf32>
    %c0_6 = arith.constant 0 : index
    %c0_7 = arith.constant 0 : index
    %8 = vector.load %arg8[%c0_6, %c0_7] : memref<16x256xf32, #tpu.memory_space<vmem>>, vector<16x256xf32>
    tpu.vector_store %arg8[%c0_6, %c0_7], %7 {strides = array<i32>} : memref<16x256xf32, #tpu.memory_space<vmem>>, vector<16x256xf32>,
    %c8_i32 = arith.constant 8 : i32
    %9 = arith.cmpi eq, %arg2, %c8_i32 : i32
    %10 = arith.extui %9 : i1 to i32
    %c0_i32_8 = arith.constant 0 : i32
    %11 = arith.cmpi ne, %10, %c0_i32_8 : i32
    scf.if %11 {
      %c0_9 = arith.constant 0 : index
      %c0_10 = arith.constant 0 : index
      %12 = vector.load %arg8[%c0_9, %c0_10] : memref<16x256xf32, #tpu.memory_space<vmem>>, vector<16x256xf32>
      %c0_11 = arith.constant 0 : index
      %c0_12 = arith.constant 0 : index
      %13 = vector.load %arg5[%c0_11, %c0_12] : memref<1x256xf32, #tpu.memory_space<vmem>>, vector<1x256xf32>
      %14 = vector.broadcast %13 : vector<1x256xf32> to vector<16x256xf32>
      %15 = arith.mulf %12, %14 : vector<16x256xf32>
      %c0_13 = arith.constant 0 : index
      %c0_14 = arith.constant 0 : index
      %16 = vector.load %arg6[%c0_13, %c0_14] : memref<1x256xf32, #tpu.memory_space<vmem>>, vector<1x256xf32>
      %17 = vector.broadcast %16 : vector<1x256xf32> to vector<16x256xf32>
      %18 = arith.addf %15, %17 : vector<16x256xf32>
      %cst_15 = arith.constant 0.000000e+00 : f32
      %19 = vector.broadcast %cst_15 : f32 to vector<16x256xf32>
      %20 = arith.maximumf %18, %19 : vector<16x256xf32>
      %21 = arith.truncf %20 : vector<16x256xf32> to vector<16x256xbf16>
      %c0_16 = arith.constant 0 : index
      %c0_17 = arith.constant 0 : index
      %22 = vector.load %arg7[%c0_16, %c0_17] : memref<16x256xbf16, #tpu.memory_space<vmem>>, vector<16x256xbf16>
      tpu.vector_store %arg7[%c0_16, %c0_17], %21 {strides = array<i32>} : memref<16x256xbf16, #tpu.memory_space<vmem>>, vector<16x256xbf16>,
    } else {
    }
    return
  }
  func.func @transform_0(%arg0: i32, %arg1: i32, %arg2: i32) -> (i32, i32) {
    %c0_i32 = arith.constant 0 : i32
    return %arg0, %arg2 : i32, i32
  }
  func.func @transform_1(%arg0: i32, %arg1: i32, %arg2: i32) -> (i32, i32) {
    %c0_i32 = arith.constant 0 : i32
    return %arg2, %arg1 : i32, i32
  }
  func.func @transform_2(%arg0: i32, %arg1: i32, %arg2: i32) -> (i32, i32) {
    %c0_i32 = arith.constant 0 : i32
    %c0_i32_0 = arith.constant 0 : i32
    return %c0_i32, %arg1 : i32, i32
  }
  func.func @transform_3(%arg0: i32, %arg1: i32, %arg2: i32) -> (i32, i32) {
    %c0_i32 = arith.constant 0 : i32
    %c0_i32_0 = arith.constant 0 : i32
    return %c0_i32, %arg1 : i32, i32
  }
  func.func @transform_4(%arg0: i32, %arg1: i32, %arg2: i32) -> (i32, i32) {
    %c0_i32 = arith.constant 0 : i32
    return %arg0, %arg1 : i32, i32
  }
}

module attributes {stable_mosaic.version = 11 : i64} {
  func.func @_fused_matmul_kernel(%arg0: i32, %arg1: i32, %arg2: i32, %arg3: memref<16x256xbf16, #tpu.memory_space<vmem>>, %arg4: memref<256x256xbf16, #tpu.memory_space<vmem>>, %arg5: memref<1x256xf32, #tpu.memory_space<vmem>>, %arg6: memref<1x256xf32, #tpu.memory_space<vmem>>, %arg7: memref<16x256xbf16, #tpu.memory_space<vmem>>, %arg8: memref<16x256xbf16, #tpu.memory_space<vmem>>, %arg9: memref<16x256xf32, #tpu.memory_space<vmem>>) attributes {dimension_semantics = [#tpu.dimension_semantics<parallel>, #tpu.dimension_semantics<parallel>, #tpu.dimension_semantics<arbitrary>], iteration_bounds = array<i64: 1, 1, 9>, scalar_prefetch = 0 : i64, scratch_operands = 1 : i64, tpu.core_type = #tpu.core_type<tc>, window_params = [{transform_indices = @transform_0, window_bounds = array<i64: 16, 256>}, {transform_indices = @transform_1, window_bounds = array<i64: 256, 256>}, {transform_indices = @transform_2, window_bounds = array<i64: 1, 256>}, {transform_indices = @transform_3, window_bounds = array<i64: 1, 256>}, {transform_indices = @transform_4, window_bounds = array<i64: 16, 256>}, {transform_indices = @transform_5, window_bounds = array<i64: 16, 256>}]} {
    %c0_i32 = arith.constant 0 : i32
    %0 = arith.cmpi eq, %arg2, %c0_i32 : i32
    %1 = arith.extui %0 : i1 to i32
    %c0_i32_0 = arith.constant 0 : i32
    %2 = arith.cmpi ne, %1, %c0_i32_0 : i32
    scf.if %2 {
      %cst_9 = arith.constant 0.000000e+00 : f32
      %12 = vector.broadcast %cst_9 : f32 to vector<16x256xf32>
      %c0_10 = arith.constant 0 : index
      %c0_11 = arith.constant 0 : index
      %13 = vector.load %arg9[%c0_10, %c0_11] : memref<16x256xf32, #tpu.memory_space<vmem>>, vector<16x256xf32>
      tpu.vector_store %arg9[%c0_10, %c0_11], %12 {strides = array<i32>} : memref<16x256xf32, #tpu.memory_space<vmem>>, vector<16x256xf32>,
    } else {
    }
    %c0 = arith.constant 0 : index
    %c0_1 = arith.constant 0 : index
    %3 = vector.load %arg9[%c0, %c0_1] : memref<16x256xf32, #tpu.memory_space<vmem>>, vector<16x256xf32>
    %c0_2 = arith.constant 0 : index
    %c0_3 = arith.constant 0 : index
    %4 = vector.load %arg3[%c0_2, %c0_3] : memref<16x256xbf16, #tpu.memory_space<vmem>>, vector<16x256xbf16>
    %c0_4 = arith.constant 0 : index
    %c0_5 = arith.constant 0 : index
    %5 = vector.load %arg4[%c0_4, %c0_5] : memref<256x256xbf16, #tpu.memory_space<vmem>>, vector<256x256xbf16>
    %cst = arith.constant dense<0.000000e+00> : vector<16x256xf32>
    %6 = tpu.matmul %4, %5, %cst {dimension_numbers = #tpu.dot_dimension_numbers<[1], [0], [0], [1], [0, 0, 1, 1], [], []>} : vector<16x256xbf16>, vector<256x256xbf16>, vector<16x256xf32> -> vector<16x256xf32>
    %7 = arith.addf %3, %6 : vector<16x256xf32>
    %c0_6 = arith.constant 0 : index
    %c0_7 = arith.constant 0 : index
    %8 = vector.load %arg9[%c0_6, %c0_7] : memref<16x256xf32, #tpu.memory_space<vmem>>, vector<16x256xf32>
    tpu.vector_store %arg9[%c0_6, %c0_7], %7 {strides = array<i32>} : memref<16x256xf32, #tpu.memory_space<vmem>>, vector<16x256xf32>,
    %c8_i32 = arith.constant 8 : i32
    %9 = arith.cmpi eq, %arg2, %c8_i32 : i32
    %10 = arith.extui %9 : i1 to i32
    %c0_i32_8 = arith.constant 0 : i32
    %11 = arith.cmpi ne, %10, %c0_i32_8 : i32
    scf.if %11 {
      %c0_9 = arith.constant 0 : index
      %c0_10 = arith.constant 0 : index
      %12 = vector.load %arg9[%c0_9, %c0_10] : memref<16x256xf32, #tpu.memory_space<vmem>>, vector<16x256xf32>
      %c0_11 = arith.constant 0 : index
      %c0_12 = arith.constant 0 : index
      %13 = vector.load %arg5[%c0_11, %c0_12] : memref<1x256xf32, #tpu.memory_space<vmem>>, vector<1x256xf32>
      %14 = vector.broadcast %13 : vector<1x256xf32> to vector<16x256xf32>
      %15 = arith.mulf %12, %14 : vector<16x256xf32>
      %c0_13 = arith.constant 0 : index
      %c0_14 = arith.constant 0 : index
      %16 = vector.load %arg6[%c0_13, %c0_14] : memref<1x256xf32, #tpu.memory_space<vmem>>, vector<1x256xf32>
      %17 = vector.broadcast %16 : vector<1x256xf32> to vector<16x256xf32>
      %18 = arith.addf %15, %17 : vector<16x256xf32>
      %c0_15 = arith.constant 0 : index
      %c0_16 = arith.constant 0 : index
      %19 = vector.load %arg7[%c0_15, %c0_16] : memref<16x256xbf16, #tpu.memory_space<vmem>>, vector<16x256xbf16>
      %20 = arith.extf %19 : vector<16x256xbf16> to vector<16x256xf32>
      %21 = arith.addf %18, %20 : vector<16x256xf32>
      %cst_17 = arith.constant 0.000000e+00 : f32
      %22 = vector.broadcast %cst_17 : f32 to vector<16x256xf32>
      %23 = arith.maximumf %21, %22 : vector<16x256xf32>
      %24 = arith.truncf %23 : vector<16x256xf32> to vector<16x256xbf16>
      %c0_18 = arith.constant 0 : index
      %c0_19 = arith.constant 0 : index
      %25 = vector.load %arg8[%c0_18, %c0_19] : memref<16x256xbf16, #tpu.memory_space<vmem>>, vector<16x256xbf16>
      tpu.vector_store %arg8[%c0_18, %c0_19], %24 {strides = array<i32>} : memref<16x256xbf16, #tpu.memory_space<vmem>>, vector<16x256xbf16>,
    } else {
    }
    return
  }
  func.func @transform_0(%arg0: i32, %arg1: i32, %arg2: i32) -> (i32, i32) {
    %c0_i32 = arith.constant 0 : i32
    return %arg0, %arg2 : i32, i32
  }
  func.func @transform_1(%arg0: i32, %arg1: i32, %arg2: i32) -> (i32, i32) {
    %c0_i32 = arith.constant 0 : i32
    return %arg2, %arg1 : i32, i32
  }
  func.func @transform_2(%arg0: i32, %arg1: i32, %arg2: i32) -> (i32, i32) {
    %c0_i32 = arith.constant 0 : i32
    %c0_i32_0 = arith.constant 0 : i32
    return %c0_i32, %arg1 : i32, i32
  }
  func.func @transform_3(%arg0: i32, %arg1: i32, %arg2: i32) -> (i32, i32) {
    %c0_i32 = arith.constant 0 : i32
    %c0_i32_0 = arith.constant 0 : i32
    return %c0_i32, %arg1 : i32, i32
  }
  func.func @transform_4(%arg0: i32, %arg1: i32, %arg2: i32) -> (i32, i32) {
    %c0_i32 = arith.constant 0 : i32
    return %arg0, %arg1 : i32, i32
  }
  func.func @transform_5(%arg0: i32, %arg1: i32, %arg2: i32) -> (i32, i32) {
    %c0_i32 = arith.constant 0 : i32
    return %arg0, %arg1 : i32, i32
  }
}

module attributes {stable_mosaic.version = 11 : i64} {
  func.func @_fused_matmul_kernel(%arg0: i32, %arg1: i32, %arg2: i32, %arg3: memref<16x256xbf16, #tpu.memory_space<vmem>>, %arg4: memref<256x256xbf16, #tpu.memory_space<vmem>>, %arg5: memref<1x256xf32, #tpu.memory_space<vmem>>, %arg6: memref<1x256xf32, #tpu.memory_space<vmem>>, %arg7: memref<16x256xbf16, #tpu.memory_space<vmem>>, %arg8: memref<16x256xf32, #tpu.memory_space<vmem>>) attributes {dimension_semantics = [#tpu.dimension_semantics<parallel>, #tpu.dimension_semantics<parallel>, #tpu.dimension_semantics<arbitrary>], iteration_bounds = array<i64: 1, 2, 9>, scalar_prefetch = 0 : i64, scratch_operands = 1 : i64, tpu.core_type = #tpu.core_type<tc>, window_params = [{transform_indices = @transform_0, window_bounds = array<i64: 16, 256>}, {transform_indices = @transform_1, window_bounds = array<i64: 256, 256>}, {transform_indices = @transform_2, window_bounds = array<i64: 1, 256>}, {transform_indices = @transform_3, window_bounds = array<i64: 1, 256>}, {transform_indices = @transform_4, window_bounds = array<i64: 16, 256>}]} {
    %c0_i32 = arith.constant 0 : i32
    %0 = arith.cmpi eq, %arg2, %c0_i32 : i32
    %1 = arith.extui %0 : i1 to i32
    %c0_i32_0 = arith.constant 0 : i32
    %2 = arith.cmpi ne, %1, %c0_i32_0 : i32
    scf.if %2 {
      %cst_9 = arith.constant 0.000000e+00 : f32
      %12 = vector.broadcast %cst_9 : f32 to vector<16x256xf32>
      %c0_10 = arith.constant 0 : index
      %c0_11 = arith.constant 0 : index
      %13 = vector.load %arg8[%c0_10, %c0_11] : memref<16x256xf32, #tpu.memory_space<vmem>>, vector<16x256xf32>
      tpu.vector_store %arg8[%c0_10, %c0_11], %12 {strides = array<i32>} : memref<16x256xf32, #tpu.memory_space<vmem>>, vector<16x256xf32>,
    } else {
    }
    %c0 = arith.constant 0 : index
    %c0_1 = arith.constant 0 : index
    %3 = vector.load %arg8[%c0, %c0_1] : memref<16x256xf32, #tpu.memory_space<vmem>>, vector<16x256xf32>
    %c0_2 = arith.constant 0 : index
    %c0_3 = arith.constant 0 : index
    %4 = vector.load %arg3[%c0_2, %c0_3] : memref<16x256xbf16, #tpu.memory_space<vmem>>, vector<16x256xbf16>
    %c0_4 = arith.constant 0 : index
    %c0_5 = arith.constant 0 : index
    %5 = vector.load %arg4[%c0_4, %c0_5] : memref<256x256xbf16, #tpu.memory_space<vmem>>, vector<256x256xbf16>
    %cst = arith.constant dense<0.000000e+00> : vector<16x256xf32>
    %6 = tpu.matmul %4, %5, %cst {dimension_numbers = #tpu.dot_dimension_numbers<[1], [0], [0], [1], [0, 0, 1, 1], [], []>} : vector<16x256xbf16>, vector<256x256xbf16>, vector<16x256xf32> -> vector<16x256xf32>
    %7 = arith.addf %3, %6 : vector<16x256xf32>
    %c0_6 = arith.constant 0 : index
    %c0_7 = arith.constant 0 : index
    %8 = vector.load %arg8[%c0_6, %c0_7] : memref<16x256xf32, #tpu.memory_space<vmem>>, vector<16x256xf32>
    tpu.vector_store %arg8[%c0_6, %c0_7], %7 {strides = array<i32>} : memref<16x256xf32, #tpu.memory_space<vmem>>, vector<16x256xf32>,
    %c8_i32 = arith.constant 8 : i32
    %9 = arith.cmpi eq, %arg2, %c8_i32 : i32
    %10 = arith.extui %9 : i1 to i32
    %c0_i32_8 = arith.constant 0 : i32
    %11 = arith.cmpi ne, %10, %c0_i32_8 : i32
    scf.if %11 {
      %c0_9 = arith.constant 0 : index
      %c0_10 = arith.constant 0 : index
      %12 = vector.load %arg8[%c0_9, %c0_10] : memref<16x256xf32, #tpu.memory_space<vmem>>, vector<16x256xf32>
      %c0_11 = arith.constant 0 : index
      %c0_12 = arith.constant 0 : index
      %13 = vector.load %arg5[%c0_11, %c0_12] : memref<1x256xf32, #tpu.memory_space<vmem>>, vector<1x256xf32>
      %14 = vector.broadcast %13 : vector<1x256xf32> to vector<16x256xf32>
      %15 = arith.mulf %12, %14 : vector<16x256xf32>
      %c0_13 = arith.constant 0 : index
      %c0_14 = arith.constant 0 : index
      %16 = vector.load %arg6[%c0_13, %c0_14] : memref<1x256xf32, #tpu.memory_space<vmem>>, vector<1x256xf32>
      %17 = vector.broadcast %16 : vector<1x256xf32> to vector<16x256xf32>
      %18 = arith.addf %15, %17 : vector<16x256xf32>
      %cst_15 = arith.constant 0.000000e+00 : f32
      %19 = vector.broadcast %cst_15 : f32 to vector<16x256xf32>
      %20 = arith.maximumf %18, %19 : vector<16x256xf32>
      %21 = arith.truncf %20 : vector<16x256xf32> to vector<16x256xbf16>
      %c0_16 = arith.constant 0 : index
      %c0_17 = arith.constant 0 : index
      %22 = vector.load %arg7[%c0_16, %c0_17] : memref<16x256xbf16, #tpu.memory_space<vmem>>, vector<16x256xbf16>
      tpu.vector_store %arg7[%c0_16, %c0_17], %21 {strides = array<i32>} : memref<16x256xbf16, #tpu.memory_space<vmem>>, vector<16x256xbf16>,
    } else {
    }
    return
  }
  func.func @transform_0(%arg0: i32, %arg1: i32, %arg2: i32) -> (i32, i32) {
    %c0_i32 = arith.constant 0 : i32
    return %arg0, %arg2 : i32, i32
  }
  func.func @transform_1(%arg0: i32, %arg1: i32, %arg2: i32) -> (i32, i32) {
    %c0_i32 = arith.constant 0 : i32
    return %arg2, %arg1 : i32, i32
  }
  func.func @transform_2(%arg0: i32, %arg1: i32, %arg2: i32) -> (i32, i32) {
    %c0_i32 = arith.constant 0 : i32
    %c0_i32_0 = arith.constant 0 : i32
    return %c0_i32, %arg1 : i32, i32
  }
  func.func @transform_3(%arg0: i32, %arg1: i32, %arg2: i32) -> (i32, i32) {
    %c0_i32 = arith.constant 0 : i32
    %c0_i32_0 = arith.constant 0 : i32
    return %c0_i32, %arg1 : i32, i32
  }
  func.func @transform_4(%arg0: i32, %arg1: i32, %arg2: i32) -> (i32, i32) {
    %c0_i32 = arith.constant 0 : i32
    return %arg0, %arg1 : i32, i32
  }
}

module attributes {stable_mosaic.version = 11 : i64} {
  func.func @_fused_matmul_kernel(%arg0: i32, %arg1: i32, %arg2: i32, %arg3: memref<16x256xbf16, #tpu.memory_space<vmem>>, %arg4: memref<256x256xbf16, #tpu.memory_space<vmem>>, %arg5: memref<1x256xf32, #tpu.memory_space<vmem>>, %arg6: memref<1x256xf32, #tpu.memory_space<vmem>>, %arg7: memref<16x256xbf16, #tpu.memory_space<vmem>>, %arg8: memref<16x256xf32, #tpu.memory_space<vmem>>) attributes {dimension_semantics = [#tpu.dimension_semantics<parallel>, #tpu.dimension_semantics<parallel>, #tpu.dimension_semantics<arbitrary>], iteration_bounds = array<i64: 1, 2, 1>, scalar_prefetch = 0 : i64, scratch_operands = 1 : i64, tpu.core_type = #tpu.core_type<tc>, window_params = [{transform_indices = @transform_0, window_bounds = array<i64: 16, 256>}, {transform_indices = @transform_1, window_bounds = array<i64: 256, 256>}, {transform_indices = @transform_2, window_bounds = array<i64: 1, 256>}, {transform_indices = @transform_3, window_bounds = array<i64: 1, 256>}, {transform_indices = @transform_4, window_bounds = array<i64: 16, 256>}]} {
    %c0_i32 = arith.constant 0 : i32
    %0 = arith.cmpi eq, %arg2, %c0_i32 : i32
    %1 = arith.extui %0 : i1 to i32
    %c0_i32_0 = arith.constant 0 : i32
    %2 = arith.cmpi ne, %1, %c0_i32_0 : i32
    scf.if %2 {
      %cst_10 = arith.constant 0.000000e+00 : f32
      %12 = vector.broadcast %cst_10 : f32 to vector<16x256xf32>
      %c0_11 = arith.constant 0 : index
      %c0_12 = arith.constant 0 : index
      %13 = vector.load %arg8[%c0_11, %c0_12] : memref<16x256xf32, #tpu.memory_space<vmem>>, vector<16x256xf32>
      tpu.vector_store %arg8[%c0_11, %c0_12], %12 {strides = array<i32>} : memref<16x256xf32, #tpu.memory_space<vmem>>, vector<16x256xf32>,
    } else {
    }
    %c0 = arith.constant 0 : index
    %c0_1 = arith.constant 0 : index
    %3 = vector.load %arg8[%c0, %c0_1] : memref<16x256xf32, #tpu.memory_space<vmem>>, vector<16x256xf32>
    %c0_2 = arith.constant 0 : index
    %c0_3 = arith.constant 0 : index
    %4 = vector.load %arg3[%c0_2, %c0_3] : memref<16x256xbf16, #tpu.memory_space<vmem>>, vector<16x256xbf16>
    %c0_4 = arith.constant 0 : index
    %c0_5 = arith.constant 0 : index
    %5 = vector.load %arg4[%c0_4, %c0_5] : memref<256x256xbf16, #tpu.memory_space<vmem>>, vector<256x256xbf16>
    %cst = arith.constant dense<0.000000e+00> : vector<16x256xf32>
    %6 = tpu.matmul %4, %5, %cst {dimension_numbers = #tpu.dot_dimension_numbers<[1], [0], [0], [1], [0, 0, 1, 1], [], []>} : vector<16x256xbf16>, vector<256x256xbf16>, vector<16x256xf32> -> vector<16x256xf32>
    %7 = arith.addf %3, %6 : vector<16x256xf32>
    %c0_6 = arith.constant 0 : index
    %c0_7 = arith.constant 0 : index
    %8 = vector.load %arg8[%c0_6, %c0_7] : memref<16x256xf32, #tpu.memory_space<vmem>>, vector<16x256xf32>
    tpu.vector_store %arg8[%c0_6, %c0_7], %7 {strides = array<i32>} : memref<16x256xf32, #tpu.memory_space<vmem>>, vector<16x256xf32>,
    %c0_i32_8 = arith.constant 0 : i32
    %9 = arith.cmpi eq, %arg2, %c0_i32_8 : i32
    %10 = arith.extui %9 : i1 to i32
    %c0_i32_9 = arith.constant 0 : i32
    %11 = arith.cmpi ne, %10, %c0_i32_9 : i32
    scf.if %11 {
      %c0_10 = arith.constant 0 : index
      %c0_11 = arith.constant 0 : index
      %12 = vector.load %arg8[%c0_10, %c0_11] : memref<16x256xf32, #tpu.memory_space<vmem>>, vector<16x256xf32>
      %c0_12 = arith.constant 0 : index
      %c0_13 = arith.constant 0 : index
      %13 = vector.load %arg5[%c0_12, %c0_13] : memref<1x256xf32, #tpu.memory_space<vmem>>, vector<1x256xf32>
      %14 = vector.broadcast %13 : vector<1x256xf32> to vector<16x256xf32>
      %15 = arith.mulf %12, %14 : vector<16x256xf32>
      %c0_14 = arith.constant 0 : index
      %c0_15 = arith.constant 0 : index
      %16 = vector.load %arg6[%c0_14, %c0_15] : memref<1x256xf32, #tpu.memory_space<vmem>>, vector<1x256xf32>
      %17 = vector.broadcast %16 : vector<1x256xf32> to vector<16x256xf32>
      %18 = arith.addf %15, %17 : vector<16x256xf32>
      %19 = arith.truncf %18 : vector<16x256xf32> to vector<16x256xbf16>
      %c0_16 = arith.constant 0 : index
      %c0_17 = arith.constant 0 : index
      %20 = vector.load %arg7[%c0_16, %c0_17] : memref<16x256xbf16, #tpu.memory_space<vmem>>, vector<16x256xbf16>
      tpu.vector_store %arg7[%c0_16, %c0_17], %19 {strides = array<i32>} : memref<16x256xbf16, #tpu.memory_space<vmem>>, vector<16x256xbf16>,
    } else {
    }
    return
  }
  func.func @transform_0(%arg0: i32, %arg1: i32, %arg2: i32) -> (i32, i32) {
    %c0_i32 = arith.constant 0 : i32
    return %arg0, %arg2 : i32, i32
  }
  func.func @transform_1(%arg0: i32, %arg1: i32, %arg2: i32) -> (i32, i32) {
    %c0_i32 = arith.constant 0 : i32
    return %arg2, %arg1 : i32, i32
  }
  func.func @transform_2(%arg0: i32, %arg1: i32, %arg2: i32) -> (i32, i32) {
    %c0_i32 = arith.constant 0 : i32
    %c0_i32_0 = arith.constant 0 : i32
    return %c0_i32, %arg1 : i32, i32
  }
  func.func @transform_3(%arg0: i32, %arg1: i32, %arg2: i32) -> (i32, i32) {
    %c0_i32 = arith.constant 0 : i32
    %c0_i32_0 = arith.constant 0 : i32
    return %c0_i32, %arg1 : i32, i32
  }
  func.func @transform_4(%arg0: i32, %arg1: i32, %arg2: i32) -> (i32, i32) {
    %c0_i32 = arith.constant 0 : i32
    return %arg0, %arg1 : i32, i32
  }
}

module attributes {stable_mosaic.version = 11 : i64} {
  func.func @_fused_matmul_kernel(%arg0: i32, %arg1: i32, %arg2: i32, %arg3: memref<16x256xbf16, #tpu.memory_space<vmem>>, %arg4: memref<256x256xbf16, #tpu.memory_space<vmem>>, %arg5: memref<1x256xf32, #tpu.memory_space<vmem>>, %arg6: memref<1x256xf32, #tpu.memory_space<vmem>>, %arg7: memref<16x256xbf16, #tpu.memory_space<vmem>>, %arg8: memref<16x256xbf16, #tpu.memory_space<vmem>>, %arg9: memref<16x256xf32, #tpu.memory_space<vmem>>) attributes {dimension_semantics = [#tpu.dimension_semantics<parallel>, #tpu.dimension_semantics<parallel>, #tpu.dimension_semantics<arbitrary>], iteration_bounds = array<i64: 1, 2, 18>, scalar_prefetch = 0 : i64, scratch_operands = 1 : i64, tpu.core_type = #tpu.core_type<tc>, window_params = [{transform_indices = @transform_0, window_bounds = array<i64: 16, 256>}, {transform_indices = @transform_1, window_bounds = array<i64: 256, 256>}, {transform_indices = @transform_2, window_bounds = array<i64: 1, 256>}, {transform_indices = @transform_3, window_bounds = array<i64: 1, 256>}, {transform_indices = @transform_4, window_bounds = array<i64: 16, 256>}, {transform_indices = @transform_5, window_bounds = array<i64: 16, 256>}]} {
    %c0_i32 = arith.constant 0 : i32
    %0 = arith.cmpi eq, %arg2, %c0_i32 : i32
    %1 = arith.extui %0 : i1 to i32
    %c0_i32_0 = arith.constant 0 : i32
    %2 = arith.cmpi ne, %1, %c0_i32_0 : i32
    scf.if %2 {
      %cst_9 = arith.constant 0.000000e+00 : f32
      %12 = vector.broadcast %cst_9 : f32 to vector<16x256xf32>
      %c0_10 = arith.constant 0 : index
      %c0_11 = arith.constant 0 : index
      %13 = vector.load %arg9[%c0_10, %c0_11] : memref<16x256xf32, #tpu.memory_space<vmem>>, vector<16x256xf32>
      tpu.vector_store %arg9[%c0_10, %c0_11], %12 {strides = array<i32>} : memref<16x256xf32, #tpu.memory_space<vmem>>, vector<16x256xf32>,
    } else {
    }
    %c0 = arith.constant 0 : index
    %c0_1 = arith.constant 0 : index
    %3 = vector.load %arg9[%c0, %c0_1] : memref<16x256xf32, #tpu.memory_space<vmem>>, vector<16x256xf32>
    %c0_2 = arith.constant 0 : index
    %c0_3 = arith.constant 0 : index
    %4 = vector.load %arg3[%c0_2, %c0_3] : memref<16x256xbf16, #tpu.memory_space<vmem>>, vector<16x256xbf16>
    %c0_4 = arith.constant 0 : index
    %c0_5 = arith.constant 0 : index
    %5 = vector.load %arg4[%c0_4, %c0_5] : memref<256x256xbf16, #tpu.memory_space<vmem>>, vector<256x256xbf16>
    %cst = arith.constant dense<0.000000e+00> : vector<16x256xf32>
    %6 = tpu.matmul %4, %5, %cst {dimension_numbers = #tpu.dot_dimension_numbers<[1], [0], [0], [1], [0, 0, 1, 1], [], []>} : vector<16x256xbf16>, vector<256x256xbf16>, vector<16x256xf32> -> vector<16x256xf32>
    %7 = arith.addf %3, %6 : vector<16x256xf32>
    %c0_6 = arith.constant 0 : index
    %c0_7 = arith.constant 0 : index
    %8 = vector.load %arg9[%c0_6, %c0_7] : memref<16x256xf32, #tpu.memory_space<vmem>>, vector<16x256xf32>
    tpu.vector_store %arg9[%c0_6, %c0_7], %7 {strides = array<i32>} : memref<16x256xf32, #tpu.memory_space<vmem>>, vector<16x256xf32>,
    %c17_i32 = arith.constant 17 : i32
    %9 = arith.cmpi eq, %arg2, %c17_i32 : i32
    %10 = arith.extui %9 : i1 to i32
    %c0_i32_8 = arith.constant 0 : i32
    %11 = arith.cmpi ne, %10, %c0_i32_8 : i32
    scf.if %11 {
      %c0_9 = arith.constant 0 : index
      %c0_10 = arith.constant 0 : index
      %12 = vector.load %arg9[%c0_9, %c0_10] : memref<16x256xf32, #tpu.memory_space<vmem>>, vector<16x256xf32>
      %c0_11 = arith.constant 0 : index
      %c0_12 = arith.constant 0 : index
      %13 = vector.load %arg5[%c0_11, %c0_12] : memref<1x256xf32, #tpu.memory_space<vmem>>, vector<1x256xf32>
      %14 = vector.broadcast %13 : vector<1x256xf32> to vector<16x256xf32>
      %15 = arith.mulf %12, %14 : vector<16x256xf32>
      %c0_13 = arith.constant 0 : index
      %c0_14 = arith.constant 0 : index
      %16 = vector.load %arg6[%c0_13, %c0_14] : memref<1x256xf32, #tpu.memory_space<vmem>>, vector<1x256xf32>
      %17 = vector.broadcast %16 : vector<1x256xf32> to vector<16x256xf32>
      %18 = arith.addf %15, %17 : vector<16x256xf32>
      %c0_15 = arith.constant 0 : index
      %c0_16 = arith.constant 0 : index
      %19 = vector.load %arg7[%c0_15, %c0_16] : memref<16x256xbf16, #tpu.memory_space<vmem>>, vector<16x256xbf16>
      %20 = arith.extf %19 : vector<16x256xbf16> to vector<16x256xf32>
      %21 = arith.addf %18, %20 : vector<16x256xf32>
      %cst_17 = arith.constant 0.000000e+00 : f32
      %22 = vector.broadcast %cst_17 : f32 to vector<16x256xf32>
      %23 = arith.maximumf %21, %22 : vector<16x256xf32>
      %24 = arith.truncf %23 : vector<16x256xf32> to vector<16x256xbf16>
      %c0_18 = arith.constant 0 : index
      %c0_19 = arith.constant 0 : index
      %25 = vector.load %arg8[%c0_18, %c0_19] : memref<16x256xbf16, #tpu.memory_space<vmem>>, vector<16x256xbf16>
      tpu.vector_store %arg8[%c0_18, %c0_19], %24 {strides = array<i32>} : memref<16x256xbf16, #tpu.memory_space<vmem>>, vector<16x256xbf16>,
    } else {
    }
    return
  }
  func.func @transform_0(%arg0: i32, %arg1: i32, %arg2: i32) -> (i32, i32) {
    %c0_i32 = arith.constant 0 : i32
    return %arg0, %arg2 : i32, i32
  }
  func.func @transform_1(%arg0: i32, %arg1: i32, %arg2: i32) -> (i32, i32) {
    %c0_i32 = arith.constant 0 : i32
    return %arg2, %arg1 : i32, i32
  }
  func.func @transform_2(%arg0: i32, %arg1: i32, %arg2: i32) -> (i32, i32) {
    %c0_i32 = arith.constant 0 : i32
    %c0_i32_0 = arith.constant 0 : i32
    return %c0_i32, %arg1 : i32, i32
  }
  func.func @transform_3(%arg0: i32, %arg1: i32, %arg2: i32) -> (i32, i32) {
    %c0_i32 = arith.constant 0 : i32
    %c0_i32_0 = arith.constant 0 : i32
    return %c0_i32, %arg1 : i32, i32
  }
  func.func @transform_4(%arg0: i32, %arg1: i32, %arg2: i32) -> (i32, i32) {
    %c0_i32 = arith.constant 0 : i32
    return %arg0, %arg1 : i32, i32
  }
  func.func @transform_5(%arg0: i32, %arg1: i32, %arg2: i32) -> (i32, i32) {
    %c0_i32 = arith.constant 0 : i32
    return %arg0, %arg1 : i32, i32
  }
}

module attributes {stable_mosaic.version = 11 : i64} {
  func.func @_fused_matmul_kernel(%arg0: i32, %arg1: i32, %arg2: i32, %arg3: memref<16x256xbf16, #tpu.memory_space<vmem>>, %arg4: memref<256x256xbf16, #tpu.memory_space<vmem>>, %arg5: memref<1x256xf32, #tpu.memory_space<vmem>>, %arg6: memref<1x256xf32, #tpu.memory_space<vmem>>, %arg7: memref<16x256xbf16, #tpu.memory_space<vmem>>, %arg8: memref<16x256xf32, #tpu.memory_space<vmem>>) attributes {dimension_semantics = [#tpu.dimension_semantics<parallel>, #tpu.dimension_semantics<parallel>, #tpu.dimension_semantics<arbitrary>], iteration_bounds = array<i64: 1, 2, 18>, scalar_prefetch = 0 : i64, scratch_operands = 1 : i64, tpu.core_type = #tpu.core_type<tc>, window_params = [{transform_indices = @transform_0, window_bounds = array<i64: 16, 256>}, {transform_indices = @transform_1, window_bounds = array<i64: 256, 256>}, {transform_indices = @transform_2, window_bounds = array<i64: 1, 256>}, {transform_indices = @transform_3, window_bounds = array<i64: 1, 256>}, {transform_indices = @transform_4, window_bounds = array<i64: 16, 256>}]} {
    %c0_i32 = arith.constant 0 : i32
    %0 = arith.cmpi eq, %arg2, %c0_i32 : i32
    %1 = arith.extui %0 : i1 to i32
    %c0_i32_0 = arith.constant 0 : i32
    %2 = arith.cmpi ne, %1, %c0_i32_0 : i32
    scf.if %2 {
      %cst_9 = arith.constant 0.000000e+00 : f32
      %12 = vector.broadcast %cst_9 : f32 to vector<16x256xf32>
      %c0_10 = arith.constant 0 : index
      %c0_11 = arith.constant 0 : index
      %13 = vector.load %arg8[%c0_10, %c0_11] : memref<16x256xf32, #tpu.memory_space<vmem>>, vector<16x256xf32>
      tpu.vector_store %arg8[%c0_10, %c0_11], %12 {strides = array<i32>} : memref<16x256xf32, #tpu.memory_space<vmem>>, vector<16x256xf32>,
    } else {
    }
    %c0 = arith.constant 0 : index
    %c0_1 = arith.constant 0 : index
    %3 = vector.load %arg8[%c0, %c0_1] : memref<16x256xf32, #tpu.memory_space<vmem>>, vector<16x256xf32>
    %c0_2 = arith.constant 0 : index
    %c0_3 = arith.constant 0 : index
    %4 = vector.load %arg3[%c0_2, %c0_3] : memref<16x256xbf16, #tpu.memory_space<vmem>>, vector<16x256xbf16>
    %c0_4 = arith.constant 0 : index
    %c0_5 = arith.constant 0 : index
    %5 = vector.load %arg4[%c0_4, %c0_5] : memref<256x256xbf16, #tpu.memory_space<vmem>>, vector<256x256xbf16>
    %cst = arith.constant dense<0.000000e+00> : vector<16x256xf32>
    %6 = tpu.matmul %4, %5, %cst {dimension_numbers = #tpu.dot_dimension_numbers<[1], [0], [0], [1], [0, 0, 1, 1], [], []>} : vector<16x256xbf16>, vector<256x256xbf16>, vector<16x256xf32> -> vector<16x256xf32>
    %7 = arith.addf %3, %6 : vector<16x256xf32>
    %c0_6 = arith.constant 0 : index
    %c0_7 = arith.constant 0 : index
    %8 = vector.load %arg8[%c0_6, %c0_7] : memref<16x256xf32, #tpu.memory_space<vmem>>, vector<16x256xf32>
    tpu.vector_store %arg8[%c0_6, %c0_7], %7 {strides = array<i32>} : memref<16x256xf32, #tpu.memory_space<vmem>>, vector<16x256xf32>,
    %c17_i32 = arith.constant 17 : i32
    %9 = arith.cmpi eq, %arg2, %c17_i32 : i32
    %10 = arith.extui %9 : i1 to i32
    %c0_i32_8 = arith.constant 0 : i32
    %11 = arith.cmpi ne, %10, %c0_i32_8 : i32
    scf.if %11 {
      %c0_9 = arith.constant 0 : index
      %c0_10 = arith.constant 0 : index
      %12 = vector.load %arg8[%c0_9, %c0_10] : memref<16x256xf32, #tpu.memory_space<vmem>>, vector<16x256xf32>
      %c0_11 = arith.constant 0 : index
      %c0_12 = arith.constant 0 : index
      %13 = vector.load %arg5[%c0_11, %c0_12] : memref<1x256xf32, #tpu.memory_space<vmem>>, vector<1x256xf32>
      %14 = vector.broadcast %13 : vector<1x256xf32> to vector<16x256xf32>
      %15 = arith.mulf %12, %14 : vector<16x256xf32>
      %c0_13 = arith.constant 0 : index
      %c0_14 = arith.constant 0 : index
      %16 = vector.load %arg6[%c0_13, %c0_14] : memref<1x256xf32, #tpu.memory_space<vmem>>, vector<1x256xf32>
      %17 = vector.broadcast %16 : vector<1x256xf32> to vector<16x256xf32>
      %18 = arith.addf %15, %17 : vector<16x256xf32>
      %cst_15 = arith.constant 0.000000e+00 : f32
      %19 = vector.broadcast %cst_15 : f32 to vector<16x256xf32>
      %20 = arith.maximumf %18, %19 : vector<16x256xf32>
      %21 = arith.truncf %20 : vector<16x256xf32> to vector<16x256xbf16>
      %c0_16 = arith.constant 0 : index
      %c0_17 = arith.constant 0 : index
      %22 = vector.load %arg7[%c0_16, %c0_17] : memref<16x256xbf16, #tpu.memory_space<vmem>>, vector<16x256xbf16>
      tpu.vector_store %arg7[%c0_16, %c0_17], %21 {strides = array<i32>} : memref<16x256xbf16, #tpu.memory_space<vmem>>, vector<16x256xbf16>,
    } else {
    }
    return
  }
  func.func @transform_0(%arg0: i32, %arg1: i32, %arg2: i32) -> (i32, i32) {
    %c0_i32 = arith.constant 0 : i32
    return %arg0, %arg2 : i32, i32
  }
  func.func @transform_1(%arg0: i32, %arg1: i32, %arg2: i32) -> (i32, i32) {
    %c0_i32 = arith.constant 0 : i32
    return %arg2, %arg1 : i32, i32
  }
  func.func @transform_2(%arg0: i32, %arg1: i32, %arg2: i32) -> (i32, i32) {
    %c0_i32 = arith.constant 0 : i32
    %c0_i32_0 = arith.constant 0 : i32
    return %c0_i32, %arg1 : i32, i32
  }
  func.func @transform_3(%arg0: i32, %arg1: i32, %arg2: i32) -> (i32, i32) {
    %c0_i32 = arith.constant 0 : i32
    %c0_i32_0 = arith.constant 0 : i32
    return %c0_i32, %arg1 : i32, i32
  }
  func.func @transform_4(%arg0: i32, %arg1: i32, %arg2: i32) -> (i32, i32) {
    %c0_i32 = arith.constant 0 : i32
    return %arg0, %arg1 : i32, i32
  }
}

module attributes {stable_mosaic.version = 11 : i64} {
  func.func @_gap_kernel(%arg0: memref<2x1x512xbf16, #tpu.memory_space<vmem>>, %arg1: memref<2x512xf32, #tpu.memory_space<vmem>>) attributes {dimension_semantics = [], scalar_prefetch = 0 : i64, scratch_operands = 0 : i64, tpu.core_type = #tpu.core_type<tc>} {
    %c0 = arith.constant 0 : index
    %c0_0 = arith.constant 0 : index
    %c0_1 = arith.constant 0 : index
    %0 = vector.load %arg0[%c0, %c0_0, %c0_1] : memref<2x1x512xbf16, #tpu.memory_space<vmem>>, vector<2x1x512xbf16>
    %1 = arith.extf %0 : vector<2x1x512xbf16> to vector<2x1x512xf32>
    %cst = arith.constant dense<0.000000e+00> : vector<2x512xf32>
    %2 = vector.multi_reduction <add>, %1, %cst [1] : vector<2x1x512xf32> to vector<2x512xf32>
    %cst_2 = arith.constant 1.000000e+00 : f32
    %3 = vector.broadcast %cst_2 : f32 to vector<2x512xf32>
    %4 = arith.mulf %2, %3 : vector<2x512xf32>
    %c0_3 = arith.constant 0 : index
    %c0_4 = arith.constant 0 : index
    %5 = vector.load %arg1[%c0_3, %c0_4] : memref<2x512xf32, #tpu.memory_space<vmem>>, vector<2x512xf32>
    tpu.vector_store %arg1[%c0_3, %c0_4], %4 {strides = array<i32>} : memref<2x512xf32, #tpu.memory_space<vmem>>, vector<2x512xf32>,
    return
  }
}

module attributes {stable_mosaic.version = 11 : i64} {
  func.func @_fused_matmul_kernel(%arg0: i32, %arg1: i32, %arg2: i32, %arg3: memref<16x256xbf16, #tpu.memory_space<vmem>>, %arg4: memref<256x256xbf16, #tpu.memory_space<vmem>>, %arg5: memref<1x256xf32, #tpu.memory_space<vmem>>, %arg6: memref<1x256xf32, #tpu.memory_space<vmem>>, %arg7: memref<16x256xf32, #tpu.memory_space<vmem>>, %arg8: memref<16x256xf32, #tpu.memory_space<vmem>>) attributes {dimension_semantics = [#tpu.dimension_semantics<parallel>, #tpu.dimension_semantics<parallel>, #tpu.dimension_semantics<arbitrary>], iteration_bounds = array<i64: 1, 1, 2>, scalar_prefetch = 0 : i64, scratch_operands = 1 : i64, tpu.core_type = #tpu.core_type<tc>, window_params = [{transform_indices = @transform_0, window_bounds = array<i64: 16, 256>}, {transform_indices = @transform_1, window_bounds = array<i64: 256, 256>}, {transform_indices = @transform_2, window_bounds = array<i64: 1, 256>}, {transform_indices = @transform_3, window_bounds = array<i64: 1, 256>}, {transform_indices = @transform_4, window_bounds = array<i64: 16, 256>}]} {
    %c0_i32 = arith.constant 0 : i32
    %0 = arith.cmpi eq, %arg2, %c0_i32 : i32
    %1 = arith.extui %0 : i1 to i32
    %c0_i32_0 = arith.constant 0 : i32
    %2 = arith.cmpi ne, %1, %c0_i32_0 : i32
    scf.if %2 {
      %cst_9 = arith.constant 0.000000e+00 : f32
      %12 = vector.broadcast %cst_9 : f32 to vector<16x256xf32>
      %c0_10 = arith.constant 0 : index
      %c0_11 = arith.constant 0 : index
      %13 = vector.load %arg8[%c0_10, %c0_11] : memref<16x256xf32, #tpu.memory_space<vmem>>, vector<16x256xf32>
      tpu.vector_store %arg8[%c0_10, %c0_11], %12 {strides = array<i32>} : memref<16x256xf32, #tpu.memory_space<vmem>>, vector<16x256xf32>,
    } else {
    }
    %c0 = arith.constant 0 : index
    %c0_1 = arith.constant 0 : index
    %3 = vector.load %arg8[%c0, %c0_1] : memref<16x256xf32, #tpu.memory_space<vmem>>, vector<16x256xf32>
    %c0_2 = arith.constant 0 : index
    %c0_3 = arith.constant 0 : index
    %4 = vector.load %arg3[%c0_2, %c0_3] : memref<16x256xbf16, #tpu.memory_space<vmem>>, vector<16x256xbf16>
    %c0_4 = arith.constant 0 : index
    %c0_5 = arith.constant 0 : index
    %5 = vector.load %arg4[%c0_4, %c0_5] : memref<256x256xbf16, #tpu.memory_space<vmem>>, vector<256x256xbf16>
    %cst = arith.constant dense<0.000000e+00> : vector<16x256xf32>
    %6 = tpu.matmul %4, %5, %cst {dimension_numbers = #tpu.dot_dimension_numbers<[1], [0], [0], [1], [0, 0, 1, 1], [], []>} : vector<16x256xbf16>, vector<256x256xbf16>, vector<16x256xf32> -> vector<16x256xf32>
    %7 = arith.addf %3, %6 : vector<16x256xf32>
    %c0_6 = arith.constant 0 : index
    %c0_7 = arith.constant 0 : index
    %8 = vector.load %arg8[%c0_6, %c0_7] : memref<16x256xf32, #tpu.memory_space<vmem>>, vector<16x256xf32>
    tpu.vector_store %arg8[%c0_6, %c0_7], %7 {strides = array<i32>} : memref<16x256xf32, #tpu.memory_space<vmem>>, vector<16x256xf32>,
    %c1_i32 = arith.constant 1 : i32
    %9 = arith.cmpi eq, %arg2, %c1_i32 : i32
    %10 = arith.extui %9 : i1 to i32
    %c0_i32_8 = arith.constant 0 : i32
    %11 = arith.cmpi ne, %10, %c0_i32_8 : i32
    scf.if %11 {
      %c0_9 = arith.constant 0 : index
      %c0_10 = arith.constant 0 : index
      %12 = vector.load %arg8[%c0_9, %c0_10] : memref<16x256xf32, #tpu.memory_space<vmem>>, vector<16x256xf32>
      %c0_11 = arith.constant 0 : index
      %c0_12 = arith.constant 0 : index
      %13 = vector.load %arg5[%c0_11, %c0_12] : memref<1x256xf32, #tpu.memory_space<vmem>>, vector<1x256xf32>
      %14 = vector.broadcast %13 : vector<1x256xf32> to vector<16x256xf32>
      %15 = arith.mulf %12, %14 : vector<16x256xf32>
      %c0_13 = arith.constant 0 : index
      %c0_14 = arith.constant 0 : index
      %16 = vector.load %arg6[%c0_13, %c0_14] : memref<1x256xf32, #tpu.memory_space<vmem>>, vector<1x256xf32>
      %17 = vector.broadcast %16 : vector<1x256xf32> to vector<16x256xf32>
      %18 = arith.addf %15, %17 : vector<16x256xf32>
      %cst_15 = arith.constant 0.000000e+00 : f32
      %19 = vector.broadcast %cst_15 : f32 to vector<16x256xf32>
      %20 = arith.maximumf %18, %19 : vector<16x256xf32>
      %c0_16 = arith.constant 0 : index
      %c0_17 = arith.constant 0 : index
      %21 = vector.load %arg7[%c0_16, %c0_17] : memref<16x256xf32, #tpu.memory_space<vmem>>, vector<16x256xf32>
      tpu.vector_store %arg7[%c0_16, %c0_17], %20 {strides = array<i32>} : memref<16x256xf32, #tpu.memory_space<vmem>>, vector<16x256xf32>,
    } else {
    }
    return
  }
  func.func @transform_0(%arg0: i32, %arg1: i32, %arg2: i32) -> (i32, i32) {
    %c0_i32 = arith.constant 0 : i32
    return %arg0, %arg2 : i32, i32
  }
  func.func @transform_1(%arg0: i32, %arg1: i32, %arg2: i32) -> (i32, i32) {
    %c0_i32 = arith.constant 0 : i32
    return %arg2, %arg1 : i32, i32
  }
  func.func @transform_2(%arg0: i32, %arg1: i32, %arg2: i32) -> (i32, i32) {
    %c0_i32 = arith.constant 0 : i32
    %c0_i32_0 = arith.constant 0 : i32
    return %c0_i32, %arg1 : i32, i32
  }
  func.func @transform_3(%arg0: i32, %arg1: i32, %arg2: i32) -> (i32, i32) {
    %c0_i32 = arith.constant 0 : i32
    %c0_i32_0 = arith.constant 0 : i32
    return %c0_i32, %arg1 : i32, i32
  }
  func.func @transform_4(%arg0: i32, %arg1: i32, %arg2: i32) -> (i32, i32) {
    %c0_i32 = arith.constant 0 : i32
    return %arg0, %arg1 : i32, i32
  }
}

module attributes {stable_mosaic.version = 11 : i64} {
  func.func @_fused_matmul_kernel(%arg0: i32, %arg1: i32, %arg2: i32, %arg3: memref<16x256xbf16, #tpu.memory_space<vmem>>, %arg4: memref<256x128xbf16, #tpu.memory_space<vmem>>, %arg5: memref<1x128xf32, #tpu.memory_space<vmem>>, %arg6: memref<1x128xf32, #tpu.memory_space<vmem>>, %arg7: memref<16x128xf32, #tpu.memory_space<vmem>>, %arg8: memref<16x128xf32, #tpu.memory_space<vmem>>) attributes {dimension_semantics = [#tpu.dimension_semantics<parallel>, #tpu.dimension_semantics<parallel>, #tpu.dimension_semantics<arbitrary>], iteration_bounds = array<i64: 1, 1, 1>, scalar_prefetch = 0 : i64, scratch_operands = 1 : i64, tpu.core_type = #tpu.core_type<tc>, window_params = [{transform_indices = @transform_0, window_bounds = array<i64: 16, 256>}, {transform_indices = @transform_1, window_bounds = array<i64: 256, 128>}, {transform_indices = @transform_2, window_bounds = array<i64: 1, 128>}, {transform_indices = @transform_3, window_bounds = array<i64: 1, 128>}, {transform_indices = @transform_4, window_bounds = array<i64: 16, 128>}]} {
    %c0_i32 = arith.constant 0 : i32
    %0 = arith.cmpi eq, %arg2, %c0_i32 : i32
    %1 = arith.extui %0 : i1 to i32
    %c0_i32_0 = arith.constant 0 : i32
    %2 = arith.cmpi ne, %1, %c0_i32_0 : i32
    scf.if %2 {
      %cst_10 = arith.constant 0.000000e+00 : f32
      %12 = vector.broadcast %cst_10 : f32 to vector<16x128xf32>
      %c0_11 = arith.constant 0 : index
      %c0_12 = arith.constant 0 : index
      %13 = vector.load %arg8[%c0_11, %c0_12] : memref<16x128xf32, #tpu.memory_space<vmem>>, vector<16x128xf32>
      tpu.vector_store %arg8[%c0_11, %c0_12], %12 {strides = array<i32>} : memref<16x128xf32, #tpu.memory_space<vmem>>, vector<16x128xf32>,
    } else {
    }
    %c0 = arith.constant 0 : index
    %c0_1 = arith.constant 0 : index
    %3 = vector.load %arg8[%c0, %c0_1] : memref<16x128xf32, #tpu.memory_space<vmem>>, vector<16x128xf32>
    %c0_2 = arith.constant 0 : index
    %c0_3 = arith.constant 0 : index
    %4 = vector.load %arg3[%c0_2, %c0_3] : memref<16x256xbf16, #tpu.memory_space<vmem>>, vector<16x256xbf16>
    %c0_4 = arith.constant 0 : index
    %c0_5 = arith.constant 0 : index
    %5 = vector.load %arg4[%c0_4, %c0_5] : memref<256x128xbf16, #tpu.memory_space<vmem>>, vector<256x128xbf16>
    %cst = arith.constant dense<0.000000e+00> : vector<16x128xf32>
    %6 = tpu.matmul %4, %5, %cst {dimension_numbers = #tpu.dot_dimension_numbers<[1], [0], [0], [1], [0, 0, 1, 1], [], []>} : vector<16x256xbf16>, vector<256x128xbf16>, vector<16x128xf32> -> vector<16x128xf32>
    %7 = arith.addf %3, %6 : vector<16x128xf32>
    %c0_6 = arith.constant 0 : index
    %c0_7 = arith.constant 0 : index
    %8 = vector.load %arg8[%c0_6, %c0_7] : memref<16x128xf32, #tpu.memory_space<vmem>>, vector<16x128xf32>
    tpu.vector_store %arg8[%c0_6, %c0_7], %7 {strides = array<i32>} : memref<16x128xf32, #tpu.memory_space<vmem>>, vector<16x128xf32>,
    %c0_i32_8 = arith.constant 0 : i32
    %9 = arith.cmpi eq, %arg2, %c0_i32_8 : i32
    %10 = arith.extui %9 : i1 to i32
    %c0_i32_9 = arith.constant 0 : i32
    %11 = arith.cmpi ne, %10, %c0_i32_9 : i32
    scf.if %11 {
      %c0_10 = arith.constant 0 : index
      %c0_11 = arith.constant 0 : index
      %12 = vector.load %arg8[%c0_10, %c0_11] : memref<16x128xf32, #tpu.memory_space<vmem>>, vector<16x128xf32>
      %c0_12 = arith.constant 0 : index
      %c0_13 = arith.constant 0 : index
      %13 = vector.load %arg5[%c0_12, %c0_13] : memref<1x128xf32, #tpu.memory_space<vmem>>, vector<1x128xf32>
      %14 = vector.broadcast %13 : vector<1x128xf32> to vector<16x128xf32>
      %15 = arith.mulf %12, %14 : vector<16x128xf32>
      %c0_14 = arith.constant 0 : index
      %c0_15 = arith.constant 0 : index
      %16 = vector.load %arg6[%c0_14, %c0_15] : memref<1x128xf32, #tpu.memory_space<vmem>>, vector<1x128xf32>
      %17 = vector.broadcast %16 : vector<1x128xf32> to vector<16x128xf32>
      %18 = arith.addf %15, %17 : vector<16x128xf32>
      %c0_16 = arith.constant 0 : index
      %c0_17 = arith.constant 0 : index
      %19 = vector.load %arg7[%c0_16, %c0_17] : memref<16x128xf32, #tpu.memory_space<vmem>>, vector<16x128xf32>
      tpu.vector_store %arg7[%c0_16, %c0_17], %18 {strides = array<i32>} : memref<16x128xf32, #tpu.memory_space<vmem>>, vector<16x128xf32>,
    } else {
    }
    return
  }
  func.func @transform_0(%arg0: i32, %arg1: i32, %arg2: i32) -> (i32, i32) {
    %c0_i32 = arith.constant 0 : i32
    return %arg0, %arg2 : i32, i32
  }
  func.func @transform_1(%arg0: i32, %arg1: i32, %arg2: i32) -> (i32, i32) {
    %c0_i32 = arith.constant 0 : i32
    return %arg2, %arg1 : i32, i32
  }
  func.func @transform_2(%arg0: i32, %arg1: i32, %arg2: i32) -> (i32, i32) {
    %c0_i32 = arith.constant 0 : i32
    %c0_i32_0 = arith.constant 0 : i32
    return %c0_i32, %arg1 : i32, i32
  }
  func.func @transform_3(%arg0: i32, %arg1: i32, %arg2: i32) -> (i32, i32) {
    %c0_i32 = arith.constant 0 : i32
    %c0_i32_0 = arith.constant 0 : i32
    return %c0_i32, %arg1 : i32, i32
  }
  func.func @transform_4(%arg0: i32, %arg1: i32, %arg2: i32) -> (i32, i32) {
    %c0_i32 = arith.constant 0 : i32
    return %arg0, %arg1 : i32, i32
  }
}

</mosaic_0001>

<bundles_post_ra>
// kernel: encoder_forward.24
= control target key start
LH: loop header
LB: loop body
LE: loop exit
PB: predicated region body
PF: predicated region fallthrough
CT: control target
= control target key end

     0   :  { %s1753_s15 = smov 0   ;;  %s1755_s16 = smov 0   ;;  %s2076_s0 = inlined_call_operand.vmem [shape: bf16[512,256], index: 0, kind: input, shape index: {}]   ;;  %s2077_s1 = inlined_call_operand.vmem [shape: bf16[256,64], index: 1, kind: input, shape index: {}]   ;;  %s2078_s2 = inlined_call_operand.vmem [shape: f32[1,64], index: 2, kind: input, shape index: {}]   ;;  %s2079_s3 = inlined_call_operand.vmem [shape: f32[1,64], index: 3, kind: input, shape index: {}]   ;;  %s2080_s4 = inlined_call_operand.vmem [shape: bf16[512,64], index: 4, kind: output, shape index: {}]  }
   0x1   :  { %s1757_s17 = smov 0  }
   0x2 LB: > { %s33_s18 = sadd.s32 1, %s1721_s16  ;;  %p1363_p0 = scmp.ge.s32.totalorder %s1725_s17, 1  ;;  %s1725_s17 = sphi %s1757_s17, %s14_s17   ;;  %s1721_s16 = sphi %s1755_s16, %s2082_s16   ;;  %s1717_s15 = sphi %s1753_s15, %s2081_s15  }
   0x3   : > { %p35_p1 = scmp.ge.s32.totalorder %s33_s18, 2  ;;  %p224_p2 = scmp.lt.s32.totalorder %s1725_s17, 3 }
   0x5   : > { %s2084_s18 = smov (%p35_p1, %s33_s18), 0  ;;  %p225_p3 = pnand %p1363_p0, %p224_p2 }
   0x6   : > { %s1364_s21 = sshll.u32 (!%p225_p3), %s1717_s15, 5 }
   0x7   : > { %228 = sbr.rel (%p225_p3) target bundleno = 322 (0x142), region = 36  ;;  %p274_p4 = scmp.lt.s32.totalorder (!%p225_p3), %s1364_s21, 63 }
   0xc   : > { %v1639_v0 = vld [vmem:[%s2077_s1 + $0x78] sm:$0xff]   ;;  %v1641_v2 = vld [vmem:[%s2077_s1 + $0x70] sm:$0xff]   ;;  %v1643_v4 = vld [vmem:[%s2077_s1 + $0x68] sm:$0xff]   ;;  %s2086_s21 = smov (!%p274_p4, %s1364_s21), 63  ;;  %vm313_vm0 = vcmask 523264   ;;  %v1727_v48 = vmov 0.0  }
   0xd   : > { %v1640_v1 = vld [vmem:[%s2077_s1 + $0x38] sm:$0xff]   ;;  %1486 = vmatprep.subr.bf16.mxu0 %v1639_v0  ;;  %1598 = vmatprep.subr.bf16.mxu1 %v1639_v0  ;;  %v1642_v3 = vld [vmem:[%s2077_s1 + $0x30] sm:$0xff]   ;;  %v1644_v5 = vld [vmem:[%s2077_s1 + $0x28] sm:$0xff]   ;;  %s1453_s10 = sshll.u32 %s2086_s21, 3  ;;  %314 = vst.msk [vmem:[#allocation2] sm:$0xff] %vm313_vm0, %v1727_v48  ;;  %s1368_s12 = sshll.u32 %s2086_s21, 2 }
   0xe   : > { %1487 = vmatpush3.bf16.msra.mxu0 %v1640_v1  ;;  %1606 = vmatpush3.bf16.msra.mxu1 %v1640_v1  ;;  %v1645_v6 = vld [vmem:[%s2077_s1 + $0x60] sm:$0xff]   ;;  %v1647_v8 = vld [vmem:[%s2077_s1 + $0x58] sm:$0xff]   ;;  %s1804_s15 = scalar_lea.vmem %s2076_s0, %s1453_s10  ;;  %v1649_v10 = vld [vmem:[%s2077_s1 + $0x50] sm:$0xff]   ;;  %315 = vst.msk [vmem:[#allocation2 + $0x8] sm:$0xff] %vm313_vm0, %v1727_v48  ;;  %s1919_s14 = scalar_lea.vmem %s2080_s4, %s1368_s12  ;;  %vm1197_vm1 = vcmask 519168  }
   0xf   : > { %1488 = vmatprep.subr.bf16.mxu0 %v1641_v2  ;;  %1599 = vmatprep.subr.bf16.mxu1 %v1641_v2  ;;  %v1646_v7 = vld [vmem:[%s2077_s1 + $0x20] sm:$0xff]   ;;  %v1648_v9 = vld [vmem:[%s2077_s1 + $0x18] sm:$0xff]   ;;  %v1650_v13 = vld [vmem:[%s2077_s1 + $0x10] sm:$0xff]   ;;  %316 = vst.msk [vmem:[#allocation2 + $0x10] sm:$0xff] %vm313_vm0, %v1727_v48 }
  0x10   : > { %v1657_v11 = vld [vmem:[%s1804_s15 + $0x4] ss:$8 sps:$4 sm:$0xff]   ;;  %v1655_v18 = vld [vmem:[%s1804_s15] ss:$8 sps:$4 sm:$0xff]   ;;  %v1661_v20 = vld [vmem:[%s1804_s15 + $0x14] ss:$8 sps:$4 sm:$0xff]  }
  0x11   : > { %v1660_v12 = vld [vmem:[%s1804_s15 + $0x84] ss:$8 sps:$4 sm:$0xff]   ;;  %730 = vmatprep.mubr.bf16.mxu0 %v1657_v11  ;;  %v1658_v19 = vld [vmem:[%s1804_s15 + $0x80] ss:$8 sps:$4 sm:$0xff]   ;;  %v1663_v21 = vld [vmem:[%s1804_s15 + $0x94] ss:$8 sps:$4 sm:$0xff]  }
  0x12   : > { %1489 = vmatpush3.bf16.msra.mxu0 %v1642_v3  ;;  %1607 = vmatpush3.bf16.msra.mxu1 %v1642_v3  ;;  %v1651_v14 = vld [vmem:[%s2077_s1 + $0x48] sm:$0xff]   ;;  %v1653_v16 = vld [vmem:[%s2077_s1 + $0x40] sm:$0xff]   ;;  %v1665_v22 = vld [vmem:[%s1804_s15 + $0x10] ss:$8 sps:$4 sm:$0xff]   ;;  %317 = vst.msk [vmem:[#allocation2 + $0x18] sm:$0xff] %vm313_vm0, %v1727_v48 }
  0x13   : > { %1490 = vmatprep.subr.bf16.mxu0 %v1643_v4  ;;  %1600 = vmatprep.subr.bf16.mxu1 %v1643_v4  ;;  %v1652_v15 = vld [vmem:[%s2077_s1 + $0x8] sm:$0xff]   ;;  %v1654_v17 = vld [vmem:[%s2077_s1] sm:$0xff]   ;;  %v1666_v23 = vld [vmem:[%s1804_s15 + $0x90] ss:$8 sps:$4 sm:$0xff]   ;;  %318 = vst.msk [vmem:[#allocation2 + $0x20] sm:$0xff] %vm313_vm0, %v1727_v48 }
  0x14   : > { %794 = vmatprep.mubr.bf16.mxu1 %v1660_v12  ;;  %v1667_v24 = vld [vmem:[%s1804_s15 + $0x24] ss:$8 sps:$4 sm:$0xff]   ;;  %v1671_v26 = vld [vmem:[%s1804_s15 + $0x20] ss:$8 sps:$4 sm:$0xff]   ;;  %v1673_v28 = vld [vmem:[%s1804_s15 + $0x34] ss:$8 sps:$4 sm:$0xff]  }
  0x15   : > { %v1669_v25 = vld [vmem:[%s1804_s15 + $0xa4] ss:$8 sps:$4 sm:$0xff]   ;;  %v1672_v27 = vld [vmem:[%s1804_s15 + $0xa0] ss:$8 sps:$4 sm:$0xff]   ;;  %v1675_v29 = vld [vmem:[%s1804_s15 + $0xb4] ss:$8 sps:$4 sm:$0xff]  }
  0x16   : > { %1491 = vmatpush3.bf16.msra.mxu0 %v1644_v5  ;;  %1608 = vmatpush3.bf16.msra.mxu1 %v1644_v5  ;;  %v1677_v30 = vld [vmem:[%s1804_s15 + $0x30] ss:$8 sps:$4 sm:$0xff]   ;;  %v1679_v32 = vld [vmem:[%s1804_s15 + $0x44] ss:$8 sps:$4 sm:$0xff]   ;;  %v1683_v34 = vld [vmem:[%s1804_s15 + $0x40] ss:$8 sps:$4 sm:$0xff]  }
  0x17   : > { %1492 = vmatprep.subr.bf16.mxu0 %v1645_v6  ;;  %1601 = vmatprep.subr.bf16.mxu1 %v1645_v6  ;;  %v1678_v31 = vld [vmem:[%s1804_s15 + $0xb0] ss:$8 sps:$4 sm:$0xff]   ;;  %v1681_v33 = vld [vmem:[%s1804_s15 + $0xc4] ss:$8 sps:$4 sm:$0xff]   ;;  %v1684_v35 = vld [vmem:[%s1804_s15 + $0xc0] ss:$8 sps:$4 sm:$0xff]  }
  0x18   : > { %v1685_v36 = vld [vmem:[%s1804_s15 + $0x54] ss:$8 sps:$4 sm:$0xff]   ;;  %v1689_v38 = vld [vmem:[%s1804_s15 + $0x50] ss:$8 sps:$4 sm:$0xff]   ;;  %v1691_v40 = vld [vmem:[%s1804_s15 + $0x64] ss:$8 sps:$4 sm:$0xff]  }
  0x19   : > { %v1687_v37 = vld [vmem:[%s1804_s15 + $0xd4] ss:$8 sps:$4 sm:$0xff]   ;;  %v1690_v39 = vld [vmem:[%s1804_s15 + $0xd0] ss:$8 sps:$4 sm:$0xff]   ;;  %v1693_v41 = vld [vmem:[%s1804_s15 + $0xe4] ss:$8 sps:$4 sm:$0xff]  }
  0x1a   : > { %1493 = vmatpush3.bf16.msra.mxu0 %v1646_v7  ;;  %1609 = vmatpush3.bf16.msra.mxu1 %v1646_v7  ;;  %v1695_v42 = vld [vmem:[%s1804_s15 + $0x60] ss:$8 sps:$4 sm:$0xff]   ;;  %v1697_v44 = vld [vmem:[%s1804_s15 + $0x74] ss:$8 sps:$4 sm:$0xff]   ;;  %v1701_v46 = vld [vmem:[%s1804_s15 + $0x70] ss:$8 sps:$4 sm:$0xff]  }
  0x1b   : > { %1494 = vmatprep.subr.bf16.mxu0 %v1647_v8  ;;  %1602 = vmatprep.subr.bf16.mxu1 %v1647_v8  ;;  %v1696_v43 = vld [vmem:[%s1804_s15 + $0xe0] ss:$8 sps:$4 sm:$0xff]   ;;  %v1699_v45 = vld [vmem:[%s1804_s15 + $0xf4] ss:$8 sps:$4 sm:$0xff]   ;;  %v1702_v47 = vld [vmem:[%s1804_s15 + $0xf0] ss:$8 sps:$4 sm:$0xff]  }
  0x1c   : > { %319 = vst.msk [vmem:[#allocation2 + $0x28] sm:$0xff] %vm313_vm0, %v1727_v48  ;;  %320 = vst.msk [vmem:[#allocation2 + $0x30] sm:$0xff] %vm313_vm0, %v1727_v48  ;;  %v346_v51 = vld [vmem:[#allocation2] sm:$0xff]  ;;  %v347_v61 = vld [vmem:[#allocation2 + $0x8] sm:$0xff] }
  0x1d   : > { %321 = vst.msk [vmem:[#allocation2 + $0x38] sm:$0xff] %vm313_vm0, %v1727_v48  ;;  %322 = vst.msk [vmem:[#allocation2 + $0x40] sm:$0xff] %vm313_vm0, %v1727_v48  ;;  %v348_v7 = vld [vmem:[#allocation2 + $0x10] sm:$0xff] }
  0x1e   : > { %1495 = vmatpush3.bf16.msra.mxu0 %v1648_v9  ;;  %1610 = vmatpush3.bf16.msra.mxu1 %v1648_v9  ;;  %323 = vst.msk [vmem:[#allocation2 + $0x48] sm:$0xff] %vm313_vm0, %v1727_v48  ;;  %324 = vst.msk [vmem:[#allocation2 + $0x50] sm:$0xff] %vm313_vm0, %v1727_v48 }
  0x1f   : > { %1496 = vmatprep.subr.bf16.mxu0 %v1649_v10  ;;  %1603 = vmatprep.subr.bf16.mxu1 %v1649_v10  ;;  %325 = vst.msk [vmem:[#allocation2 + $0x58] sm:$0xff] %vm313_vm0, %v1727_v48  ;;  %326 = vst.msk [vmem:[#allocation2 + $0x60] sm:$0xff] %vm313_vm0, %v1727_v48 }
  0x20   : > { %327 = vst.msk [vmem:[#allocation2 + $0x68] sm:$0xff] %vm313_vm0, %v1727_v48  ;;  %328 = vst.msk [vmem:[#allocation2 + $0x70] sm:$0xff] %vm313_vm0, %v1727_v48 }
  0x21   : > { %329 = vst.msk [vmem:[#allocation2 + $0x78] sm:$0xff] %vm313_vm0, %v1727_v48  ;;  %330 = vst.msk [vmem:[#allocation2 + $0x80] sm:$0xff] %vm313_vm0, %v1727_v48 }
  0x22   : > { %1497 = vmatpush3.bf16.msra.mxu0 %v1650_v13  ;;  %1611 = vmatpush3.bf16.msra.mxu1 %v1650_v13  ;;  %331 = vst.msk [vmem:[#allocation2 + $0x88] sm:$0xff] %vm313_vm0, %v1727_v48  ;;  %332 = vst.msk [vmem:[#allocation2 + $0x90] sm:$0xff] %vm313_vm0, %v1727_v48  ;;  %v1898_v13 = vld [vmem:[%s2078_s2] ss:$0 sm:$0xff] }
  0x23   : > { %1498 = vmatprep.subr.bf16.mxu0 %v1651_v14  ;;  %1604 = vmatprep.subr.bf16.mxu1 %v1651_v14  ;;  %333 = vst.msk [vmem:[#allocation2 + $0x98] sm:$0xff] %vm313_vm0, %v1727_v48  ;;  %334 = vst.msk [vmem:[#allocation2 + $0xa0] sm:$0xff] %vm313_vm0, %v1727_v48 }
  0x24   : > { %335 = vst.msk [vmem:[#allocation2 + $0xa8] sm:$0xff] %vm313_vm0, %v1727_v48  ;;  %336 = vst.msk [vmem:[#allocation2 + $0xb0] sm:$0xff] %vm313_vm0, %v1727_v48 }
  0x25   : > { %337 = vst.msk [vmem:[#allocation2 + $0xb8] sm:$0xff] %vm313_vm0, %v1727_v48  ;;  %338 = vst.msk [vmem:[#allocation2 + $0xc0] sm:$0xff] %vm313_vm0, %v1727_v48 }
  0x26   : > { %1499 = vmatpush3.bf16.msra.mxu0 %v1652_v15  ;;  %1612 = vmatpush3.bf16.msra.mxu1 %v1652_v15  ;;  %339 = vst.msk [vmem:[#allocation2 + $0xc8] sm:$0xff] %vm313_vm0, %v1727_v48  ;;  %340 = vst.msk [vmem:[#allocation2 + $0xd0] sm:$0xff] %vm313_vm0, %v1727_v48 }
  0x27   : > { %1500 = vmatprep.subr.bf16.mxu0 %v1653_v16  ;;  %1605 = vmatprep.subr.bf16.mxu1 %v1653_v16  ;;  %341 = vst.msk [vmem:[#allocation2 + $0xd8] sm:$0xff] %vm313_vm0, %v1727_v48  ;;  %342 = vst.msk [vmem:[#allocation2 + $0xe0] sm:$0xff] %vm313_vm0, %v1727_v48  ;;  %v1903_v16 = vld [vmem:[%s2079_s3] ss:$0 sm:$0xff] }
  0x28   : > { %343 = vst.msk [vmem:[#allocation2 + $0xe8] sm:$0xff] %vm313_vm0, %v1727_v48  ;;  %344 = vst.msk [vmem:[#allocation2 + $0xf0] sm:$0xff] %vm313_vm0, %v1727_v48  ;;  %v362_v53 = vld [vmem:[#allocation2 + $0x80] sm:$0xff] }
  0x29   : > { %345 = vst.msk [vmem:[#allocation2 + $0xf8] sm:$0xff] %vm313_vm0, %v1727_v48  ;;  %v363_v63 = vld [vmem:[#allocation2 + $0x88] sm:$0xff]  ;;  %v364_v9 = vld [vmem:[#allocation2 + $0x90] sm:$0xff] }
  0x2a   : > { %1501 = vmatpush3.bf16.msra.mxu0 %v1654_v17  ;;  %1613 = vmatpush3.bf16.msra.mxu1 %v1654_v17 }
  0x2d   : > { %731 = vmatmul.mubr.bf16.vlgmr.msra.gmra.mxu0 %v1655_v18  ;;  %795 = vmatmul.mubr.bf16.vlgmr.msra.gmra.mxu1 %v1658_v19  ;;  %v349_v19 = vld [vmem:[#allocation2 + $0x18] sm:$0xff] }
  0x2e   : > { %738 = vmatprep.mubr.bf16.mxu0 %v1661_v20  ;;  %802 = vmatprep.mubr.bf16.mxu1 %v1663_v21 }
  0x35   : > { %739 = vmatmul.mubr.bf16.gmra.mxu0 %v1665_v22  ;;  %803 = vmatmul.mubr.bf16.gmra.mxu1 %v1666_v23  ;;  %v365_v23 = vld [vmem:[#allocation2 + $0x98] sm:$0xff] }
  0x36   : > { %746 = vmatprep.mubr.bf16.mxu0 %v1667_v24  ;;  %810 = vmatprep.mubr.bf16.mxu1 %v1669_v25 }
  0x3d   : > { %747 = vmatmul.mubr.bf16.gmra.mxu0 %v1671_v26  ;;  %811 = vmatmul.mubr.bf16.gmra.mxu1 %v1672_v27 }
  0x3e   : > { %754 = vmatprep.mubr.bf16.mxu0 %v1673_v28  ;;  %818 = vmatprep.mubr.bf16.mxu1 %v1675_v29 }
  0x45   : > { %755 = vmatmul.mubr.bf16.gmra.mxu0 %v1677_v30  ;;  %819 = vmatmul.mubr.bf16.gmra.mxu1 %v1678_v31 }
  0x46   : > { %762 = vmatprep.mubr.bf16.mxu0 %v1679_v32  ;;  %826 = vmatprep.mubr.bf16.mxu1 %v1681_v33 }
  0x4d   : > { %763 = vmatmul.mubr.bf16.gmra.mxu0 %v1683_v34  ;;  %827 = vmatmul.mubr.bf16.gmra.mxu1 %v1684_v35 }
  0x4e   : > { %770 = vmatprep.mubr.bf16.mxu0 %v1685_v36  ;;  %834 = vmatprep.mubr.bf16.mxu1 %v1687_v37 }
  0x55   : > { %771 = vmatmul.mubr.bf16.gmra.mxu0 %v1689_v38  ;;  %835 = vmatmul.mubr.bf16.gmra.mxu1 %v1690_v39 }
  0x56   : > { %778 = vmatprep.mubr.bf16.mxu0 %v1691_v40  ;;  %842 = vmatprep.mubr.bf16.mxu1 %v1693_v41 }
  0x5d   : > { %779 = vmatmul.mubr.bf16.gmra.mxu0 %v1695_v42  ;;  %843 = vmatmul.mubr.bf16.gmra.mxu1 %v1696_v43  ;;  %v350_v43 = vld [vmem:[#allocation2 + $0x20] sm:$0xff] }
  0x5e   : > { %786 = vmatprep.mubr.bf16.mxu0 %v1697_v44  ;;  %850 = vmatprep.mubr.bf16.mxu1 %v1699_v45  ;;  %v366_v44 = vld [vmem:[#allocation2 + $0xa0] sm:$0xff] }
  0x65   : > { %787 = vmatmul.mubr.bf16.gmra.mxu0 %v1701_v46  ;;  %851 = vmatmul.mubr.bf16.gmra.mxu1 %v1702_v47 }
  0xed   : > { %v1502_v49 = vpop.f32.mrf.mxu0  ;;  %v1550_v50 = vpop.f32.mrf.mxu1 }
  0xef   : > { %v1503_v52 = vpop.f32.mrf.mxu0  ;;  %v1551_v54 = vpop.f32.mrf.mxu1 }
  0xf0   : > { %v1504_v55 = vadd.f32 %v1503_v52, %v1502_v49  ;;  %v1552_v56 = vadd.f32 %v1551_v54, %v1550_v50 }
  0xf1   : > { %v1505_v57 = vpop.f32.mrf.mxu0  ;;  %v1553_v58 = vpop.f32.mrf.mxu1 }
  0xf2   : > { %v859_v59 = vadd.f32 %v1504_v55, %v346_v51  ;;  %v875_v60 = vadd.f32 %v1552_v56, %v362_v53 }
  0xf3   : > { %v1506_v62 = vpop.f32.mrf.mxu0  ;;  %v1554_v0 = vpop.f32.mrf.mxu1 }
  0xf4   : > { %892 = vst.msk [vmem:[#allocation2] sm:$0xff] %vm313_vm0, %v859_v59  ;;  %908 = vst.msk [vmem:[#allocation2 + $0x80] sm:$0xff] %vm313_vm0, %v875_v60  ;;  %v1507_v1 = vadd.f32 %v1506_v62, %v1505_v57  ;;  %v1555_v2 = vadd.f32 %v1554_v0, %v1553_v58  ;;  %v367_v0 = vld [vmem:[#allocation2 + $0xa8] sm:$0xff] }
  0xf5   : > { %v1508_v3 = vpop.f32.mrf.mxu0  ;;  %v1556_v4 = vpop.f32.mrf.mxu1 }
  0xf6   : > { %v860_v5 = vadd.f32 %v1507_v1, %v347_v61  ;;  %v876_v6 = vadd.f32 %v1555_v2, %v363_v63  ;;  %v351_v63 = vld [vmem:[#allocation2 + $0x28] sm:$0xff] }
  0xf7   : > { %v1509_v8 = vpop.f32.mrf.mxu0  ;;  %v1557_v10 = vpop.f32.mrf.mxu1 }
  0xf8   : > { %893 = vst.msk [vmem:[#allocation2 + $0x8] sm:$0xff] %vm313_vm0, %v860_v5  ;;  %909 = vst.msk [vmem:[#allocation2 + $0x88] sm:$0xff] %vm313_vm0, %v876_v6  ;;  %v1510_v11 = vadd.f32 %v1509_v8, %v1508_v3  ;;  %v1558_v12 = vadd.f32 %v1557_v10, %v1556_v4 }
  0xf9   : > { %v1511_v14 = vpop.f32.mrf.mxu0  ;;  %v1559_v15 = vpop.f32.mrf.mxu1 }
  0xfa   : > { %v861_v17 = vadd.f32 %v1510_v11, %v348_v7  ;;  %v877_v18 = vadd.f32 %v1558_v12, %v364_v9 }
  0xfb   : > { %v927_v20 = vld [vmem:[#allocation2] sm:$0xff]  ;;  %v1512_v22 = vpop.f32.mrf.mxu0  ;;  %v1560_v24 = vpop.f32.mrf.mxu1 }
  0xfc   : > { %v943_v21 = vld [vmem:[#allocation2 + $0x80] sm:$0xff]  ;;  %v966_v25 = vmul.f32 %v1898_v13, %v927_v20  ;;  %894 = vst.msk [vmem:[#allocation2 + $0x10] sm:$0xff] %vm313_vm0, %v861_v17  ;;  %910 = vst.msk [vmem:[#allocation2 + $0x90] sm:$0xff] %vm313_vm0, %v877_v18  ;;  %v1513_v27 = vadd.f32 %v1512_v22, %v1511_v14  ;;  %v1561_v28 = vadd.f32 %v1560_v24, %v1559_v15  ;;  %v368_v22 = vld [vmem:[#allocation2 + $0xb0] sm:$0xff] }
  0xfd   : > { %v982_v26 = vmul.f32 %v1898_v13, %v943_v21  ;;  %v1514_v29 = vpop.f32.mrf.mxu0  ;;  %v1562_v30 = vpop.f32.mrf.mxu1  ;;  %v352_v21 = vld [vmem:[#allocation2 + $0x30] sm:$0xff] }
  0xfe   : > { %v1005_v31 = vadd.f32 %v1903_v16, %v966_v25  ;;  %v862_v33 = vadd.f32 %v1513_v27, %v349_v19  ;;  %v878_v34 = vadd.f32 %v1561_v28, %v365_v23 }
  0xff   : > { %v1021_v32 = vadd.f32 %v1903_v16, %v982_v26  ;;  %v928_v35 = vld [vmem:[#allocation2 + $0x8] sm:$0xff]  ;;  %v1515_v37 = vpop.f32.mrf.mxu0  ;;  %v1563_v38 = vpop.f32.mrf.mxu1 }
 0x100   : > { %v944_v36 = vld [vmem:[#allocation2 + $0x88] sm:$0xff]  ;;  %v1037_v39 = vmax.f32 %v1005_v31, 0.0  ;;  %v967_v41 = vmul.f32 %v1898_v13, %v928_v35  ;;  %895 = vst.msk [vmem:[#allocation2 + $0x18] sm:$0xff] %vm313_vm0, %v862_v33  ;;  %911 = vst.msk [vmem:[#allocation2 + $0x98] sm:$0xff] %vm313_vm0, %v878_v34  ;;  %v1516_v45 = vadd.f32 %v1515_v37, %v1514_v29  ;;  %v1564_v46 = vadd.f32 %v1563_v38, %v1562_v30  ;;  %v353_v33 = vld [vmem:[#allocation2 + $0x38] sm:$0xff] }
 0x101   : > { %v1053_v40 = vmax.f32 %v1021_v32, 0.0  ;;  %v983_v42 = vmul.f32 %v1898_v13, %v944_v36  ;;  %v1517_v47 = vpop.f32.mrf.mxu0  ;;  %v1565_v48 = vpop.f32.mrf.mxu1  ;;  %v369_v35 = vld [vmem:[#allocation2 + $0xb8] sm:$0xff] }
 0x102   : > { %v1454_v49 = vpack.c.bf16 %v1037_v39, %v1037_v39  ;;  %v1006_v51 = vadd.f32 %v1903_v16, %v967_v41  ;;  %v863_v55 = vadd.f32 %v1516_v45, %v350_v43  ;;  %v879_v56 = vadd.f32 %v1564_v46, %v366_v44 }
 0x103   : > { %v1470_v50 = vpack.c.bf16 %v1053_v40, %v1053_v40  ;;  %v1022_v52 = vadd.f32 %v1903_v16, %v983_v42  ;;  %v929_v53 = vld [vmem:[#allocation2 + $0x10] sm:$0xff]  ;;  %v1518_v57 = vpop.f32.mrf.mxu0  ;;  %v1566_v58 = vpop.f32.mrf.mxu1 }
 0x104   : > { %v945_v54 = vld [vmem:[#allocation2 + $0x90] sm:$0xff]  ;;  %1198 = vst.msk [vmem:[%s1919_s14] sm:$0xf] %vm1197_vm1, %v1454_v49  ;;  %v1038_v59 = vmax.f32 %v1006_v51, 0.0  ;;  %v968_v61 = vmul.f32 %v1898_v13, %v929_v53  ;;  %v1519_v1 = vadd.f32 %v1518_v57, %v1517_v47  ;;  %v1567_v2 = vadd.f32 %v1566_v58, %v1565_v48  ;;  %v354_v53 = vld [vmem:[#allocation2 + $0x40] sm:$0xff] }
 0x105   : > { %1214 = vst.msk [vmem:[%s1919_s14 + $0x40] sm:$0xf] %vm1197_vm1, %v1470_v50  ;;  %v1054_v60 = vmax.f32 %v1022_v52, 0.0  ;;  %v984_v62 = vmul.f32 %v1898_v13, %v945_v54  ;;  %v1520_v3 = vpop.f32.mrf.mxu0  ;;  %v1568_v4 = vpop.f32.mrf.mxu1 }
 0x106   : > { %896 = vst.msk [vmem:[#allocation2 + $0x20] sm:$0xff] %vm313_vm0, %v863_v55  ;;  %912 = vst.msk [vmem:[#allocation2 + $0xa0] sm:$0xff] %vm313_vm0, %v879_v56  ;;  %v1455_v5 = vpack.c.bf16 %v1038_v59, %v1038_v59  ;;  %v1007_v7 = vadd.f32 %v1903_v16, %v968_v61  ;;  %v864_v11 = vadd.f32 %v1519_v1, %v351_v63  ;;  %v370_v55 = vld [vmem:[#allocation2 + $0xc0] sm:$0xff] }
 0x107   : > { %v1471_v6 = vpack.c.bf16 %v1054_v60, %v1054_v60  ;;  %v1023_v8 = vadd.f32 %v1903_v16, %v984_v62  ;;  %v930_v9 = vld [vmem:[#allocation2 + $0x18] sm:$0xff]  ;;  %v880_v12 = vadd.f32 %v1567_v2, %v367_v0  ;;  %v1521_v14 = vpop.f32.mrf.mxu0  ;;  %v1569_v15 = vpop.f32.mrf.mxu1 }
 0x108   : > { %v946_v10 = vld [vmem:[#allocation2 + $0x98] sm:$0xff]  ;;  %1199 = vst.msk [vmem:[%s1919_s14 + $0x4] sm:$0xf] %vm1197_vm1, %v1455_v5  ;;  %v1039_v17 = vmax.f32 %v1007_v7, 0.0  ;;  %v969_v19 = vmul.f32 %v1898_v13, %v930_v9  ;;  %v1522_v23 = vadd.f32 %v1521_v14, %v1520_v3  ;;  %v1570_v24 = vadd.f32 %v1569_v15, %v1568_v4  ;;  %v355_v9 = vld [vmem:[#allocation2 + $0x48] sm:$0xff] }
 0x109   : > { %1215 = vst.msk [vmem:[%s1919_s14 + $0x44] sm:$0xf] %vm1197_vm1, %v1471_v6  ;;  %v1055_v18 = vmax.f32 %v1023_v8, 0.0  ;;  %v985_v20 = vmul.f32 %v1898_v13, %v946_v10  ;;  %v1523_v25 = vpop.f32.mrf.mxu0  ;;  %v1571_v26 = vpop.f32.mrf.mxu1 }
 0x10a   : > { %897 = vst.msk [vmem:[#allocation2 + $0x28] sm:$0xff] %vm313_vm0, %v864_v11  ;;  %913 = vst.msk [vmem:[#allocation2 + $0xa8] sm:$0xff] %vm313_vm0, %v880_v12  ;;  %v1456_v27 = vpack.c.bf16 %v1039_v17, %v1039_v17  ;;  %v1008_v29 = vadd.f32 %v1903_v16, %v969_v19  ;;  %v865_v31 = vadd.f32 %v1522_v23, %v352_v21  ;;  %v371_v11 = vld [vmem:[#allocation2 + $0xc8] sm:$0xff] }
 0x10b   : > { %v1472_v28 = vpack.c.bf16 %v1055_v18, %v1055_v18  ;;  %v1024_v30 = vadd.f32 %v1903_v16, %v985_v20  ;;  %v881_v32 = vadd.f32 %v1570_v24, %v368_v22  ;;  %v1524_v34 = vpop.f32.mrf.mxu0  ;;  %v1572_v36 = vpop.f32.mrf.mxu1 }
 0x10c   : > { %1200 = vst.msk [vmem:[%s1919_s14 + $0x8] sm:$0xf] %vm1197_vm1, %v1456_v27  ;;  %v1040_v37 = vmax.f32 %v1008_v29, 0.0  ;;  %v1525_v41 = vadd.f32 %v1524_v34, %v1523_v25  ;;  %v1573_v42 = vadd.f32 %v1572_v36, %v1571_v26  ;;  %v356_v27 = vld [vmem:[#allocation2 + $0x50] sm:$0xff] }
 0x10d   : > { %1216 = vst.msk [vmem:[%s1919_s14 + $0x48] sm:$0xf] %vm1197_vm1, %v1472_v28  ;;  %v1056_v38 = vmax.f32 %v1024_v30, 0.0  ;;  %v931_v39 = vld [vmem:[#allocation2 + $0x20] sm:$0xff]  ;;  %v1526_v45 = vpop.f32.mrf.mxu0  ;;  %v1574_v46 = vpop.f32.mrf.mxu1 }
 0x10e   : > { %v947_v40 = vld [vmem:[#allocation2 + $0xa0] sm:$0xff]  ;;  %v970_v43 = vmul.f32 %v1898_v13, %v931_v39  ;;  %898 = vst.msk [vmem:[#allocation2 + $0x30] sm:$0xff] %vm313_vm0, %v865_v31  ;;  %914 = vst.msk [vmem:[#allocation2 + $0xb0] sm:$0xff] %vm313_vm0, %v881_v32  ;;  %v1457_v47 = vpack.c.bf16 %v1040_v37, %v1040_v37  ;;  %v866_v49 = vadd.f32 %v1525_v41, %v353_v33 }
 0x10f   : > { %v986_v44 = vmul.f32 %v1898_v13, %v947_v40  ;;  %v1473_v48 = vpack.c.bf16 %v1056_v38, %v1056_v38  ;;  %v882_v50 = vadd.f32 %v1573_v42, %v369_v35  ;;  %v1527_v54 = vpop.f32.mrf.mxu0  ;;  %v1575_v56 = vpop.f32.mrf.mxu1  ;;  %v372_v35 = vld [vmem:[#allocation2 + $0xd0] sm:$0xff] }
 0x110   : > { %v1009_v51 = vadd.f32 %v1903_v16, %v970_v43  ;;  %1201 = vst.msk [vmem:[%s1919_s14 + $0xc] sm:$0xf] %vm1197_vm1, %v1457_v47  ;;  %v1528_v59 = vadd.f32 %v1527_v54, %v1526_v45  ;;  %v1576_v60 = vadd.f32 %v1575_v56, %v1574_v46 }
 0x111   : > { %v1025_v52 = vadd.f32 %v1903_v16, %v986_v44  ;;  %1217 = vst.msk [vmem:[%s1919_s14 + $0x4c] sm:$0xf] %vm1197_vm1, %v1473_v48  ;;  %v932_v57 = vld [vmem:[#allocation2 + $0x28] sm:$0xff]  ;;  %v1529_v1 = vpop.f32.mrf.mxu0  ;;  %v1577_v2 = vpop.f32.mrf.mxu1 }
 0x112   : > { %v948_v58 = vld [vmem:[#allocation2 + $0xa8] sm:$0xff]  ;;  %899 = vst.msk [vmem:[#allocation2 + $0x38] sm:$0xff] %vm313_vm0, %v866_v49  ;;  %915 = vst.msk [vmem:[#allocation2 + $0xb8] sm:$0xff] %vm313_vm0, %v882_v50  ;;  %v1041_v61 = vmax.f32 %v1009_v51, 0.0  ;;  %v971_v63 = vmul.f32 %v1898_v13, %v932_v57  ;;  %v867_v3 = vadd.f32 %v1528_v59, %v354_v53  ;;  %v883_v4 = vadd.f32 %v1576_v60, %v370_v55  ;;  %v357_v59 = vld [vmem:[#allocation2 + $0x58] sm:$0xff] }
 0x113   : > { %v1057_v62 = vmax.f32 %v1025_v52, 0.0  ;;  %v987_v0 = vmul.f32 %v1898_v13, %v948_v58  ;;  %v1530_v10 = vpop.f32.mrf.mxu0  ;;  %v1578_v12 = vpop.f32.mrf.mxu1  ;;  %v373_v60 = vld [vmem:[#allocation2 + $0xd8] sm:$0xff] }
 0x114   : > { %v1458_v5 = vpack.c.bf16 %v1041_v61, %v1041_v61  ;;  %v1010_v7 = vadd.f32 %v1903_v16, %v971_v63  ;;  %900 = vst.msk [vmem:[#allocation2 + $0x40] sm:$0xff] %vm313_vm0, %v867_v3  ;;  %916 = vst.msk [vmem:[#allocation2 + $0xc0] sm:$0xff] %vm313_vm0, %v883_v4  ;;  %v1531_v17 = vadd.f32 %v1530_v10, %v1529_v1 }
 0x115   : > { %v1474_v6 = vpack.c.bf16 %v1057_v62, %v1057_v62  ;;  %v1026_v8 = vadd.f32 %v1903_v16, %v987_v0  ;;  %v933_v14 = vld [vmem:[#allocation2 + $0x30] sm:$0xff]  ;;  %v1579_v18 = vadd.f32 %v1578_v12, %v1577_v2  ;;  %v1532_v23 = vpop.f32.mrf.mxu0  ;;  %v1580_v24 = vpop.f32.mrf.mxu1 }
 0x116   : > { %v949_v15 = vld [vmem:[#allocation2 + $0xb0] sm:$0xff]  ;;  %1202 = vst.msk [vmem:[%s1919_s14 + $0x10] sm:$0xf] %vm1197_vm1, %v1458_v5  ;;  %v1042_v19 = vmax.f32 %v1010_v7, 0.0  ;;  %v972_v21 = vmul.f32 %v1898_v13, %v933_v14  ;;  %v868_v25 = vadd.f32 %v1531_v17, %v355_v9  ;;  %v358_v17 = vld [vmem:[#allocation2 + $0x60] sm:$0xff] }
 0x117   : > { %1218 = vst.msk [vmem:[%s1919_s14 + $0x50] sm:$0xf] %vm1197_vm1, %v1474_v6  ;;  %v1058_v20 = vmax.f32 %v1026_v8, 0.0  ;;  %v988_v22 = vmul.f32 %v1898_v13, %v949_v15  ;;  %v884_v26 = vadd.f32 %v1579_v18, %v371_v11  ;;  %v1533_v34 = vpop.f32.mrf.mxu0  ;;  %v1581_v36 = vpop.f32.mrf.mxu1  ;;  %v374_v18 = vld [vmem:[#allocation2 + $0xe0] sm:$0xff] }
 0x118   : > { %v1459_v28 = vpack.c.bf16 %v1042_v19, %v1042_v19  ;;  %v1011_v30 = vadd.f32 %v1903_v16, %v972_v21  ;;  %901 = vst.msk [vmem:[#allocation2 + $0x48] sm:$0xff] %vm313_vm0, %v868_v25  ;;  %v1534_v39 = vadd.f32 %v1533_v34, %v1532_v23  ;;  %v1582_v40 = vadd.f32 %v1581_v36, %v1580_v24 }
 0x119   : > { %v1475_v29 = vpack.c.bf16 %v1058_v20, %v1058_v20  ;;  %v1027_v31 = vadd.f32 %v1903_v16, %v988_v22  ;;  %v934_v32 = vld [vmem:[#allocation2 + $0x38] sm:$0xff]  ;;  %917 = vst.msk [vmem:[#allocation2 + $0xc8] sm:$0xff] %vm313_vm0, %v884_v26  ;;  %v1535_v43 = vpop.f32.mrf.mxu0  ;;  %v1583_v44 = vpop.f32.mrf.mxu1 }
 0x11a   : > { %v950_v33 = vld [vmem:[#allocation2 + $0xb8] sm:$0xff]  ;;  %v973_v37 = vmul.f32 %v1898_v13, %v934_v32  ;;  %1203 = vst.msk [vmem:[%s1919_s14 + $0x14] sm:$0xf] %vm1197_vm1, %v1459_v28  ;;  %v1043_v41 = vmax.f32 %v1011_v30, 0.0  ;;  %v869_v47 = vadd.f32 %v1534_v39, %v356_v27  ;;  %v885_v48 = vadd.f32 %v1582_v40, %v372_v35 }
 0x11b   : > { %v989_v38 = vmul.f32 %v1898_v13, %v950_v33  ;;  %1219 = vst.msk [vmem:[%s1919_s14 + $0x54] sm:$0xf] %vm1197_vm1, %v1475_v29  ;;  %v1059_v42 = vmax.f32 %v1027_v31, 0.0  ;;  %v935_v51 = vld [vmem:[#allocation2 + $0x40] sm:$0xff]  ;;  %v1536_v53 = vpop.f32.mrf.mxu0  ;;  %v1584_v54 = vpop.f32.mrf.mxu1 }
 0x11c   : > { %v1012_v45 = vadd.f32 %v1903_v16, %v973_v37  ;;  %v1460_v49 = vpack.c.bf16 %v1043_v41, %v1043_v41  ;;  %v951_v52 = vld [vmem:[#allocation2 + $0xc0] sm:$0xff]  ;;  %v974_v57 = vmul.f32 %v1898_v13, %v935_v51  ;;  %902 = vst.msk [vmem:[#allocation2 + $0x50] sm:$0xff] %vm313_vm0, %v869_v47  ;;  %918 = vst.msk [vmem:[#allocation2 + $0xd0] sm:$0xff] %vm313_vm0, %v885_v48  ;;  %v359_v37 = vld [vmem:[#allocation2 + $0x68] sm:$0xff] }
 0x11d   : > { %v1028_v46 = vadd.f32 %v1903_v16, %v989_v38  ;;  %v1476_v50 = vpack.c.bf16 %v1059_v42, %v1059_v42  ;;  %v990_v58 = vmul.f32 %v1898_v13, %v951_v52  ;;  %v1537_v61 = vadd.f32 %v1536_v53, %v1535_v43  ;;  %v1538_v63 = vpop.f32.mrf.mxu0  ;;  %v1586_v0 = vpop.f32.mrf.mxu1  ;;  %v375_v38 = vld [vmem:[#allocation2 + $0xe8] sm:$0xff]  ;;  %v376_v51 = vld [vmem:[#allocation2 + $0xf0] sm:$0xff] }
 0x11e   : > { %v1044_v55 = vmax.f32 %v1012_v45, 0.0  ;;  %1204 = vst.msk [vmem:[%s1919_s14 + $0x18] sm:$0xf] %vm1197_vm1, %v1460_v49  ;;  %v1585_v62 = vadd.f32 %v1584_v54, %v1583_v44  ;;  %v1013_v3 = vadd.f32 %v1903_v16, %v974_v57  ;;  %v360_v49 = vld [vmem:[#allocation2 + $0x70] sm:$0xff] }
 0x11f   : > { %v1060_v56 = vmax.f32 %v1028_v46, 0.0  ;;  %1220 = vst.msk [vmem:[%s1919_s14 + $0x58] sm:$0xf] %vm1197_vm1, %v1476_v50  ;;  %v1029_v4 = vadd.f32 %v1903_v16, %v990_v58  ;;  %v936_v5 = vld [vmem:[#allocation2 + $0x48] sm:$0xff]  ;;  %v870_v7 = vadd.f32 %v1537_v61, %v357_v59  ;;  %v1539_v9 = vpop.f32.mrf.mxu0  ;;  %v1587_v10 = vpop.f32.mrf.mxu1 }
 0x120   : > { %v1461_v1 = vpack.c.bf16 %v1044_v55, %v1044_v55  ;;  %v952_v6 = vld [vmem:[#allocation2 + $0xc8] sm:$0xff]  ;;  %v886_v8 = vadd.f32 %v1585_v62, %v373_v60  ;;  %v1045_v11 = vmax.f32 %v1013_v3, 0.0  ;;  %v975_v14 = vmul.f32 %v1898_v13, %v936_v5  ;;  %v361_v5 = vld [vmem:[#allocation2 + $0x78] sm:$0xff] }
 0x121   : > { %v1477_v2 = vpack.c.bf16 %v1060_v56, %v1060_v56  ;;  %v1061_v12 = vmax.f32 %v1029_v4, 0.0  ;;  %v991_v15 = vmul.f32 %v1898_v13, %v952_v6  ;;  %903 = vst.msk [vmem:[#allocation2 + $0x58] sm:$0xff] %vm313_vm0, %v870_v7  ;;  %v1540_v19 = vadd.f32 %v1539_v9, %v1538_v63  ;;  %v1541_v21 = vpop.f32.mrf.mxu0  ;;  %v1589_v22 = vpop.f32.mrf.mxu1  ;;  %v377_v7 = vld [vmem:[#allocation2 + $0xf8] sm:$0xff] }
 0x122   : > { %1205 = vst.msk [vmem:[%s1919_s14 + $0x1c] sm:$0xf] %vm1197_vm1, %v1461_v1  ;;  %v1588_v20 = vadd.f32 %v1587_v10, %v1586_v0  ;;  %v1462_v23 = vpack.c.bf16 %v1045_v11, %v1045_v11  ;;  %v1014_v25 = vadd.f32 %v1903_v16, %v975_v14 }
 0x123   : > { %1221 = vst.msk [vmem:[%s1919_s14 + $0x5c] sm:$0xf] %vm1197_vm1, %v1477_v2  ;;  %v1478_v24 = vpack.c.bf16 %v1061_v12, %v1061_v12  ;;  %v1030_v26 = vadd.f32 %v1903_v16, %v991_v15  ;;  %v937_v27 = vld [vmem:[#allocation2 + $0x50] sm:$0xff]  ;;  %v871_v29 = vadd.f32 %v1540_v19, %v358_v17  ;;  %v1542_v31 = vpop.f32.mrf.mxu0  ;;  %v1590_v32 = vpop.f32.mrf.mxu1 }
 0x124   : > { %919 = vst.msk [vmem:[#allocation2 + $0xd8] sm:$0xff] %vm313_vm0, %v886_v8  ;;  %v953_v28 = vld [vmem:[#allocation2 + $0xd0] sm:$0xff]  ;;  %v887_v30 = vadd.f32 %v1588_v20, %v374_v18  ;;  %v1046_v33 = vmax.f32 %v1014_v25, 0.0  ;;  %v976_v35 = vmul.f32 %v1898_v13, %v937_v27  ;;  %v1543_v39 = vadd.f32 %v1542_v31, %v1541_v21 }
 0x125   : > { %1206 = vst.msk [vmem:[%s1919_s14 + $0x20] sm:$0xf] %vm1197_vm1, %v1462_v23  ;;  %1222 = vst.msk [vmem:[%s1919_s14 + $0x60] sm:$0xf] %vm1197_vm1, %v1478_v24  ;;  %v1062_v34 = vmax.f32 %v1030_v26, 0.0  ;;  %v992_v36 = vmul.f32 %v1898_v13, %v953_v28  ;;  %v1591_v40 = vadd.f32 %v1590_v32, %v1589_v22  ;;  %v1544_v41 = vpop.f32.mrf.mxu0  ;;  %v1592_v42 = vpop.f32.mrf.mxu1 }
 0x126   : > { %904 = vst.msk [vmem:[#allocation2 + $0x60] sm:$0xff] %vm313_vm0, %v871_v29  ;;  %920 = vst.msk [vmem:[#allocation2 + $0xe0] sm:$0xff] %vm313_vm0, %v887_v30  ;;  %v1463_v43 = vpack.c.bf16 %v1046_v33, %v1046_v33  ;;  %v1015_v45 = vadd.f32 %v1903_v16, %v976_v35  ;;  %v872_v47 = vadd.f32 %v1543_v39, %v359_v37 }
 0x127   : > { %v1479_v44 = vpack.c.bf16 %v1062_v34, %v1062_v34  ;;  %v1031_v46 = vadd.f32 %v1903_v16, %v992_v36  ;;  %v888_v48 = vadd.f32 %v1591_v40, %v375_v38  ;;  %v1545_v50 = vpop.f32.mrf.mxu0  ;;  %v1593_v52 = vpop.f32.mrf.mxu1 }
 0x128   : > { %1207 = vst.msk [vmem:[%s1919_s14 + $0x24] sm:$0xf] %vm1197_vm1, %v1463_v43  ;;  %v1047_v53 = vmax.f32 %v1015_v45, 0.0  ;;  %v938_v55 = vld [vmem:[#allocation2 + $0x58] sm:$0xff]  ;;  %v1546_v57 = vadd.f32 %v1545_v50, %v1544_v41  ;;  %v1594_v58 = vadd.f32 %v1593_v52, %v1592_v42 }
 0x129   : > { %1223 = vst.msk [vmem:[%s1919_s14 + $0x64] sm:$0xf] %vm1197_vm1, %v1479_v44  ;;  %v1063_v54 = vmax.f32 %v1031_v46, 0.0  ;;  %v977_v59 = vmul.f32 %v1898_v13, %v938_v55  ;;  %v1547_v61 = vpop.f32.mrf.mxu0  ;;  %v1595_v62 = vpop.f32.mrf.mxu1 }
 0x12a   : > { %905 = vst.msk [vmem:[#allocation2 + $0x68] sm:$0xff] %vm313_vm0, %v872_v47  ;;  %921 = vst.msk [vmem:[#allocation2 + $0xe8] sm:$0xff] %vm313_vm0, %v888_v48  ;;  %v1464_v63 = vpack.c.bf16 %v1047_v53, %v1047_v53  ;;  %v873_v1 = vadd.f32 %v1546_v57, %v360_v49  ;;  %v889_v2 = vadd.f32 %v1594_v58, %v376_v51 }
 0x12b   : > { %v954_v56 = vld [vmem:[#allocation2 + $0xd8] sm:$0xff]  ;;  %v1480_v0 = vpack.c.bf16 %v1063_v54, %v1063_v54  ;;  %v1016_v3 = vadd.f32 %v1903_v16, %v977_v59  ;;  %v1548_v6 = vpop.f32.mrf.mxu0  ;;  %v1596_v8 = vpop.f32.mrf.mxu1 }
 0x12c   : > { %v993_v60 = vmul.f32 %v1898_v13, %v954_v56  ;;  %1208 = vst.msk [vmem:[%s1919_s14 + $0x28] sm:$0xf] %vm1197_vm1, %v1464_v63  ;;  %v1549_v11 = vadd.f32 %v1548_v6, %v1547_v61  ;;  %v1597_v12 = vadd.f32 %v1596_v8, %v1595_v62 }
 0x12d   : > { %1224 = vst.msk [vmem:[%s1919_s14 + $0x68] sm:$0xf] %vm1197_vm1, %v1480_v0  ;;  %v939_v9 = vld [vmem:[#allocation2 + $0x60] sm:$0xff]  ;;  %v1048_v14 = vmax.f32 %v1016_v3, 0.0 }
 0x12e   : > { %v1032_v4 = vadd.f32 %v1903_v16, %v993_v60  ;;  %v955_v10 = vld [vmem:[#allocation2 + $0xe0] sm:$0xff]  ;;  %906 = vst.msk [vmem:[#allocation2 + $0x70] sm:$0xff] %vm313_vm0, %v873_v1  ;;  %922 = vst.msk [vmem:[#allocation2 + $0xf0] sm:$0xff] %vm313_vm0, %v889_v2  ;;  %v978_v17 = vmul.f32 %v1898_v13, %v939_v9  ;;  %v874_v19 = vadd.f32 %v1549_v11, %v361_v5 }
 0x12f   : > { %v994_v18 = vmul.f32 %v1898_v13, %v955_v10  ;;  %v890_v20 = vadd.f32 %v1597_v12, %v377_v7  ;;  %v1465_v21 = vpack.c.bf16 %v1048_v14, %v1048_v14 }
 0x130   : > { %v1064_v15 = vmax.f32 %v1032_v4, 0.0  ;;  %v1017_v23 = vadd.f32 %v1903_v16, %v978_v17  ;;  %907 = vst.msk [vmem:[#allocation2 + $0x78] sm:$0xff] %vm313_vm0, %v874_v19 }
 0x131   : > { %v1033_v24 = vadd.f32 %v1903_v16, %v994_v18  ;;  %v940_v25 = vld [vmem:[#allocation2 + $0x68] sm:$0xff]  ;;  %923 = vst.msk [vmem:[#allocation2 + $0xf8] sm:$0xff] %vm313_vm0, %v890_v20 }
 0x132   : > { %v1481_v22 = vpack.c.bf16 %v1064_v15, %v1064_v15  ;;  %v956_v26 = vld [vmem:[#allocation2 + $0xe8] sm:$0xff]  ;;  %1209 = vst.msk [vmem:[%s1919_s14 + $0x2c] sm:$0xf] %vm1197_vm1, %v1465_v21  ;;  %v1049_v27 = vmax.f32 %v1017_v23, 0.0  ;;  %v979_v29 = vmul.f32 %v1898_v13, %v940_v25 }
 0x133   : > { %v1065_v28 = vmax.f32 %v1033_v24, 0.0  ;;  %v995_v30 = vmul.f32 %v1898_v13, %v956_v26 }
 0x134   : > { %1225 = vst.msk [vmem:[%s1919_s14 + $0x6c] sm:$0xf] %vm1197_vm1, %v1481_v22  ;;  %v1466_v31 = vpack.c.bf16 %v1049_v27, %v1049_v27  ;;  %v1018_v33 = vadd.f32 %v1903_v16, %v979_v29 }
 0x135   : > { %v1482_v32 = vpack.c.bf16 %v1065_v28, %v1065_v28  ;;  %v1034_v34 = vadd.f32 %v1903_v16, %v995_v30  ;;  %v941_v35 = vld [vmem:[#allocation2 + $0x70] sm:$0xff] }
 0x136   : > { %v957_v36 = vld [vmem:[#allocation2 + $0xf0] sm:$0xff]  ;;  %v980_v37 = vmul.f32 %v1898_v13, %v941_v35  ;;  %1210 = vst.msk [vmem:[%s1919_s14 + $0x30] sm:$0xf] %vm1197_vm1, %v1466_v31  ;;  %v1050_v39 = vmax.f32 %v1018_v33, 0.0 }
 0x137   : > { %v996_v38 = vmul.f32 %v1898_v13, %v957_v36  ;;  %1226 = vst.msk [vmem:[%s1919_s14 + $0x70] sm:$0xf] %vm1197_vm1, %v1482_v32  ;;  %v1066_v40 = vmax.f32 %v1034_v34, 0.0  ;;  %v942_v45 = vld [vmem:[#allocation2 + $0x78] sm:$0xff] }
 0x138   : > { %v1019_v41 = vadd.f32 %v1903_v16, %v980_v37  ;;  %v1467_v43 = vpack.c.bf16 %v1050_v39, %v1050_v39  ;;  %v958_v46 = vld [vmem:[#allocation2 + $0xf8] sm:$0xff]  ;;  %v981_v49 = vmul.f32 %v1898_v13, %v942_v45 }
 0x139   : > { %v1035_v42 = vadd.f32 %v1903_v16, %v996_v38  ;;  %v1483_v44 = vpack.c.bf16 %v1066_v40, %v1066_v40  ;;  %v997_v50 = vmul.f32 %v1898_v13, %v958_v46 }
 0x13a   : > { %v1051_v47 = vmax.f32 %v1019_v41, 0.0  ;;  %1211 = vst.msk [vmem:[%s1919_s14 + $0x34] sm:$0xf] %vm1197_vm1, %v1467_v43  ;;  %v1020_v53 = vadd.f32 %v1903_v16, %v981_v49 }
 0x13b   : > { %v1067_v48 = vmax.f32 %v1035_v42, 0.0  ;;  %1227 = vst.msk [vmem:[%s1919_s14 + $0x74] sm:$0xf] %vm1197_vm1, %v1483_v44  ;;  %v1036_v54 = vadd.f32 %v1903_v16, %v997_v50 }
 0x13c   : > { %v1468_v51 = vpack.c.bf16 %v1051_v47, %v1051_v47  ;;  %v1052_v55 = vmax.f32 %v1020_v53, 0.0 }
 0x13d   : > { %v1484_v52 = vpack.c.bf16 %v1067_v48, %v1067_v48  ;;  %v1068_v56 = vmax.f32 %v1036_v54, 0.0 }
 0x13e   : > { %1212 = vst.msk [vmem:[%s1919_s14 + $0x38] sm:$0xf] %vm1197_vm1, %v1468_v51  ;;  %v1469_v57 = vpack.c.bf16 %v1052_v55, %v1052_v55 }
 0x13f   : > { %1228 = vst.msk [vmem:[%s1919_s14 + $0x78] sm:$0xf] %vm1197_vm1, %v1484_v52  ;;  %v1485_v58 = vpack.c.bf16 %v1068_v56, %v1068_v56 }
 0x140   : > { %1213 = vst.msk [vmem:[%s1919_s14 + $0x3c] sm:$0xf] %vm1197_vm1, %v1469_v57 }
 0x141   : > { %1229 = vst.msk [vmem:[%s1919_s14 + $0x7c] sm:$0xf] %vm1197_vm1, %v1485_v58 }
 0x142 PF: > { %s14_s17 = sadd.s32 1, %s1725_s17   ;;  %s2081_s15 = smov %s1721_s16 }
 0x143   : > { %p11_p5 = scmp.ge.s32.totalorder %s14_s17, 4   ;;  %s2082_s16 = smov %s2084_s18 }
 0x145   :  { %13 = sbr.rel (!%p11_p5) target bundleno = 2 (0x2), region = 83 }

// kernel: encoder_forward.25
= control target key start
LH: loop header
LB: loop body
LE: loop exit
PB: predicated region body
PF: predicated region fallthrough
CT: control target
= control target key end

     0   :  { %vm304_vm0 = vcmask 519168   ;;  %s871_s0 = inlined_call_operand.vmem [shape: bf16[128,64], index: 0, kind: input, shape index: {}]   ;;  %s872_s1 = inlined_call_operand.vmem [shape: bf16[128,64], index: 1, kind: input, shape index: {}]   ;;  %s873_s2 = inlined_call_operand.vmem [shape: bf16[128,64], index: 2, kind: input, shape index: {}]   ;;  %s874_s3 = inlined_call_operand.vmem [shape: bf16[128,64], index: 3, kind: input, shape index: {}]   ;;  %s875_s4 = inlined_call_operand.vmem [shape: bf16[128,64], index: 4, kind: input, shape index: {}]   ;;  %s876_s5 = inlined_call_operand.vmem [shape: bf16[128,64], index: 5, kind: input, shape index: {}]   ;;  %s877_s6 = inlined_call_operand.vmem [shape: bf16[128,64], index: 6, kind: input, shape index: {}]   ;;  %s878_s7 = inlined_call_operand.vmem [shape: bf16[128,64], index: 7, kind: input, shape index: {}]   ;;  %s879_s8 = inlined_call_operand.vmem [shape: bf16[128,64], index: 8, kind: input, shape index: {}]   ;;  %s880_s9 = inlined_call_operand.vmem [shape: bf16[128,64], index: 9, kind: output, shape index: {}]  }
   0x1   :  { %v32_v0 = vld [vmem:[%s871_s0] sm:$0xf]  ;;  %v33_v6 = vld [vmem:[%s871_s0 + $0x4] sm:$0xf]  ;;  %v34_v15 = vld [vmem:[%s871_s0 + $0x8] sm:$0xf] }
   0x2   :  { %v48_v1 = vld [vmem:[%s872_s1] sm:$0xf]  ;;  %v49_v7 = vld [vmem:[%s872_s1 + $0x4] sm:$0xf]  ;;  %v50_v16 = vld [vmem:[%s872_s1 + $0x8] sm:$0xf] }
   0x3   :  { %v80_v2 = vld [vmem:[%s873_s2] sm:$0xf]  ;;  %v64_v3 = vmax.bf16 %v48_v1, %v32_v0  ;;  %v81_v8 = vld [vmem:[%s873_s2 + $0x4] sm:$0xf]  ;;  %v65_v10 = vmax.bf16 %v49_v7, %v33_v6  ;;  %v82_v17 = vld [vmem:[%s873_s2 + $0x8] sm:$0xf]  ;;  %v66_v20 = vmax.bf16 %v50_v16, %v34_v15 }
   0x4   :  { %v112_v4 = vld [vmem:[%s874_s3] sm:$0xf]  ;;  %v113_v13 = vld [vmem:[%s874_s3 + $0x4] sm:$0xf]  ;;  %v114_v24 = vld [vmem:[%s874_s3 + $0x8] sm:$0xf] }
   0x5   :  { %v96_v5 = vmax.bf16 %v80_v2, %v64_v3  ;;  %v144_v9 = vld [vmem:[%s875_s4] sm:$0xf]  ;;  %v97_v14 = vmax.bf16 %v81_v8, %v65_v10  ;;  %v145_v19 = vld [vmem:[%s875_s4 + $0x4] sm:$0xf]  ;;  %v98_v26 = vmax.bf16 %v82_v17, %v66_v20  ;;  %v35_v27 = vld [vmem:[%s871_s0 + $0xc] sm:$0xf] }
   0x6   :  { %v176_v12 = vld [vmem:[%s876_s5] sm:$0xf]  ;;  %v177_v23 = vld [vmem:[%s876_s5 + $0x4] sm:$0xf]  ;;  %v51_v28 = vld [vmem:[%s872_s1 + $0xc] sm:$0xf] }
   0x7   :  { %v128_v11 = vmax.bf16 %v112_v4, %v96_v5  ;;  %v208_v21 = vld [vmem:[%s877_s6] sm:$0xf]  ;;  %v129_v22 = vmax.bf16 %v113_v13, %v97_v14  ;;  %v83_v29 = vld [vmem:[%s873_s2 + $0xc] sm:$0xf]  ;;  %v146_v33 = vld [vmem:[%s875_s4 + $0x8] sm:$0xf]  ;;  %v67_v34 = vmax.bf16 %v51_v28, %v35_v27  ;;  %v130_v37 = vmax.bf16 %v114_v24, %v98_v26 }
   0x8   :  { %v240_v30 = vld [vmem:[%s878_s7] sm:$0xf]  ;;  %v209_v36 = vld [vmem:[%s877_s6 + $0x4] sm:$0xf]  ;;  %v178_v38 = vld [vmem:[%s876_s5 + $0x8] sm:$0xf] }
   0x9   :  { %v160_v18 = vmax.bf16 %v144_v9, %v128_v11  ;;  %v272_v31 = vld [vmem:[%s879_s8] sm:$0xf]  ;;  %v161_v32 = vmax.bf16 %v145_v19, %v129_v22  ;;  %v115_v39 = vld [vmem:[%s874_s3 + $0xc] sm:$0xf]  ;;  %v99_v41 = vmax.bf16 %v83_v29, %v67_v34  ;;  %v36_v42 = vld [vmem:[%s871_s0 + $0x10] sm:$0xf]  ;;  %v162_v48 = vmax.bf16 %v146_v33, %v130_v37 }
   0xa   :  { %v52_v43 = vld [vmem:[%s872_s1 + $0x10] sm:$0xf]  ;;  %v241_v46 = vld [vmem:[%s878_s7 + $0x4] sm:$0xf]  ;;  %v147_v49 = vld [vmem:[%s875_s4 + $0xc] sm:$0xf] }
   0xb   :  { %v192_v25 = vmax.bf16 %v176_v12, %v160_v18  ;;  %v193_v40 = vmax.bf16 %v177_v23, %v161_v32  ;;  %v84_v44 = vld [vmem:[%s873_s2 + $0x10] sm:$0xf]  ;;  %v273_v47 = vld [vmem:[%s879_s8 + $0x4] sm:$0xf]  ;;  %v68_v50 = vmax.bf16 %v52_v43, %v36_v42  ;;  %v210_v52 = vld [vmem:[%s877_s6 + $0x8] sm:$0xf]  ;;  %v131_v53 = vmax.bf16 %v115_v39, %v99_v41 }
   0xc   :  { %v179_v54 = vld [vmem:[%s876_s5 + $0xc] sm:$0xf]  ;;  %v116_v55 = vld [vmem:[%s874_s3 + $0x10] sm:$0xf]  ;;  %v194_v57 = vmax.bf16 %v178_v38, %v162_v48  ;;  %v37_v59 = vld [vmem:[%s871_s0 + $0x14] sm:$0xf] }
   0xd   :  { %v224_v35 = vmax.bf16 %v208_v21, %v192_v25  ;;  %v225_v51 = vmax.bf16 %v209_v36, %v193_v40  ;;  %v100_v58 = vmax.bf16 %v84_v44, %v68_v50  ;;  %v53_v60 = vld [vmem:[%s872_s1 + $0x14] sm:$0xf]  ;;  %v242_v63 = vld [vmem:[%s878_s7 + $0x8] sm:$0xf]  ;;  %v163_v1 = vmax.bf16 %v147_v49, %v131_v53  ;;  %v148_v2 = vld [vmem:[%s875_s4 + $0x10] sm:$0xf] }
   0xe   :  { %v85_v61 = vld [vmem:[%s873_s2 + $0x14] sm:$0xf]  ;;  %v274_v0 = vld [vmem:[%s879_s8 + $0x8] sm:$0xf]  ;;  %v69_v3 = vmax.bf16 %v53_v60, %v37_v59  ;;  %v226_v4 = vmax.bf16 %v210_v52, %v194_v57  ;;  %v211_v5 = vld [vmem:[%s877_s6 + $0xc] sm:$0xf] }
   0xf   :  { %v256_v45 = vmax.bf16 %v240_v30, %v224_v35  ;;  %v257_v62 = vmax.bf16 %v241_v46, %v225_v51  ;;  %v132_v6 = vmax.bf16 %v116_v55, %v100_v58  ;;  %v180_v7 = vld [vmem:[%s876_s5 + $0x10] sm:$0xf]  ;;  %v117_v8 = vld [vmem:[%s874_s3 + $0x14] sm:$0xf]  ;;  %v195_v10 = vmax.bf16 %v179_v54, %v163_v1  ;;  %v38_v12 = vld [vmem:[%s871_s0 + $0x18] sm:$0xf] }
  0x10   :  { %v101_v11 = vmax.bf16 %v85_v61, %v69_v3  ;;  %v54_v13 = vld [vmem:[%s872_s1 + $0x18] sm:$0xf]  ;;  %v258_v15 = vmax.bf16 %v242_v63, %v226_v4  ;;  %v243_v16 = vld [vmem:[%s878_s7 + $0xc] sm:$0xf]  ;;  %v149_v19 = vld [vmem:[%s875_s4 + $0x14] sm:$0xf] }
  0x11   :  { %v288_v56 = vmax.bf16 %v272_v31, %v256_v45  ;;  %v289_v9 = vmax.bf16 %v273_v47, %v257_v62  ;;  %v86_v14 = vld [vmem:[%s873_s2 + $0x18] sm:$0xf]  ;;  %v275_v17 = vld [vmem:[%s879_s8 + $0xc] sm:$0xf]  ;;  %v164_v18 = vmax.bf16 %v148_v2, %v132_v6  ;;  %v70_v20 = vmax.bf16 %v54_v13, %v38_v12  ;;  %v212_v22 = vld [vmem:[%s877_s6 + $0x10] sm:$0xf] }
  0x12   :  { %v227_v21 = vmax.bf16 %v211_v5, %v195_v10  ;;  %v133_v23 = vmax.bf16 %v117_v8, %v101_v11  ;;  %v181_v24 = vld [vmem:[%s876_s5 + $0x14] sm:$0xf]  ;;  %v118_v25 = vld [vmem:[%s874_s3 + $0x18] sm:$0xf]  ;;  %v290_v26 = vmax.bf16 %v274_v0, %v258_v15  ;;  %v39_v29 = vld [vmem:[%s871_s0 + $0x1c] sm:$0xf] }
  0x13   :  { %305 = vst.msk [vmem:[%s880_s9] sm:$0xf] %vm304_vm0, %v288_v56  ;;  %306 = vst.msk [vmem:[%s880_s9 + $0x4] sm:$0xf] %vm304_vm0, %v289_v9  ;;  %v196_v27 = vmax.bf16 %v180_v7, %v164_v18  ;;  %v102_v28 = vmax.bf16 %v86_v14, %v70_v20  ;;  %v55_v30 = vld [vmem:[%s872_s1 + $0x1c] sm:$0xf] }
  0x14   :  { %v87_v31 = vld [vmem:[%s873_s2 + $0x1c] sm:$0xf]  ;;  %v259_v32 = vmax.bf16 %v243_v16, %v227_v21  ;;  %v244_v33 = vld [vmem:[%s878_s7 + $0x10] sm:$0xf]  ;;  %v165_v35 = vmax.bf16 %v149_v19, %v133_v23  ;;  %v150_v36 = vld [vmem:[%s875_s4 + $0x18] sm:$0xf]  ;;  %v71_v37 = vmax.bf16 %v55_v30, %v39_v29 }
  0x15   :  { %v276_v34 = vld [vmem:[%s879_s8 + $0x10] sm:$0xf]  ;;  %307 = vst.msk [vmem:[%s880_s9 + $0x8] sm:$0xf] %vm304_vm0, %v290_v26  ;;  %v228_v38 = vmax.bf16 %v212_v22, %v196_v27  ;;  %v213_v39 = vld [vmem:[%s877_s6 + $0x14] sm:$0xf]  ;;  %v134_v40 = vmax.bf16 %v118_v25, %v102_v28 }
  0x16   :  { %v182_v41 = vld [vmem:[%s876_s5 + $0x18] sm:$0xf]  ;;  %v119_v42 = vld [vmem:[%s874_s3 + $0x1c] sm:$0xf]  ;;  %v291_v43 = vmax.bf16 %v275_v17, %v259_v32  ;;  %v197_v44 = vmax.bf16 %v181_v24, %v165_v35  ;;  %v103_v45 = vmax.bf16 %v87_v31, %v71_v37  ;;  %v40_v46 = vld [vmem:[%s871_s0 + $0x20] sm:$0xf] }
  0x17   :  { %v56_v47 = vld [vmem:[%s872_s1 + $0x20] sm:$0xf]  ;;  %v260_v49 = vmax.bf16 %v244_v33, %v228_v38  ;;  %v245_v50 = vld [vmem:[%s878_s7 + $0x14] sm:$0xf]  ;;  %v166_v52 = vmax.bf16 %v150_v36, %v134_v40  ;;  %v151_v53 = vld [vmem:[%s875_s4 + $0x1c] sm:$0xf] }
  0x18   :  { %v88_v48 = vld [vmem:[%s873_s2 + $0x20] sm:$0xf]  ;;  %v277_v51 = vld [vmem:[%s879_s8 + $0x14] sm:$0xf]  ;;  %v72_v54 = vmax.bf16 %v56_v47, %v40_v46  ;;  %308 = vst.msk [vmem:[%s880_s9 + $0xc] sm:$0xf] %vm304_vm0, %v291_v43  ;;  %v229_v55 = vmax.bf16 %v213_v39, %v197_v44  ;;  %v135_v57 = vmax.bf16 %v119_v42, %v103_v45 }
  0x19   :  { %v214_v56 = vld [vmem:[%s877_s6 + $0x18] sm:$0xf]  ;;  %v183_v58 = vld [vmem:[%s876_s5 + $0x1c] sm:$0xf]  ;;  %v120_v59 = vld [vmem:[%s874_s3 + $0x20] sm:$0xf]  ;;  %v292_v60 = vmax.bf16 %v276_v34, %v260_v49  ;;  %v198_v61 = vmax.bf16 %v182_v41, %v166_v52 }
  0x1a   :  { %v104_v62 = vmax.bf16 %v88_v48, %v72_v54  ;;  %v41_v63 = vld [vmem:[%s871_s0 + $0x24] sm:$0xf]  ;;  %v261_v2 = vmax.bf16 %v245_v50, %v229_v55  ;;  %v246_v3 = vld [vmem:[%s878_s7 + $0x18] sm:$0xf]  ;;  %v167_v5 = vmax.bf16 %v151_v53, %v135_v57  ;;  %v152_v6 = vld [vmem:[%s875_s4 + $0x20] sm:$0xf] }
  0x1b   :  { %v57_v0 = vld [vmem:[%s872_s1 + $0x24] sm:$0xf]  ;;  %v278_v4 = vld [vmem:[%s879_s8 + $0x18] sm:$0xf]  ;;  %309 = vst.msk [vmem:[%s880_s9 + $0x10] sm:$0xf] %vm304_vm0, %v292_v60  ;;  %v230_v8 = vmax.bf16 %v214_v56, %v198_v61 }
  0x1c   :  { %v89_v1 = vld [vmem:[%s873_s2 + $0x24] sm:$0xf]  ;;  %v73_v7 = vmax.bf16 %v57_v0, %v41_v63  ;;  %v215_v9 = vld [vmem:[%s877_s6 + $0x1c] sm:$0xf]  ;;  %v136_v10 = vmax.bf16 %v120_v59, %v104_v62  ;;  %v184_v11 = vld [vmem:[%s876_s5 + $0x20] sm:$0xf]  ;;  %v293_v13 = vmax.bf16 %v277_v51, %v261_v2  ;;  %v199_v14 = vmax.bf16 %v183_v58, %v167_v5 }
  0x1d   :  { %v121_v12 = vld [vmem:[%s874_s3 + $0x24] sm:$0xf]  ;;  %v42_v16 = vld [vmem:[%s871_s0 + $0x28] sm:$0xf]  ;;  %v262_v19 = vmax.bf16 %v246_v3, %v230_v8  ;;  %v247_v20 = vld [vmem:[%s878_s7 + $0x1c] sm:$0xf] }
  0x1e   :  { %v105_v15 = vmax.bf16 %v89_v1, %v73_v7  ;;  %v58_v17 = vld [vmem:[%s872_s1 + $0x28] sm:$0xf]  ;;  %v279_v21 = vld [vmem:[%s879_s8 + $0x1c] sm:$0xf]  ;;  %v168_v22 = vmax.bf16 %v152_v6, %v136_v10  ;;  %v153_v23 = vld [vmem:[%s875_s4 + $0x24] sm:$0xf]  ;;  %v231_v25 = vmax.bf16 %v215_v9, %v199_v14 }
  0x1f   :  { %v90_v18 = vld [vmem:[%s873_s2 + $0x28] sm:$0xf]  ;;  %v74_v24 = vmax.bf16 %v58_v17, %v42_v16  ;;  %310 = vst.msk [vmem:[%s880_s9 + $0x14] sm:$0xf] %vm304_vm0, %v293_v13  ;;  %v216_v26 = vld [vmem:[%s877_s6 + $0x20] sm:$0xf]  ;;  %v294_v30 = vmax.bf16 %v278_v4, %v262_v19 }
  0x20   :  { %v137_v27 = vmax.bf16 %v121_v12, %v105_v15  ;;  %v185_v28 = vld [vmem:[%s876_s5 + $0x24] sm:$0xf]  ;;  %v122_v29 = vld [vmem:[%s874_s3 + $0x28] sm:$0xf]  ;;  %v200_v31 = vmax.bf16 %v184_v11, %v168_v22  ;;  %v43_v33 = vld [vmem:[%s871_s0 + $0x2c] sm:$0xf]  ;;  %v263_v36 = vmax.bf16 %v247_v20, %v231_v25 }
  0x21   :  { %v106_v32 = vmax.bf16 %v90_v18, %v74_v24  ;;  %v59_v34 = vld [vmem:[%s872_s1 + $0x2c] sm:$0xf]  ;;  %v248_v37 = vld [vmem:[%s878_s7 + $0x20] sm:$0xf]  ;;  %v154_v40 = vld [vmem:[%s875_s4 + $0x28] sm:$0xf] }
  0x22   :  { %v91_v35 = vld [vmem:[%s873_s2 + $0x2c] sm:$0xf]  ;;  %v280_v38 = vld [vmem:[%s879_s8 + $0x20] sm:$0xf]  ;;  %v169_v39 = vmax.bf16 %v153_v23, %v137_v27  ;;  %v75_v41 = vmax.bf16 %v59_v34, %v43_v33  ;;  %311 = vst.msk [vmem:[%s880_s9 + $0x18] sm:$0xf] %vm304_vm0, %v294_v30  ;;  %v232_v42 = vmax.bf16 %v216_v26, %v200_v31  ;;  %v295_v47 = vmax.bf16 %v279_v21, %v263_v36 }
  0x23   :  { %v217_v43 = vld [vmem:[%s877_s6 + $0x24] sm:$0xf]  ;;  %v138_v44 = vmax.bf16 %v122_v29, %v106_v32  ;;  %v186_v45 = vld [vmem:[%s876_s5 + $0x28] sm:$0xf]  ;;  %v123_v46 = vld [vmem:[%s874_s3 + $0x2c] sm:$0xf] }
  0x24   :  { %v201_v48 = vmax.bf16 %v185_v28, %v169_v39  ;;  %v107_v49 = vmax.bf16 %v91_v35, %v75_v41  ;;  %v44_v50 = vld [vmem:[%s871_s0 + $0x30] sm:$0xf]  ;;  %v264_v53 = vmax.bf16 %v248_v37, %v232_v42  ;;  %v249_v54 = vld [vmem:[%s878_s7 + $0x24] sm:$0xf]  ;;  %v155_v57 = vld [vmem:[%s875_s4 + $0x2c] sm:$0xf] }
  0x25   :  { %v60_v51 = vld [vmem:[%s872_s1 + $0x30] sm:$0xf]  ;;  %v281_v55 = vld [vmem:[%s879_s8 + $0x24] sm:$0xf]  ;;  %v170_v56 = vmax.bf16 %v154_v40, %v138_v44  ;;  %312 = vst.msk [vmem:[%s880_s9 + $0x1c] sm:$0xf] %vm304_vm0, %v295_v47 }
  0x26   :  { %v92_v52 = vld [vmem:[%s873_s2 + $0x30] sm:$0xf]  ;;  %v76_v58 = vmax.bf16 %v60_v51, %v44_v50  ;;  %v233_v59 = vmax.bf16 %v217_v43, %v201_v48  ;;  %v218_v60 = vld [vmem:[%s877_s6 + $0x28] sm:$0xf]  ;;  %v139_v61 = vmax.bf16 %v123_v46, %v107_v49  ;;  %v187_v62 = vld [vmem:[%s876_s5 + $0x2c] sm:$0xf]  ;;  %v296_v0 = vmax.bf16 %v280_v38, %v264_v53 }
  0x27   :  { %v124_v63 = vld [vmem:[%s874_s3 + $0x30] sm:$0xf]  ;;  %v202_v1 = vmax.bf16 %v186_v45, %v170_v56  ;;  %v45_v3 = vld [vmem:[%s871_s0 + $0x34] sm:$0xf]  ;;  %v250_v7 = vld [vmem:[%s878_s7 + $0x28] sm:$0xf] }
  0x28   :  { %v108_v2 = vmax.bf16 %v92_v52, %v76_v58  ;;  %v61_v4 = vld [vmem:[%s872_s1 + $0x34] sm:$0xf]  ;;  %v265_v6 = vmax.bf16 %v249_v54, %v233_v59  ;;  %v282_v8 = vld [vmem:[%s879_s8 + $0x28] sm:$0xf]  ;;  %v171_v9 = vmax.bf16 %v155_v57, %v139_v61  ;;  %v156_v10 = vld [vmem:[%s875_s4 + $0x30] sm:$0xf] }
  0x29   :  { %v93_v5 = vld [vmem:[%s873_s2 + $0x34] sm:$0xf]  ;;  %v77_v11 = vmax.bf16 %v61_v4, %v45_v3  ;;  %313 = vst.msk [vmem:[%s880_s9 + $0x20] sm:$0xf] %vm304_vm0, %v296_v0  ;;  %v234_v12 = vmax.bf16 %v218_v60, %v202_v1  ;;  %v219_v13 = vld [vmem:[%s877_s6 + $0x2c] sm:$0xf] }
  0x2a   :  { %v140_v14 = vmax.bf16 %v124_v63, %v108_v2  ;;  %v188_v15 = vld [vmem:[%s876_s5 + $0x30] sm:$0xf]  ;;  %v125_v16 = vld [vmem:[%s874_s3 + $0x34] sm:$0xf]  ;;  %v297_v17 = vmax.bf16 %v281_v55, %v265_v6  ;;  %v203_v18 = vmax.bf16 %v187_v62, %v171_v9  ;;  %v46_v20 = vld [vmem:[%s871_s0 + $0x38] sm:$0xf] }
  0x2b   :  { %v109_v19 = vmax.bf16 %v93_v5, %v77_v11  ;;  %v62_v21 = vld [vmem:[%s872_s1 + $0x38] sm:$0xf]  ;;  %v266_v23 = vmax.bf16 %v250_v7, %v234_v12  ;;  %v251_v24 = vld [vmem:[%s878_s7 + $0x2c] sm:$0xf]  ;;  %v157_v27 = vld [vmem:[%s875_s4 + $0x34] sm:$0xf] }
  0x2c   :  { %v94_v22 = vld [vmem:[%s873_s2 + $0x38] sm:$0xf]  ;;  %v283_v25 = vld [vmem:[%s879_s8 + $0x2c] sm:$0xf]  ;;  %v172_v26 = vmax.bf16 %v156_v10, %v140_v14  ;;  %v78_v28 = vmax.bf16 %v62_v21, %v46_v20  ;;  %314 = vst.msk [vmem:[%s880_s9 + $0x24] sm:$0xf] %vm304_vm0, %v297_v17  ;;  %v235_v29 = vmax.bf16 %v219_v13, %v203_v18 }
  0x2d   :  { %v220_v30 = vld [vmem:[%s877_s6 + $0x30] sm:$0xf]  ;;  %v141_v31 = vmax.bf16 %v125_v16, %v109_v19  ;;  %v189_v32 = vld [vmem:[%s876_s5 + $0x34] sm:$0xf]  ;;  %v126_v33 = vld [vmem:[%s874_s3 + $0x38] sm:$0xf]  ;;  %v298_v34 = vmax.bf16 %v282_v8, %v266_v23 }
  0x2e   :  { %v204_v35 = vmax.bf16 %v188_v15, %v172_v26  ;;  %v110_v36 = vmax.bf16 %v94_v22, %v78_v28  ;;  %v47_v37 = vld [vmem:[%s871_s0 + $0x3c] sm:$0xf]  ;;  %v267_v40 = vmax.bf16 %v251_v24, %v235_v29  ;;  %v252_v41 = vld [vmem:[%s878_s7 + $0x30] sm:$0xf]  ;;  %v158_v43 = vld [vmem:[%s875_s4 + $0x38] sm:$0xf] }
  0x2f   :  { %v63_v38 = vld [vmem:[%s872_s1 + $0x3c] sm:$0xf]  ;;  %v173_v42 = vmax.bf16 %v157_v27, %v141_v31  ;;  %315 = vst.msk [vmem:[%s880_s9 + $0x28] sm:$0xf] %vm304_vm0, %v298_v34  ;;  %v221_v46 = vld [vmem:[%s877_s6 + $0x34] sm:$0xf] }
  0x30   :  { %v95_v39 = vld [vmem:[%s873_s2 + $0x3c] sm:$0xf]  ;;  %v79_v44 = vmax.bf16 %v63_v38, %v47_v37  ;;  %v236_v45 = vmax.bf16 %v220_v30, %v204_v35  ;;  %v142_v47 = vmax.bf16 %v126_v33, %v110_v36  ;;  %v299_v49 = vmax.bf16 %v283_v25, %v267_v40  ;;  %v284_v50 = vld [vmem:[%s879_s8 + $0x30] sm:$0xf]  ;;  %v190_v52 = vld [vmem:[%s876_s5 + $0x38] sm:$0xf] }
  0x31   :  { %v127_v48 = vld [vmem:[%s874_s3 + $0x3c] sm:$0xf]  ;;  %v205_v51 = vmax.bf16 %v189_v32, %v173_v42  ;;  %v253_v55 = vld [vmem:[%s878_s7 + $0x34] sm:$0xf]  ;;  %v222_v59 = vld [vmem:[%s877_s6 + $0x38] sm:$0xf] }
  0x32   :  { %v111_v53 = vmax.bf16 %v95_v39, %v79_v44  ;;  %v268_v54 = vmax.bf16 %v252_v41, %v236_v45  ;;  %v174_v56 = vmax.bf16 %v158_v43, %v142_v47  ;;  %v159_v57 = vld [vmem:[%s875_s4 + $0x3c] sm:$0xf]  ;;  %316 = vst.msk [vmem:[%s880_s9 + $0x2c] sm:$0xf] %vm304_vm0, %v299_v49  ;;  %v285_v62 = vld [vmem:[%s879_s8 + $0x34] sm:$0xf] }
  0x33   :  { %v237_v58 = vmax.bf16 %v221_v46, %v205_v51  ;;  %v191_v0 = vld [vmem:[%s876_s5 + $0x3c] sm:$0xf]  ;;  %v254_v2 = vld [vmem:[%s878_s7 + $0x38] sm:$0xf] }
  0x34   :  { %v143_v60 = vmax.bf16 %v127_v48, %v111_v53  ;;  %v300_v61 = vmax.bf16 %v284_v50, %v268_v54  ;;  %v206_v63 = vmax.bf16 %v190_v52, %v174_v56  ;;  %v223_v5 = vld [vmem:[%s877_s6 + $0x3c] sm:$0xf]  ;;  %v286_v7 = vld [vmem:[%s879_s8 + $0x38] sm:$0xf] }
  0x35   :  { %v269_v1 = vmax.bf16 %v253_v55, %v237_v58  ;;  %v255_v10 = vld [vmem:[%s878_s7 + $0x3c] sm:$0xf] }
  0x36   :  { %v175_v3 = vmax.bf16 %v159_v57, %v143_v60  ;;  %317 = vst.msk [vmem:[%s880_s9 + $0x30] sm:$0xf] %vm304_vm0, %v300_v61  ;;  %v238_v4 = vmax.bf16 %v222_v59, %v206_v63  ;;  %v287_v13 = vld [vmem:[%s879_s8 + $0x3c] sm:$0xf] }
  0x37   :  { %v301_v6 = vmax.bf16 %v285_v62, %v269_v1 }
  0x38   :  { %v207_v8 = vmax.bf16 %v191_v0, %v175_v3  ;;  %v270_v9 = vmax.bf16 %v254_v2, %v238_v4 }
  0x39   :  { %318 = vst.msk [vmem:[%s880_s9 + $0x34] sm:$0xf] %vm304_vm0, %v301_v6 }
  0x3a   :  { %v239_v11 = vmax.bf16 %v223_v5, %v207_v8  ;;  %v302_v12 = vmax.bf16 %v286_v7, %v270_v9 }
  0x3c   :  { %v271_v14 = vmax.bf16 %v255_v10, %v239_v11  ;;  %319 = vst.msk [vmem:[%s880_s9 + $0x38] sm:$0xf] %vm304_vm0, %v302_v12 }
  0x3e   :  { %v303_v15 = vmax.bf16 %v287_v13, %v271_v14 }
  0x40   :  { %320 = vst.msk [vmem:[%s880_s9 + $0x3c] sm:$0xf] %vm304_vm0, %v303_v15 }

// kernel: encoder_forward.26
= control target key start
LH: loop header
LB: loop body
LE: loop exit
PB: predicated region body
PF: predicated region fallthrough
CT: control target
= control target key end

     0   :  { %s1231_s15 = smov 0   ;;  %s1233_s16 = smov 0   ;;  %s1474_s0 = inlined_call_operand.vmem [shape: bf16[128,640], index: 0, kind: input, shape index: {}]   ;;  %s1475_s1 = inlined_call_operand.vmem [shape: bf16[640,64], index: 1, kind: input, shape index: {}]   ;;  %s1476_s2 = inlined_call_operand.vmem [shape: f32[1,64], index: 2, kind: input, shape index: {}]   ;;  %s1477_s3 = inlined_call_operand.vmem [shape: f32[1,64], index: 3, kind: input, shape index: {}]   ;;  %s1478_s4 = inlined_call_operand.vmem [shape: bf16[128,64], index: 4, kind: output, shape index: {}]  }
   0x1   :  { %s1235_s17 = smov 0   ;;  %s1237_s18 = smov 0  }
   0x2   :  { %s1239_s19 = smov 0  }
   0x3 LB: > { %s26_s20 = sadd.s32 1, %s1199_s18  ;;  %p49_p1 = scmp.ne.s32.totalorder %s1191_s16, %s1187_s15  ;;  %s1203_s19 = sphi %s1239_s19, %s14_s19   ;;  %s1199_s18 = sphi %s1237_s18, %s1482_s18   ;;  %s1195_s17 = sphi %s1235_s17, %s1481_s17   ;;  %s1191_s16 = sphi %s1233_s16, %s1480_s16   ;;  %s1187_s15 = sphi %s1231_s15, %s1479_s15  }
   0x4   : > { %p27_p0 = scmp.ge.s32.totalorder %s26_s20, 5  ;;  %p50_p2 = scmp.eq.s32.totalorder %s1203_s19, 0 }
   0x5   : > { %s42_s22 = sadd.s32 1, %s1191_s16  ;;  %p981_p5 = scmp.ge.s32.totalorder %s1203_s19, 5 }
   0x6   : > { %s1484_s20 = smov (%p27_p0, %s26_s20), 0  ;;  %p51_p3 = por %p50_p2, %p49_p1 }
   0x7   : > { %s38_s21 = ssub.s32 %s1199_s18, %s1484_s20  ;;  %195 = sbr.rel (%p981_p5) target bundleno = 26 (0x1a), region = 24 }
   0x8   : > { %p40_p4 = scmp.eq.s32.totalorder %s38_s21, 0 }
   0xa   : > { %s1266_s23 = scalar_select %p40_p4, %s1191_s16, %s42_s22  }
   0xc   : > { %198 = sbr.rel (!%p51_p3) target bundleno = 26 (0x1a), region = 28  ;;  %s200_s24 = sand.u32 (%p51_p3), 1, %s1191_s16  }
   0xd   : > { %s983_s25 = sshll.u32 (%p51_p3), %s1199_s18, 2  ;;  %s982_s26 = sshll.u32 (%p51_p3), %s200_s24, 6 }
   0xe   : > { %s1274_s29 = scalar_lea.vmem (%p51_p3), %s1474_s0, %s983_s25  ;;  %s202_s30 = scalar_lea.vmem (%p51_p3), [#allocation3], %s982_s26 }
   0xf   : > { %v224_v0 = vld [vmem:[%s1274_s29] sm:$0xf] (%p51_p3)  ;;  %v226_v1 = vld [vmem:[%s1274_s29 + $0x14] sm:$0xf] (%p51_p3)  ;;  %v228_v2 = vld [vmem:[%s1274_s29 + $0x28] sm:$0xf] (%p51_p3) }
  0x10   : > { %225 = vst [vmem:[%s202_s30] sm:$0xf] (%p51_p3), %v224_v0  ;;  %227 = vst [vmem:[%s202_s30 + $0x4] sm:$0xf] (%p51_p3), %v226_v1  ;;  %v230_v3 = vld [vmem:[%s1274_s29 + $0x3c] sm:$0xf] (%p51_p3) }
  0x11   : > { %v232_v4 = vld [vmem:[%s1274_s29 + $0x50] sm:$0xf]  ;;  %229 = vst [vmem:[%s202_s30 + $0x8] sm:$0xf] %v228_v2  ;;  %231 = vst [vmem:[%s202_s30 + $0xc] sm:$0xf] %v230_v3 }
  0x12   : > { %233 = vst [vmem:[%s202_s30 + $0x10] sm:$0xf] %v232_v4  ;;  %v234_v5 = vld [vmem:[%s1274_s29 + $0x64] sm:$0xf]  ;;  %v236_v6 = vld [vmem:[%s1274_s29 + $0x78] sm:$0xf] }
  0x13   : > { %v238_v7 = vld [vmem:[%s1274_s29 + $0x8c] sm:$0xf]  ;;  %235 = vst [vmem:[%s202_s30 + $0x14] sm:$0xf] %v234_v5  ;;  %237 = vst [vmem:[%s202_s30 + $0x18] sm:$0xf] %v236_v6 }
  0x14   : > { %239 = vst [vmem:[%s202_s30 + $0x1c] sm:$0xf] %v238_v7  ;;  %v240_v8 = vld [vmem:[%s1274_s29 + $0xa0] sm:$0xf]  ;;  %v242_v9 = vld [vmem:[%s1274_s29 + $0xb4] sm:$0xf] }
  0x15   : > { %v244_v10 = vld [vmem:[%s1274_s29 + $0xc8] sm:$0xf]  ;;  %241 = vst [vmem:[%s202_s30 + $0x20] sm:$0xf] %v240_v8  ;;  %243 = vst [vmem:[%s202_s30 + $0x24] sm:$0xf] %v242_v9 }
  0x16   : > { %245 = vst [vmem:[%s202_s30 + $0x28] sm:$0xf] %v244_v10  ;;  %v246_v11 = vld [vmem:[%s1274_s29 + $0xdc] sm:$0xf]  ;;  %v248_v12 = vld [vmem:[%s1274_s29 + $0xf0] sm:$0xf] }
  0x17   : > { %v250_v13 = vld [vmem:[%s1274_s29 + $0x104] sm:$0xf]  ;;  %247 = vst [vmem:[%s202_s30 + $0x2c] sm:$0xf] %v246_v11  ;;  %249 = vst [vmem:[%s202_s30 + $0x30] sm:$0xf] %v248_v12 }
  0x18   : > { %251 = vst [vmem:[%s202_s30 + $0x34] sm:$0xf] %v250_v13  ;;  %v252_v14 = vld [vmem:[%s1274_s29 + $0x118] sm:$0xf]  ;;  %v254_v15 = vld [vmem:[%s1274_s29 + $0x12c] sm:$0xf] }
  0x19   : > { %253 = vst [vmem:[%s202_s30 + $0x38] sm:$0xf] %v252_v14  ;;  %255 = vst [vmem:[%s202_s30 + $0x3c] sm:$0xf] %v254_v15 }
  0x1a PF: > { %p984_p6 = scmp.ge.s32.totalorder %s1203_s19, 1  ;;  %p322_p7 = scmp.lt.s32.totalorder %s1203_s19, 6 }
  0x1c   : > { %p323_p8 = pnand %p984_p6, %p322_p7 }
  0x1d   : > { %s329_s5 = sand.u32 (!%p323_p8), 1, %s1187_s15   ;;  %s986_s6 = sshll.u32 (!%p323_p8), %s1195_s17, 4 }
  0x1e   : > { %326 = sbr.rel (%p323_p8) target bundleno = 314 (0x13a), region = 73  ;;  %s985_s7 = sshll.u32 (!%p323_p8), %s329_s5, 6 }
  0x1f   : > { %p373_p9 = scmp.lt.s32.totalorder (!%p323_p8), %s986_s6, 79  ;;  %s1301_s12 = scalar_lea.vmem (!%p323_p8), [#allocation3], %s985_s7 }
  0x20   : > { %p988_p10 = scmp.ne.s32.totalorder (!%p323_p8), %s1195_s17, 0 }
  0x23   : > { %s1486_s6 = smov (!%p373_p9, %s986_s6), 79  ;;  %400 = sbr.rel (%p988_p10) target bundleno = 49 (0x31), region = 81 }
  0x24   : > { %s987_s8 = sshll.u32 %s1486_s6, 2 }
  0x25   : > { %s1299_s11 = scalar_lea.vmem %s1475_s1, %s987_s8 }
  0x28   : > { %vm401_vm0 = vcmask 523264   ;;  %v1205_v16 = vmov 0.0  }
  0x29   : > { %402 = vst.msk [vmem:[#allocation2] sm:$0xff] %vm401_vm0, %v1205_v16  ;;  %403 = vst.msk [vmem:[#allocation2 + $0x8] sm:$0xff] %vm401_vm0, %v1205_v16 }
  0x2a   : > { %404 = vst.msk [vmem:[#allocation2 + $0x10] sm:$0xff] %vm401_vm0, %v1205_v16  ;;  %405 = vst.msk [vmem:[#allocation2 + $0x18] sm:$0xff] %vm401_vm0, %v1205_v16 }
  0x2b   : > { %406 = vst.msk [vmem:[#allocation2 + $0x20] sm:$0xff] %vm401_vm0, %v1205_v16  ;;  %407 = vst.msk [vmem:[#allocation2 + $0x28] sm:$0xff] %vm401_vm0, %v1205_v16 }
  0x2c   : > { %408 = vst.msk [vmem:[#allocation2 + $0x30] sm:$0xff] %vm401_vm0, %v1205_v16  ;;  %409 = vst.msk [vmem:[#allocation2 + $0x38] sm:$0xff] %vm401_vm0, %v1205_v16 }
  0x2d   : > { %410 = vst.msk [vmem:[#allocation2 + $0x40] sm:$0xff] %vm401_vm0, %v1205_v16  ;;  %411 = vst.msk [vmem:[#allocation2 + $0x48] sm:$0xff] %vm401_vm0, %v1205_v16 }
  0x2e   : > { %412 = vst.msk [vmem:[#allocation2 + $0x50] sm:$0xff] %vm401_vm0, %v1205_v16  ;;  %413 = vst.msk [vmem:[#allocation2 + $0x58] sm:$0xff] %vm401_vm0, %v1205_v16 }
  0x2f   : > { %414 = vst.msk [vmem:[#allocation2 + $0x60] sm:$0xff] %vm401_vm0, %v1205_v16  ;;  %415 = vst.msk [vmem:[#allocation2 + $0x68] sm:$0xff] %vm401_vm0, %v1205_v16 }
  0x30   : > { %416 = vst.msk [vmem:[#allocation2 + $0x70] sm:$0xff] %vm401_vm0, %v1205_v16  ;;  %417 = vst.msk [vmem:[#allocation2 + $0x78] sm:$0xff] %vm401_vm0, %v1205_v16 }
  0x31 PF: > { %v1149_v17 = vld [vmem:[%s1299_s11 + $0x38] sm:$0xff]   ;;  %v1150_v18 = vld [vmem:[%s1299_s11 + $0x30] sm:$0xff]   ;;  %v1151_v19 = vld [vmem:[%s1299_s11 + $0x28] sm:$0xff]   ;;  %vm675_vm1 = vcmask 523264   ;;  %p1005_p11 = scmp.ne.s32.totalorder %s1195_s17, 4 }
  0x32   : > { %1060 = vmatprep.subr.bf16.mxu0 %v1149_v17  ;;  %1092 = vmatprep.subr.bf16.mxu1 %v1149_v17  ;;  %v1152_v20 = vld [vmem:[%s1299_s11 + $0x20] sm:$0xff]   ;;  %v1153_v23 = vld [vmem:[%s1299_s11 + $0x18] sm:$0xff]   ;;  %v1154_v24 = vld [vmem:[%s1299_s11 + $0x10] sm:$0xff]  }
  0x33   : > { %1061 = vmatpush3.bf16.msra.mxu0 %v1149_v17  ;;  %1100 = vmatpush3.bf16.msra.mxu1 %v1149_v17  ;;  %v1157_v21 = vld [vmem:[%s1301_s12] sm:$0xff]   ;;  %v1155_v25 = vld [vmem:[%s1299_s11 + $0x8] sm:$0xff]   ;;  %v1161_v29 = vld [vmem:[%s1301_s12 + $0x10] sm:$0xff]  }
  0x34   : > { %1062 = vmatprep.subr.bf16.mxu0 %v1150_v18  ;;  %1093 = vmatprep.subr.bf16.mxu1 %v1150_v18  ;;  %v1158_v22 = vld [vmem:[%s1301_s12 + $0x20] sm:$0xff]   ;;  %v1159_v27 = vld [vmem:[%s1301_s12 + $0x8] sm:$0xff]   ;;  %v1162_v30 = vld [vmem:[%s1301_s12 + $0x30] sm:$0xff]  }
  0x35   : > { %1076 = vmatprep.mubr.bf16.mxu0 %v1157_v21  ;;  %1084 = vmatprep.mubr.bf16.mxu1 %v1158_v22  ;;  %v1156_v26 = vld [vmem:[%s1299_s11] sm:$0xff]   ;;  %v1160_v28 = vld [vmem:[%s1301_s12 + $0x28] sm:$0xff]   ;;  %v1163_v31 = vld [vmem:[%s1301_s12 + $0x18] sm:$0xff]  }
  0x36   : > { %v1164_v32 = vld [vmem:[%s1301_s12 + $0x38] sm:$0xff]   ;;  %v420_v33 = vld [vmem:[#allocation2 + $0x10] sm:$0xff]  ;;  %v418_v37 = vld [vmem:[#allocation2] sm:$0xff] }
  0x37   : > { %1063 = vmatpush3.bf16.msra.mxu0 %v1150_v18  ;;  %1101 = vmatpush3.bf16.msra.mxu1 %v1150_v18  ;;  %v428_v34 = vld [vmem:[#allocation2 + $0x50] sm:$0xff]  ;;  %v426_v38 = vld [vmem:[#allocation2 + $0x40] sm:$0xff]  ;;  %v421_v43 = vld [vmem:[#allocation2 + $0x18] sm:$0xff] }
  0x38   : > { %1064 = vmatprep.subr.bf16.mxu0 %v1151_v19  ;;  %1094 = vmatprep.subr.bf16.mxu1 %v1151_v19  ;;  %v429_v44 = vld [vmem:[#allocation2 + $0x58] sm:$0xff]  ;;  %v419_v49 = vld [vmem:[#allocation2 + $0x8] sm:$0xff]  ;;  %v424_v55 = vld [vmem:[#allocation2 + $0x30] sm:$0xff] }
  0x39   : > { %v427_v50 = vld [vmem:[#allocation2 + $0x48] sm:$0xff]  ;;  %v432_v56 = vld [vmem:[#allocation2 + $0x70] sm:$0xff]  ;;  %v422_v61 = vld [vmem:[#allocation2 + $0x20] sm:$0xff] }
  0x3a   : > { %v430_v62 = vld [vmem:[#allocation2 + $0x60] sm:$0xff]  ;;  %v425_v3 = vld [vmem:[#allocation2 + $0x38] sm:$0xff]  ;;  %v423_v9 = vld [vmem:[#allocation2 + $0x28] sm:$0xff] }
  0x3b   : > { %1065 = vmatpush3.bf16.msra.mxu0 %v1151_v19  ;;  %1102 = vmatpush3.bf16.msra.mxu1 %v1151_v19  ;;  %v433_v4 = vld [vmem:[#allocation2 + $0x78] sm:$0xff]  ;;  %v431_v10 = vld [vmem:[#allocation2 + $0x68] sm:$0xff] }
  0x3c   : > { %1066 = vmatprep.subr.bf16.mxu0 %v1152_v20  ;;  %1095 = vmatprep.subr.bf16.mxu1 %v1152_v20 }
  0x3f   : > { %1067 = vmatpush3.bf16.msra.mxu0 %v1152_v20  ;;  %1103 = vmatpush3.bf16.msra.mxu1 %v1152_v20 }
  0x40   : > { %1068 = vmatprep.subr.bf16.mxu0 %v1153_v23  ;;  %1096 = vmatprep.subr.bf16.mxu1 %v1153_v23 }
  0x43   : > { %1069 = vmatpush3.bf16.msra.mxu0 %v1153_v23  ;;  %1104 = vmatpush3.bf16.msra.mxu1 %v1153_v23 }
  0x44   : > { %1070 = vmatprep.subr.bf16.mxu0 %v1154_v24  ;;  %1097 = vmatprep.subr.bf16.mxu1 %v1154_v24 }
  0x47   : > { %1071 = vmatpush3.bf16.msra.mxu0 %v1154_v24  ;;  %1105 = vmatpush3.bf16.msra.mxu1 %v1154_v24 }
  0x48   : > { %1072 = vmatprep.subr.bf16.mxu0 %v1155_v25  ;;  %1098 = vmatprep.subr.bf16.mxu1 %v1155_v25 }
  0x4b   : > { %1073 = vmatpush3.bf16.msra.mxu0 %v1155_v25  ;;  %1106 = vmatpush3.bf16.msra.mxu1 %v1155_v25 }
  0x4c   : > { %1074 = vmatprep.subr.bf16.mxu0 %v1156_v26  ;;  %1099 = vmatprep.subr.bf16.mxu1 %v1156_v26 }
  0x4f   : > { %1075 = vmatpush3.bf16.msra.mxu0 %v1156_v26  ;;  %1107 = vmatpush3.bf16.msra.mxu1 %v1156_v26 }
  0x52   : > { %1077 = vmatmul.mubr.bf16.vlgmr.msra.gmra.mxu0 %v1159_v27  ;;  %1085 = vmatmul.mubr.bf16.vlgmr.msra.gmra.mxu1 %v1160_v28 }
  0x53   : > { %1080 = vmatprep.mubr.bf16.mxu0 %v1161_v29  ;;  %1088 = vmatprep.mubr.bf16.mxu1 %v1162_v30 }
  0x5a   : > { %1081 = vmatmul.mubr.bf16.gmra.mxu0 %v1163_v31  ;;  %1089 = vmatmul.mubr.bf16.gmra.mxu1 %v1164_v32 }
 0x112   : > { %v1078_v35 = vpop.f32.mrf.mxu0  ;;  %v1086_v36 = vpop.f32.mrf.mxu1 }
 0x113   : > { %v661_v39 = vadd.f32 %v1078_v35, %v420_v33  ;;  %v669_v40 = vadd.f32 %v1086_v36, %v428_v34 }
 0x114   : > { %v596_v41 = vpop.f32.mrf.mxu0  ;;  %v628_v42 = vpop.f32.mrf.mxu1 }
 0x115   : > { %678 = vst.msk [vmem:[#allocation2 + $0x10] sm:$0xff] %vm675_vm1, %v661_v39  ;;  %686 = vst.msk [vmem:[#allocation2 + $0x50] sm:$0xff] %vm675_vm1, %v669_v40  ;;  %v659_v45 = vadd.f32 %v596_v41, %v418_v37  ;;  %v667_v46 = vadd.f32 %v628_v42, %v426_v38 }
 0x116   : > { %v1079_v47 = vpop.f32.mrf.mxu0  ;;  %v1087_v48 = vpop.f32.mrf.mxu1 }
 0x117   : > { %676 = vst.msk [vmem:[#allocation2] sm:$0xff] %vm675_vm1, %v659_v45  ;;  %684 = vst.msk [vmem:[#allocation2 + $0x40] sm:$0xff] %vm675_vm1, %v667_v46  ;;  %v662_v51 = vadd.f32 %v1079_v47, %v421_v43  ;;  %v670_v52 = vadd.f32 %v1087_v48, %v429_v44 }
 0x118   : > { %v599_v53 = vpop.f32.mrf.mxu0  ;;  %v631_v54 = vpop.f32.mrf.mxu1 }
 0x119   : > { %679 = vst.msk [vmem:[#allocation2 + $0x18] sm:$0xff] %vm675_vm1, %v662_v51  ;;  %687 = vst.msk [vmem:[#allocation2 + $0x58] sm:$0xff] %vm675_vm1, %v670_v52  ;;  %v660_v57 = vadd.f32 %v599_v53, %v419_v49  ;;  %v668_v58 = vadd.f32 %v631_v54, %v427_v50 }
 0x11a   : > { %v1082_v59 = vpop.f32.mrf.mxu0  ;;  %v1090_v60 = vpop.f32.mrf.mxu1 }
 0x11b   : > { %677 = vst.msk [vmem:[#allocation2 + $0x8] sm:$0xff] %vm675_vm1, %v660_v57  ;;  %685 = vst.msk [vmem:[#allocation2 + $0x48] sm:$0xff] %vm675_vm1, %v668_v58  ;;  %v665_v63 = vadd.f32 %v1082_v59, %v424_v55  ;;  %v673_v0 = vadd.f32 %v1090_v60, %v432_v56 }
 0x11c   : > { %v612_v1 = vpop.f32.mrf.mxu0  ;;  %v644_v2 = vpop.f32.mrf.mxu1 }
 0x11d   : > { %682 = vst.msk [vmem:[#allocation2 + $0x30] sm:$0xff] %vm675_vm1, %v665_v63  ;;  %690 = vst.msk [vmem:[#allocation2 + $0x70] sm:$0xff] %vm675_vm1, %v673_v0  ;;  %v663_v5 = vadd.f32 %v612_v1, %v422_v61  ;;  %v671_v6 = vadd.f32 %v644_v2, %v430_v62 }
 0x11e   : > { %v1083_v7 = vpop.f32.mrf.mxu0  ;;  %v1091_v8 = vpop.f32.mrf.mxu1 }
 0x11f   : > { %680 = vst.msk [vmem:[#allocation2 + $0x20] sm:$0xff] %vm675_vm1, %v663_v5  ;;  %688 = vst.msk [vmem:[#allocation2 + $0x60] sm:$0xff] %vm675_vm1, %v671_v6  ;;  %v666_v11 = vadd.f32 %v1083_v7, %v425_v3  ;;  %v674_v12 = vadd.f32 %v1091_v8, %v433_v4  ;;  %695 = sbr.rel (%p1005_p11) target bundleno = 314 (0x13a), region = 85 }
 0x120   : > { %v615_v13 = vpop.f32.mrf.mxu0  ;;  %v647_v14 = vpop.f32.mrf.mxu1 }
 0x121   : > { %683 = vst.msk [vmem:[#allocation2 + $0x38] sm:$0xff] %vm675_vm1, %v666_v11  ;;  %691 = vst.msk [vmem:[#allocation2 + $0x78] sm:$0xff] %vm675_vm1, %v674_v12  ;;  %v664_v15 = vadd.f32 %v615_v13, %v423_v9  ;;  %v672_v16 = vadd.f32 %v647_v14, %v431_v10 }
 0x123   : > { %681 = vst.msk [vmem:[#allocation2 + $0x28] sm:$0xff] %vm675_vm1, %v664_v15  ;;  %689 = vst.msk [vmem:[#allocation2 + $0x68] sm:$0xff] %vm675_vm1, %v672_v16 }
 0x124   : > { %v696_v17 = vld [vmem:[#allocation2] sm:$0xff]  ;;  %v697_v21 = vld [vmem:[#allocation2 + $0x8] sm:$0xff]  ;;  %v698_v22 = vld [vmem:[#allocation2 + $0x10] sm:$0xff]  ;;  %vm838_vm2 = vcmask 519168  }
 0x125   : > { %v1356_v18 = vld [vmem:[%s1476_s2] ss:$0 sm:$0xff]  ;;  %v699_v23 = vld [vmem:[#allocation2 + $0x18] sm:$0xff]  ;;  %v702_v29 = vld [vmem:[#allocation2 + $0x30] sm:$0xff] }
 0x126   : > { %v1361_v19 = vld [vmem:[%s1477_s3] ss:$0 sm:$0xff]  ;;  %v719_v20 = vmul.f32 %v1356_v18, %v696_v17  ;;  %v720_v24 = vmul.f32 %v1356_v18, %v697_v21  ;;  %v721_v25 = vmul.f32 %v1356_v18, %v698_v22  ;;  %v722_v26 = vmul.f32 %v1356_v18, %v699_v23  ;;  %v705_v52 = vld [vmem:[#allocation2 + $0x48] sm:$0xff]  ;;  %v706_v53 = vld [vmem:[#allocation2 + $0x50] sm:$0xff] }
 0x127   : > { %v700_v27 = vld [vmem:[#allocation2 + $0x20] sm:$0xff]  ;;  %v725_v33 = vmul.f32 %v1356_v18, %v702_v29  ;;  %v707_v54 = vld [vmem:[#allocation2 + $0x58] sm:$0xff]  ;;  %v710_v61 = vld [vmem:[#allocation2 + $0x70] sm:$0xff]  ;;  %v728_v4 = vmul.f32 %v1356_v18, %v705_v52  ;;  %v729_v5 = vmul.f32 %v1356_v18, %v706_v53 }
 0x128   : > { %v742_v30 = vadd.f32 %v1361_v19, %v719_v20  ;;  %v723_v31 = vmul.f32 %v1356_v18, %v700_v27  ;;  %v703_v34 = vld [vmem:[#allocation2 + $0x38] sm:$0xff]  ;;  %v743_v35 = vadd.f32 %v1361_v19, %v720_v24  ;;  %v744_v36 = vadd.f32 %v1361_v19, %v721_v25  ;;  %v704_v47 = vld [vmem:[#allocation2 + $0x40] sm:$0xff] }
 0x129   : > { %v745_v37 = vadd.f32 %v1361_v19, %v722_v26  ;;  %v726_v38 = vmul.f32 %v1356_v18, %v703_v34  ;;  %v748_v42 = vadd.f32 %v1361_v19, %v725_v33  ;;  %v708_v59 = vld [vmem:[#allocation2 + $0x60] sm:$0xff]  ;;  %v727_v1 = vmul.f32 %v1356_v18, %v704_v47  ;;  %v711_v2 = vld [vmem:[#allocation2 + $0x78] sm:$0xff] }
 0x12a   : > { %v701_v28 = vld [vmem:[#allocation2 + $0x28] sm:$0xff]  ;;  %v758_v39 = vmax.f32 %v742_v30, 0.0  ;;  %v746_v40 = vadd.f32 %v1361_v19, %v723_v31  ;;  %v759_v43 = vmax.f32 %v743_v35, 0.0  ;;  %v760_v44 = vmax.f32 %v744_v36, 0.0 }
 0x12b   : > { %v724_v32 = vmul.f32 %v1356_v18, %v701_v28  ;;  %v761_v45 = vmax.f32 %v745_v37, 0.0  ;;  %v749_v46 = vadd.f32 %v1361_v19, %v726_v38  ;;  %v764_v51 = vmax.f32 %v748_v42, 0.0  ;;  %v709_v60 = vld [vmem:[#allocation2 + $0x68] sm:$0xff] }
 0x12c   : > { %v1028_v48 = vpack.c.bf16 %v758_v39, %v758_v39  ;;  %v762_v49 = vmax.f32 %v746_v40, 0.0  ;;  %v1029_v55 = vpack.c.bf16 %v759_v43, %v759_v43  ;;  %v1030_v56 = vpack.c.bf16 %v760_v44, %v760_v44 }
 0x12d   : > { %v747_v41 = vadd.f32 %v1361_v19, %v724_v32  ;;  %v1031_v57 = vpack.c.bf16 %v761_v45, %v761_v45  ;;  %v765_v58 = vmax.f32 %v749_v46, 0.0  ;;  %v1034_v0 = vpack.c.bf16 %v764_v51, %v764_v51 }
 0x12e   : > { %839 = vst.msk [vmem:[%s1478_s4] sm:$0xf] %vm838_vm2, %v1028_v48  ;;  %v1032_v62 = vpack.c.bf16 %v762_v49, %v762_v49  ;;  %840 = vst.msk [vmem:[%s1478_s4 + $0x4] sm:$0xf] %vm838_vm2, %v1029_v55  ;;  %v730_v6 = vmul.f32 %v1356_v18, %v707_v54  ;;  %v750_v7 = vadd.f32 %v1361_v19, %v727_v1 }
 0x12f   : > { %v763_v50 = vmax.f32 %v747_v41, 0.0  ;;  %841 = vst.msk [vmem:[%s1478_s4 + $0x8] sm:$0xf] %vm838_vm2, %v1030_v56  ;;  %842 = vst.msk [vmem:[%s1478_s4 + $0xc] sm:$0xf] %vm838_vm2, %v1031_v57  ;;  %v1035_v3 = vpack.c.bf16 %v765_v58, %v765_v58  ;;  %v731_v8 = vmul.f32 %v1356_v18, %v708_v59  ;;  %v732_v9 = vmul.f32 %v1356_v18, %v709_v60 }
 0x130   : > { %843 = vst.msk [vmem:[%s1478_s4 + $0x10] sm:$0xf] %vm838_vm2, %v1032_v62  ;;  %845 = vst.msk [vmem:[%s1478_s4 + $0x18] sm:$0xf] %vm838_vm2, %v1034_v0  ;;  %v733_v10 = vmul.f32 %v1356_v18, %v710_v61  ;;  %v751_v11 = vadd.f32 %v1361_v19, %v728_v4  ;;  %v752_v12 = vadd.f32 %v1361_v19, %v729_v5  ;;  %v766_v15 = vmax.f32 %v750_v7, 0.0 }
 0x131   : > { %v1033_v63 = vpack.c.bf16 %v763_v50, %v763_v50  ;;  %846 = vst.msk [vmem:[%s1478_s4 + $0x1c] sm:$0xf] %vm838_vm2, %v1035_v3  ;;  %v753_v13 = vadd.f32 %v1361_v19, %v730_v6  ;;  %v734_v14 = vmul.f32 %v1356_v18, %v711_v2  ;;  %v754_v16 = vadd.f32 %v1361_v19, %v731_v8 }
 0x132   : > { %v755_v17 = vadd.f32 %v1361_v19, %v732_v9  ;;  %v756_v20 = vadd.f32 %v1361_v19, %v733_v10  ;;  %v767_v21 = vmax.f32 %v751_v11, 0.0  ;;  %v768_v22 = vmax.f32 %v752_v12, 0.0 }
 0x133   : > { %844 = vst.msk [vmem:[%s1478_s4 + $0x14] sm:$0xf] %vm838_vm2, %v1033_v63  ;;  %v769_v23 = vmax.f32 %v753_v13, 0.0  ;;  %v757_v24 = vadd.f32 %v1361_v19, %v734_v14  ;;  %v1036_v25 = vpack.c.bf16 %v766_v15, %v766_v15  ;;  %v770_v26 = vmax.f32 %v754_v16, 0.0 }
 0x134   : > { %v771_v27 = vmax.f32 %v755_v17, 0.0  ;;  %v772_v28 = vmax.f32 %v756_v20, 0.0  ;;  %v1037_v29 = vpack.c.bf16 %v767_v21, %v767_v21  ;;  %v1038_v30 = vpack.c.bf16 %v768_v22, %v768_v22 }
 0x135   : > { %v1039_v31 = vpack.c.bf16 %v769_v23, %v769_v23  ;;  %v773_v18 = vmax.f32 %v757_v24, 0.0  ;;  %847 = vst.msk [vmem:[%s1478_s4 + $0x20] sm:$0xf] %vm838_vm2, %v1036_v25  ;;  %v1040_v32 = vpack.c.bf16 %v770_v26, %v770_v26 }
 0x136   : > { %v1041_v33 = vpack.c.bf16 %v771_v27, %v771_v27  ;;  %v1042_v34 = vpack.c.bf16 %v772_v28, %v772_v28  ;;  %848 = vst.msk [vmem:[%s1478_s4 + $0x24] sm:$0xf] %vm838_vm2, %v1037_v29  ;;  %849 = vst.msk [vmem:[%s1478_s4 + $0x28] sm:$0xf] %vm838_vm2, %v1038_v30 }
 0x137   : > { %850 = vst.msk [vmem:[%s1478_s4 + $0x2c] sm:$0xf] %vm838_vm2, %v1039_v31  ;;  %v1043_v19 = vpack.c.bf16 %v773_v18, %v773_v18  ;;  %851 = vst.msk [vmem:[%s1478_s4 + $0x30] sm:$0xf] %vm838_vm2, %v1040_v32 }
 0x138   : > { %852 = vst.msk [vmem:[%s1478_s4 + $0x34] sm:$0xf] %vm838_vm2, %v1041_v33  ;;  %853 = vst.msk [vmem:[%s1478_s4 + $0x38] sm:$0xf] %vm838_vm2, %v1042_v34 }
 0x139   : > { %854 = vst.msk [vmem:[%s1478_s4 + $0x3c] sm:$0xf] %vm838_vm2, %v1043_v19 }
 0x13a PF: > { %s14_s19 = sadd.s32 1, %s1203_s19   ;;  %s1479_s15 = smov %s1191_s16 }
 0x13b   : > { %p11_p12 = scmp.ge.s32.totalorder %s14_s19, 7   ;;  %s1480_s16 = smov %s1266_s23 }
 0x13c   : > { %s1481_s17 = smov %s1199_s18  ;;  %s1482_s18 = smov %s1484_s20 }
 0x13d   :  { %13 = sbr.rel (!%p11_p12) target bundleno = 3 (0x3), region = 129 }

// kernel: encoder_forward.27
= control target key start
LH: loop header
LB: loop body
LE: loop exit
PB: predicated region body
PF: predicated region fallthrough
CT: control target
= control target key end

     0   :  { %s1402_s18 = smov 0   ;;  %s1404_s19 = smov 0   ;;  %s1669_s0 = inlined_call_operand.vmem [shape: bf16[128,640], index: 0, kind: input, shape index: {}]   ;;  %s1670_s1 = inlined_call_operand.vmem [shape: bf16[640,64], index: 1, kind: input, shape index: {}]   ;;  %s1671_s2 = inlined_call_operand.vmem [shape: f32[1,64], index: 2, kind: input, shape index: {}]   ;;  %s1672_s3 = inlined_call_operand.vmem [shape: f32[1,64], index: 3, kind: input, shape index: {}]   ;;  %s1673_s4 = inlined_call_operand.vmem [shape: bf16[128,64], index: 4, kind: input, shape index: {}]   ;;  %s1674_s5 = inlined_call_operand.vmem [shape: bf16[128,64], index: 5, kind: output, shape index: {}]  }
   0x1   :  { %s1406_s20 = smov 0   ;;  %s1408_s21 = smov 0  }
   0x2   :  { %s1410_s22 = smov 0  }
   0x3 LB: > { %s27_s23 = sadd.s32 1, %s1365_s21  ;;  %p50_p1 = scmp.ne.s32.totalorder %s1357_s19, %s1353_s18  ;;  %s1369_s22 = sphi %s1410_s22, %s15_s22   ;;  %s1365_s21 = sphi %s1408_s21, %s1678_s21   ;;  %s1361_s20 = sphi %s1406_s20, %s1677_s20   ;;  %s1357_s19 = sphi %s1404_s19, %s1676_s19   ;;  %s1353_s18 = sphi %s1402_s18, %s1675_s18  }
   0x4   : > { %p28_p0 = scmp.ge.s32.totalorder %s27_s23, 5  ;;  %p51_p2 = scmp.eq.s32.totalorder %s1369_s22, 0 }
   0x5   : > { %s43_s25 = sadd.s32 1, %s1357_s19  ;;  %p1108_p5 = scmp.ge.s32.totalorder %s1369_s22, 5 }
   0x6   : > { %s1680_s23 = smov (%p28_p0, %s27_s23), 0  ;;  %p52_p3 = por %p51_p2, %p50_p1 }
   0x7   : > { %s39_s24 = ssub.s32 %s1365_s21, %s1680_s23  ;;  %236 = sbr.rel (%p1108_p5) target bundleno = 26 (0x1a), region = 28 }
   0x8   : > { %p41_p4 = scmp.eq.s32.totalorder %s39_s24, 0 }
   0xa   : > { %s1437_s26 = scalar_select %p41_p4, %s1357_s19, %s43_s25  }
   0xc   : > { %239 = sbr.rel (!%p52_p3) target bundleno = 26 (0x1a), region = 32  ;;  %s241_s27 = sand.u32 (%p52_p3), 1, %s1357_s19  }
   0xd   : > { %s1110_s28 = sshll.u32 (%p52_p3), %s1365_s21, 2  ;;  %s1109_s29 = sshll.u32 (%p52_p3), %s241_s27, 6 }
   0xe   : > { %s1445_s7 = scalar_lea.vmem (%p52_p3), %s1669_s0, %s1110_s28  ;;  %s243_s8 = scalar_lea.vmem (%p52_p3), [#allocation3], %s1109_s29 }
   0xf   : > { %v265_v0 = vld [vmem:[%s1445_s7] sm:$0xf] (%p52_p3)  ;;  %v267_v1 = vld [vmem:[%s1445_s7 + $0x14] sm:$0xf] (%p52_p3)  ;;  %v269_v2 = vld [vmem:[%s1445_s7 + $0x28] sm:$0xf] (%p52_p3) }
  0x10   : > { %266 = vst [vmem:[%s243_s8] sm:$0xf] (%p52_p3), %v265_v0  ;;  %268 = vst [vmem:[%s243_s8 + $0x4] sm:$0xf] (%p52_p3), %v267_v1  ;;  %v271_v3 = vld [vmem:[%s1445_s7 + $0x3c] sm:$0xf] (%p52_p3) }
  0x11   : > { %v273_v4 = vld [vmem:[%s1445_s7 + $0x50] sm:$0xf]  ;;  %270 = vst [vmem:[%s243_s8 + $0x8] sm:$0xf] %v269_v2  ;;  %272 = vst [vmem:[%s243_s8 + $0xc] sm:$0xf] %v271_v3 }
  0x12   : > { %274 = vst [vmem:[%s243_s8 + $0x10] sm:$0xf] %v273_v4  ;;  %v275_v5 = vld [vmem:[%s1445_s7 + $0x64] sm:$0xf]  ;;  %v277_v6 = vld [vmem:[%s1445_s7 + $0x78] sm:$0xf] }
  0x13   : > { %v279_v7 = vld [vmem:[%s1445_s7 + $0x8c] sm:$0xf]  ;;  %276 = vst [vmem:[%s243_s8 + $0x14] sm:$0xf] %v275_v5  ;;  %278 = vst [vmem:[%s243_s8 + $0x18] sm:$0xf] %v277_v6 }
  0x14   : > { %280 = vst [vmem:[%s243_s8 + $0x1c] sm:$0xf] %v279_v7  ;;  %v281_v8 = vld [vmem:[%s1445_s7 + $0xa0] sm:$0xf]  ;;  %v283_v9 = vld [vmem:[%s1445_s7 + $0xb4] sm:$0xf] }
  0x15   : > { %v285_v10 = vld [vmem:[%s1445_s7 + $0xc8] sm:$0xf]  ;;  %282 = vst [vmem:[%s243_s8 + $0x20] sm:$0xf] %v281_v8  ;;  %284 = vst [vmem:[%s243_s8 + $0x24] sm:$0xf] %v283_v9 }
  0x16   : > { %286 = vst [vmem:[%s243_s8 + $0x28] sm:$0xf] %v285_v10  ;;  %v287_v11 = vld [vmem:[%s1445_s7 + $0xdc] sm:$0xf]  ;;  %v289_v12 = vld [vmem:[%s1445_s7 + $0xf0] sm:$0xf] }
  0x17   : > { %v291_v13 = vld [vmem:[%s1445_s7 + $0x104] sm:$0xf]  ;;  %288 = vst [vmem:[%s243_s8 + $0x2c] sm:$0xf] %v287_v11  ;;  %290 = vst [vmem:[%s243_s8 + $0x30] sm:$0xf] %v289_v12 }
  0x18   : > { %292 = vst [vmem:[%s243_s8 + $0x34] sm:$0xf] %v291_v13  ;;  %v293_v14 = vld [vmem:[%s1445_s7 + $0x118] sm:$0xf]  ;;  %v295_v15 = vld [vmem:[%s1445_s7 + $0x12c] sm:$0xf] }
  0x19   : > { %294 = vst [vmem:[%s243_s8 + $0x38] sm:$0xf] %v293_v14  ;;  %296 = vst [vmem:[%s243_s8 + $0x3c] sm:$0xf] %v295_v15 }
  0x1a PF: > { %p1111_p6 = scmp.ge.s32.totalorder %s1369_s22, 1  ;;  %p363_p7 = scmp.lt.s32.totalorder %s1369_s22, 6 }
  0x1c   : > { %p364_p8 = pnand %p1111_p6, %p363_p7 }
  0x1d   : > { %s370_s9 = sand.u32 (!%p364_p8), 1, %s1353_s18   ;;  %s1113_s10 = sshll.u32 (!%p364_p8), %s1361_s20, 4 }
  0x1e   : > { %367 = sbr.rel (%p364_p8) target bundleno = 325 (0x145), region = 77  ;;  %s1112_s11 = sshll.u32 (!%p364_p8), %s370_s9, 6 }
  0x1f   : > { %p424_p9 = scmp.lt.s32.totalorder (!%p364_p8), %s1113_s10, 79  ;;  %s1472_s16 = scalar_lea.vmem (!%p364_p8), [#allocation3], %s1112_s11 }
  0x20   : > { %p1115_p10 = scmp.ne.s32.totalorder (!%p364_p8), %s1361_s20, 0 }
  0x23   : > { %s1682_s10 = smov (!%p424_p9, %s1113_s10), 79  ;;  %460 = sbr.rel (%p1115_p10) target bundleno = 49 (0x31), region = 85 }
  0x24   : > { %s1114_s12 = sshll.u32 %s1682_s10, 2 }
  0x25   : > { %s1470_s15 = scalar_lea.vmem %s1670_s1, %s1114_s12 }
  0x28   : > { %vm461_vm0 = vcmask 523264   ;;  %v1371_v16 = vmov 0.0  }
  0x29   : > { %462 = vst.msk [vmem:[#allocation2] sm:$0xff] %vm461_vm0, %v1371_v16  ;;  %463 = vst.msk [vmem:[#allocation2 + $0x8] sm:$0xff] %vm461_vm0, %v1371_v16 }
  0x2a   : > { %464 = vst.msk [vmem:[#allocation2 + $0x10] sm:$0xff] %vm461_vm0, %v1371_v16  ;;  %465 = vst.msk [vmem:[#allocation2 + $0x18] sm:$0xff] %vm461_vm0, %v1371_v16 }
  0x2b   : > { %466 = vst.msk [vmem:[#allocation2 + $0x20] sm:$0xff] %vm461_vm0, %v1371_v16  ;;  %467 = vst.msk [vmem:[#allocation2 + $0x28] sm:$0xff] %vm461_vm0, %v1371_v16 }
  0x2c   : > { %468 = vst.msk [vmem:[#allocation2 + $0x30] sm:$0xff] %vm461_vm0, %v1371_v16  ;;  %469 = vst.msk [vmem:[#allocation2 + $0x38] sm:$0xff] %vm461_vm0, %v1371_v16 }
  0x2d   : > { %470 = vst.msk [vmem:[#allocation2 + $0x40] sm:$0xff] %vm461_vm0, %v1371_v16  ;;  %471 = vst.msk [vmem:[#allocation2 + $0x48] sm:$0xff] %vm461_vm0, %v1371_v16 }
  0x2e   : > { %472 = vst.msk [vmem:[#allocation2 + $0x50] sm:$0xff] %vm461_vm0, %v1371_v16  ;;  %473 = vst.msk [vmem:[#allocation2 + $0x58] sm:$0xff] %vm461_vm0, %v1371_v16 }
  0x2f   : > { %474 = vst.msk [vmem:[#allocation2 + $0x60] sm:$0xff] %vm461_vm0, %v1371_v16  ;;  %475 = vst.msk [vmem:[#allocation2 + $0x68] sm:$0xff] %vm461_vm0, %v1371_v16 }
  0x30   : > { %476 = vst.msk [vmem:[#allocation2 + $0x70] sm:$0xff] %vm461_vm0, %v1371_v16  ;;  %477 = vst.msk [vmem:[#allocation2 + $0x78] sm:$0xff] %vm461_vm0, %v1371_v16 }
  0x31 PF: > { %v1315_v17 = vld [vmem:[%s1470_s15 + $0x38] sm:$0xff]   ;;  %v1316_v18 = vld [vmem:[%s1470_s15 + $0x30] sm:$0xff]   ;;  %v1317_v19 = vld [vmem:[%s1470_s15 + $0x28] sm:$0xff]   ;;  %vm735_vm1 = vcmask 523264   ;;  %p1132_p11 = scmp.ne.s32.totalorder %s1361_s20, 4 }
  0x32   : > { %1226 = vmatprep.subr.bf16.mxu0 %v1315_v17  ;;  %1258 = vmatprep.subr.bf16.mxu1 %v1315_v17  ;;  %v1318_v20 = vld [vmem:[%s1470_s15 + $0x20] sm:$0xff]   ;;  %v1319_v23 = vld [vmem:[%s1470_s15 + $0x18] sm:$0xff]   ;;  %v1320_v24 = vld [vmem:[%s1470_s15 + $0x10] sm:$0xff]  }
  0x33   : > { %1227 = vmatpush3.bf16.msra.mxu0 %v1315_v17  ;;  %1266 = vmatpush3.bf16.msra.mxu1 %v1315_v17  ;;  %v1323_v21 = vld [vmem:[%s1472_s16] sm:$0xff]   ;;  %v1321_v25 = vld [vmem:[%s1470_s15 + $0x8] sm:$0xff]   ;;  %v1327_v29 = vld [vmem:[%s1472_s16 + $0x10] sm:$0xff]  }
  0x34   : > { %1228 = vmatprep.subr.bf16.mxu0 %v1316_v18  ;;  %1259 = vmatprep.subr.bf16.mxu1 %v1316_v18  ;;  %v1324_v22 = vld [vmem:[%s1472_s16 + $0x20] sm:$0xff]   ;;  %v1325_v27 = vld [vmem:[%s1472_s16 + $0x8] sm:$0xff]   ;;  %v1328_v30 = vld [vmem:[%s1472_s16 + $0x30] sm:$0xff]  }
  0x35   : > { %1242 = vmatprep.mubr.bf16.mxu0 %v1323_v21  ;;  %1250 = vmatprep.mubr.bf16.mxu1 %v1324_v22  ;;  %v1322_v26 = vld [vmem:[%s1470_s15] sm:$0xff]   ;;  %v1326_v28 = vld [vmem:[%s1472_s16 + $0x28] sm:$0xff]   ;;  %v1329_v31 = vld [vmem:[%s1472_s16 + $0x18] sm:$0xff]  }
  0x36   : > { %v1330_v32 = vld [vmem:[%s1472_s16 + $0x38] sm:$0xff]   ;;  %v480_v33 = vld [vmem:[#allocation2 + $0x10] sm:$0xff]  ;;  %v478_v37 = vld [vmem:[#allocation2] sm:$0xff] }
  0x37   : > { %1229 = vmatpush3.bf16.msra.mxu0 %v1316_v18  ;;  %1267 = vmatpush3.bf16.msra.mxu1 %v1316_v18  ;;  %v488_v34 = vld [vmem:[#allocation2 + $0x50] sm:$0xff]  ;;  %v486_v38 = vld [vmem:[#allocation2 + $0x40] sm:$0xff]  ;;  %v481_v43 = vld [vmem:[#allocation2 + $0x18] sm:$0xff] }
  0x38   : > { %1230 = vmatprep.subr.bf16.mxu0 %v1317_v19  ;;  %1260 = vmatprep.subr.bf16.mxu1 %v1317_v19  ;;  %v489_v44 = vld [vmem:[#allocation2 + $0x58] sm:$0xff]  ;;  %v479_v49 = vld [vmem:[#allocation2 + $0x8] sm:$0xff]  ;;  %v484_v55 = vld [vmem:[#allocation2 + $0x30] sm:$0xff] }
  0x39   : > { %v487_v50 = vld [vmem:[#allocation2 + $0x48] sm:$0xff]  ;;  %v492_v56 = vld [vmem:[#allocation2 + $0x70] sm:$0xff]  ;;  %v482_v61 = vld [vmem:[#allocation2 + $0x20] sm:$0xff] }
  0x3a   : > { %v490_v62 = vld [vmem:[#allocation2 + $0x60] sm:$0xff]  ;;  %v485_v3 = vld [vmem:[#allocation2 + $0x38] sm:$0xff]  ;;  %v483_v9 = vld [vmem:[#allocation2 + $0x28] sm:$0xff] }
  0x3b   : > { %1231 = vmatpush3.bf16.msra.mxu0 %v1317_v19  ;;  %1268 = vmatpush3.bf16.msra.mxu1 %v1317_v19  ;;  %v493_v4 = vld [vmem:[#allocation2 + $0x78] sm:$0xff]  ;;  %v491_v10 = vld [vmem:[#allocation2 + $0x68] sm:$0xff] }
  0x3c   : > { %1232 = vmatprep.subr.bf16.mxu0 %v1318_v20  ;;  %1261 = vmatprep.subr.bf16.mxu1 %v1318_v20 }
  0x3f   : > { %1233 = vmatpush3.bf16.msra.mxu0 %v1318_v20  ;;  %1269 = vmatpush3.bf16.msra.mxu1 %v1318_v20 }
  0x40   : > { %1234 = vmatprep.subr.bf16.mxu0 %v1319_v23  ;;  %1262 = vmatprep.subr.bf16.mxu1 %v1319_v23 }
  0x43   : > { %1235 = vmatpush3.bf16.msra.mxu0 %v1319_v23  ;;  %1270 = vmatpush3.bf16.msra.mxu1 %v1319_v23 }
  0x44   : > { %1236 = vmatprep.subr.bf16.mxu0 %v1320_v24  ;;  %1263 = vmatprep.subr.bf16.mxu1 %v1320_v24 }
  0x47   : > { %1237 = vmatpush3.bf16.msra.mxu0 %v1320_v24  ;;  %1271 = vmatpush3.bf16.msra.mxu1 %v1320_v24 }
  0x48   : > { %1238 = vmatprep.subr.bf16.mxu0 %v1321_v25  ;;  %1264 = vmatprep.subr.bf16.mxu1 %v1321_v25 }
  0x4b   : > { %1239 = vmatpush3.bf16.msra.mxu0 %v1321_v25  ;;  %1272 = vmatpush3.bf16.msra.mxu1 %v1321_v25 }
  0x4c   : > { %1240 = vmatprep.subr.bf16.mxu0 %v1322_v26  ;;  %1265 = vmatprep.subr.bf16.mxu1 %v1322_v26 }
  0x4f   : > { %1241 = vmatpush3.bf16.msra.mxu0 %v1322_v26  ;;  %1273 = vmatpush3.bf16.msra.mxu1 %v1322_v26 }
  0x52   : > { %1243 = vmatmul.mubr.bf16.vlgmr.msra.gmra.mxu0 %v1325_v27  ;;  %1251 = vmatmul.mubr.bf16.vlgmr.msra.gmra.mxu1 %v1326_v28 }
  0x53   : > { %1246 = vmatprep.mubr.bf16.mxu0 %v1327_v29  ;;  %1254 = vmatprep.mubr.bf16.mxu1 %v1328_v30 }
  0x5a   : > { %1247 = vmatmul.mubr.bf16.gmra.mxu0 %v1329_v31  ;;  %1255 = vmatmul.mubr.bf16.gmra.mxu1 %v1330_v32 }
 0x112   : > { %v1244_v35 = vpop.f32.mrf.mxu0  ;;  %v1252_v36 = vpop.f32.mrf.mxu1 }
 0x113   : > { %v721_v39 = vadd.f32 %v1244_v35, %v480_v33  ;;  %v729_v40 = vadd.f32 %v1252_v36, %v488_v34 }
 0x114   : > { %v656_v41 = vpop.f32.mrf.mxu0  ;;  %v688_v42 = vpop.f32.mrf.mxu1 }
 0x115   : > { %738 = vst.msk [vmem:[#allocation2 + $0x10] sm:$0xff] %vm735_vm1, %v721_v39  ;;  %746 = vst.msk [vmem:[#allocation2 + $0x50] sm:$0xff] %vm735_vm1, %v729_v40  ;;  %v719_v45 = vadd.f32 %v656_v41, %v478_v37  ;;  %v727_v46 = vadd.f32 %v688_v42, %v486_v38 }
 0x116   : > { %v1245_v47 = vpop.f32.mrf.mxu0  ;;  %v1253_v48 = vpop.f32.mrf.mxu1 }
 0x117   : > { %736 = vst.msk [vmem:[#allocation2] sm:$0xff] %vm735_vm1, %v719_v45  ;;  %744 = vst.msk [vmem:[#allocation2 + $0x40] sm:$0xff] %vm735_vm1, %v727_v46  ;;  %v722_v51 = vadd.f32 %v1245_v47, %v481_v43  ;;  %v730_v52 = vadd.f32 %v1253_v48, %v489_v44 }
 0x118   : > { %v659_v53 = vpop.f32.mrf.mxu0  ;;  %v691_v54 = vpop.f32.mrf.mxu1 }
 0x119   : > { %739 = vst.msk [vmem:[#allocation2 + $0x18] sm:$0xff] %vm735_vm1, %v722_v51  ;;  %747 = vst.msk [vmem:[#allocation2 + $0x58] sm:$0xff] %vm735_vm1, %v730_v52  ;;  %v720_v57 = vadd.f32 %v659_v53, %v479_v49  ;;  %v728_v58 = vadd.f32 %v691_v54, %v487_v50 }
 0x11a   : > { %v1248_v59 = vpop.f32.mrf.mxu0  ;;  %v1256_v60 = vpop.f32.mrf.mxu1 }
 0x11b   : > { %737 = vst.msk [vmem:[#allocation2 + $0x8] sm:$0xff] %vm735_vm1, %v720_v57  ;;  %745 = vst.msk [vmem:[#allocation2 + $0x48] sm:$0xff] %vm735_vm1, %v728_v58  ;;  %v725_v63 = vadd.f32 %v1248_v59, %v484_v55  ;;  %v733_v0 = vadd.f32 %v1256_v60, %v492_v56 }
 0x11c   : > { %v672_v1 = vpop.f32.mrf.mxu0  ;;  %v704_v2 = vpop.f32.mrf.mxu1 }
 0x11d   : > { %742 = vst.msk [vmem:[#allocation2 + $0x30] sm:$0xff] %vm735_vm1, %v725_v63  ;;  %750 = vst.msk [vmem:[#allocation2 + $0x70] sm:$0xff] %vm735_vm1, %v733_v0  ;;  %v723_v5 = vadd.f32 %v672_v1, %v482_v61  ;;  %v731_v6 = vadd.f32 %v704_v2, %v490_v62 }
 0x11e   : > { %v1249_v7 = vpop.f32.mrf.mxu0  ;;  %v1257_v8 = vpop.f32.mrf.mxu1 }
 0x11f   : > { %740 = vst.msk [vmem:[#allocation2 + $0x20] sm:$0xff] %vm735_vm1, %v723_v5  ;;  %748 = vst.msk [vmem:[#allocation2 + $0x60] sm:$0xff] %vm735_vm1, %v731_v6  ;;  %v726_v11 = vadd.f32 %v1249_v7, %v485_v3  ;;  %v734_v12 = vadd.f32 %v1257_v8, %v493_v4  ;;  %755 = sbr.rel (%p1132_p11) target bundleno = 325 (0x145), region = 89 }
 0x120   : > { %v675_v13 = vpop.f32.mrf.mxu0  ;;  %v707_v14 = vpop.f32.mrf.mxu1 }
 0x121   : > { %743 = vst.msk [vmem:[#allocation2 + $0x38] sm:$0xff] %vm735_vm1, %v726_v11  ;;  %751 = vst.msk [vmem:[#allocation2 + $0x78] sm:$0xff] %vm735_vm1, %v734_v12  ;;  %v724_v15 = vadd.f32 %v675_v13, %v483_v9  ;;  %v732_v16 = vadd.f32 %v707_v14, %v491_v10 }
 0x123   : > { %741 = vst.msk [vmem:[#allocation2 + $0x28] sm:$0xff] %vm735_vm1, %v724_v15  ;;  %749 = vst.msk [vmem:[#allocation2 + $0x68] sm:$0xff] %vm735_vm1, %v732_v16 }
 0x124   : > { %v756_v17 = vld [vmem:[#allocation2] sm:$0xff]  ;;  %vm946_vm2 = vcmask 519168   ;;  %v757_v22 = vld [vmem:[#allocation2 + $0x8] sm:$0xff]  ;;  %v758_v23 = vld [vmem:[#allocation2 + $0x10] sm:$0xff] }
 0x125   : > { %v1527_v18 = vld [vmem:[%s1671_s2] ss:$0 sm:$0xff]  ;;  %v1203_v28 = vld [vmem:[%s1673_s4 + $0x8] sm:$0xff]   ;;  %v759_v29 = vld [vmem:[#allocation2 + $0x18] sm:$0xff] }
 0x126   : > { %v1532_v19 = vld [vmem:[%s1672_s3] ss:$0 sm:$0xff]  ;;  %v779_v20 = vmul.f32 %v1527_v18, %v756_v17  ;;  %v780_v25 = vmul.f32 %v1527_v18, %v757_v22  ;;  %v781_v27 = vmul.f32 %v1527_v18, %v758_v23  ;;  %v1177_v32 = vunpack.c.l.bf16 %v1203_v28  ;;  %v1204_v35 = vld [vmem:[%s1673_s4 + $0x10] sm:$0xff]   ;;  %v1205_v42 = vld [vmem:[%s1673_s4 + $0x18] sm:$0xff]  }
 0x127   : > { %v1172_v21 = vld [vmem:[%s1673_s4] sm:$0xff]   ;;  %v782_v33 = vmul.f32 %v1527_v18, %v759_v29  ;;  %v1178_v34 = vunpack.c.h.bf16 %v1203_v28  ;;  %v762_v37 = vld [vmem:[#allocation2 + $0x30] sm:$0xff]  ;;  %v1181_v41 = vunpack.c.l.bf16 %v1204_v35  ;;  %v1182_v46 = vunpack.c.h.bf16 %v1204_v35  ;;  %v765_v6 = vld [vmem:[#allocation2 + $0x48] sm:$0xff] }
 0x128   : > { %v1173_v24 = vunpack.c.l.bf16 %v1172_v21  ;;  %v1174_v26 = vunpack.c.h.bf16 %v1172_v21  ;;  %v760_v30 = vld [vmem:[#allocation2 + $0x20] sm:$0xff]  ;;  %v802_v31 = vadd.f32 %v1532_v19, %v779_v20  ;;  %v803_v38 = vadd.f32 %v1532_v19, %v780_v25  ;;  %v763_v51 = vld [vmem:[#allocation2 + $0x38] sm:$0xff]  ;;  %v766_v11 = vld [vmem:[#allocation2 + $0x50] sm:$0xff] }
 0x129   : > { %v804_v39 = vadd.f32 %v1532_v19, %v781_v27  ;;  %v783_v40 = vmul.f32 %v1527_v18, %v760_v30  ;;  %v805_v44 = vadd.f32 %v1532_v19, %v782_v33  ;;  %v785_v50 = vmul.f32 %v1527_v18, %v762_v37  ;;  %v764_v0 = vld [vmem:[#allocation2 + $0x40] sm:$0xff]  ;;  %v1207_v12 = vld [vmem:[%s1673_s4 + $0x28] sm:$0xff]   ;;  %v767_v17 = vld [vmem:[#allocation2 + $0x58] sm:$0xff] }
 0x12a   : > { %v761_v36 = vld [vmem:[#allocation2 + $0x28] sm:$0xff]  ;;  %v850_v43 = vadd.f32 %v1173_v24, %v802_v31  ;;  %v851_v47 = vadd.f32 %v1174_v26, %v803_v38  ;;  %v1185_v55 = vunpack.c.l.bf16 %v1205_v42  ;;  %v786_v63 = vmul.f32 %v1527_v18, %v763_v51  ;;  %v1206_v1 = vld [vmem:[%s1673_s4 + $0x20] sm:$0xff]   ;;  %v1208_v25 = vld [vmem:[%s1673_s4 + $0x30] sm:$0xff]  }
 0x12b   : > { %v784_v45 = vmul.f32 %v1527_v18, %v761_v36  ;;  %v852_v48 = vadd.f32 %v1177_v32, %v804_v39  ;;  %v806_v49 = vadd.f32 %v1532_v19, %v783_v40  ;;  %v853_v53 = vadd.f32 %v1178_v34, %v805_v44  ;;  %v768_v24 = vld [vmem:[#allocation2 + $0x60] sm:$0xff]  ;;  %v769_v30 = vld [vmem:[#allocation2 + $0x68] sm:$0xff]  ;;  %v770_v39 = vld [vmem:[#allocation2 + $0x70] sm:$0xff] }
 0x12c   : > { %v866_v52 = vmax.f32 %v850_v43, 0.0  ;;  %v867_v56 = vmax.f32 %v851_v47, 0.0  ;;  %v808_v59 = vadd.f32 %v1532_v19, %v785_v50  ;;  %v809_v9 = vadd.f32 %v1532_v19, %v786_v63  ;;  %v1209_v44 = vld [vmem:[%s1673_s4 + $0x38] sm:$0xff]  }
 0x12d   : > { %v807_v54 = vadd.f32 %v1532_v19, %v784_v45  ;;  %v868_v57 = vmax.f32 %v852_v48, 0.0  ;;  %v854_v58 = vadd.f32 %v1181_v41, %v806_v49  ;;  %v869_v61 = vmax.f32 %v853_v53, 0.0  ;;  %v771_v53 = vld [vmem:[#allocation2 + $0x78] sm:$0xff] }
 0x12e   : > { %v1155_v60 = vpack.c.bf16 %v866_v52, %v866_v52  ;;  %v1156_v2 = vpack.c.bf16 %v867_v56, %v867_v56  ;;  %v856_v5 = vadd.f32 %v1185_v55, %v808_v59  ;;  %v1186_v10 = vunpack.c.h.bf16 %v1205_v42 }
 0x12f   : > { %v855_v62 = vadd.f32 %v1182_v46, %v807_v54  ;;  %v1157_v3 = vpack.c.bf16 %v868_v57, %v868_v57  ;;  %v870_v4 = vmax.f32 %v854_v58, 0.0  ;;  %v1158_v7 = vpack.c.bf16 %v869_v61, %v869_v61 }
 0x130   : > { %947 = vst.msk [vmem:[%s1674_s5] sm:$0xf] %vm946_vm2, %v1155_v60  ;;  %948 = vst.msk [vmem:[%s1674_s5 + $0x4] sm:$0xf] %vm946_vm2, %v1156_v2  ;;  %v872_v14 = vmax.f32 %v856_v5, 0.0  ;;  %v787_v15 = vmul.f32 %v1527_v18, %v764_v0  ;;  %v1189_v16 = vunpack.c.l.bf16 %v1206_v1  ;;  %v857_v21 = vadd.f32 %v1186_v10, %v809_v9 }
 0x131   : > { %v871_v8 = vmax.f32 %v855_v62, 0.0  ;;  %949 = vst.msk [vmem:[%s1674_s5 + $0x8] sm:$0xf] %vm946_vm2, %v1157_v3  ;;  %v1159_v13 = vpack.c.bf16 %v870_v4, %v870_v4  ;;  %950 = vst.msk [vmem:[%s1674_s5 + $0xc] sm:$0xf] %vm946_vm2, %v1158_v7  ;;  %v788_v22 = vmul.f32 %v1527_v18, %v765_v6  ;;  %v1190_v23 = vunpack.c.h.bf16 %v1206_v1 }
 0x132   : > { %v1161_v26 = vpack.c.bf16 %v872_v14, %v872_v14  ;;  %v810_v27 = vadd.f32 %v1532_v19, %v787_v15  ;;  %v789_v28 = vmul.f32 %v1527_v18, %v766_v11  ;;  %v1193_v29 = vunpack.c.l.bf16 %v1207_v12 }
 0x133   : > { %v1160_v20 = vpack.c.bf16 %v871_v8, %v871_v8  ;;  %951 = vst.msk [vmem:[%s1674_s5 + $0x10] sm:$0xf] %vm946_vm2, %v1159_v13  ;;  %v873_v31 = vmax.f32 %v857_v21, 0.0  ;;  %v811_v32 = vadd.f32 %v1532_v19, %v788_v22  ;;  %v790_v33 = vmul.f32 %v1527_v18, %v767_v17 }
 0x134   : > { %v1194_v34 = vunpack.c.h.bf16 %v1207_v12  ;;  %953 = vst.msk [vmem:[%s1674_s5 + $0x18] sm:$0xf] %vm946_vm2, %v1161_v26  ;;  %v858_v35 = vadd.f32 %v1189_v16, %v810_v27  ;;  %v812_v36 = vadd.f32 %v1532_v19, %v789_v28  ;;  %v791_v37 = vmul.f32 %v1527_v18, %v768_v24 }
 0x135   : > { %952 = vst.msk [vmem:[%s1674_s5 + $0x14] sm:$0xf] %vm946_vm2, %v1160_v20  ;;  %v1197_v38 = vunpack.c.l.bf16 %v1208_v25  ;;  %v1162_v40 = vpack.c.bf16 %v873_v31, %v873_v31  ;;  %v859_v41 = vadd.f32 %v1190_v23, %v811_v32  ;;  %v813_v42 = vadd.f32 %v1532_v19, %v790_v33 }
 0x136   : > { %v792_v43 = vmul.f32 %v1527_v18, %v769_v30  ;;  %v874_v45 = vmax.f32 %v858_v35, 0.0  ;;  %v860_v46 = vadd.f32 %v1193_v29, %v812_v36  ;;  %v814_v47 = vadd.f32 %v1532_v19, %v791_v37 }
 0x137   : > { %v1198_v48 = vunpack.c.h.bf16 %v1208_v25  ;;  %954 = vst.msk [vmem:[%s1674_s5 + $0x1c] sm:$0xf] %vm946_vm2, %v1162_v40  ;;  %v875_v49 = vmax.f32 %v859_v41, 0.0  ;;  %v861_v50 = vadd.f32 %v1194_v34, %v813_v42  ;;  %v793_v52 = vmul.f32 %v1527_v18, %v770_v39 }
 0x138   : > { %v815_v51 = vadd.f32 %v1532_v19, %v792_v43  ;;  %v1163_v54 = vpack.c.bf16 %v874_v45, %v874_v45  ;;  %v876_v55 = vmax.f32 %v860_v46, 0.0  ;;  %v862_v56 = vadd.f32 %v1197_v38, %v814_v47 }
 0x139   : > { %v1201_v57 = vunpack.c.l.bf16 %v1209_v44  ;;  %v1164_v58 = vpack.c.bf16 %v875_v49, %v875_v49  ;;  %v877_v59 = vmax.f32 %v861_v50, 0.0  ;;  %v816_v61 = vadd.f32 %v1532_v19, %v793_v52 }
 0x13a   : > { %v863_v60 = vadd.f32 %v1198_v48, %v815_v51  ;;  %955 = vst.msk [vmem:[%s1674_s5 + $0x20] sm:$0xf] %vm946_vm2, %v1163_v54  ;;  %v1165_v62 = vpack.c.bf16 %v876_v55, %v876_v55  ;;  %v878_v63 = vmax.f32 %v862_v56, 0.0  ;;  %v794_v0 = vmul.f32 %v1527_v18, %v771_v53 }
 0x13b   : > { %v1202_v1 = vunpack.c.h.bf16 %v1209_v44  ;;  %956 = vst.msk [vmem:[%s1674_s5 + $0x24] sm:$0xf] %vm946_vm2, %v1164_v58  ;;  %v1166_v2 = vpack.c.bf16 %v877_v59, %v877_v59  ;;  %v864_v4 = vadd.f32 %v1201_v57, %v816_v61 }
 0x13c   : > { %v879_v3 = vmax.f32 %v863_v60, 0.0  ;;  %957 = vst.msk [vmem:[%s1674_s5 + $0x28] sm:$0xf] %vm946_vm2, %v1165_v62  ;;  %v1167_v5 = vpack.c.bf16 %v878_v63, %v878_v63  ;;  %v817_v6 = vadd.f32 %v1532_v19, %v794_v0 }
 0x13d   : > { %958 = vst.msk [vmem:[%s1674_s5 + $0x2c] sm:$0xf] %vm946_vm2, %v1166_v2  ;;  %v880_v7 = vmax.f32 %v864_v4, 0.0 }
 0x13e   : > { %v1168_v18 = vpack.c.bf16 %v879_v3, %v879_v3  ;;  %959 = vst.msk [vmem:[%s1674_s5 + $0x30] sm:$0xf] %vm946_vm2, %v1167_v5  ;;  %v865_v8 = vadd.f32 %v1202_v1, %v817_v6 }
 0x13f   : > { %v1169_v9 = vpack.c.bf16 %v880_v7, %v880_v7 }
 0x140   : > { %960 = vst.msk [vmem:[%s1674_s5 + $0x34] sm:$0xf] %vm946_vm2, %v1168_v18  ;;  %v881_v19 = vmax.f32 %v865_v8, 0.0 }
 0x141   : > { %961 = vst.msk [vmem:[%s1674_s5 + $0x38] sm:$0xf] %vm946_vm2, %v1169_v9 }
 0x142   : > { %v1170_v10 = vpack.c.bf16 %v881_v19, %v881_v19 }
 0x144   : > { %962 = vst.msk [vmem:[%s1674_s5 + $0x3c] sm:$0xf] %vm946_vm2, %v1170_v10 }
 0x145 PF: > { %s15_s22 = sadd.s32 1, %s1369_s22   ;;  %s1675_s18 = smov %s1357_s19 }
 0x146   : > { %p12_p12 = scmp.ge.s32.totalorder %s15_s22, 7   ;;  %s1676_s19 = smov %s1437_s26 }
 0x147   : > { %s1677_s20 = smov %s1365_s21  ;;  %s1678_s21 = smov %s1680_s23 }
 0x148   :  { %14 = sbr.rel (!%p12_p12) target bundleno = 3 (0x3), region = 136 }

// kernel: encoder_forward.30
= control target key start
LH: loop header
LB: loop body
LE: loop exit
PB: predicated region body
PF: predicated region fallthrough
CT: control target
= control target key end

     0   :  { %s869_s15 = smov 0   ;;  %s871_s16 = smov 0   ;;  %s965_s0 = inlined_call_operand.vmem [shape: bf16[32,640], index: 0, kind: input, shape index: {}]   ;;  %s966_s1 = inlined_call_operand.vmem [shape: bf16[640,128], index: 1, kind: input, shape index: {}]   ;;  %s967_s2 = inlined_call_operand.vmem [shape: f32[1,128], index: 2, kind: input, shape index: {}]   ;;  %s968_s3 = inlined_call_operand.vmem [shape: f32[1,128], index: 3, kind: input, shape index: {}]   ;;  %s969_s4 = inlined_call_operand.vmem [shape: bf16[32,128], index: 4, kind: output, shape index: {}]  }
   0x1   :  { %s873_s17 = smov 0   ;;  %s875_s18 = smov 0  }
   0x2   :  { %s877_s19 = smov 0  }
   0x3 LB: > { %s26_s20 = sadd.s32 1, %s837_s18  ;;  %p49_p1 = scmp.ne.s32.totalorder %s829_s16, %s825_s15  ;;  %s841_s19 = sphi %s877_s19, %s14_s19   ;;  %s837_s18 = sphi %s875_s18, %s973_s18   ;;  %s833_s17 = sphi %s873_s17, %s972_s17   ;;  %s829_s16 = sphi %s871_s16, %s971_s16   ;;  %s825_s15 = sphi %s869_s15, %s970_s15  }
   0x4   : > { %p27_p0 = scmp.ge.s32.totalorder %s26_s20, 5  ;;  %p50_p2 = scmp.eq.s32.totalorder %s841_s19, 0 }
   0x5   : > { %s42_s22 = sadd.s32 1, %s829_s16  ;;  %p678_p5 = scmp.ge.s32.totalorder %s841_s19, 5 }
   0x6   : > { %s975_s20 = smov (%p27_p0, %s26_s20), 0  ;;  %p51_p3 = por %p50_p2, %p49_p1 }
   0x7   : > { %s38_s21 = ssub.s32 %s837_s18, %s975_s20  ;;  %195 = sbr.rel (%p678_p5) target bundleno = 18 (0x12), region = 24 }
   0x8   : > { %p40_p4 = scmp.eq.s32.totalorder %s38_s21, 0 }
   0xa   : > { %s904_s23 = scalar_select %p40_p4, %s829_s16, %s42_s22  }
   0xc   : > { %198 = sbr.rel (!%p51_p3) target bundleno = 18 (0x12), region = 28  ;;  %s200_s24 = sand.u32 (%p51_p3), 1, %s829_s16  }
   0xd   : > { %s680_s25 = sshll.u32 (%p51_p3), %s837_s18, 2  ;;  %s679_s26 = sshll.u32 (%p51_p3), %s200_s24, 4 }
   0xe   : > { %s207_s29 = scalar_lea.vmem (%p51_p3), %s965_s0, %s680_s25  ;;  %s202_s30 = scalar_lea.vmem (%p51_p3), [#allocation3], %s679_s26 }
   0xf   : > { %v224_v0 = vld [vmem:[%s207_s29] sm:$0xf] (%p51_p3)  ;;  %v226_v1 = vld [vmem:[%s207_s29 + $0x14] sm:$0xf] (%p51_p3)  ;;  %v228_v2 = vld [vmem:[%s207_s29 + $0x28] sm:$0xf] (%p51_p3) }
  0x10   : > { %225 = vst [vmem:[%s202_s30] sm:$0xf] (%p51_p3), %v224_v0  ;;  %227 = vst [vmem:[%s202_s30 + $0x4] sm:$0xf] (%p51_p3), %v226_v1  ;;  %v230_v3 = vld [vmem:[%s207_s29 + $0x3c] sm:$0xf] (%p51_p3) }
  0x11   : > { %229 = vst [vmem:[%s202_s30 + $0x8] sm:$0xf] %v228_v2  ;;  %231 = vst [vmem:[%s202_s30 + $0xc] sm:$0xf] %v230_v3 }
  0x12 PF: > { %p681_p6 = scmp.ge.s32.totalorder %s841_s19, 1  ;;  %p274_p7 = scmp.lt.s32.totalorder %s841_s19, 6 }
  0x14   : > { %p275_p8 = pnand %p681_p6, %p274_p7 }
  0x15   : > { %s281_s5 = sand.u32 (!%p275_p8), 1, %s825_s15   ;;  %s683_s6 = sshll.u32 (!%p275_p8), %s833_s17, 4 }
  0x16   : > { %278 = sbr.rel (%p275_p8) target bundleno = 286 (0x11e), region = 73  ;;  %s916_s7 = sshll.u32 (!%p275_p8), %s281_s5, 4 }
  0x17   : > { %p325_p9 = scmp.lt.s32.totalorder (!%p275_p8), %s683_s6, 79  ;;  %s283_s12 = scalar_lea.vmem (!%p275_p8), [#allocation3], %s916_s7 }
  0x18   : > { %p685_p10 = scmp.ne.s32.totalorder (!%p275_p8), %s833_s17, 0 }
  0x1b   : > { %s977_s6 = smov (!%p325_p9, %s683_s6), 79  ;;  %352 = sbr.rel (%p685_p10) target bundleno = 35 (0x23), region = 81 }
  0x1c   : > { %s684_s8 = sshll.u32 %s977_s6, 2 }
  0x1d   : > { %s921_s11 = scalar_lea.vmem %s966_s1, %s684_s8 }
  0x20   : > { %v843_v4 = vmov 0.0  }
  0x21   : > { %353 = vst [vmem:[#allocation2 + $0x10] sm:$0xff] %v843_v4  ;;  %354 = vst [vmem:[#allocation2] sm:$0xff] %v843_v4 }
  0x22   : > { %355 = vst [vmem:[#allocation2 + $0x18] sm:$0xff] %v843_v4  ;;  %356 = vst [vmem:[#allocation2 + $0x8] sm:$0xff] %v843_v4 }
  0x23 PF: > { %v793_v5 = vld [vmem:[%s921_s11 + $0x38] sm:$0xff]   ;;  %v794_v6 = vld [vmem:[%s921_s11 + $0x30] sm:$0xff]   ;;  %v795_v7 = vld [vmem:[%s921_s11 + $0x28] sm:$0xff]   ;;  %p696_p11 = scmp.ne.s32.totalorder %s833_s17, 4 }
  0x24   : > { %732 = vmatprep.subr.bf16.mxu0 %v793_v5  ;;  %v796_v8 = vld [vmem:[%s921_s11 + $0x20] sm:$0xff]   ;;  %v797_v10 = vld [vmem:[%s921_s11 + $0x18] sm:$0xff]   ;;  %v798_v11 = vld [vmem:[%s921_s11 + $0x10] sm:$0xff]  }
  0x25   : > { %733 = vmatpush3.bf16.msra.mxu0 %v793_v5  ;;  %v801_v9 = vld [vmem:[%s283_s12] sm:$0xff]   ;;  %v799_v12 = vld [vmem:[%s921_s11 + $0x8] sm:$0xff]  }
  0x26   : > { %734 = vmatprep.subr.bf16.mxu0 %v794_v6  ;;  %748 = vmatprep.mubr.bf16.mxu0 %v801_v9  ;;  %v800_v13 = vld [vmem:[%s921_s11] sm:$0xff]   ;;  %v802_v14 = vld [vmem:[%s283_s12 + $0x8] sm:$0xff]  }
  0x28   : > { %v357_v17 = vld [vmem:[#allocation2 + $0x10] sm:$0xff]  ;;  %v358_v23 = vld [vmem:[#allocation2] sm:$0xff] }
  0x29   : > { %735 = vmatpush3.bf16.msra.mxu0 %v794_v6  ;;  %v359_v15 = vld [vmem:[#allocation2 + $0x18] sm:$0xff]  ;;  %v360_v20 = vld [vmem:[#allocation2 + $0x8] sm:$0xff] }
  0x2a   : > { %736 = vmatprep.subr.bf16.mxu0 %v795_v7 }
  0x2d   : > { %737 = vmatpush3.bf16.msra.mxu0 %v795_v7 }
  0x2e   : > { %738 = vmatprep.subr.bf16.mxu0 %v796_v8 }
  0x31   : > { %739 = vmatpush3.bf16.msra.mxu0 %v796_v8 }
  0x32   : > { %740 = vmatprep.subr.bf16.mxu0 %v797_v10 }
  0x35   : > { %741 = vmatpush3.bf16.msra.mxu0 %v797_v10 }
  0x36   : > { %742 = vmatprep.subr.bf16.mxu0 %v798_v11 }
  0x39   : > { %743 = vmatpush3.bf16.msra.mxu0 %v798_v11 }
  0x3a   : > { %744 = vmatprep.subr.bf16.mxu0 %v799_v12 }
  0x3d   : > { %745 = vmatpush3.bf16.msra.mxu0 %v799_v12 }
  0x3e   : > { %746 = vmatprep.subr.bf16.mxu0 %v800_v13 }
  0x41   : > { %747 = vmatpush3.bf16.msra.mxu0 %v800_v13 }
  0x44   : > { %749 = vmatmul.mubr.bf16.vlgmr.msra.gmra.mxu0 %v802_v14 }
 0x104   : > { %v750_v16 = vpop.f32.mrf.mxu0 }
 0x105   : > { %v492_v18 = vadd.f32 %v750_v16, %v359_v15 }
 0x106   : > { %v475_v19 = vpop.f32.mrf.mxu0 }
 0x107   : > { %496 = vst [vmem:[#allocation2 + $0x18] sm:$0xff] %v492_v18  ;;  %v490_v21 = vadd.f32 %v475_v19, %v357_v17 }
 0x108   : > { %v751_v22 = vpop.f32.mrf.mxu0 }
 0x109   : > { %494 = vst [vmem:[#allocation2 + $0x10] sm:$0xff] %v490_v21  ;;  %v493_v24 = vadd.f32 %v751_v22, %v360_v20  ;;  %501 = sbr.rel (%p696_p11) target bundleno = 286 (0x11e), region = 85 }
 0x10a   : > { %v478_v25 = vpop.f32.mrf.mxu0 }
 0x10b   : > { %497 = vst [vmem:[#allocation2 + $0x8] sm:$0xff] %v493_v24  ;;  %v491_v26 = vadd.f32 %v478_v25, %v358_v23 }
 0x10d   : > { %495 = vst [vmem:[#allocation2] sm:$0xff] %v491_v26 }
 0x10e   : > { %v697_v29 = vld [vmem:[%s967_s2] ss:$0 sm:$0xff]  ;;  %v504_v33 = vld [vmem:[#allocation2 + $0x18] sm:$0xff] }
 0x10f   : > { %v698_v32 = vld [vmem:[%s968_s3] ss:$0 sm:$0xff]  ;;  %v515_v35 = vmul.f32 %v697_v29, %v504_v33 }
 0x110   : > { %v502_v27 = vld [vmem:[#allocation2 + $0x10] sm:$0xff] }
 0x111   : > { %v513_v30 = vmul.f32 %v697_v29, %v502_v27  ;;  %v526_v39 = vadd.f32 %v698_v32, %v515_v35 }
 0x112   : > { %v505_v34 = vld [vmem:[#allocation2 + $0x8] sm:$0xff] }
 0x113   : > { %v516_v36 = vmul.f32 %v697_v29, %v505_v34  ;;  %v524_v37 = vadd.f32 %v698_v32, %v513_v30  ;;  %v530_v43 = vmax.f32 %v526_v39, 0.0 }
 0x114   : > { %v503_v28 = vld [vmem:[#allocation2] sm:$0xff] }
 0x115   : > { %v514_v31 = vmul.f32 %v697_v29, %v503_v28  ;;  %v527_v40 = vadd.f32 %v698_v32, %v516_v36  ;;  %v528_v41 = vmax.f32 %v524_v37, 0.0 }
 0x117   : > { %v525_v38 = vadd.f32 %v698_v32, %v514_v31  ;;  %v531_v44 = vmax.f32 %v527_v40, 0.0 }
 0x119   : > { %v529_v42 = vmax.f32 %v525_v38, 0.0  ;;  %v719_v46 = vpack.c.bf16 %v531_v44, %v530_v43 }
 0x11b   : > { %v714_v45 = vpack.c.bf16 %v529_v42, %v528_v41  ;;  %721 = vst [vmem:[%s969_s4 + $0x8] sm:$0xff] %v719_v46  }
 0x11d   : > { %715 = vst [vmem:[%s969_s4] sm:$0xff] %v714_v45  }
 0x11e PF: > { %s14_s19 = sadd.s32 1, %s841_s19   ;;  %s970_s15 = smov %s829_s16 }
 0x11f   : > { %p11_p12 = scmp.ge.s32.totalorder %s14_s19, 7   ;;  %s971_s16 = smov %s904_s23 }
 0x120   : > { %s972_s17 = smov %s837_s18  ;;  %s973_s18 = smov %s975_s20 }
 0x121   :  { %13 = sbr.rel (!%p11_p12) target bundleno = 3 (0x3), region = 129 }

// kernel: encoder_forward.31
= control target key start
LH: loop header
LB: loop body
LE: loop exit
PB: predicated region body
PF: predicated region fallthrough
CT: control target
= control target key end

     0   :  { %vm76_vm0 = vcmask 523264   ;;  %s301_s1 = inlined_call_operand.vmem [shape: bf16[64,128], index: 1, kind: input, shape index: {}]   ;;  %s302_s0 = inlined_call_operand.vmem [shape: bf16[32,64], index: 0, kind: input, shape index: {}]   ;;  %s303_s2 = inlined_call_operand.vmem [shape: f32[1,128], index: 2, kind: input, shape index: {}]   ;;  %s304_s3 = inlined_call_operand.vmem [shape: f32[1,128], index: 3, kind: input, shape index: {}]   ;;  %s305_s4 = inlined_call_operand.vmem [shape: bf16[32,128], index: 4, kind: output, shape index: {}]  }
   0x1   :  { %v240_v0 = vld [vmem:[%s301_s1 + $0x18] sm:$0xff]   ;;  %v241_v1 = vld [vmem:[%s301_s1 + $0x10] sm:$0xff]   ;;  %v242_v2 = vld [vmem:[%s301_s1 + $0x8] sm:$0xff]  }
   0x2   :  { %228 = vmatprep.subr.bf16.mxu0 %v240_v0  ;;  %v244_v3 = vld [vmem:[%s302_s0] sm:$0xff]   ;;  %v245_v5 = vld [vmem:[%s302_s0 + $0x8] sm:$0xff]  }
   0x3   :  { %229 = vmatpush3.bf16.msra.mxu0 %v240_v0  ;;  %236 = vmatprep.mubr.msk.bf16.mxu0 %vm76_vm0, %v244_v3  ;;  %v243_v4 = vld [vmem:[%s301_s1] sm:$0xff]  }
   0x4   :  { %230 = vmatprep.subr.bf16.mxu0 %v241_v1  ;;  %v201_v7 = vld [vmem:[%s303_s2] ss:$0 sm:$0xff] }
   0x5   :  { %v202_v10 = vld [vmem:[%s304_s3] ss:$0 sm:$0xff] }
   0x7   :  { %231 = vmatpush3.bf16.msra.mxu0 %v241_v1 }
   0x8   :  { %232 = vmatprep.subr.bf16.mxu0 %v242_v2 }
   0xb   :  { %233 = vmatpush3.bf16.msra.mxu0 %v242_v2 }
   0xc   :  { %234 = vmatprep.subr.bf16.mxu0 %v243_v4 }
   0xf   :  { %235 = vmatpush3.bf16.msra.mxu0 %v243_v4 }
  0x12   :  { %237 = vmatmul.mubr.msk.bf16.vlgmr.msra.gmra.mxu0 %vm76_vm0, %v245_v5 }
  0xd2   :  { %v238_v6 = vpop.f32.mrf.mxu0 }
  0xd3   :  { %v156_v9 = vmul.f32 %v238_v6, %v201_v7 }
  0xd4   :  { %v117_v8 = vpop.f32.mrf.mxu0 }
  0xd5   :  { %v154_v12 = vmul.f32 %v201_v7, %v117_v8  ;;  %v167_v15 = vadd.f32 %v202_v10, %v156_v9 }
  0xd6   :  { %v239_v11 = vpop.f32.mrf.mxu0 }
  0xd7   :  { %v157_v13 = vmul.f32 %v239_v11, %v201_v7  ;;  %v165_v18 = vadd.f32 %v202_v10, %v154_v12 }
  0xd8   :  { %v120_v14 = vpop.f32.mrf.mxu0 }
  0xd9   :  { %v168_v16 = vadd.f32 %v202_v10, %v157_v13  ;;  %v155_v17 = vmul.f32 %v201_v7, %v120_v14 }
  0xdb   :  { %v219_v19 = vpack.c.bf16 %v168_v16, %v167_v15  ;;  %v166_v20 = vadd.f32 %v202_v10, %v155_v17 }
  0xdd   :  { %221 = vst [vmem:[%s305_s4 + $0x8] sm:$0xff] %v219_v19   ;;  %v214_v21 = vpack.c.bf16 %v166_v20, %v165_v18 }
  0xdf   :  { %215 = vst [vmem:[%s305_s4] sm:$0xff] %v214_v21  }

// kernel: encoder_forward.32
= control target key start
LH: loop header
LB: loop body
LE: loop exit
PB: predicated region body
PF: predicated region fallthrough
CT: control target
= control target key end

     0   :  { %s974_s18 = smov 0   ;;  %s976_s19 = smov 0   ;;  %s1076_s0 = inlined_call_operand.vmem [shape: bf16[32,1152], index: 0, kind: input, shape index: {}]   ;;  %s1077_s1 = inlined_call_operand.vmem [shape: bf16[1152,128], index: 1, kind: input, shape index: {}]   ;;  %s1078_s2 = inlined_call_operand.vmem [shape: f32[1,128], index: 2, kind: input, shape index: {}]   ;;  %s1079_s3 = inlined_call_operand.vmem [shape: f32[1,128], index: 3, kind: input, shape index: {}]   ;;  %s1080_s4 = inlined_call_operand.vmem [shape: bf16[32,128], index: 4, kind: input, shape index: {}]   ;;  %s1081_s5 = inlined_call_operand.vmem [shape: bf16[32,128], index: 5, kind: output, shape index: {}]  }
   0x1   :  { %s978_s20 = smov 0   ;;  %s980_s21 = smov 0  }
   0x2   :  { %s982_s22 = smov 0  }
   0x3 LB: > { %s27_s23 = sadd.s32 1, %s937_s21  ;;  %p50_p1 = scmp.ne.s32.totalorder %s929_s19, %s925_s18  ;;  %s941_s22 = sphi %s982_s22, %s15_s22   ;;  %s937_s21 = sphi %s980_s21, %s1085_s21   ;;  %s933_s20 = sphi %s978_s20, %s1084_s20   ;;  %s929_s19 = sphi %s976_s19, %s1083_s19   ;;  %s925_s18 = sphi %s974_s18, %s1082_s18  }
   0x4   : > { %p28_p0 = scmp.ge.s32.totalorder %s27_s23, 9  ;;  %p51_p2 = scmp.eq.s32.totalorder %s941_s22, 0 }
   0x5   : > { %s43_s25 = sadd.s32 1, %s929_s19  ;;  %p769_p5 = scmp.ge.s32.totalorder %s941_s22, 9 }
   0x6   : > { %s1087_s23 = smov (%p28_p0, %s27_s23), 0  ;;  %p52_p3 = por %p51_p2, %p50_p1 }
   0x7   : > { %s39_s24 = ssub.s32 %s937_s21, %s1087_s23  ;;  %236 = sbr.rel (%p769_p5) target bundleno = 18 (0x12), region = 28 }
   0x8   : > { %p41_p4 = scmp.eq.s32.totalorder %s39_s24, 0 }
   0xa   : > { %s1009_s26 = scalar_select %p41_p4, %s929_s19, %s43_s25  }
   0xc   : > { %239 = sbr.rel (!%p52_p3) target bundleno = 18 (0x12), region = 32  ;;  %s241_s27 = sand.u32 (%p52_p3), 1, %s929_s19  }
   0xd   : > { %s771_s28 = sshll.u32 (%p52_p3), %s937_s21, 2  ;;  %s770_s29 = sshll.u32 (%p52_p3), %s241_s27, 4 }
   0xe   : > { %s248_s7 = scalar_lea.vmem (%p52_p3), %s1076_s0, %s771_s28  ;;  %s243_s8 = scalar_lea.vmem (%p52_p3), [#allocation3], %s770_s29 }
   0xf   : > { %v265_v0 = vld [vmem:[%s248_s7] sm:$0xf] (%p52_p3)  ;;  %v267_v1 = vld [vmem:[%s248_s7 + $0x24] sm:$0xf] (%p52_p3)  ;;  %v269_v2 = vld [vmem:[%s248_s7 + $0x48] sm:$0xf] (%p52_p3) }
  0x10   : > { %266 = vst [vmem:[%s243_s8] sm:$0xf] (%p52_p3), %v265_v0  ;;  %268 = vst [vmem:[%s243_s8 + $0x4] sm:$0xf] (%p52_p3), %v267_v1  ;;  %v271_v3 = vld [vmem:[%s248_s7 + $0x6c] sm:$0xf] (%p52_p3) }
  0x11   : > { %270 = vst [vmem:[%s243_s8 + $0x8] sm:$0xf] %v269_v2  ;;  %272 = vst [vmem:[%s243_s8 + $0xc] sm:$0xf] %v271_v3 }
  0x12 PF: > { %p772_p6 = scmp.ge.s32.totalorder %s941_s22, 1  ;;  %p315_p7 = scmp.lt.s32.totalorder %s941_s22, 10 }
  0x14   : > { %p316_p8 = pnand %p772_p6, %p315_p7 }
  0x15   : > { %s322_s9 = sand.u32 (!%p316_p8), 1, %s925_s18   ;;  %s774_s10 = sshll.u32 (!%p316_p8), %s933_s20, 4 }
  0x16   : > { %319 = sbr.rel (%p316_p8) target bundleno = 288 (0x120), region = 77  ;;  %s1021_s11 = sshll.u32 (!%p316_p8), %s322_s9, 4 }
  0x17   : > { %p376_p9 = scmp.lt.s32.totalorder (!%p316_p8), %s774_s10, 143  ;;  %s324_s16 = scalar_lea.vmem (!%p316_p8), [#allocation3], %s1021_s11 }
  0x18   : > { %p776_p10 = scmp.ne.s32.totalorder (!%p316_p8), %s933_s20, 0 }
  0x1b   : > { %s1089_s10 = smov (!%p376_p9, %s774_s10), 143  ;;  %412 = sbr.rel (%p776_p10) target bundleno = 35 (0x23), region = 85 }
  0x1c   : > { %s775_s12 = sshll.u32 %s1089_s10, 2 }
  0x1d   : > { %s1026_s15 = scalar_lea.vmem %s1077_s1, %s775_s12 }
  0x20   : > { %v943_v4 = vmov 0.0  }
  0x21   : > { %413 = vst [vmem:[#allocation2 + $0x10] sm:$0xff] %v943_v4  ;;  %414 = vst [vmem:[#allocation2] sm:$0xff] %v943_v4 }
  0x22   : > { %415 = vst [vmem:[#allocation2 + $0x18] sm:$0xff] %v943_v4  ;;  %416 = vst [vmem:[#allocation2 + $0x8] sm:$0xff] %v943_v4 }
  0x23 PF: > { %v893_v5 = vld [vmem:[%s1026_s15 + $0x38] sm:$0xff]   ;;  %v894_v6 = vld [vmem:[%s1026_s15 + $0x30] sm:$0xff]   ;;  %v895_v7 = vld [vmem:[%s1026_s15 + $0x28] sm:$0xff]   ;;  %p787_p11 = scmp.ne.s32.totalorder %s933_s20, 8 }
  0x24   : > { %832 = vmatprep.subr.bf16.mxu0 %v893_v5  ;;  %v896_v8 = vld [vmem:[%s1026_s15 + $0x20] sm:$0xff]   ;;  %v897_v10 = vld [vmem:[%s1026_s15 + $0x18] sm:$0xff]   ;;  %v898_v11 = vld [vmem:[%s1026_s15 + $0x10] sm:$0xff]  }
  0x25   : > { %833 = vmatpush3.bf16.msra.mxu0 %v893_v5  ;;  %v901_v9 = vld [vmem:[%s324_s16] sm:$0xff]   ;;  %v899_v12 = vld [vmem:[%s1026_s15 + $0x8] sm:$0xff]  }
  0x26   : > { %834 = vmatprep.subr.bf16.mxu0 %v894_v6  ;;  %848 = vmatprep.mubr.bf16.mxu0 %v901_v9  ;;  %v900_v13 = vld [vmem:[%s1026_s15] sm:$0xff]   ;;  %v902_v14 = vld [vmem:[%s324_s16 + $0x8] sm:$0xff]  }
  0x28   : > { %v417_v17 = vld [vmem:[#allocation2 + $0x10] sm:$0xff]  ;;  %v418_v23 = vld [vmem:[#allocation2] sm:$0xff] }
  0x29   : > { %835 = vmatpush3.bf16.msra.mxu0 %v894_v6  ;;  %v419_v15 = vld [vmem:[#allocation2 + $0x18] sm:$0xff]  ;;  %v420_v20 = vld [vmem:[#allocation2 + $0x8] sm:$0xff] }
  0x2a   : > { %836 = vmatprep.subr.bf16.mxu0 %v895_v7 }
  0x2d   : > { %837 = vmatpush3.bf16.msra.mxu0 %v895_v7 }
  0x2e   : > { %838 = vmatprep.subr.bf16.mxu0 %v896_v8 }
  0x31   : > { %839 = vmatpush3.bf16.msra.mxu0 %v896_v8 }
  0x32   : > { %840 = vmatprep.subr.bf16.mxu0 %v897_v10 }
  0x35   : > { %841 = vmatpush3.bf16.msra.mxu0 %v897_v10 }
  0x36   : > { %842 = vmatprep.subr.bf16.mxu0 %v898_v11 }
  0x39   : > { %843 = vmatpush3.bf16.msra.mxu0 %v898_v11 }
  0x3a   : > { %844 = vmatprep.subr.bf16.mxu0 %v899_v12 }
  0x3d   : > { %845 = vmatpush3.bf16.msra.mxu0 %v899_v12 }
  0x3e   : > { %846 = vmatprep.subr.bf16.mxu0 %v900_v13 }
  0x41   : > { %847 = vmatpush3.bf16.msra.mxu0 %v900_v13 }
  0x44   : > { %849 = vmatmul.mubr.bf16.vlgmr.msra.gmra.mxu0 %v902_v14 }
 0x104   : > { %v850_v16 = vpop.f32.mrf.mxu0 }
 0x105   : > { %v552_v18 = vadd.f32 %v850_v16, %v419_v15 }
 0x106   : > { %v535_v19 = vpop.f32.mrf.mxu0 }
 0x107   : > { %556 = vst [vmem:[#allocation2 + $0x18] sm:$0xff] %v552_v18  ;;  %v550_v21 = vadd.f32 %v535_v19, %v417_v17 }
 0x108   : > { %v851_v22 = vpop.f32.mrf.mxu0 }
 0x109   : > { %554 = vst [vmem:[#allocation2 + $0x10] sm:$0xff] %v550_v21  ;;  %v553_v24 = vadd.f32 %v851_v22, %v420_v20  ;;  %561 = sbr.rel (%p787_p11) target bundleno = 288 (0x120), region = 89 }
 0x10a   : > { %v538_v25 = vpop.f32.mrf.mxu0 }
 0x10b   : > { %557 = vst [vmem:[#allocation2 + $0x8] sm:$0xff] %v553_v24  ;;  %v551_v26 = vadd.f32 %v538_v25, %v418_v23 }
 0x10d   : > { %555 = vst [vmem:[#allocation2] sm:$0xff] %v551_v26 }
 0x10e   : > { %v788_v29 = vld [vmem:[%s1078_s2] ss:$0 sm:$0xff]  ;;  %v564_v34 = vld [vmem:[#allocation2 + $0x18] sm:$0xff]  ;;  %v820_v39 = vld [vmem:[%s1080_s4 + $0x8] sm:$0xff]  }
 0x10f   : > { %v789_v32 = vld [vmem:[%s1079_s3] ss:$0 sm:$0xff]  ;;  %v575_v38 = vmul.f32 %v788_v29, %v564_v34  ;;  %v808_v43 = vunpack.c.l.bf16 %v820_v39  ;;  %v809_v45 = vunpack.c.h.bf16 %v820_v39 }
 0x110   : > { %v562_v27 = vld [vmem:[#allocation2 + $0x10] sm:$0xff]  ;;  %v803_v33 = vld [vmem:[%s1080_s4] sm:$0xff]  }
 0x111   : > { %v573_v30 = vmul.f32 %v788_v29, %v562_v27  ;;  %v804_v35 = vunpack.c.l.bf16 %v803_v33  ;;  %v805_v36 = vunpack.c.h.bf16 %v803_v33  ;;  %v586_v44 = vadd.f32 %v789_v32, %v575_v38 }
 0x112   : > { %v565_v37 = vld [vmem:[#allocation2 + $0x8] sm:$0xff] }
 0x113   : > { %v584_v40 = vadd.f32 %v789_v32, %v573_v30  ;;  %v576_v42 = vmul.f32 %v788_v29, %v565_v37  ;;  %v598_v49 = vadd.f32 %v808_v43, %v586_v44 }
 0x114   : > { %v563_v28 = vld [vmem:[#allocation2] sm:$0xff] }
 0x115   : > { %v574_v31 = vmul.f32 %v788_v29, %v563_v28  ;;  %v596_v46 = vadd.f32 %v804_v35, %v584_v40  ;;  %v587_v48 = vadd.f32 %v789_v32, %v576_v42  ;;  %v602_v53 = vmax.f32 %v598_v49, 0.0 }
 0x117   : > { %v585_v41 = vadd.f32 %v789_v32, %v574_v31  ;;  %v600_v50 = vmax.f32 %v596_v46, 0.0  ;;  %v599_v52 = vadd.f32 %v809_v45, %v587_v48 }
 0x119   : > { %v597_v47 = vadd.f32 %v805_v36, %v585_v41  ;;  %v603_v55 = vmax.f32 %v599_v52, 0.0 }
 0x11b   : > { %v601_v51 = vmax.f32 %v597_v47, 0.0  ;;  %v818_v56 = vpack.c.bf16 %v603_v55, %v602_v53 }
 0x11d   : > { %v813_v54 = vpack.c.bf16 %v601_v51, %v600_v50  ;;  %821 = vst [vmem:[%s1081_s5 + $0x8] sm:$0xff] %v818_v56  }
 0x11f   : > { %814 = vst [vmem:[%s1081_s5] sm:$0xff] %v813_v54  }
 0x120 PF: > { %s15_s22 = sadd.s32 1, %s941_s22   ;;  %s1082_s18 = smov %s929_s19 }
 0x121   : > { %p12_p12 = scmp.ge.s32.totalorder %s15_s22, 11   ;;  %s1083_s19 = smov %s1009_s26 }
 0x122   : > { %s1084_s20 = smov %s937_s21  ;;  %s1085_s21 = smov %s1087_s23 }
 0x123   :  { %14 = sbr.rel (!%p12_p12) target bundleno = 3 (0x3), region = 136 }

// kernel: encoder_forward.33
= control target key start
LH: loop header
LB: loop body
LE: loop exit
PB: predicated region body
PF: predicated region fallthrough
CT: control target
= control target key end

     0   :  { %s869_s15 = smov 0   ;;  %s871_s16 = smov 0   ;;  %s965_s0 = inlined_call_operand.vmem [shape: bf16[32,1152], index: 0, kind: input, shape index: {}]   ;;  %s966_s1 = inlined_call_operand.vmem [shape: bf16[1152,128], index: 1, kind: input, shape index: {}]   ;;  %s967_s2 = inlined_call_operand.vmem [shape: f32[1,128], index: 2, kind: input, shape index: {}]   ;;  %s968_s3 = inlined_call_operand.vmem [shape: f32[1,128], index: 3, kind: input, shape index: {}]   ;;  %s969_s4 = inlined_call_operand.vmem [shape: bf16[32,128], index: 4, kind: output, shape index: {}]  }
   0x1   :  { %s873_s17 = smov 0   ;;  %s875_s18 = smov 0  }
   0x2   :  { %s877_s19 = smov 0  }
   0x3 LB: > { %s26_s20 = sadd.s32 1, %s837_s18  ;;  %p49_p1 = scmp.ne.s32.totalorder %s829_s16, %s825_s15  ;;  %s841_s19 = sphi %s877_s19, %s14_s19   ;;  %s837_s18 = sphi %s875_s18, %s973_s18   ;;  %s833_s17 = sphi %s873_s17, %s972_s17   ;;  %s829_s16 = sphi %s871_s16, %s971_s16   ;;  %s825_s15 = sphi %s869_s15, %s970_s15  }
   0x4   : > { %p27_p0 = scmp.ge.s32.totalorder %s26_s20, 9  ;;  %p50_p2 = scmp.eq.s32.totalorder %s841_s19, 0 }
   0x5   : > { %s42_s22 = sadd.s32 1, %s829_s16  ;;  %p678_p5 = scmp.ge.s32.totalorder %s841_s19, 9 }
   0x6   : > { %s975_s20 = smov (%p27_p0, %s26_s20), 0  ;;  %p51_p3 = por %p50_p2, %p49_p1 }
   0x7   : > { %s38_s21 = ssub.s32 %s837_s18, %s975_s20  ;;  %195 = sbr.rel (%p678_p5) target bundleno = 18 (0x12), region = 24 }
   0x8   : > { %p40_p4 = scmp.eq.s32.totalorder %s38_s21, 0 }
   0xa   : > { %s904_s23 = scalar_select %p40_p4, %s829_s16, %s42_s22  }
   0xc   : > { %198 = sbr.rel (!%p51_p3) target bundleno = 18 (0x12), region = 28  ;;  %s200_s24 = sand.u32 (%p51_p3), 1, %s829_s16  }
   0xd   : > { %s680_s25 = sshll.u32 (%p51_p3), %s837_s18, 2  ;;  %s679_s26 = sshll.u32 (%p51_p3), %s200_s24, 4 }
   0xe   : > { %s207_s29 = scalar_lea.vmem (%p51_p3), %s965_s0, %s680_s25  ;;  %s202_s30 = scalar_lea.vmem (%p51_p3), [#allocation3], %s679_s26 }
   0xf   : > { %v224_v0 = vld [vmem:[%s207_s29] sm:$0xf] (%p51_p3)  ;;  %v226_v1 = vld [vmem:[%s207_s29 + $0x24] sm:$0xf] (%p51_p3)  ;;  %v228_v2 = vld [vmem:[%s207_s29 + $0x48] sm:$0xf] (%p51_p3) }
  0x10   : > { %225 = vst [vmem:[%s202_s30] sm:$0xf] (%p51_p3), %v224_v0  ;;  %227 = vst [vmem:[%s202_s30 + $0x4] sm:$0xf] (%p51_p3), %v226_v1  ;;  %v230_v3 = vld [vmem:[%s207_s29 + $0x6c] sm:$0xf] (%p51_p3) }
  0x11   : > { %229 = vst [vmem:[%s202_s30 + $0x8] sm:$0xf] %v228_v2  ;;  %231 = vst [vmem:[%s202_s30 + $0xc] sm:$0xf] %v230_v3 }
  0x12 PF: > { %p681_p6 = scmp.ge.s32.totalorder %s841_s19, 1  ;;  %p274_p7 = scmp.lt.s32.totalorder %s841_s19, 10 }
  0x14   : > { %p275_p8 = pnand %p681_p6, %p274_p7 }
  0x15   : > { %s281_s5 = sand.u32 (!%p275_p8), 1, %s825_s15   ;;  %s683_s6 = sshll.u32 (!%p275_p8), %s833_s17, 4 }
  0x16   : > { %278 = sbr.rel (%p275_p8) target bundleno = 286 (0x11e), region = 73  ;;  %s916_s7 = sshll.u32 (!%p275_p8), %s281_s5, 4 }
  0x17   : > { %p325_p9 = scmp.lt.s32.totalorder (!%p275_p8), %s683_s6, 143  ;;  %s283_s12 = scalar_lea.vmem (!%p275_p8), [#allocation3], %s916_s7 }
  0x18   : > { %p685_p10 = scmp.ne.s32.totalorder (!%p275_p8), %s833_s17, 0 }
  0x1b   : > { %s977_s6 = smov (!%p325_p9, %s683_s6), 143  ;;  %352 = sbr.rel (%p685_p10) target bundleno = 35 (0x23), region = 81 }
  0x1c   : > { %s684_s8 = sshll.u32 %s977_s6, 2 }
  0x1d   : > { %s921_s11 = scalar_lea.vmem %s966_s1, %s684_s8 }
  0x20   : > { %v843_v4 = vmov 0.0  }
  0x21   : > { %353 = vst [vmem:[#allocation2 + $0x10] sm:$0xff] %v843_v4  ;;  %354 = vst [vmem:[#allocation2] sm:$0xff] %v843_v4 }
  0x22   : > { %355 = vst [vmem:[#allocation2 + $0x18] sm:$0xff] %v843_v4  ;;  %356 = vst [vmem:[#allocation2 + $0x8] sm:$0xff] %v843_v4 }
  0x23 PF: > { %v793_v5 = vld [vmem:[%s921_s11 + $0x38] sm:$0xff]   ;;  %v794_v6 = vld [vmem:[%s921_s11 + $0x30] sm:$0xff]   ;;  %v795_v7 = vld [vmem:[%s921_s11 + $0x28] sm:$0xff]   ;;  %p696_p11 = scmp.ne.s32.totalorder %s833_s17, 8 }
  0x24   : > { %732 = vmatprep.subr.bf16.mxu0 %v793_v5  ;;  %v796_v8 = vld [vmem:[%s921_s11 + $0x20] sm:$0xff]   ;;  %v797_v10 = vld [vmem:[%s921_s11 + $0x18] sm:$0xff]   ;;  %v798_v11 = vld [vmem:[%s921_s11 + $0x10] sm:$0xff]  }
  0x25   : > { %733 = vmatpush3.bf16.msra.mxu0 %v793_v5  ;;  %v801_v9 = vld [vmem:[%s283_s12] sm:$0xff]   ;;  %v799_v12 = vld [vmem:[%s921_s11 + $0x8] sm:$0xff]  }
  0x26   : > { %734 = vmatprep.subr.bf16.mxu0 %v794_v6  ;;  %748 = vmatprep.mubr.bf16.mxu0 %v801_v9  ;;  %v800_v13 = vld [vmem:[%s921_s11] sm:$0xff]   ;;  %v802_v14 = vld [vmem:[%s283_s12 + $0x8] sm:$0xff]  }
  0x28   : > { %v357_v17 = vld [vmem:[#allocation2 + $0x10] sm:$0xff]  ;;  %v358_v23 = vld [vmem:[#allocation2] sm:$0xff] }
  0x29   : > { %735 = vmatpush3.bf16.msra.mxu0 %v794_v6  ;;  %v359_v15 = vld [vmem:[#allocation2 + $0x18] sm:$0xff]  ;;  %v360_v20 = vld [vmem:[#allocation2 + $0x8] sm:$0xff] }
  0x2a   : > { %736 = vmatprep.subr.bf16.mxu0 %v795_v7 }
  0x2d   : > { %737 = vmatpush3.bf16.msra.mxu0 %v795_v7 }
  0x2e   : > { %738 = vmatprep.subr.bf16.mxu0 %v796_v8 }
  0x31   : > { %739 = vmatpush3.bf16.msra.mxu0 %v796_v8 }
  0x32   : > { %740 = vmatprep.subr.bf16.mxu0 %v797_v10 }
  0x35   : > { %741 = vmatpush3.bf16.msra.mxu0 %v797_v10 }
  0x36   : > { %742 = vmatprep.subr.bf16.mxu0 %v798_v11 }
  0x39   : > { %743 = vmatpush3.bf16.msra.mxu0 %v798_v11 }
  0x3a   : > { %744 = vmatprep.subr.bf16.mxu0 %v799_v12 }
  0x3d   : > { %745 = vmatpush3.bf16.msra.mxu0 %v799_v12 }
  0x3e   : > { %746 = vmatprep.subr.bf16.mxu0 %v800_v13 }
  0x41   : > { %747 = vmatpush3.bf16.msra.mxu0 %v800_v13 }
  0x44   : > { %749 = vmatmul.mubr.bf16.vlgmr.msra.gmra.mxu0 %v802_v14 }
 0x104   : > { %v750_v16 = vpop.f32.mrf.mxu0 }
 0x105   : > { %v492_v18 = vadd.f32 %v750_v16, %v359_v15 }
 0x106   : > { %v475_v19 = vpop.f32.mrf.mxu0 }
 0x107   : > { %496 = vst [vmem:[#allocation2 + $0x18] sm:$0xff] %v492_v18  ;;  %v490_v21 = vadd.f32 %v475_v19, %v357_v17 }
 0x108   : > { %v751_v22 = vpop.f32.mrf.mxu0 }
 0x109   : > { %494 = vst [vmem:[#allocation2 + $0x10] sm:$0xff] %v490_v21  ;;  %v493_v24 = vadd.f32 %v751_v22, %v360_v20  ;;  %501 = sbr.rel (%p696_p11) target bundleno = 286 (0x11e), region = 85 }
 0x10a   : > { %v478_v25 = vpop.f32.mrf.mxu0 }
 0x10b   : > { %497 = vst [vmem:[#allocation2 + $0x8] sm:$0xff] %v493_v24  ;;  %v491_v26 = vadd.f32 %v478_v25, %v358_v23 }
 0x10d   : > { %495 = vst [vmem:[#allocation2] sm:$0xff] %v491_v26 }
 0x10e   : > { %v697_v29 = vld [vmem:[%s967_s2] ss:$0 sm:$0xff]  ;;  %v504_v33 = vld [vmem:[#allocation2 + $0x18] sm:$0xff] }
 0x10f   : > { %v698_v32 = vld [vmem:[%s968_s3] ss:$0 sm:$0xff]  ;;  %v515_v35 = vmul.f32 %v697_v29, %v504_v33 }
 0x110   : > { %v502_v27 = vld [vmem:[#allocation2 + $0x10] sm:$0xff] }
 0x111   : > { %v513_v30 = vmul.f32 %v697_v29, %v502_v27  ;;  %v526_v39 = vadd.f32 %v698_v32, %v515_v35 }
 0x112   : > { %v505_v34 = vld [vmem:[#allocation2 + $0x8] sm:$0xff] }
 0x113   : > { %v516_v36 = vmul.f32 %v697_v29, %v505_v34  ;;  %v524_v37 = vadd.f32 %v698_v32, %v513_v30  ;;  %v530_v43 = vmax.f32 %v526_v39, 0.0 }
 0x114   : > { %v503_v28 = vld [vmem:[#allocation2] sm:$0xff] }
 0x115   : > { %v514_v31 = vmul.f32 %v697_v29, %v503_v28  ;;  %v527_v40 = vadd.f32 %v698_v32, %v516_v36  ;;  %v528_v41 = vmax.f32 %v524_v37, 0.0 }
 0x117   : > { %v525_v38 = vadd.f32 %v698_v32, %v514_v31  ;;  %v531_v44 = vmax.f32 %v527_v40, 0.0 }
 0x119   : > { %v529_v42 = vmax.f32 %v525_v38, 0.0  ;;  %v719_v46 = vpack.c.bf16 %v531_v44, %v530_v43 }
 0x11b   : > { %v714_v45 = vpack.c.bf16 %v529_v42, %v528_v41  ;;  %721 = vst [vmem:[%s969_s4 + $0x8] sm:$0xff] %v719_v46  }
 0x11d   : > { %715 = vst [vmem:[%s969_s4] sm:$0xff] %v714_v45  }
 0x11e PF: > { %s14_s19 = sadd.s32 1, %s841_s19   ;;  %s970_s15 = smov %s829_s16 }
 0x11f   : > { %p11_p12 = scmp.ge.s32.totalorder %s14_s19, 11   ;;  %s971_s16 = smov %s904_s23 }
 0x120   : > { %s972_s17 = smov %s837_s18  ;;  %s973_s18 = smov %s975_s20 }
 0x121   :  { %13 = sbr.rel (!%p11_p12) target bundleno = 3 (0x3), region = 129 }

// kernel: encoder_forward.35
= control target key start
LH: loop header
LB: loop body
LE: loop exit
PB: predicated region body
PF: predicated region fallthrough
CT: control target
= control target key end

     0   :  { %s897_s15 = smov 0   ;;  %s899_s16 = smov 0   ;;  %s999_s0 = inlined_call_operand.vmem [shape: bf16[16,1152], index: 0, kind: input, shape index: {}]   ;;  %s1000_s1 = inlined_call_operand.vmem [shape: bf16[1152,256], index: 1, kind: input, shape index: {}]   ;;  %s1001_s2 = inlined_call_operand.vmem [shape: f32[1,256], index: 2, kind: input, shape index: {}]   ;;  %s1002_s3 = inlined_call_operand.vmem [shape: f32[1,256], index: 3, kind: input, shape index: {}]   ;;  %s1003_s4 = inlined_call_operand.vmem [shape: bf16[16,256], index: 4, kind: output, shape index: {}]  }
   0x1   :  { %s901_s17 = smov 0   ;;  %s903_s18 = smov 0  }
   0x2   :  { %s905_s19 = smov 0  }
   0x3 LB: > { %s26_s20 = sadd.s32 1, %s864_s18  ;;  %p49_p1 = scmp.ne.s32.totalorder %s856_s16, %s852_s15  ;;  %s868_s19 = sphi %s905_s19, %s14_s19   ;;  %s864_s18 = sphi %s903_s18, %s1007_s18   ;;  %s860_s17 = sphi %s901_s17, %s1006_s17   ;;  %s856_s16 = sphi %s899_s16, %s1005_s16   ;;  %s852_s15 = sphi %s897_s15, %s1004_s15  }
   0x4   : > { %p27_p0 = scmp.ge.s32.totalorder %s26_s20, 9  ;;  %p50_p2 = scmp.eq.s32.totalorder %s868_s19, 0 }
   0x5   : > { %s42_s22 = sadd.s32 1, %s856_s16  ;;  %p727_p5 = scmp.ge.s32.totalorder %s868_s19, 9 }
   0x6   : > { %s1009_s20 = smov (%p27_p0, %s26_s20), 0  ;;  %p51_p3 = por %p50_p2, %p49_p1 }
   0x7   : > { %s38_s21 = ssub.s32 %s864_s18, %s1009_s20  ;;  %199 = sbr.rel (%p727_p5) target bundleno = 17 (0x11), region = 24 }
   0x8   : > { %p40_p4 = scmp.eq.s32.totalorder %s38_s21, 0 }
   0xa   : > { %s932_s23 = scalar_select %p40_p4, %s856_s16, %s42_s22  }
   0xc   : > { %202 = sbr.rel (!%p51_p3) target bundleno = 17 (0x11), region = 28  ;;  %s204_s24 = sand.u32 (%p51_p3), 1, %s856_s16  }
   0xd   : > { %s729_s25 = sshll.u32 (%p51_p3), %s864_s18, 2  ;;  %s728_s26 = sshll.u32 (%p51_p3), %s204_s24, 3 }
   0xe   : > { %s211_s29 = scalar_lea.vmem (%p51_p3), %s999_s0, %s729_s25  ;;  %s206_s30 = scalar_lea.vmem (%p51_p3), [#allocation3], %s728_s26 }
   0xf   : > { %v228_v0 = vld [vmem:[%s211_s29] sm:$0xf] (%p51_p3)  ;;  %v230_v1 = vld [vmem:[%s211_s29 + $0x24] sm:$0xf] (%p51_p3) }
  0x10   : > { %229 = vst [vmem:[%s206_s30] sm:$0xf] (%p51_p3), %v228_v0  ;;  %231 = vst [vmem:[%s206_s30 + $0x4] sm:$0xf] (%p51_p3), %v230_v1 }
  0x11 PF: > { %p730_p6 = scmp.ge.s32.totalorder %s868_s19, 1  ;;  %p273_p7 = scmp.lt.s32.totalorder %s868_s19, 10 }
  0x13   : > { %p274_p8 = pnand %p730_p6, %p273_p7 }
  0x14   : > { %s280_s5 = sand.u32 (!%p274_p8), 1, %s852_s15   ;;  %s732_s6 = sshll.u32 (!%p274_p8), %s860_s17, 4 }
  0x15   : > { %277 = sbr.rel (%p274_p8) target bundleno = 286 (0x11e), region = 73  ;;  %s944_s7 = sshll.u32 (!%p274_p8), %s280_s5, 3 }
  0x16   : > { %p331_p9 = scmp.lt.s32.totalorder (!%p274_p8), %s732_s6, 143  ;;  %s282_s12 = scalar_lea.vmem (!%p274_p8), [#allocation3], %s944_s7 }
  0x17   : > { %p735_p10 = scmp.ne.s32.totalorder (!%p274_p8), %s860_s17, 0 }
  0x1a   : > { %s1011_s6 = smov (!%p331_p9, %s732_s6), 143  ;;  %367 = sbr.rel (%p735_p10) target bundleno = 34 (0x22), region = 81 }
  0x1b   : > { %s760_s8 = sshll.u32 %s1011_s6, 3 }
  0x1c   : > { %s949_s11 = scalar_lea.vmem %s1000_s1, %s760_s8 }
  0x1f   : > { %v870_v2 = vmov 0.0  }
  0x20   : > { %368 = vst [vmem:[#allocation2 + $0x10] sm:$0xff] %v870_v2  ;;  %369 = vst [vmem:[#allocation2] sm:$0xff] %v870_v2 }
  0x21   : > { %370 = vst [vmem:[#allocation2 + $0x18] sm:$0xff] %v870_v2  ;;  %371 = vst [vmem:[#allocation2 + $0x8] sm:$0xff] %v870_v2 }
  0x22 PF: > { %v805_v3 = vld [vmem:[%s949_s11 + $0x74] ss:$8 sps:$4 sm:$0xff]   ;;  %v807_v4 = vld [vmem:[%s949_s11 + $0x70] ss:$8 sps:$4 sm:$0xff]   ;;  %v871_v5 = vmov 0   ;;  %v829_v20 = vld [vmem:[%s282_s12] sm:$0xff]  }
  0x23   : > { %512 = vmatprep.mubr.bf16.mxu0 %v871_v5  ;;  %480 = vmatprep.subr.bf16.mxu0 %v805_v3  ;;  %v808_v6 = vld [vmem:[%s949_s11 + $0x64] ss:$8 sps:$4 sm:$0xff]   ;;  %v810_v7 = vld [vmem:[%s949_s11 + $0x60] ss:$8 sps:$4 sm:$0xff]   ;;  %v811_v8 = vld [vmem:[%s949_s11 + $0x54] ss:$8 sps:$4 sm:$0xff]  }
  0x24   : > { %481 = vmatpush1.bf16.msra.mxu0 %v807_v4  ;;  %v813_v9 = vld [vmem:[%s949_s11 + $0x50] ss:$8 sps:$4 sm:$0xff]   ;;  %v814_v10 = vld [vmem:[%s949_s11 + $0x44] ss:$8 sps:$4 sm:$0xff]   ;;  %v816_v11 = vld [vmem:[%s949_s11 + $0x40] ss:$8 sps:$4 sm:$0xff]  }
  0x25   : > { %482 = vmatprep.subr.bf16.mxu0 %v808_v6  ;;  %v817_v12 = vld [vmem:[%s949_s11 + $0x34] ss:$8 sps:$4 sm:$0xff]   ;;  %v819_v13 = vld [vmem:[%s949_s11 + $0x30] ss:$8 sps:$4 sm:$0xff]   ;;  %v820_v14 = vld [vmem:[%s949_s11 + $0x24] ss:$8 sps:$4 sm:$0xff]  }
  0x26   : > { %v822_v15 = vld [vmem:[%s949_s11 + $0x20] ss:$8 sps:$4 sm:$0xff]   ;;  %v823_v16 = vld [vmem:[%s949_s11 + $0x14] ss:$8 sps:$4 sm:$0xff]   ;;  %v825_v17 = vld [vmem:[%s949_s11 + $0x10] ss:$8 sps:$4 sm:$0xff]  }
  0x27   : > { %v826_v18 = vld [vmem:[%s949_s11 + $0x4] ss:$8 sps:$4 sm:$0xff]   ;;  %v828_v19 = vld [vmem:[%s949_s11] ss:$8 sps:$4 sm:$0xff]   ;;  %v372_v21 = vld [vmem:[#allocation2 + $0x10] sm:$0xff]  ;;  %p753_p11 = scmp.ne.s32.totalorder %s860_s17, 8 }
  0x28   : > { %483 = vmatpush1.bf16.msra.mxu0 %v810_v7  ;;  %v373_v23 = vld [vmem:[#allocation2] sm:$0xff]  ;;  %v374_v26 = vld [vmem:[#allocation2 + $0x18] sm:$0xff]  ;;  %v375_v29 = vld [vmem:[#allocation2 + $0x8] sm:$0xff] }
  0x29   : > { %484 = vmatprep.subr.bf16.mxu0 %v811_v8 }
  0x2c   : > { %485 = vmatpush1.bf16.msra.mxu0 %v813_v9 }
  0x2d   : > { %486 = vmatprep.subr.bf16.mxu0 %v814_v10 }
  0x30   : > { %487 = vmatpush1.bf16.msra.mxu0 %v816_v11 }
  0x31   : > { %488 = vmatprep.subr.bf16.mxu0 %v817_v12 }
  0x34   : > { %489 = vmatpush1.bf16.msra.mxu0 %v819_v13 }
  0x35   : > { %490 = vmatprep.subr.bf16.mxu0 %v820_v14 }
  0x38   : > { %491 = vmatpush1.bf16.msra.mxu0 %v822_v15 }
  0x39   : > { %492 = vmatprep.subr.bf16.mxu0 %v823_v16 }
  0x3c   : > { %493 = vmatpush1.bf16.msra.mxu0 %v825_v17 }
  0x3d   : > { %494 = vmatprep.subr.bf16.mxu0 %v826_v18 }
  0x40   : > { %495 = vmatpush1.bf16.msra.mxu0 %v828_v19 }
  0x43   : > { %513 = vmatmul.mubr.bf16.vlgmr.msra.gmra.mxu0 %v829_v20 }
 0x103   : > { %v514_v22 = vpop.f32.mrf.mxu0 }
 0x104   : > { %v523_v24 = vadd.f32 %v514_v22, %v372_v21 }
 0x105   : > { %v516_v25 = vpop.f32.mrf.mxu0 }
 0x106   : > { %527 = vst [vmem:[#allocation2 + $0x10] sm:$0xff] %v523_v24  ;;  %v524_v27 = vadd.f32 %v516_v25, %v373_v23 }
 0x107   : > { %v518_v28 = vpop.f32.mrf.mxu0 }
 0x108   : > { %528 = vst [vmem:[#allocation2] sm:$0xff] %v524_v27  ;;  %v525_v30 = vadd.f32 %v518_v28, %v374_v26  ;;  %534 = sbr.rel (%p753_p11) target bundleno = 286 (0x11e), region = 85 }
 0x109   : > { %v520_v31 = vpop.f32.mrf.mxu0 }
 0x10a   : > { %529 = vst [vmem:[#allocation2 + $0x18] sm:$0xff] %v525_v30  ;;  %v526_v32 = vadd.f32 %v520_v31, %v375_v29 }
 0x10c   : > { %530 = vst [vmem:[#allocation2 + $0x8] sm:$0xff] %v526_v32 }
 0x10d   : > { %v541_v33 = vlaneseq  ;;  %v539_v35 = vld [vmem:[%s1001_s2] sm:$0x3]  ;;  %v535_v37 = vld [vmem:[#allocation2 + $0x10] sm:$0xff] }
 0x10e   : > { %v555_v36 = vld [vmem:[%s1002_s3] sm:$0x3] }
 0x10f   : > { %v542_v34 = vshrl.u32 %v541_v33, 7  ;;  %v536_v40 = vld [vmem:[#allocation2] sm:$0xff] }
 0x111   : > { %v543_v38 = vsub.s32 0, %v542_v34  ;;  %v547_v39 = vsub.s32 1, %v542_v34  ;;  %v537_v41 = vld [vmem:[#allocation2 + $0x18] sm:$0xff] }
 0x113   : > { %v538_v42 = vld [vmem:[#allocation2 + $0x8] sm:$0xff]  ;;  %v544_v43 = vrot.slane %v539_v35, %v543_v38  ;;  %v548_v44 = vrot.slane %v539_v35, %v547_v39  ;;  %v560_v45 = vrot.slane %v555_v36, %v543_v38  ;;  %v564_v46 = vrot.slane %v555_v36, %v547_v39 }
 0x115   : > { %v551_v47 = vmul.f32 %v544_v43, %v535_v37  ;;  %v552_v48 = vmul.f32 %v548_v44, %v536_v40  ;;  %v553_v49 = vmul.f32 %v544_v43, %v537_v41  ;;  %v554_v50 = vmul.f32 %v548_v44, %v538_v42 }
 0x117   : > { %v567_v51 = vadd.f32 %v560_v45, %v551_v47  ;;  %v568_v52 = vadd.f32 %v564_v46, %v552_v48  ;;  %v569_v53 = vadd.f32 %v560_v45, %v553_v49  ;;  %v570_v54 = vadd.f32 %v564_v46, %v554_v50 }
 0x119   : > { %v571_v55 = vmax.f32 %v567_v51, 0.0  ;;  %v572_v56 = vmax.f32 %v568_v52, 0.0  ;;  %v573_v57 = vmax.f32 %v569_v53, 0.0  ;;  %v574_v58 = vmax.f32 %v570_v54, 0.0 }
 0x11b   : > { %v761_v59 = vpack.c.bf16 %v572_v56, %v571_v55  ;;  %v762_v60 = vpack.c.bf16 %v574_v58, %v573_v57 }
 0x11d   : > { %587 = vst [vmem:[%s1003_s4] sm:$0xff] %v761_v59  ;;  %588 = vst [vmem:[%s1003_s4 + $0x8] sm:$0xff] %v762_v60 }
 0x11e PF: > { %s14_s19 = sadd.s32 1, %s868_s19   ;;  %s1004_s15 = smov %s856_s16 }
 0x11f   : > { %p11_p12 = scmp.ge.s32.totalorder %s14_s19, 11   ;;  %s1005_s16 = smov %s932_s23 }
 0x120   : > { %s1006_s17 = smov %s864_s18  ;;  %s1007_s18 = smov %s1009_s20 }
 0x121   :  { %13 = sbr.rel (!%p11_p12) target bundleno = 3 (0x3), region = 129 }

// kernel: encoder_forward.36
= control target key start
LH: loop header
LB: loop body
LE: loop exit
PB: predicated region body
PF: predicated region fallthrough
CT: control target
= control target key end

     0   :  { %v289_v1 = vmov 0   ;;  %v194_v18 = vlaneseq  ;;  %s378_s1 = inlined_call_operand.vmem [shape: bf16[128,256], index: 1, kind: input, shape index: {}]   ;;  %s379_s0 = inlined_call_operand.vmem [shape: bf16[16,128], index: 0, kind: input, shape index: {}]   ;;  %s380_s2 = inlined_call_operand.vmem [shape: f32[1,256], index: 2, kind: input, shape index: {}]   ;;  %s381_s3 = inlined_call_operand.vmem [shape: f32[1,256], index: 3, kind: input, shape index: {}]   ;;  %s382_s4 = inlined_call_operand.vmem [shape: bf16[16,256], index: 4, kind: output, shape index: {}]  }
   0x1   :  { %v264_v0 = vld [vmem:[%s378_s1 + $0x74] ss:$8 sps:$4 sm:$0xff]   ;;  %166 = vmatprep.mubr.bf16.mxu0 %v289_v1  ;;  %v266_v2 = vld [vmem:[%s378_s1 + $0x70] ss:$8 sps:$4 sm:$0xff]   ;;  %v267_v3 = vld [vmem:[%s378_s1 + $0x64] ss:$8 sps:$4 sm:$0xff]  }
   0x2   :  { %134 = vmatprep.subr.bf16.mxu0 %v264_v0  ;;  %v269_v4 = vld [vmem:[%s378_s1 + $0x60] ss:$8 sps:$4 sm:$0xff]   ;;  %v270_v5 = vld [vmem:[%s378_s1 + $0x54] ss:$8 sps:$4 sm:$0xff]   ;;  %v272_v6 = vld [vmem:[%s378_s1 + $0x50] ss:$8 sps:$4 sm:$0xff]  }
   0x3   :  { %135 = vmatpush1.bf16.msra.mxu0 %v266_v2  ;;  %v273_v7 = vld [vmem:[%s378_s1 + $0x44] ss:$8 sps:$4 sm:$0xff]   ;;  %v275_v8 = vld [vmem:[%s378_s1 + $0x40] ss:$8 sps:$4 sm:$0xff]   ;;  %v276_v9 = vld [vmem:[%s378_s1 + $0x34] ss:$8 sps:$4 sm:$0xff]  }
   0x4   :  { %136 = vmatprep.subr.bf16.mxu0 %v267_v3  ;;  %v278_v10 = vld [vmem:[%s378_s1 + $0x30] ss:$8 sps:$4 sm:$0xff]   ;;  %v279_v11 = vld [vmem:[%s378_s1 + $0x24] ss:$8 sps:$4 sm:$0xff]   ;;  %v281_v12 = vld [vmem:[%s378_s1 + $0x20] ss:$8 sps:$4 sm:$0xff]  }
   0x5   :  { %v282_v13 = vld [vmem:[%s378_s1 + $0x14] ss:$8 sps:$4 sm:$0xff]   ;;  %v284_v14 = vld [vmem:[%s378_s1 + $0x10] ss:$8 sps:$4 sm:$0xff]   ;;  %v285_v15 = vld [vmem:[%s378_s1 + $0x4] ss:$8 sps:$4 sm:$0xff]  }
   0x6   :  { %v287_v16 = vld [vmem:[%s378_s1] ss:$8 sps:$4 sm:$0xff]   ;;  %v195_v19 = vshrl.u32 %v194_v18, 7 }
   0x7   :  { %137 = vmatpush1.bf16.msra.mxu0 %v269_v4  ;;  %v288_v17 = vld [vmem:[%s379_s0] sm:$0xff]  }
   0x8   :  { %138 = vmatprep.subr.bf16.mxu0 %v270_v5  ;;  %v196_v20 = vsub.s32 0, %v195_v19  ;;  %v192_v21 = vld [vmem:[%s380_s2] sm:$0x3]  ;;  %v200_v22 = vsub.s32 1, %v195_v19 }
   0x9   :  { %v208_v24 = vld [vmem:[%s381_s3] sm:$0x3] }
   0xa   :  { %v197_v23 = vrot.slane %v192_v21, %v196_v20  ;;  %v201_v25 = vrot.slane %v192_v21, %v200_v22  ;;  %v213_v28 = vrot.slane %v208_v24, %v196_v20  ;;  %v217_v29 = vrot.slane %v208_v24, %v200_v22 }
   0xb   :  { %139 = vmatpush1.bf16.msra.mxu0 %v272_v6 }
   0xc   :  { %140 = vmatprep.subr.bf16.mxu0 %v273_v7 }
   0xf   :  { %141 = vmatpush1.bf16.msra.mxu0 %v275_v8 }
  0x10   :  { %142 = vmatprep.subr.bf16.mxu0 %v276_v9 }
  0x13   :  { %143 = vmatpush1.bf16.msra.mxu0 %v278_v10 }
  0x14   :  { %144 = vmatprep.subr.bf16.mxu0 %v279_v11 }
  0x17   :  { %145 = vmatpush1.bf16.msra.mxu0 %v281_v12 }
  0x18   :  { %146 = vmatprep.subr.bf16.mxu0 %v282_v13 }
  0x1b   :  { %147 = vmatpush1.bf16.msra.mxu0 %v284_v14 }
  0x1c   :  { %148 = vmatprep.subr.bf16.mxu0 %v285_v15 }
  0x1f   :  { %149 = vmatpush1.bf16.msra.mxu0 %v287_v16 }
  0x22   :  { %167 = vmatmul.mubr.bf16.vlgmr.msra.gmra.mxu0 %v288_v17 }
  0xe2   :  { %v168_v26 = vpop.f32.mrf.mxu0 }
  0xe3   :  { %v204_v27 = vmul.f32 %v197_v23, %v168_v26 }
  0xe4   :  { %v170_v30 = vpop.f32.mrf.mxu0 }
  0xe5   :  { %v205_v31 = vmul.f32 %v201_v25, %v170_v30  ;;  %v220_v33 = vadd.f32 %v213_v28, %v204_v27 }
  0xe6   :  { %v172_v32 = vpop.f32.mrf.mxu0 }
  0xe7   :  { %v221_v34 = vadd.f32 %v217_v29, %v205_v31  ;;  %v206_v35 = vmul.f32 %v197_v23, %v172_v32 }
  0xe8   :  { %v174_v36 = vpop.f32.mrf.mxu0 }
  0xe9   :  { %v261_v37 = vpack.c.bf16 %v221_v34, %v220_v33  ;;  %v207_v38 = vmul.f32 %v201_v25, %v174_v36  ;;  %v222_v39 = vadd.f32 %v213_v28, %v206_v35 }
  0xeb   :  { %236 = vst [vmem:[%s382_s4] sm:$0xff] %v261_v37  ;;  %v223_v40 = vadd.f32 %v217_v29, %v207_v38 }
  0xed   :  { %v262_v41 = vpack.c.bf16 %v223_v40, %v222_v39 }
  0xef   :  { %237 = vst [vmem:[%s382_s4 + $0x8] sm:$0xff] %v262_v41 }

// kernel: encoder_forward.37
= control target key start
LH: loop header
LB: loop body
LE: loop exit
PB: predicated region body
PF: predicated region fallthrough
CT: control target
= control target key end

     0   :  { %s1139_s18 = smov 0   ;;  %s1141_s19 = smov 0   ;;  %s1265_s0 = inlined_call_operand.vmem [shape: bf16[16,2304], index: 0, kind: input, shape index: {}]   ;;  %s1266_s1 = inlined_call_operand.vmem [shape: bf16[2304,256], index: 1, kind: input, shape index: {}]   ;;  %s1267_s2 = inlined_call_operand.vmem [shape: f32[1,256], index: 2, kind: input, shape index: {}]   ;;  %s1268_s3 = inlined_call_operand.vmem [shape: f32[1,256], index: 3, kind: input, shape index: {}]   ;;  %s1269_s4 = inlined_call_operand.vmem [shape: bf16[16,256], index: 4, kind: input, shape index: {}]   ;;  %s1270_s5 = inlined_call_operand.vmem [shape: bf16[16,256], index: 5, kind: output, shape index: {}]  }
   0x1   :  { %s1143_s20 = smov 0   ;;  %s1145_s21 = smov 0  }
   0x2   :  { %s1147_s22 = smov 0  }
   0x3 LB: > { %s27_s23 = sadd.s32 1, %s1102_s21  ;;  %p50_p1 = scmp.ne.s32.totalorder %s1094_s19, %s1090_s18  ;;  %s1106_s22 = sphi %s1147_s22, %s15_s22   ;;  %s1102_s21 = sphi %s1145_s21, %s1274_s21   ;;  %s1098_s20 = sphi %s1143_s20, %s1273_s20   ;;  %s1094_s19 = sphi %s1141_s19, %s1272_s19   ;;  %s1090_s18 = sphi %s1139_s18, %s1271_s18  }
   0x4   : > { %p28_p0 = scmp.ge.s32.totalorder %s27_s23, 9  ;;  %p51_p2 = scmp.eq.s32.totalorder %s1106_s22, 0 }
   0x5   : > { %s43_s25 = sadd.s32 1, %s1094_s19  ;;  %p921_p5 = scmp.ge.s32.totalorder %s1106_s22, 9 }
   0x6   : > { %s1276_s23 = smov (%p28_p0, %s27_s23), 0  ;;  %p52_p3 = por %p51_p2, %p50_p1 }
   0x7   : > { %s39_s24 = ssub.s32 %s1102_s21, %s1276_s23  ;;  %243 = sbr.rel (%p921_p5) target bundleno = 17 (0x11), region = 28 }
   0x8   : > { %p41_p4 = scmp.eq.s32.totalorder %s39_s24, 0 }
   0xa   : > { %s1174_s26 = scalar_select %p41_p4, %s1094_s19, %s43_s25  }
   0xc   : > { %246 = sbr.rel (!%p52_p3) target bundleno = 17 (0x11), region = 32  ;;  %s248_s27 = sand.u32 (%p52_p3), 1, %s1094_s19  }
   0xd   : > { %s972_s28 = sshll.u32 (%p52_p3), %s1102_s21, 3  ;;  %s922_s29 = sshll.u32 (%p52_p3), %s248_s27, 4 }
   0xe   : > { %s256_s7 = scalar_lea.vmem (%p52_p3), %s1265_s0, %s972_s28  ;;  %s250_s8 = scalar_lea.vmem (%p52_p3), [#allocation3], %s922_s29 }
   0xf   : > { %v287_v0 = vld [vmem:[%s256_s7] sm:$0xff] (%p52_p3)  ;;  %v289_v1 = vld [vmem:[%s256_s7 + $0x48] sm:$0xff] (%p52_p3) }
  0x10   : > { %288 = vst [vmem:[%s250_s8] sm:$0xff] (%p52_p3), %v287_v0  ;;  %290 = vst [vmem:[%s250_s8 + $0x8] sm:$0xff] (%p52_p3), %v289_v1 }
  0x11 PF: > { %p925_p6 = scmp.ge.s32.totalorder %s1106_s22, 1  ;;  %p310_p7 = scmp.lt.s32.totalorder %s1106_s22, 10 }
  0x13   : > { %p311_p8 = pnand %p925_p6, %p310_p7 }
  0x14   : > { %s317_s9 = sand.u32 (!%p311_p8), 1, %s1090_s18   ;;  %s927_s10 = sshll.u32 (!%p311_p8), %s1098_s20, 5 }
  0x15   : > { %314 = sbr.rel (%p311_p8) target bundleno = 320 (0x140), region = 74  ;;  %s1186_s11 = sshll.u32 (!%p311_p8), %s317_s9, 4 }
  0x16   : > { %p381_p9 = scmp.lt.s32.totalorder (!%p311_p8), %s927_s10, 287  ;;  %s319_s16 = scalar_lea.vmem (!%p311_p8), [#allocation3], %s1186_s11 }
  0x17   : > { %p930_p10 = scmp.ne.s32.totalorder (!%p311_p8), %s1098_s20, 0 }
  0x1a   : > { %s1278_s10 = smov (!%p381_p9, %s927_s10), 287  ;;  %428 = sbr.rel (%p930_p10) target bundleno = 34 (0x22), region = 82 }
  0x1b   : > { %s973_s12 = sshll.u32 %s1278_s10, 3 }
  0x1c   : > { %s1191_s15 = scalar_lea.vmem %s1266_s1, %s973_s12 }
  0x1f   : > { %v1108_v2 = vmov 0.0  }
  0x20   : > { %429 = vst [vmem:[#allocation2 + $0x10] sm:$0xff] %v1108_v2  ;;  %430 = vst [vmem:[#allocation2] sm:$0xff] %v1108_v2 }
  0x21   : > { %431 = vst [vmem:[#allocation2 + $0x18] sm:$0xff] %v1108_v2  ;;  %432 = vst [vmem:[#allocation2 + $0x8] sm:$0xff] %v1108_v2 }
  0x22 PF: > { %v1017_v3 = vld [vmem:[%s1191_s15 + $0x74] ss:$8 sps:$4 sm:$0xff]   ;;  %v1019_v4 = vld [vmem:[%s1191_s15 + $0x70] ss:$8 sps:$4 sm:$0xff]   ;;  %v1020_v5 = vld [vmem:[%s1191_s15 + $0x64] ss:$8 sps:$4 sm:$0xff]  }
  0x23   : > { %641 = vmatprep.subr.bf16.mxu0 %v1017_v3  ;;  %v1022_v6 = vld [vmem:[%s1191_s15 + $0x60] ss:$8 sps:$4 sm:$0xff]   ;;  %v1023_v7 = vld [vmem:[%s1191_s15 + $0x54] ss:$8 sps:$4 sm:$0xff]   ;;  %v1025_v8 = vld [vmem:[%s1191_s15 + $0x50] ss:$8 sps:$4 sm:$0xff]  }
  0x24   : > { %642 = vmatpush1.bf16.msra.mxu0 %v1019_v4  ;;  %v1026_v9 = vld [vmem:[%s1191_s15 + $0x44] ss:$8 sps:$4 sm:$0xff]   ;;  %v1028_v10 = vld [vmem:[%s1191_s15 + $0x40] ss:$8 sps:$4 sm:$0xff]   ;;  %v1029_v11 = vld [vmem:[%s1191_s15 + $0x34] ss:$8 sps:$4 sm:$0xff]  }
  0x25   : > { %643 = vmatprep.subr.bf16.mxu0 %v1020_v5  ;;  %v1031_v12 = vld [vmem:[%s1191_s15 + $0x30] ss:$8 sps:$4 sm:$0xff]   ;;  %v1032_v13 = vld [vmem:[%s1191_s15 + $0x24] ss:$8 sps:$4 sm:$0xff]   ;;  %v1034_v14 = vld [vmem:[%s1191_s15 + $0x20] ss:$8 sps:$4 sm:$0xff]  }
  0x26   : > { %v1035_v15 = vld [vmem:[%s1191_s15 + $0x14] ss:$8 sps:$4 sm:$0xff]   ;;  %v1037_v17 = vld [vmem:[%s1191_s15 + $0x10] ss:$8 sps:$4 sm:$0xff]   ;;  %v1038_v18 = vld [vmem:[%s1191_s15 + $0x4] ss:$8 sps:$4 sm:$0xff]  }
  0x27   : > { %v1067_v16 = vld [vmem:[%s319_s16 + $0x4] ss:$8 sps:$4 sm:$0xff]   ;;  %v1040_v19 = vld [vmem:[%s1191_s15] ss:$8 sps:$4 sm:$0xff]   ;;  %v1043_v21 = vld [vmem:[%s1191_s15 + $0xf0] ss:$8 sps:$4 sm:$0xff]  }
  0x28   : > { %644 = vmatpush1.bf16.msra.mxu0 %v1022_v6  ;;  %673 = vmatprep.mubr.bf16.mxu0 %v1067_v16  ;;  %v1041_v20 = vld [vmem:[%s1191_s15 + $0xf4] ss:$8 sps:$4 sm:$0xff]   ;;  %v1044_v22 = vld [vmem:[%s1191_s15 + $0xe4] ss:$8 sps:$4 sm:$0xff]   ;;  %v1046_v23 = vld [vmem:[%s1191_s15 + $0xe0] ss:$8 sps:$4 sm:$0xff]  }
  0x29   : > { %645 = vmatprep.subr.bf16.mxu0 %v1023_v7  ;;  %v1047_v24 = vld [vmem:[%s1191_s15 + $0xd4] ss:$8 sps:$4 sm:$0xff]   ;;  %v1049_v25 = vld [vmem:[%s1191_s15 + $0xd0] ss:$8 sps:$4 sm:$0xff]   ;;  %v1050_v26 = vld [vmem:[%s1191_s15 + $0xc4] ss:$8 sps:$4 sm:$0xff]  }
  0x2a   : > { %v1052_v27 = vld [vmem:[%s1191_s15 + $0xc0] ss:$8 sps:$4 sm:$0xff]   ;;  %v1053_v28 = vld [vmem:[%s1191_s15 + $0xb4] ss:$8 sps:$4 sm:$0xff]   ;;  %v1055_v29 = vld [vmem:[%s1191_s15 + $0xb0] ss:$8 sps:$4 sm:$0xff]  }
  0x2b   : > { %v1056_v30 = vld [vmem:[%s1191_s15 + $0xa4] ss:$8 sps:$4 sm:$0xff]   ;;  %v1058_v31 = vld [vmem:[%s1191_s15 + $0xa0] ss:$8 sps:$4 sm:$0xff]   ;;  %v1059_v32 = vld [vmem:[%s1191_s15 + $0x94] ss:$8 sps:$4 sm:$0xff]  }
  0x2c   : > { %646 = vmatpush1.bf16.msra.mxu0 %v1025_v8  ;;  %v1061_v33 = vld [vmem:[%s1191_s15 + $0x90] ss:$8 sps:$4 sm:$0xff]   ;;  %v1062_v34 = vld [vmem:[%s1191_s15 + $0x84] ss:$8 sps:$4 sm:$0xff]   ;;  %v1064_v35 = vld [vmem:[%s1191_s15 + $0x80] ss:$8 sps:$4 sm:$0xff]  }
  0x2d   : > { %647 = vmatprep.subr.bf16.mxu0 %v1026_v9  ;;  %v1065_v36 = vld [vmem:[%s319_s16] ss:$8 sps:$4 sm:$0xff]   ;;  %p965_p11 = scmp.ne.s32.totalorder %s1098_s20, 8 }
  0x2e   : > { %v433_v37 = vld [vmem:[#allocation2 + $0x10] sm:$0xff]  ;;  %v434_v39 = vld [vmem:[#allocation2] sm:$0xff]  ;;  %v435_v42 = vld [vmem:[#allocation2 + $0x18] sm:$0xff] }
  0x2f   : > { %v436_v45 = vld [vmem:[#allocation2 + $0x8] sm:$0xff] }
  0x30   : > { %648 = vmatpush1.bf16.msra.mxu0 %v1028_v10 }
  0x31   : > { %649 = vmatprep.subr.bf16.mxu0 %v1029_v11 }
  0x34   : > { %650 = vmatpush1.bf16.msra.mxu0 %v1031_v12 }
  0x35   : > { %651 = vmatprep.subr.bf16.mxu0 %v1032_v13 }
  0x38   : > { %652 = vmatpush1.bf16.msra.mxu0 %v1034_v14 }
  0x39   : > { %653 = vmatprep.subr.bf16.mxu0 %v1035_v15 }
  0x3c   : > { %654 = vmatpush1.bf16.msra.mxu0 %v1037_v17 }
  0x3d   : > { %655 = vmatprep.subr.bf16.mxu0 %v1038_v18 }
  0x40   : > { %656 = vmatpush1.bf16.msra.mxu0 %v1040_v19 }
  0x41   : > { %657 = vmatprep.subr.bf16.mxu0 %v1041_v20 }
  0x44   : > { %658 = vmatpush2.bf16.msra.mxu0 %v1043_v21 }
  0x45   : > { %659 = vmatprep.subr.bf16.mxu0 %v1044_v22 }
  0x48   : > { %660 = vmatpush2.bf16.msra.mxu0 %v1046_v23 }
  0x49   : > { %661 = vmatprep.subr.bf16.mxu0 %v1047_v24 }
  0x4c   : > { %662 = vmatpush2.bf16.msra.mxu0 %v1049_v25 }
  0x4d   : > { %663 = vmatprep.subr.bf16.mxu0 %v1050_v26 }
  0x50   : > { %664 = vmatpush2.bf16.msra.mxu0 %v1052_v27 }
  0x51   : > { %665 = vmatprep.subr.bf16.mxu0 %v1053_v28 }
  0x54   : > { %666 = vmatpush2.bf16.msra.mxu0 %v1055_v29 }
  0x55   : > { %667 = vmatprep.subr.bf16.mxu0 %v1056_v30 }
  0x58   : > { %668 = vmatpush2.bf16.msra.mxu0 %v1058_v31 }
  0x59   : > { %669 = vmatprep.subr.bf16.mxu0 %v1059_v32 }
  0x5c   : > { %670 = vmatpush2.bf16.msra.mxu0 %v1061_v33 }
  0x5d   : > { %671 = vmatprep.subr.bf16.mxu0 %v1062_v34 }
  0x60   : > { %672 = vmatpush2.bf16.msra.mxu0 %v1064_v35 }
  0x63   : > { %674 = vmatmul.mubr.bf16.vlgmr.msra.gmra.mxu0 %v1065_v36 }
 0x123   : > { %v675_v38 = vpop.f32.mrf.mxu0 }
 0x124   : > { %v684_v40 = vadd.f32 %v675_v38, %v433_v37 }
 0x125   : > { %v677_v41 = vpop.f32.mrf.mxu0 }
 0x126   : > { %688 = vst [vmem:[#allocation2 + $0x10] sm:$0xff] %v684_v40  ;;  %v685_v43 = vadd.f32 %v677_v41, %v434_v39 }
 0x127   : > { %v679_v44 = vpop.f32.mrf.mxu0 }
 0x128   : > { %689 = vst [vmem:[#allocation2] sm:$0xff] %v685_v43  ;;  %v686_v46 = vadd.f32 %v679_v44, %v435_v42  ;;  %695 = sbr.rel (%p965_p11) target bundleno = 320 (0x140), region = 86 }
 0x129   : > { %v681_v47 = vpop.f32.mrf.mxu0 }
 0x12a   : > { %690 = vst [vmem:[#allocation2 + $0x18] sm:$0xff] %v686_v46  ;;  %v687_v48 = vadd.f32 %v681_v47, %v436_v45 }
 0x12c   : > { %691 = vst [vmem:[#allocation2 + $0x8] sm:$0xff] %v687_v48 }
 0x12d   : > { %v702_v49 = vlaneseq  ;;  %v700_v51 = vld [vmem:[%s1267_s2] sm:$0x3]  ;;  %v696_v53 = vld [vmem:[#allocation2 + $0x10] sm:$0xff]  ;;  %v733_v57 = vld [vmem:[%s1269_s4 + $0x8] sm:$0xff] }
 0x12e   : > { %v716_v52 = vld [vmem:[%s1268_s3] sm:$0x3]  ;;  %v736_v3 = vunpack.c.l.bf16 %v733_v57  ;;  %v737_v4 = vunpack.c.h.bf16 %v733_v57 }
 0x12f   : > { %v703_v50 = vshrl.u32 %v702_v49, 7  ;;  %v732_v56 = vld [vmem:[%s1269_s4] sm:$0xff] }
 0x130   : > { %v697_v58 = vld [vmem:[#allocation2] sm:$0xff]  ;;  %v734_v1 = vunpack.c.l.bf16 %v732_v56  ;;  %v735_v2 = vunpack.c.h.bf16 %v732_v56 }
 0x131   : > { %v704_v54 = vsub.s32 0, %v703_v50  ;;  %v708_v55 = vsub.s32 1, %v703_v50  ;;  %v698_v59 = vld [vmem:[#allocation2 + $0x18] sm:$0xff] }
 0x133   : > { %v699_v60 = vld [vmem:[#allocation2 + $0x8] sm:$0xff]  ;;  %v705_v61 = vrot.slane %v700_v51, %v704_v54  ;;  %v709_v62 = vrot.slane %v700_v51, %v708_v55  ;;  %v721_v63 = vrot.slane %v716_v52, %v704_v54  ;;  %v725_v0 = vrot.slane %v716_v52, %v708_v55 }
 0x135   : > { %v712_v5 = vmul.f32 %v705_v61, %v696_v53  ;;  %v713_v6 = vmul.f32 %v709_v62, %v697_v58  ;;  %v714_v7 = vmul.f32 %v705_v61, %v698_v59  ;;  %v715_v8 = vmul.f32 %v709_v62, %v699_v60 }
 0x137   : > { %v728_v9 = vadd.f32 %v721_v63, %v712_v5  ;;  %v729_v10 = vadd.f32 %v725_v0, %v713_v6  ;;  %v730_v11 = vadd.f32 %v721_v63, %v714_v7  ;;  %v731_v12 = vadd.f32 %v725_v0, %v715_v8 }
 0x139   : > { %v738_v13 = vadd.f32 %v734_v1, %v728_v9  ;;  %v739_v14 = vadd.f32 %v735_v2, %v729_v10  ;;  %v740_v15 = vadd.f32 %v736_v3, %v730_v11  ;;  %v741_v16 = vadd.f32 %v737_v4, %v731_v12 }
 0x13b   : > { %v742_v17 = vmax.f32 %v738_v13, 0.0  ;;  %v743_v18 = vmax.f32 %v739_v14, 0.0  ;;  %v744_v19 = vmax.f32 %v740_v15, 0.0  ;;  %v745_v20 = vmax.f32 %v741_v16, 0.0 }
 0x13d   : > { %v974_v21 = vpack.c.bf16 %v743_v18, %v742_v17  ;;  %v975_v22 = vpack.c.bf16 %v745_v20, %v744_v19 }
 0x13f   : > { %758 = vst [vmem:[%s1270_s5] sm:$0xff] %v974_v21  ;;  %759 = vst [vmem:[%s1270_s5 + $0x8] sm:$0xff] %v975_v22 }
 0x140 PF: > { %s15_s22 = sadd.s32 1, %s1106_s22   ;;  %s1271_s18 = smov %s1094_s19 }
 0x141   : > { %p12_p12 = scmp.ge.s32.totalorder %s15_s22, 11   ;;  %s1272_s19 = smov %s1174_s26 }
 0x142   : > { %s1273_s20 = smov %s1102_s21  ;;  %s1274_s21 = smov %s1276_s23 }
 0x143   :  { %14 = sbr.rel (!%p12_p12) target bundleno = 3 (0x3), region = 133 }

// kernel: encoder_forward.38
= control target key start
LH: loop header
LB: loop body
LE: loop exit
PB: predicated region body
PF: predicated region fallthrough
CT: control target
= control target key end

     0   :  { %s1034_s15 = smov 0   ;;  %s1036_s16 = smov 0   ;;  %s1154_s0 = inlined_call_operand.vmem [shape: bf16[16,2304], index: 0, kind: input, shape index: {}]   ;;  %s1155_s1 = inlined_call_operand.vmem [shape: bf16[2304,256], index: 1, kind: input, shape index: {}]   ;;  %s1156_s2 = inlined_call_operand.vmem [shape: f32[1,256], index: 2, kind: input, shape index: {}]   ;;  %s1157_s3 = inlined_call_operand.vmem [shape: f32[1,256], index: 3, kind: input, shape index: {}]   ;;  %s1158_s4 = inlined_call_operand.vmem [shape: bf16[16,256], index: 4, kind: output, shape index: {}]  }
   0x1   :  { %s1038_s17 = smov 0   ;;  %s1040_s18 = smov 0  }
   0x2   :  { %s1042_s19 = smov 0  }
   0x3 LB: > { %s26_s20 = sadd.s32 1, %s1002_s18  ;;  %p49_p1 = scmp.ne.s32.totalorder %s994_s16, %s990_s15  ;;  %s1006_s19 = sphi %s1042_s19, %s14_s19   ;;  %s1002_s18 = sphi %s1040_s18, %s1162_s18   ;;  %s998_s17 = sphi %s1038_s17, %s1161_s17   ;;  %s994_s16 = sphi %s1036_s16, %s1160_s16   ;;  %s990_s15 = sphi %s1034_s15, %s1159_s15  }
   0x4   : > { %p27_p0 = scmp.ge.s32.totalorder %s26_s20, 9  ;;  %p50_p2 = scmp.eq.s32.totalorder %s1006_s19, 0 }
   0x5   : > { %s42_s22 = sadd.s32 1, %s994_s16  ;;  %p821_p5 = scmp.ge.s32.totalorder %s1006_s19, 9 }
   0x6   : > { %s1164_s20 = smov (%p27_p0, %s26_s20), 0  ;;  %p51_p3 = por %p50_p2, %p49_p1 }
   0x7   : > { %s38_s21 = ssub.s32 %s1002_s18, %s1164_s20  ;;  %199 = sbr.rel (%p821_p5) target bundleno = 17 (0x11), region = 24 }
   0x8   : > { %p40_p4 = scmp.eq.s32.totalorder %s38_s21, 0 }
   0xa   : > { %s1069_s23 = scalar_select %p40_p4, %s994_s16, %s42_s22  }
   0xc   : > { %202 = sbr.rel (!%p51_p3) target bundleno = 17 (0x11), region = 28  ;;  %s204_s24 = sand.u32 (%p51_p3), 1, %s994_s16  }
   0xd   : > { %s872_s25 = sshll.u32 (%p51_p3), %s1002_s18, 3  ;;  %s822_s26 = sshll.u32 (%p51_p3), %s204_s24, 4 }
   0xe   : > { %s212_s29 = scalar_lea.vmem (%p51_p3), %s1154_s0, %s872_s25  ;;  %s206_s30 = scalar_lea.vmem (%p51_p3), [#allocation3], %s822_s26 }
   0xf   : > { %v243_v0 = vld [vmem:[%s212_s29] sm:$0xff] (%p51_p3)  ;;  %v245_v1 = vld [vmem:[%s212_s29 + $0x48] sm:$0xff] (%p51_p3) }
  0x10   : > { %244 = vst [vmem:[%s206_s30] sm:$0xff] (%p51_p3), %v243_v0  ;;  %246 = vst [vmem:[%s206_s30 + $0x8] sm:$0xff] (%p51_p3), %v245_v1 }
  0x11 PF: > { %p825_p6 = scmp.ge.s32.totalorder %s1006_s19, 1  ;;  %p266_p7 = scmp.lt.s32.totalorder %s1006_s19, 10 }
  0x13   : > { %p267_p8 = pnand %p825_p6, %p266_p7 }
  0x14   : > { %s273_s5 = sand.u32 (!%p267_p8), 1, %s990_s15   ;;  %s827_s6 = sshll.u32 (!%p267_p8), %s998_s17, 5 }
  0x15   : > { %270 = sbr.rel (%p267_p8) target bundleno = 318 (0x13e), region = 70  ;;  %s1081_s7 = sshll.u32 (!%p267_p8), %s273_s5, 4 }
  0x16   : > { %p325_p9 = scmp.lt.s32.totalorder (!%p267_p8), %s827_s6, 287  ;;  %s275_s12 = scalar_lea.vmem (!%p267_p8), [#allocation3], %s1081_s7 }
  0x17   : > { %p830_p10 = scmp.ne.s32.totalorder (!%p267_p8), %s998_s17, 0 }
  0x1a   : > { %s1166_s6 = smov (!%p325_p9, %s827_s6), 287  ;;  %360 = sbr.rel (%p830_p10) target bundleno = 34 (0x22), region = 78 }
  0x1b   : > { %s873_s8 = sshll.u32 %s1166_s6, 3 }
  0x1c   : > { %s1086_s11 = scalar_lea.vmem %s1155_s1, %s873_s8 }
  0x1f   : > { %v1008_v2 = vmov 0.0  }
  0x20   : > { %361 = vst [vmem:[#allocation2 + $0x10] sm:$0xff] %v1008_v2  ;;  %362 = vst [vmem:[#allocation2] sm:$0xff] %v1008_v2 }
  0x21   : > { %363 = vst [vmem:[#allocation2 + $0x18] sm:$0xff] %v1008_v2  ;;  %364 = vst [vmem:[#allocation2 + $0x8] sm:$0xff] %v1008_v2 }
  0x22 PF: > { %v917_v3 = vld [vmem:[%s1086_s11 + $0x74] ss:$8 sps:$4 sm:$0xff]   ;;  %v919_v4 = vld [vmem:[%s1086_s11 + $0x70] ss:$8 sps:$4 sm:$0xff]   ;;  %v920_v5 = vld [vmem:[%s1086_s11 + $0x64] ss:$8 sps:$4 sm:$0xff]  }
  0x23   : > { %573 = vmatprep.subr.bf16.mxu0 %v917_v3  ;;  %v922_v6 = vld [vmem:[%s1086_s11 + $0x60] ss:$8 sps:$4 sm:$0xff]   ;;  %v923_v7 = vld [vmem:[%s1086_s11 + $0x54] ss:$8 sps:$4 sm:$0xff]   ;;  %v925_v8 = vld [vmem:[%s1086_s11 + $0x50] ss:$8 sps:$4 sm:$0xff]  }
  0x24   : > { %574 = vmatpush1.bf16.msra.mxu0 %v919_v4  ;;  %v926_v9 = vld [vmem:[%s1086_s11 + $0x44] ss:$8 sps:$4 sm:$0xff]   ;;  %v928_v10 = vld [vmem:[%s1086_s11 + $0x40] ss:$8 sps:$4 sm:$0xff]   ;;  %v929_v11 = vld [vmem:[%s1086_s11 + $0x34] ss:$8 sps:$4 sm:$0xff]  }
  0x25   : > { %575 = vmatprep.subr.bf16.mxu0 %v920_v5  ;;  %v931_v12 = vld [vmem:[%s1086_s11 + $0x30] ss:$8 sps:$4 sm:$0xff]   ;;  %v932_v13 = vld [vmem:[%s1086_s11 + $0x24] ss:$8 sps:$4 sm:$0xff]   ;;  %v934_v14 = vld [vmem:[%s1086_s11 + $0x20] ss:$8 sps:$4 sm:$0xff]  }
  0x26   : > { %v935_v15 = vld [vmem:[%s1086_s11 + $0x14] ss:$8 sps:$4 sm:$0xff]   ;;  %v937_v17 = vld [vmem:[%s1086_s11 + $0x10] ss:$8 sps:$4 sm:$0xff]   ;;  %v938_v18 = vld [vmem:[%s1086_s11 + $0x4] ss:$8 sps:$4 sm:$0xff]  }
  0x27   : > { %v967_v16 = vld [vmem:[%s275_s12 + $0x4] ss:$8 sps:$4 sm:$0xff]   ;;  %v940_v19 = vld [vmem:[%s1086_s11] ss:$8 sps:$4 sm:$0xff]   ;;  %v943_v21 = vld [vmem:[%s1086_s11 + $0xf0] ss:$8 sps:$4 sm:$0xff]  }
  0x28   : > { %576 = vmatpush1.bf16.msra.mxu0 %v922_v6  ;;  %605 = vmatprep.mubr.bf16.mxu0 %v967_v16  ;;  %v941_v20 = vld [vmem:[%s1086_s11 + $0xf4] ss:$8 sps:$4 sm:$0xff]   ;;  %v944_v22 = vld [vmem:[%s1086_s11 + $0xe4] ss:$8 sps:$4 sm:$0xff]   ;;  %v946_v23 = vld [vmem:[%s1086_s11 + $0xe0] ss:$8 sps:$4 sm:$0xff]  }
  0x29   : > { %577 = vmatprep.subr.bf16.mxu0 %v923_v7  ;;  %v947_v24 = vld [vmem:[%s1086_s11 + $0xd4] ss:$8 sps:$4 sm:$0xff]   ;;  %v949_v25 = vld [vmem:[%s1086_s11 + $0xd0] ss:$8 sps:$4 sm:$0xff]   ;;  %v950_v26 = vld [vmem:[%s1086_s11 + $0xc4] ss:$8 sps:$4 sm:$0xff]  }
  0x2a   : > { %v952_v27 = vld [vmem:[%s1086_s11 + $0xc0] ss:$8 sps:$4 sm:$0xff]   ;;  %v953_v28 = vld [vmem:[%s1086_s11 + $0xb4] ss:$8 sps:$4 sm:$0xff]   ;;  %v955_v29 = vld [vmem:[%s1086_s11 + $0xb0] ss:$8 sps:$4 sm:$0xff]  }
  0x2b   : > { %v956_v30 = vld [vmem:[%s1086_s11 + $0xa4] ss:$8 sps:$4 sm:$0xff]   ;;  %v958_v31 = vld [vmem:[%s1086_s11 + $0xa0] ss:$8 sps:$4 sm:$0xff]   ;;  %v959_v32 = vld [vmem:[%s1086_s11 + $0x94] ss:$8 sps:$4 sm:$0xff]  }
  0x2c   : > { %578 = vmatpush1.bf16.msra.mxu0 %v925_v8  ;;  %v961_v33 = vld [vmem:[%s1086_s11 + $0x90] ss:$8 sps:$4 sm:$0xff]   ;;  %v962_v34 = vld [vmem:[%s1086_s11 + $0x84] ss:$8 sps:$4 sm:$0xff]   ;;  %v964_v35 = vld [vmem:[%s1086_s11 + $0x80] ss:$8 sps:$4 sm:$0xff]  }
  0x2d   : > { %579 = vmatprep.subr.bf16.mxu0 %v926_v9  ;;  %v965_v36 = vld [vmem:[%s275_s12] ss:$8 sps:$4 sm:$0xff]   ;;  %p865_p11 = scmp.ne.s32.totalorder %s998_s17, 8 }
  0x2e   : > { %v365_v37 = vld [vmem:[#allocation2 + $0x10] sm:$0xff]  ;;  %v366_v39 = vld [vmem:[#allocation2] sm:$0xff]  ;;  %v367_v42 = vld [vmem:[#allocation2 + $0x18] sm:$0xff] }
  0x2f   : > { %v368_v45 = vld [vmem:[#allocation2 + $0x8] sm:$0xff] }
  0x30   : > { %580 = vmatpush1.bf16.msra.mxu0 %v928_v10 }
  0x31   : > { %581 = vmatprep.subr.bf16.mxu0 %v929_v11 }
  0x34   : > { %582 = vmatpush1.bf16.msra.mxu0 %v931_v12 }
  0x35   : > { %583 = vmatprep.subr.bf16.mxu0 %v932_v13 }
  0x38   : > { %584 = vmatpush1.bf16.msra.mxu0 %v934_v14 }
  0x39   : > { %585 = vmatprep.subr.bf16.mxu0 %v935_v15 }
  0x3c   : > { %586 = vmatpush1.bf16.msra.mxu0 %v937_v17 }
  0x3d   : > { %587 = vmatprep.subr.bf16.mxu0 %v938_v18 }
  0x40   : > { %588 = vmatpush1.bf16.msra.mxu0 %v940_v19 }
  0x41   : > { %589 = vmatprep.subr.bf16.mxu0 %v941_v20 }
  0x44   : > { %590 = vmatpush2.bf16.msra.mxu0 %v943_v21 }
  0x45   : > { %591 = vmatprep.subr.bf16.mxu0 %v944_v22 }
  0x48   : > { %592 = vmatpush2.bf16.msra.mxu0 %v946_v23 }
  0x49   : > { %593 = vmatprep.subr.bf16.mxu0 %v947_v24 }
  0x4c   : > { %594 = vmatpush2.bf16.msra.mxu0 %v949_v25 }
  0x4d   : > { %595 = vmatprep.subr.bf16.mxu0 %v950_v26 }
  0x50   : > { %596 = vmatpush2.bf16.msra.mxu0 %v952_v27 }
  0x51   : > { %597 = vmatprep.subr.bf16.mxu0 %v953_v28 }
  0x54   : > { %598 = vmatpush2.bf16.msra.mxu0 %v955_v29 }
  0x55   : > { %599 = vmatprep.subr.bf16.mxu0 %v956_v30 }
  0x58   : > { %600 = vmatpush2.bf16.msra.mxu0 %v958_v31 }
  0x59   : > { %601 = vmatprep.subr.bf16.mxu0 %v959_v32 }
  0x5c   : > { %602 = vmatpush2.bf16.msra.mxu0 %v961_v33 }
  0x5d   : > { %603 = vmatprep.subr.bf16.mxu0 %v962_v34 }
  0x60   : > { %604 = vmatpush2.bf16.msra.mxu0 %v964_v35 }
  0x63   : > { %606 = vmatmul.mubr.bf16.vlgmr.msra.gmra.mxu0 %v965_v36 }
 0x123   : > { %v607_v38 = vpop.f32.mrf.mxu0 }
 0x124   : > { %v616_v40 = vadd.f32 %v607_v38, %v365_v37 }
 0x125   : > { %v609_v41 = vpop.f32.mrf.mxu0 }
 0x126   : > { %620 = vst [vmem:[#allocation2 + $0x10] sm:$0xff] %v616_v40  ;;  %v617_v43 = vadd.f32 %v609_v41, %v366_v39 }
 0x127   : > { %v611_v44 = vpop.f32.mrf.mxu0 }
 0x128   : > { %621 = vst [vmem:[#allocation2] sm:$0xff] %v617_v43  ;;  %v618_v46 = vadd.f32 %v611_v44, %v367_v42  ;;  %627 = sbr.rel (%p865_p11) target bundleno = 318 (0x13e), region = 82 }
 0x129   : > { %v613_v47 = vpop.f32.mrf.mxu0 }
 0x12a   : > { %622 = vst [vmem:[#allocation2 + $0x18] sm:$0xff] %v618_v46  ;;  %v619_v48 = vadd.f32 %v613_v47, %v368_v45 }
 0x12c   : > { %623 = vst [vmem:[#allocation2 + $0x8] sm:$0xff] %v619_v48 }
 0x12d   : > { %v634_v49 = vlaneseq  ;;  %v632_v51 = vld [vmem:[%s1156_s2] sm:$0x3]  ;;  %v628_v53 = vld [vmem:[#allocation2 + $0x10] sm:$0xff] }
 0x12e   : > { %v648_v52 = vld [vmem:[%s1157_s3] sm:$0x3] }
 0x12f   : > { %v635_v50 = vshrl.u32 %v634_v49, 7  ;;  %v629_v56 = vld [vmem:[#allocation2] sm:$0xff] }
 0x131   : > { %v636_v54 = vsub.s32 0, %v635_v50  ;;  %v640_v55 = vsub.s32 1, %v635_v50  ;;  %v630_v57 = vld [vmem:[#allocation2 + $0x18] sm:$0xff] }
 0x133   : > { %v631_v58 = vld [vmem:[#allocation2 + $0x8] sm:$0xff]  ;;  %v637_v59 = vrot.slane %v632_v51, %v636_v54  ;;  %v641_v60 = vrot.slane %v632_v51, %v640_v55  ;;  %v653_v61 = vrot.slane %v648_v52, %v636_v54  ;;  %v657_v62 = vrot.slane %v648_v52, %v640_v55 }
 0x135   : > { %v644_v63 = vmul.f32 %v637_v59, %v628_v53  ;;  %v645_v0 = vmul.f32 %v641_v60, %v629_v56  ;;  %v646_v1 = vmul.f32 %v637_v59, %v630_v57  ;;  %v647_v2 = vmul.f32 %v641_v60, %v631_v58 }
 0x137   : > { %v660_v3 = vadd.f32 %v653_v61, %v644_v63  ;;  %v661_v4 = vadd.f32 %v657_v62, %v645_v0  ;;  %v662_v5 = vadd.f32 %v653_v61, %v646_v1  ;;  %v663_v6 = vadd.f32 %v657_v62, %v647_v2 }
 0x139   : > { %v664_v7 = vmax.f32 %v660_v3, 0.0  ;;  %v665_v8 = vmax.f32 %v661_v4, 0.0  ;;  %v666_v9 = vmax.f32 %v662_v5, 0.0  ;;  %v667_v10 = vmax.f32 %v663_v6, 0.0 }
 0x13b   : > { %v874_v11 = vpack.c.bf16 %v665_v8, %v664_v7  ;;  %v875_v12 = vpack.c.bf16 %v667_v10, %v666_v9 }
 0x13d   : > { %680 = vst [vmem:[%s1158_s4] sm:$0xff] %v874_v11  ;;  %681 = vst [vmem:[%s1158_s4 + $0x8] sm:$0xff] %v875_v12 }
 0x13e PF: > { %s14_s19 = sadd.s32 1, %s1006_s19   ;;  %s1159_s15 = smov %s994_s16 }
 0x13f   : > { %p11_p12 = scmp.ge.s32.totalorder %s14_s19, 11   ;;  %s1160_s16 = smov %s1069_s23 }
 0x140   : > { %s1161_s17 = smov %s1002_s18  ;;  %s1162_s18 = smov %s1164_s20 }
 0x141   :  { %13 = sbr.rel (!%p11_p12) target bundleno = 3 (0x3), region = 126 }

// kernel: encoder_forward.40
= control target key start
LH: loop header
LB: loop body
LE: loop exit
PB: predicated region body
PF: predicated region fallthrough
CT: control target
= control target key end

     0   :  { %s1298_s15 = smov 0   ;;  %s1300_s16 = smov 0   ;;  %s1594_s0 = inlined_call_operand.vmem [shape: bf16[16,2304], index: 0, kind: input, shape index: {}]   ;;  %s1595_s1 = inlined_call_operand.vmem [shape: bf16[2304,512], index: 1, kind: input, shape index: {}]   ;;  %s1596_s2 = inlined_call_operand.vmem [shape: f32[1,512], index: 2, kind: input, shape index: {}]   ;;  %s1597_s3 = inlined_call_operand.vmem [shape: f32[1,512], index: 3, kind: input, shape index: {}]   ;;  %s1598_s4 = inlined_call_operand.vmem [shape: bf16[16,512], index: 4, kind: output, shape index: {}]  }
   0x1   :  { %s1302_s17 = smov 0   ;;  %s1304_s18 = smov 0  }
   0x2   :  { %s1306_s19 = smov 0   ;;  %s1308_s20 = smov 0  }
   0x3   :  { %s1310_s21 = smov 0   ;;  %s1312_s22 = smov 0  }
   0x4   :  { %s1314_s23 = smov 0   ;;  %s1316_s24 = smov 0  }
   0x5   :  { %s1318_s25 = smov 0  }
   0x6 LB: > { %1602 = sst [smem:[#allocation6_spill]] %s1250_s20  ;;  %s978_s26 = sadd.s32 4294967295, %s1270_s25   ;;  %s1270_s25 = sphi %s1318_s25, %s14_s25   ;;  %s1266_s24 = sphi %s1316_s24, %s1620_s24   ;;  %s1262_s23 = sphi %s1314_s23, %s1619_s23   ;;  %s1258_s22 = sphi %s1312_s22, %s1618_s22   ;;  %s1254_s21 = sphi %s1310_s21, %s1617_s21   ;;  %s1250_s20 = sphi %s1308_s20, %s1610_s20   ;;  %s1246_s19 = sphi %s1306_s19, %s1609_s19   ;;  %s1242_s18 = sphi %s1304_s18, %s1616_s18   ;;  %s1238_s17 = sphi %s1302_s17, %s1615_s17   ;;  %s1234_s16 = sphi %s1300_s16, %s1614_s16   ;;  %s1230_s15 = sphi %s1298_s15, %s1613_s15  }
   0x7   : > { %s26_s27 = sadd.s32 1, %s1262_s23  ;;  %s29_s28 = sadd.s32 1, %s1266_s24 }
   0x8   : > { %p27_p0 = scmp.ge.s32.totalorder %s26_s27, 9  ;;  %s42_s29 = sadd.s32 1, %s1250_s20 }
   0x9   : > { %p49_p1 = scmp.ne.s32.totalorder %s1250_s20, %s1246_s19  ;;  %p50_p2 = scmp.eq.s32.totalorder %s1270_s25, 0 }
   0xa   : > { %s1622_s27 = smov (%p27_p0, %s26_s27), 0  ;;  %s1624_s28 = smov (!%p27_p0, %s29_s28), %s1266_s24 }
   0xb   : > { %1603 = sst [smem:[#allocation7_spill]] %s1622_s27  ;;  %s38_s30 = ssub.s32 %s1262_s23, %s1622_s27 }
   0xc   : > { %p31_p3 = scmp.ge.s32.totalorder %s1624_s28, 2  ;;  %p40_p4 = scmp.eq.s32.totalorder %s38_s30, 0 }
   0xd   : > { %p1365_p5 = por %p50_p2, %p49_p1  ;;  %s70_s6 = sadd.s32 1, %s1242_s18 }
   0xe   : > { %s1626_s28 = smov (%p31_p3, %s1624_s28), 0  ;;  %p77_p6 = scmp.ne.s32.totalorder %s1242_s18, %s1238_s17 }
   0xf   : > { %1605 = sst [smem:[#allocation8_spill]] %s1626_s28  ;;  %s66_s8 = ssub.s32 %s1266_s24, %s1626_s28 }
  0x10   : > { %s1373_s7 = scalar_select %p40_p4, %s1250_s20, %s42_s29  }
  0x11   : > { %s67_s9 = sor.u32 %s66_s8, %s38_s30  ;;  %p148_p7 = scmp.eq.s32.totalorder %s66_s8, 0 }
  0x12   : > { %1606 = sst [smem:[#allocation9_spill]] %s1373_s7  ;;  %p68_p8 = scmp.eq.s32.totalorder %s67_s9, 0 }
  0x13   : > { %p1379_p9 = por %p77_p6, %p50_p2  ;;  %s150_s11 = sadd.s32 1, %s1234_s16 }
  0x14   : > { %p160_p10 = scmp.ne.s32.totalorder %s1234_s16, %s1230_s15  ;;  %p161_p11 = scmp.eq.s32.totalorder %s978_s26, 17 }
  0x15   : > { %s1387_s12 = scalar_select %p68_p8, %s1242_s18, %s70_s6  }
  0x16   : > { %s1390_s13 = scalar_select %p148_p7, %s1234_s16, %s150_s11  }
  0x17   : > { %p1392_p12 = por %p161_p11, %p160_p10  ;;  %p981_p13 = scmp.ge.s32.totalorder %s1270_s25, 18 }
  0x19   : > { %183 = sbr.rel (%p981_p13) target bundleno = 58 (0x3a), region = 16 }
  0x1e   : > { %186 = sbr.rel (!%p1365_p5) target bundleno = 35 (0x23), region = 20  ;;  %s188_s29 = sand.u32 (%p1365_p5), 1, %s1250_s20  }
  0x1f   : > { %s1039_s30 = sshll.u32 (%p1365_p5), %s1262_s23, 3  ;;  %s982_s8 = sshll.u32 (%p1365_p5), %s188_s29, 4 }
  0x20   : > { %s196_s11 = scalar_lea.vmem (%p1365_p5), %s1594_s0, %s1039_s30  ;;  %s190_s26 = scalar_lea.vmem (%p1365_p5), [#allocation3], %s982_s8 }
  0x21   : > { %v227_v0 = vld [vmem:[%s196_s11] sm:$0xff] (%p1365_p5)  ;;  %v229_v1 = vld [vmem:[%s196_s11 + $0x48] sm:$0xff] (%p1365_p5) }
  0x22   : > { %228 = vst [vmem:[%s190_s26] sm:$0xff] (%p1365_p5), %v227_v0  ;;  %230 = vst [vmem:[%s190_s26 + $0x8] sm:$0xff] (%p1365_p5), %v229_v1 }
  0x23 PF: > { %236 = sbr.rel (!%p1379_p9) target bundleno = 58 (0x3a), region = 58  ;;  %s238_s5 = sand.u32 (%p1379_p9), 1, %s1242_s18  }
  0x24   : > { %s987_s28 = sshll.u32 (%p1379_p9), %s1266_s24, 1  ;;  %s985_s27 = sshll.u32 (%p1379_p9), %s238_s5, 8 }
  0x25   : > { %s1040_s29 = sshll.u32 (%p1379_p9), %s1262_s23, 7  ;;  %s1417_s10 = scalar_lea.vmem (%p1379_p9), [#allocation4], %s985_s27 }
  0x26   : > { %s244_s7 = sadd.s32 (%p1379_p9), %s1040_s29, %s987_s28 }
  0x27   : > { %s989_s20 = sshll.u32 (%p1379_p9), %s244_s7, 2 }
  0x28   : > { %s1412_s9 = scalar_lea.vmem %s1595_s1, %s989_s20 }
  0x29   : > { %v337_v2 = vld [vmem:[%s1412_s9] sm:$0xff]  ;;  %v339_v3 = vld [vmem:[%s1412_s9 + $0x10] sm:$0xff] }
  0x2a   : > { %v341_v4 = vld [vmem:[%s1412_s9 + $0x20] sm:$0xff]  ;;  %338 = vst [vmem:[%s1417_s10] sm:$0xff] %v337_v2  ;;  %340 = vst [vmem:[%s1417_s10 + $0x8] sm:$0xff] %v339_v3  ;;  %v343_v5 = vld [vmem:[%s1412_s9 + $0x30] sm:$0xff] }
  0x2b   : > { %342 = vst [vmem:[%s1417_s10 + $0x10] sm:$0xff] %v341_v4  ;;  %v345_v6 = vld [vmem:[%s1412_s9 + $0x40] sm:$0xff]  ;;  %v347_v7 = vld [vmem:[%s1412_s9 + $0x50] sm:$0xff]  ;;  %344 = vst [vmem:[%s1417_s10 + $0x18] sm:$0xff] %v343_v5 }
  0x2c   : > { %346 = vst [vmem:[%s1417_s10 + $0x20] sm:$0xff] %v345_v6  ;;  %348 = vst [vmem:[%s1417_s10 + $0x28] sm:$0xff] %v347_v7  ;;  %v349_v8 = vld [vmem:[%s1412_s9 + $0x60] sm:$0xff]  ;;  %v351_v9 = vld [vmem:[%s1412_s9 + $0x70] sm:$0xff] }
  0x2d   : > { %v353_v10 = vld [vmem:[%s1412_s9 + $0x80] sm:$0xff]  ;;  %350 = vst [vmem:[%s1417_s10 + $0x30] sm:$0xff] %v349_v8  ;;  %352 = vst [vmem:[%s1417_s10 + $0x38] sm:$0xff] %v351_v9  ;;  %v355_v11 = vld [vmem:[%s1412_s9 + $0x90] sm:$0xff] }
  0x2e   : > { %354 = vst [vmem:[%s1417_s10 + $0x40] sm:$0xff] %v353_v10  ;;  %v357_v12 = vld [vmem:[%s1412_s9 + $0xa0] sm:$0xff]  ;;  %v359_v13 = vld [vmem:[%s1412_s9 + $0xb0] sm:$0xff]  ;;  %356 = vst [vmem:[%s1417_s10 + $0x48] sm:$0xff] %v355_v11 }
  0x2f   : > { %358 = vst [vmem:[%s1417_s10 + $0x50] sm:$0xff] %v357_v12  ;;  %360 = vst [vmem:[%s1417_s10 + $0x58] sm:$0xff] %v359_v13  ;;  %v361_v14 = vld [vmem:[%s1412_s9 + $0xc0] sm:$0xff]  ;;  %v363_v15 = vld [vmem:[%s1412_s9 + $0xd0] sm:$0xff] }
  0x30   : > { %v365_v16 = vld [vmem:[%s1412_s9 + $0xe0] sm:$0xff]  ;;  %362 = vst [vmem:[%s1417_s10 + $0x60] sm:$0xff] %v361_v14  ;;  %364 = vst [vmem:[%s1417_s10 + $0x68] sm:$0xff] %v363_v15  ;;  %v367_v17 = vld [vmem:[%s1412_s9 + $0xf0] sm:$0xff] }
  0x31   : > { %366 = vst [vmem:[%s1417_s10 + $0x70] sm:$0xff] %v365_v16  ;;  %v369_v18 = vld [vmem:[%s1412_s9 + $0x100] sm:$0xff]  ;;  %v371_v19 = vld [vmem:[%s1412_s9 + $0x110] sm:$0xff]  ;;  %368 = vst [vmem:[%s1417_s10 + $0x78] sm:$0xff] %v367_v17 }
  0x32   : > { %370 = vst [vmem:[%s1417_s10 + $0x80] sm:$0xff] %v369_v18  ;;  %372 = vst [vmem:[%s1417_s10 + $0x88] sm:$0xff] %v371_v19  ;;  %v373_v20 = vld [vmem:[%s1412_s9 + $0x120] sm:$0xff]  ;;  %v375_v21 = vld [vmem:[%s1412_s9 + $0x130] sm:$0xff] }
  0x33   : > { %v377_v22 = vld [vmem:[%s1412_s9 + $0x140] sm:$0xff]  ;;  %374 = vst [vmem:[%s1417_s10 + $0x90] sm:$0xff] %v373_v20  ;;  %376 = vst [vmem:[%s1417_s10 + $0x98] sm:$0xff] %v375_v21  ;;  %v379_v23 = vld [vmem:[%s1412_s9 + $0x150] sm:$0xff] }
  0x34   : > { %378 = vst [vmem:[%s1417_s10 + $0xa0] sm:$0xff] %v377_v22  ;;  %v381_v24 = vld [vmem:[%s1412_s9 + $0x160] sm:$0xff]  ;;  %v383_v25 = vld [vmem:[%s1412_s9 + $0x170] sm:$0xff]  ;;  %380 = vst [vmem:[%s1417_s10 + $0xa8] sm:$0xff] %v379_v23 }
  0x35   : > { %382 = vst [vmem:[%s1417_s10 + $0xb0] sm:$0xff] %v381_v24  ;;  %384 = vst [vmem:[%s1417_s10 + $0xb8] sm:$0xff] %v383_v25  ;;  %v385_v26 = vld [vmem:[%s1412_s9 + $0x180] sm:$0xff]  ;;  %v387_v27 = vld [vmem:[%s1412_s9 + $0x190] sm:$0xff] }
  0x36   : > { %v389_v28 = vld [vmem:[%s1412_s9 + $0x1a0] sm:$0xff]  ;;  %386 = vst [vmem:[%s1417_s10 + $0xc0] sm:$0xff] %v385_v26  ;;  %388 = vst [vmem:[%s1417_s10 + $0xc8] sm:$0xff] %v387_v27  ;;  %v391_v29 = vld [vmem:[%s1412_s9 + $0x1b0] sm:$0xff] }
  0x37   : > { %390 = vst [vmem:[%s1417_s10 + $0xd0] sm:$0xff] %v389_v28  ;;  %v393_v30 = vld [vmem:[%s1412_s9 + $0x1c0] sm:$0xff]  ;;  %v395_v31 = vld [vmem:[%s1412_s9 + $0x1d0] sm:$0xff]  ;;  %392 = vst [vmem:[%s1417_s10 + $0xd8] sm:$0xff] %v391_v29 }
  0x38   : > { %394 = vst [vmem:[%s1417_s10 + $0xe0] sm:$0xff] %v393_v30  ;;  %396 = vst [vmem:[%s1417_s10 + $0xe8] sm:$0xff] %v395_v31  ;;  %v397_v32 = vld [vmem:[%s1412_s9 + $0x1e0] sm:$0xff]  ;;  %v399_v33 = vld [vmem:[%s1412_s9 + $0x1f0] sm:$0xff] }
  0x39   : > { %398 = vst [vmem:[%s1417_s10 + $0xf0] sm:$0xff] %v397_v32  ;;  %400 = vst [vmem:[%s1417_s10 + $0xf8] sm:$0xff] %v399_v33 }
  0x3a PF: > { %p990_p0 = scmp.ge.s32.totalorder %s1270_s25, 1  ;;  %p421_p1 = scmp.lt.s32.totalorder %s1270_s25, 19 }
  0x3c   : > { %p422_p2 = pnand %p990_p0, %p421_p1 }
  0x3d   : > { %s428_s20 = sand.u32 (!%p422_p2), 1, %s1246_s19   ;;  %s435_s27 = sand.u32 (!%p422_p2), 1, %s1238_s17  }
  0x3e   : > { %425 = sbr.rel (%p422_p2) target bundleno = 369 (0x171), region = 104  ;;  %s1484_s28 = sshll.u32 (!%p422_p2), %s428_s20, 4 }
  0x3f   : > { %s992_s7 = sshll.u32 (!%p422_p2), %s435_s27, 8  ;;  %s468_s8 = sand.u32 (!%p422_p2), 1, %s1230_s15  }
  0x40   : > { %s994_s11 = sshll.u32 (!%p422_p2), %s1258_s22, 1  ;;  %s993_s26 = sshll.u32 (!%p422_p2), %s468_s8, 4 }
  0x41   : > { %p476_p3 = scmp.lt.s32.totalorder (!%p422_p2), %s994_s11, 3  ;;  %s430_s19 = scalar_lea.vmem (!%p422_p2), [#allocation3], %s1484_s28 }
  0x42   : > { %s1499_s10 = scalar_lea.vmem (!%p422_p2), [#allocation4], %s992_s7  ;;  %s1501_s20 = scalar_lea.vmem (!%p422_p2), [#allocation5], %s993_s26 }
  0x43   : > { %s1628_s11 = smov (!%p476_p3, %s994_s11), 3  ;;  %p996_p4 = scmp.ne.s32.totalorder %s1254_s21, 0 }
  0x44   : > { %s478_s6 = scalar_lea.vmem %s1596_s2, %s1628_s11  ;;  %s483_s17 = scalar_lea.vmem %s1597_s3, %s1628_s11 }
  0x45   : > { %490 = sbr.rel (%p996_p4) target bundleno = 77 (0x4d), region = 116 }
  0x4a   : > { %v1272_v34 = vmov 0.0  }
  0x4b   : > { %491 = vst [vmem:[#allocation2 + $0x10] sm:$0xff] %v1272_v34  ;;  %492 = vst [vmem:[#allocation2] sm:$0xff] %v1272_v34 }
  0x4c   : > { %493 = vst [vmem:[#allocation2 + $0x18] sm:$0xff] %v1272_v34  ;;  %494 = vst [vmem:[#allocation2 + $0x8] sm:$0xff] %v1272_v34 }
  0x4d PF: > { %v1133_v35 = vld [vmem:[%s1499_s10 + $0x74] ss:$8 sps:$4 sm:$0xff]   ;;  %v1135_v36 = vld [vmem:[%s1499_s10 + $0x70] ss:$8 sps:$4 sm:$0xff]   ;;  %v1136_v37 = vld [vmem:[%s1499_s10 + $0x64] ss:$8 sps:$4 sm:$0xff]  }
  0x4e   : > { %703 = vmatprep.subr.bf16.mxu0 %v1133_v35  ;;  %v1138_v38 = vld [vmem:[%s1499_s10 + $0x60] ss:$8 sps:$4 sm:$0xff]   ;;  %v1139_v39 = vld [vmem:[%s1499_s10 + $0x54] ss:$8 sps:$4 sm:$0xff]   ;;  %v1141_v40 = vld [vmem:[%s1499_s10 + $0x50] ss:$8 sps:$4 sm:$0xff]  }
  0x4f   : > { %704 = vmatpush1.bf16.msra.mxu0 %v1135_v36  ;;  %v1142_v41 = vld [vmem:[%s1499_s10 + $0x44] ss:$8 sps:$4 sm:$0xff]   ;;  %v1144_v42 = vld [vmem:[%s1499_s10 + $0x40] ss:$8 sps:$4 sm:$0xff]   ;;  %v1145_v43 = vld [vmem:[%s1499_s10 + $0x34] ss:$8 sps:$4 sm:$0xff]  }
  0x50   : > { %705 = vmatprep.subr.bf16.mxu0 %v1136_v37  ;;  %v1147_v44 = vld [vmem:[%s1499_s10 + $0x30] ss:$8 sps:$4 sm:$0xff]   ;;  %v1148_v45 = vld [vmem:[%s1499_s10 + $0x24] ss:$8 sps:$4 sm:$0xff]   ;;  %v1150_v46 = vld [vmem:[%s1499_s10 + $0x20] ss:$8 sps:$4 sm:$0xff]  }
  0x51   : > { %v1151_v47 = vld [vmem:[%s1499_s10 + $0x14] ss:$8 sps:$4 sm:$0xff]   ;;  %v1153_v49 = vld [vmem:[%s1499_s10 + $0x10] ss:$8 sps:$4 sm:$0xff]   ;;  %v1154_v50 = vld [vmem:[%s1499_s10 + $0x4] ss:$8 sps:$4 sm:$0xff]  }
  0x52   : > { %v1183_v48 = vld [vmem:[%s430_s19 + $0x4] ss:$8 sps:$4 sm:$0xff]   ;;  %v1156_v51 = vld [vmem:[%s1499_s10] ss:$8 sps:$4 sm:$0xff]   ;;  %v1159_v53 = vld [vmem:[%s1499_s10 + $0xf0] ss:$8 sps:$4 sm:$0xff]  }
  0x53   : > { %706 = vmatpush1.bf16.msra.mxu0 %v1138_v38  ;;  %735 = vmatprep.mubr.bf16.mxu0 %v1183_v48  ;;  %v1157_v52 = vld [vmem:[%s1499_s10 + $0xf4] ss:$8 sps:$4 sm:$0xff]   ;;  %v1160_v54 = vld [vmem:[%s1499_s10 + $0xe4] ss:$8 sps:$4 sm:$0xff]   ;;  %v1162_v55 = vld [vmem:[%s1499_s10 + $0xe0] ss:$8 sps:$4 sm:$0xff]  }
  0x54   : > { %707 = vmatprep.subr.bf16.mxu0 %v1139_v39  ;;  %v1163_v56 = vld [vmem:[%s1499_s10 + $0xd4] ss:$8 sps:$4 sm:$0xff]   ;;  %v1165_v57 = vld [vmem:[%s1499_s10 + $0xd0] ss:$8 sps:$4 sm:$0xff]   ;;  %v1166_v58 = vld [vmem:[%s1499_s10 + $0xc4] ss:$8 sps:$4 sm:$0xff]  }
  0x55   : > { %v1168_v59 = vld [vmem:[%s1499_s10 + $0xc0] ss:$8 sps:$4 sm:$0xff]   ;;  %v1169_v60 = vld [vmem:[%s1499_s10 + $0xb4] ss:$8 sps:$4 sm:$0xff]   ;;  %v1171_v61 = vld [vmem:[%s1499_s10 + $0xb0] ss:$8 sps:$4 sm:$0xff]  }
  0x56   : > { %v1172_v62 = vld [vmem:[%s1499_s10 + $0xa4] ss:$8 sps:$4 sm:$0xff]   ;;  %v1174_v63 = vld [vmem:[%s1499_s10 + $0xa0] ss:$8 sps:$4 sm:$0xff]   ;;  %v1175_v0 = vld [vmem:[%s1499_s10 + $0x94] ss:$8 sps:$4 sm:$0xff]  }
  0x57   : > { %708 = vmatpush1.bf16.msra.mxu0 %v1141_v40  ;;  %v1177_v1 = vld [vmem:[%s1499_s10 + $0x90] ss:$8 sps:$4 sm:$0xff]   ;;  %v1178_v2 = vld [vmem:[%s1499_s10 + $0x84] ss:$8 sps:$4 sm:$0xff]   ;;  %v1180_v3 = vld [vmem:[%s1499_s10 + $0x80] ss:$8 sps:$4 sm:$0xff]  }
  0x58   : > { %709 = vmatprep.subr.bf16.mxu0 %v1142_v41  ;;  %v1181_v4 = vld [vmem:[%s430_s19] ss:$8 sps:$4 sm:$0xff]   ;;  %p1031_p5 = scmp.ne.s32.totalorder %s1254_s21, 8 }
  0x59   : > { %v495_v5 = vld [vmem:[#allocation2 + $0x10] sm:$0xff]  ;;  %v496_v7 = vld [vmem:[#allocation2] sm:$0xff]  ;;  %v497_v10 = vld [vmem:[#allocation2 + $0x18] sm:$0xff] }
  0x5a   : > { %v498_v13 = vld [vmem:[#allocation2 + $0x8] sm:$0xff] }
  0x5b   : > { %710 = vmatpush1.bf16.msra.mxu0 %v1144_v42 }
  0x5c   : > { %711 = vmatprep.subr.bf16.mxu0 %v1145_v43 }
  0x5f   : > { %712 = vmatpush1.bf16.msra.mxu0 %v1147_v44 }
  0x60   : > { %713 = vmatprep.subr.bf16.mxu0 %v1148_v45 }
  0x63   : > { %714 = vmatpush1.bf16.msra.mxu0 %v1150_v46 }
  0x64   : > { %715 = vmatprep.subr.bf16.mxu0 %v1151_v47 }
  0x67   : > { %716 = vmatpush1.bf16.msra.mxu0 %v1153_v49 }
  0x68   : > { %717 = vmatprep.subr.bf16.mxu0 %v1154_v50 }
  0x6b   : > { %718 = vmatpush1.bf16.msra.mxu0 %v1156_v51 }
  0x6c   : > { %719 = vmatprep.subr.bf16.mxu0 %v1157_v52 }
  0x6f   : > { %720 = vmatpush2.bf16.msra.mxu0 %v1159_v53 }
  0x70   : > { %721 = vmatprep.subr.bf16.mxu0 %v1160_v54 }
  0x73   : > { %722 = vmatpush2.bf16.msra.mxu0 %v1162_v55 }
  0x74   : > { %723 = vmatprep.subr.bf16.mxu0 %v1163_v56 }
  0x77   : > { %724 = vmatpush2.bf16.msra.mxu0 %v1165_v57 }
  0x78   : > { %725 = vmatprep.subr.bf16.mxu0 %v1166_v58 }
  0x7b   : > { %726 = vmatpush2.bf16.msra.mxu0 %v1168_v59 }
  0x7c   : > { %727 = vmatprep.subr.bf16.mxu0 %v1169_v60 }
  0x7f   : > { %728 = vmatpush2.bf16.msra.mxu0 %v1171_v61 }
  0x80   : > { %729 = vmatprep.subr.bf16.mxu0 %v1172_v62 }
  0x83   : > { %730 = vmatpush2.bf16.msra.mxu0 %v1174_v63 }
  0x84   : > { %731 = vmatprep.subr.bf16.mxu0 %v1175_v0 }
  0x87   : > { %732 = vmatpush2.bf16.msra.mxu0 %v1177_v1 }
  0x88   : > { %733 = vmatprep.subr.bf16.mxu0 %v1178_v2 }
  0x8b   : > { %734 = vmatpush2.bf16.msra.mxu0 %v1180_v3 }
  0x8e   : > { %736 = vmatmul.mubr.bf16.vlgmr.msra.gmra.mxu0 %v1181_v4 }
 0x14e   : > { %v737_v6 = vpop.f32.mrf.mxu0 }
 0x14f   : > { %v746_v8 = vadd.f32 %v737_v6, %v495_v5 }
 0x150   : > { %v739_v9 = vpop.f32.mrf.mxu0 }
 0x151   : > { %750 = vst [vmem:[#allocation2 + $0x10] sm:$0xff] %v746_v8  ;;  %v747_v11 = vadd.f32 %v739_v9, %v496_v7 }
 0x152   : > { %v741_v12 = vpop.f32.mrf.mxu0 }
 0x153   : > { %751 = vst [vmem:[#allocation2] sm:$0xff] %v747_v11  ;;  %v748_v14 = vadd.f32 %v741_v12, %v497_v10  ;;  %757 = sbr.rel (%p1031_p5) target bundleno = 361 (0x169), region = 120 }
 0x154   : > { %v743_v15 = vpop.f32.mrf.mxu0 }
 0x155   : > { %752 = vst [vmem:[#allocation2 + $0x18] sm:$0xff] %v748_v14  ;;  %v749_v16 = vadd.f32 %v743_v15, %v498_v13 }
 0x157   : > { %753 = vst [vmem:[#allocation2 + $0x8] sm:$0xff] %v749_v16 }
 0x158   : > { %v764_v17 = vlaneseq  ;;  %v762_v19 = vld [vmem:[%s478_s6] sm:$0x3]  ;;  %v758_v21 = vld [vmem:[#allocation2 + $0x10] sm:$0xff] }
 0x159   : > { %v778_v20 = vld [vmem:[%s483_s17] sm:$0x3] }
 0x15a   : > { %v765_v18 = vshrl.u32 %v764_v17, 7  ;;  %v759_v24 = vld [vmem:[#allocation2] sm:$0xff] }
 0x15c   : > { %v766_v22 = vsub.s32 0, %v765_v18  ;;  %v770_v23 = vsub.s32 1, %v765_v18  ;;  %v760_v25 = vld [vmem:[#allocation2 + $0x18] sm:$0xff] }
 0x15e   : > { %v761_v26 = vld [vmem:[#allocation2 + $0x8] sm:$0xff]  ;;  %v767_v27 = vrot.slane %v762_v19, %v766_v22  ;;  %v771_v28 = vrot.slane %v762_v19, %v770_v23  ;;  %v783_v29 = vrot.slane %v778_v20, %v766_v22  ;;  %v787_v30 = vrot.slane %v778_v20, %v770_v23 }
 0x160   : > { %v774_v31 = vmul.f32 %v767_v27, %v758_v21  ;;  %v775_v32 = vmul.f32 %v771_v28, %v759_v24  ;;  %v776_v33 = vmul.f32 %v767_v27, %v760_v25  ;;  %v777_v34 = vmul.f32 %v771_v28, %v761_v26 }
 0x162   : > { %v790_v35 = vadd.f32 %v783_v29, %v774_v31  ;;  %v791_v36 = vadd.f32 %v787_v30, %v775_v32  ;;  %v792_v37 = vadd.f32 %v783_v29, %v776_v33  ;;  %v793_v38 = vadd.f32 %v787_v30, %v777_v34 }
 0x164   : > { %v794_v39 = vmax.f32 %v790_v35, 0.0  ;;  %v795_v40 = vmax.f32 %v791_v36, 0.0  ;;  %v796_v41 = vmax.f32 %v792_v37, 0.0  ;;  %v797_v42 = vmax.f32 %v793_v38, 0.0 }
 0x166   : > { %v1041_v43 = vpack.c.bf16 %v795_v40, %v794_v39  ;;  %v1042_v44 = vpack.c.bf16 %v797_v42, %v796_v41 }
 0x168   : > { %810 = vst [vmem:[%s1501_s20] sm:$0xff] %v1041_v43  ;;  %811 = vst [vmem:[%s1501_s20 + $0x8] sm:$0xff] %v1042_v44 }
 0x169 PF: > { %818 = sbr.rel (!%p1392_p12) target bundleno = 369 (0x171), region = 124  ;;  %s1043_s21 = sshll.u32 (%p1392_p12), %s1258_s22, 3 }
 0x16a   : > { %s824_s26 = scalar_lea.vmem (%p1392_p12), %s1598_s4, %s1043_s21 }
 0x16f   : > { %v855_v45 = vld [vmem:[%s1501_s20] sm:$0xff]  ;;  %v857_v46 = vld [vmem:[%s1501_s20 + $0x8] sm:$0xff] }
 0x170   : > { %856 = vst [vmem:[%s824_s26] sm:$0xff] %v855_v45  ;;  %858 = vst [vmem:[%s824_s26 + $0x10] sm:$0xff] %v857_v46 }
 0x171 PF: > { %s14_s25 = sadd.s32 1, %s1270_s25   ;;  %s1609_s19 = sld [smem:[#allocation6_spill]] }
 0x172   : > { %p11_p6 = scmp.ge.s32.totalorder %s14_s25, 20   ;;  %s1610_s20 = sld [smem:[#allocation9_spill]] }
 0x173   : > { %s1611_s14 = sld [smem:[#allocation7_spill]]  ;;  %s1613_s15 = smov %s1234_s16 }
 0x174   : > { %s1612_s5 = sld [smem:[#allocation8_spill]]  ;;  %s1614_s16 = smov %s1390_s13 }
 0x175   : > { %s1615_s17 = smov %s1242_s18  ;;  %s1616_s18 = smov %s1387_s12 }
 0x176   : > { %s1617_s21 = smov %s1262_s23  ;;  %s1618_s22 = smov %s1266_s24 }
 0x177   :  { %13 = sbr.rel (!%p11_p6) target bundleno = 6 (0x6), region = 207 }
 0x179   : > { %s1619_s23 = smov %s1611_s14 }
 0x17a   : > { %s1620_s24 = smov %s1612_s5 }

// kernel: encoder_forward.41
= control target key start
LH: loop header
LB: loop body
LE: loop exit
PB: predicated region body
PF: predicated region fallthrough
CT: control target
= control target key end

     0   :  { %s1158_s15 = smov 0   ;;  %s1160_s16 = smov 0   ;;  %s1349_s0 = inlined_call_operand.vmem [shape: bf16[16,256], index: 0, kind: input, shape index: {}]   ;;  %s1350_s1 = inlined_call_operand.vmem [shape: bf16[256,512], index: 1, kind: input, shape index: {}]   ;;  %s1351_s2 = inlined_call_operand.vmem [shape: f32[1,512], index: 2, kind: input, shape index: {}]   ;;  %s1352_s3 = inlined_call_operand.vmem [shape: f32[1,512], index: 3, kind: input, shape index: {}]   ;;  %s1353_s4 = inlined_call_operand.vmem [shape: bf16[16,512], index: 4, kind: output, shape index: {}]  }
   0x1   :  { %s1162_s17 = smov 0   ;;  %s1164_s18 = smov 0  }
   0x2   :  { %s1166_s19 = smov 0  }
   0x3 LB: > { %s29_s20 = sadd.s32 1, %s1127_s18  ;;  %s944_s21 = sadd.s32 4294967295, %s1131_s19   ;;  %s1131_s19 = sphi %s1166_s19, %s14_s19   ;;  %s1127_s18 = sphi %s1164_s18, %s1358_s18   ;;  %s1123_s17 = sphi %s1162_s17, %s1357_s17   ;;  %s1119_s16 = sphi %s1160_s16, %s1356_s16   ;;  %s1115_s15 = sphi %s1158_s15, %s1355_s15  }
   0x4   : > { %p31_p0 = scmp.ge.s32.totalorder %s29_s20, 2  ;;  %p77_p1 = scmp.ne.s32.totalorder %s1119_s16, %s1115_s15 }
   0x5   : > { %p78_p2 = scmp.eq.s32.totalorder %s1131_s19, 0  ;;  %p161_p4 = scmp.eq.s32.totalorder %s944_s21, 1 }
   0x6   : > { %s1360_s20 = smov (%p31_p0, %s29_s20), 0  ;;  %s70_s23 = sadd.s32 1, %s1119_s16 }
   0x7   : > { %p79_p3 = por %p78_p2, %p77_p1  ;;  %s66_s22 = ssub.s32 %s1127_s18, %s1360_s20 }
   0x8   : > { %p68_p5 = scmp.eq.s32.totalorder %s66_s22, 0  ;;  %p1193_p6 = por %p161_p4, %p77_p1 }
   0x9   : > { %p948_p7 = scmp.ge.s32.totalorder %s1131_s19, 2 }
   0xa   : > { %s1198_s25 = scalar_select %p68_p5, %s1119_s16, %s70_s23  }
   0xb   : > { %198 = sbr.rel (%p948_p7) target bundleno = 36 (0x24), region = 20 }
  0x10   : > { %201 = sbr.rel (!%p79_p3) target bundleno = 36 (0x24), region = 24  ;;  %s203_s26 = sand.u32 (%p79_p3), 1, %s1119_s16  }
  0x11   : > { %s998_s27 = sshll.u32 (%p79_p3), %s1127_s18, 3  ;;  %s949_s28 = sshll.u32 (%p79_p3), %s203_s26, 8 }
  0x12   : > { %s1206_s5 = scalar_lea.vmem (%p79_p3), %s1350_s1, %s998_s27  ;;  %s1211_s6 = scalar_lea.vmem (%p79_p3), [#allocation3], %s949_s28 }
  0x13   : > { %v302_v0 = vld [vmem:[%s1206_s5] sm:$0xff] (%p79_p3)  ;;  %v304_v1 = vld [vmem:[%s1206_s5 + $0x10] sm:$0xff] (%p79_p3) }
  0x14   : > { %v306_v2 = vld [vmem:[%s1206_s5 + $0x20] sm:$0xff] (%p79_p3)  ;;  %303 = vst [vmem:[%s1211_s6] sm:$0xff] (%p79_p3), %v302_v0  ;;  %305 = vst [vmem:[%s1211_s6 + $0x8] sm:$0xff] (%p79_p3), %v304_v1  ;;  %v308_v3 = vld [vmem:[%s1206_s5 + $0x30] sm:$0xff] (%p79_p3) }
  0x15   : > { %307 = vst [vmem:[%s1211_s6 + $0x10] sm:$0xff] %v306_v2  ;;  %v310_v4 = vld [vmem:[%s1206_s5 + $0x40] sm:$0xff]  ;;  %v312_v5 = vld [vmem:[%s1206_s5 + $0x50] sm:$0xff]  ;;  %309 = vst [vmem:[%s1211_s6 + $0x18] sm:$0xff] %v308_v3 }
  0x16   : > { %311 = vst [vmem:[%s1211_s6 + $0x20] sm:$0xff] %v310_v4  ;;  %313 = vst [vmem:[%s1211_s6 + $0x28] sm:$0xff] %v312_v5  ;;  %v314_v6 = vld [vmem:[%s1206_s5 + $0x60] sm:$0xff]  ;;  %v316_v7 = vld [vmem:[%s1206_s5 + $0x70] sm:$0xff] }
  0x17   : > { %v318_v8 = vld [vmem:[%s1206_s5 + $0x80] sm:$0xff]  ;;  %315 = vst [vmem:[%s1211_s6 + $0x30] sm:$0xff] %v314_v6  ;;  %317 = vst [vmem:[%s1211_s6 + $0x38] sm:$0xff] %v316_v7  ;;  %v320_v9 = vld [vmem:[%s1206_s5 + $0x90] sm:$0xff] }
  0x18   : > { %319 = vst [vmem:[%s1211_s6 + $0x40] sm:$0xff] %v318_v8  ;;  %v322_v10 = vld [vmem:[%s1206_s5 + $0xa0] sm:$0xff]  ;;  %v324_v11 = vld [vmem:[%s1206_s5 + $0xb0] sm:$0xff]  ;;  %321 = vst [vmem:[%s1211_s6 + $0x48] sm:$0xff] %v320_v9 }
  0x19   : > { %323 = vst [vmem:[%s1211_s6 + $0x50] sm:$0xff] %v322_v10  ;;  %325 = vst [vmem:[%s1211_s6 + $0x58] sm:$0xff] %v324_v11  ;;  %v326_v12 = vld [vmem:[%s1206_s5 + $0xc0] sm:$0xff]  ;;  %v328_v13 = vld [vmem:[%s1206_s5 + $0xd0] sm:$0xff] }
  0x1a   : > { %v330_v14 = vld [vmem:[%s1206_s5 + $0xe0] sm:$0xff]  ;;  %327 = vst [vmem:[%s1211_s6 + $0x60] sm:$0xff] %v326_v12  ;;  %329 = vst [vmem:[%s1211_s6 + $0x68] sm:$0xff] %v328_v13  ;;  %v332_v15 = vld [vmem:[%s1206_s5 + $0xf0] sm:$0xff] }
  0x1b   : > { %331 = vst [vmem:[%s1211_s6 + $0x70] sm:$0xff] %v330_v14  ;;  %v334_v16 = vld [vmem:[%s1206_s5 + $0x100] sm:$0xff]  ;;  %v336_v17 = vld [vmem:[%s1206_s5 + $0x110] sm:$0xff]  ;;  %333 = vst [vmem:[%s1211_s6 + $0x78] sm:$0xff] %v332_v15 }
  0x1c   : > { %335 = vst [vmem:[%s1211_s6 + $0x80] sm:$0xff] %v334_v16  ;;  %337 = vst [vmem:[%s1211_s6 + $0x88] sm:$0xff] %v336_v17  ;;  %v338_v18 = vld [vmem:[%s1206_s5 + $0x120] sm:$0xff]  ;;  %v340_v19 = vld [vmem:[%s1206_s5 + $0x130] sm:$0xff] }
  0x1d   : > { %v342_v20 = vld [vmem:[%s1206_s5 + $0x140] sm:$0xff]  ;;  %339 = vst [vmem:[%s1211_s6 + $0x90] sm:$0xff] %v338_v18  ;;  %341 = vst [vmem:[%s1211_s6 + $0x98] sm:$0xff] %v340_v19  ;;  %v344_v21 = vld [vmem:[%s1206_s5 + $0x150] sm:$0xff] }
  0x1e   : > { %343 = vst [vmem:[%s1211_s6 + $0xa0] sm:$0xff] %v342_v20  ;;  %v346_v22 = vld [vmem:[%s1206_s5 + $0x160] sm:$0xff]  ;;  %v348_v23 = vld [vmem:[%s1206_s5 + $0x170] sm:$0xff]  ;;  %345 = vst [vmem:[%s1211_s6 + $0xa8] sm:$0xff] %v344_v21 }
  0x1f   : > { %347 = vst [vmem:[%s1211_s6 + $0xb0] sm:$0xff] %v346_v22  ;;  %349 = vst [vmem:[%s1211_s6 + $0xb8] sm:$0xff] %v348_v23  ;;  %v350_v24 = vld [vmem:[%s1206_s5 + $0x180] sm:$0xff]  ;;  %v352_v25 = vld [vmem:[%s1206_s5 + $0x190] sm:$0xff] }
  0x20   : > { %v354_v26 = vld [vmem:[%s1206_s5 + $0x1a0] sm:$0xff]  ;;  %351 = vst [vmem:[%s1211_s6 + $0xc0] sm:$0xff] %v350_v24  ;;  %353 = vst [vmem:[%s1211_s6 + $0xc8] sm:$0xff] %v352_v25  ;;  %v356_v27 = vld [vmem:[%s1206_s5 + $0x1b0] sm:$0xff] }
  0x21   : > { %355 = vst [vmem:[%s1211_s6 + $0xd0] sm:$0xff] %v354_v26  ;;  %v358_v28 = vld [vmem:[%s1206_s5 + $0x1c0] sm:$0xff]  ;;  %v360_v29 = vld [vmem:[%s1206_s5 + $0x1d0] sm:$0xff]  ;;  %357 = vst [vmem:[%s1211_s6 + $0xd8] sm:$0xff] %v356_v27 }
  0x22   : > { %359 = vst [vmem:[%s1211_s6 + $0xe0] sm:$0xff] %v358_v28  ;;  %361 = vst [vmem:[%s1211_s6 + $0xe8] sm:$0xff] %v360_v29  ;;  %v362_v30 = vld [vmem:[%s1206_s5 + $0x1e0] sm:$0xff]  ;;  %v364_v31 = vld [vmem:[%s1206_s5 + $0x1f0] sm:$0xff] }
  0x23   : > { %363 = vst [vmem:[%s1211_s6 + $0xf0] sm:$0xff] %v362_v30  ;;  %365 = vst [vmem:[%s1211_s6 + $0xf8] sm:$0xff] %v364_v31 }
  0x24 PF: > { %p952_p8 = scmp.ge.s32.totalorder %s1131_s19, 1  ;;  %p386_p9 = scmp.lt.s32.totalorder %s1131_s19, 3 }
  0x26   : > { %p387_p10 = pnand %p952_p8, %p386_p9 }
  0x27   : > { %s393_s7 = sand.u32 (!%p387_p10), 1, %s1115_s15   ;;  %s955_s14 = sshll.u32 (!%p387_p10), %s1123_s17, 1 }
  0x28   : > { %390 = sbr.rel (%p387_p10) target bundleno = 324 (0x144), region = 70  ;;  %s953_s8 = sshll.u32 (!%p387_p10), %s393_s7, 8 }
  0x29   : > { %s1282_s11 = scalar_lea.vmem (!%p387_p10), [#allocation3], %s953_s8  ;;  %p450_p11 = scmp.lt.s32.totalorder (!%p387_p10), %s955_s14, 3 }
  0x2a   : > { %s954_s29 = sshll.u32 (!%p387_p10), %s393_s7, 4 }
  0x2b   : > { %s434_s30 = scalar_lea.vmem (!%p387_p10), [#allocation4], %s954_s29 }
  0x2d   : > { %v1092_v32 = vld [vmem:[%s1349_s0 + $0x4] ss:$8 sps:$4 sm:$0xff]   ;;  %v1042_v33 = vld [vmem:[%s1282_s11 + $0x74] ss:$8 sps:$4 sm:$0xff]   ;;  %v1044_v34 = vld [vmem:[%s1282_s11 + $0x70] ss:$8 sps:$4 sm:$0xff]   ;;  %v737_v2 = vlaneseq }
  0x2e   : > { %709 = vmatprep.mubr.bf16.mxu0 %v1092_v32  ;;  %677 = vmatprep.subr.bf16.mxu0 %v1042_v33  ;;  %v1045_v35 = vld [vmem:[%s1282_s11 + $0x64] ss:$8 sps:$4 sm:$0xff]   ;;  %v1047_v36 = vld [vmem:[%s1282_s11 + $0x60] ss:$8 sps:$4 sm:$0xff]   ;;  %v1048_v37 = vld [vmem:[%s1282_s11 + $0x54] ss:$8 sps:$4 sm:$0xff]  }
  0x2f   : > { %678 = vmatpush1.bf16.msra.mxu0 %v1044_v34  ;;  %v1050_v38 = vld [vmem:[%s1282_s11 + $0x50] ss:$8 sps:$4 sm:$0xff]   ;;  %v1051_v39 = vld [vmem:[%s1282_s11 + $0x44] ss:$8 sps:$4 sm:$0xff]   ;;  %v1053_v40 = vld [vmem:[%s1282_s11 + $0x40] ss:$8 sps:$4 sm:$0xff]  }
  0x30   : > { %679 = vmatprep.subr.bf16.mxu0 %v1045_v35  ;;  %v1054_v41 = vld [vmem:[%s1282_s11 + $0x34] ss:$8 sps:$4 sm:$0xff]   ;;  %v1056_v42 = vld [vmem:[%s1282_s11 + $0x30] ss:$8 sps:$4 sm:$0xff]   ;;  %v1057_v43 = vld [vmem:[%s1282_s11 + $0x24] ss:$8 sps:$4 sm:$0xff]  }
  0x31   : > { %v1059_v44 = vld [vmem:[%s1282_s11 + $0x20] ss:$8 sps:$4 sm:$0xff]   ;;  %v1060_v45 = vld [vmem:[%s1282_s11 + $0x14] ss:$8 sps:$4 sm:$0xff]   ;;  %v1062_v46 = vld [vmem:[%s1282_s11 + $0x10] ss:$8 sps:$4 sm:$0xff]  }
  0x32   : > { %v1063_v47 = vld [vmem:[%s1282_s11 + $0x4] ss:$8 sps:$4 sm:$0xff]   ;;  %v1065_v48 = vld [vmem:[%s1282_s11] ss:$8 sps:$4 sm:$0xff]   ;;  %v1066_v49 = vld [vmem:[%s1282_s11 + $0xf4] ss:$8 sps:$4 sm:$0xff]  }
  0x33   : > { %680 = vmatpush1.bf16.msra.mxu0 %v1047_v36  ;;  %v1068_v50 = vld [vmem:[%s1282_s11 + $0xf0] ss:$8 sps:$4 sm:$0xff]   ;;  %v1069_v51 = vld [vmem:[%s1282_s11 + $0xe4] ss:$8 sps:$4 sm:$0xff]   ;;  %v1071_v52 = vld [vmem:[%s1282_s11 + $0xe0] ss:$8 sps:$4 sm:$0xff]  }
  0x34   : > { %681 = vmatprep.subr.bf16.mxu0 %v1048_v37  ;;  %v1072_v53 = vld [vmem:[%s1282_s11 + $0xd4] ss:$8 sps:$4 sm:$0xff]   ;;  %v1074_v54 = vld [vmem:[%s1282_s11 + $0xd0] ss:$8 sps:$4 sm:$0xff]   ;;  %v1075_v55 = vld [vmem:[%s1282_s11 + $0xc4] ss:$8 sps:$4 sm:$0xff]  }
  0x35   : > { %v1077_v56 = vld [vmem:[%s1282_s11 + $0xc0] ss:$8 sps:$4 sm:$0xff]   ;;  %v1078_v57 = vld [vmem:[%s1282_s11 + $0xb4] ss:$8 sps:$4 sm:$0xff]   ;;  %v1080_v58 = vld [vmem:[%s1282_s11 + $0xb0] ss:$8 sps:$4 sm:$0xff]  }
  0x36   : > { %v1081_v59 = vld [vmem:[%s1282_s11 + $0xa4] ss:$8 sps:$4 sm:$0xff]   ;;  %v1083_v60 = vld [vmem:[%s1282_s11 + $0xa0] ss:$8 sps:$4 sm:$0xff]   ;;  %v1084_v61 = vld [vmem:[%s1282_s11 + $0x94] ss:$8 sps:$4 sm:$0xff]  }
  0x37   : > { %682 = vmatpush1.bf16.msra.mxu0 %v1050_v38  ;;  %v1086_v62 = vld [vmem:[%s1282_s11 + $0x90] ss:$8 sps:$4 sm:$0xff]   ;;  %v1087_v63 = vld [vmem:[%s1282_s11 + $0x84] ss:$8 sps:$4 sm:$0xff]   ;;  %v1089_v0 = vld [vmem:[%s1282_s11 + $0x80] ss:$8 sps:$4 sm:$0xff]  }
  0x38   : > { %683 = vmatprep.subr.bf16.mxu0 %v1051_v39  ;;  %v1090_v1 = vld [vmem:[%s1349_s0] ss:$8 sps:$4 sm:$0xff]   ;;  %s1362_s14 = smov (!%p450_p11, %s955_s14), 3  ;;  %v738_v3 = vshrl.u32 %v737_v2, 7  ;;  %s1001_s15 = sshll.u32 (%p1193_p6), %s1123_s17, 3 }
  0x39   : > { %s452_s23 = scalar_lea.vmem %s1351_s2, %s1362_s14  ;;  %s457_s28 = scalar_lea.vmem %s1352_s3, %s1362_s14 }
  0x3a   : > { %v739_v4 = vsub.s32 0, %v738_v3  ;;  %v735_v5 = vld [vmem:[%s452_s23] sm:$0x3]  ;;  %v743_v6 = vsub.s32 1, %v738_v3  ;;  %s793_s7 = scalar_lea.vmem (%p1193_p6), %s1353_s4, %s1001_s15 }
  0x3b   : > { %684 = vmatpush1.bf16.msra.mxu0 %v1053_v40  ;;  %v751_v8 = vld [vmem:[%s457_s28] sm:$0x3] }
  0x3c   : > { %685 = vmatprep.subr.bf16.mxu0 %v1054_v41  ;;  %v740_v7 = vrot.slane %v735_v5, %v739_v4  ;;  %v744_v9 = vrot.slane %v735_v5, %v743_v6  ;;  %v756_v12 = vrot.slane %v751_v8, %v739_v4  ;;  %v760_v13 = vrot.slane %v751_v8, %v743_v6 }
  0x3f   : > { %686 = vmatpush1.bf16.msra.mxu0 %v1056_v42 }
  0x40   : > { %687 = vmatprep.subr.bf16.mxu0 %v1057_v43 }
  0x43   : > { %688 = vmatpush1.bf16.msra.mxu0 %v1059_v44 }
  0x44   : > { %689 = vmatprep.subr.bf16.mxu0 %v1060_v45 }
  0x47   : > { %690 = vmatpush1.bf16.msra.mxu0 %v1062_v46 }
  0x48   : > { %691 = vmatprep.subr.bf16.mxu0 %v1063_v47 }
  0x4b   : > { %692 = vmatpush1.bf16.msra.mxu0 %v1065_v48 }
  0x4c   : > { %693 = vmatprep.subr.bf16.mxu0 %v1066_v49 }
  0x4f   : > { %694 = vmatpush2.bf16.msra.mxu0 %v1068_v50 }
  0x50   : > { %695 = vmatprep.subr.bf16.mxu0 %v1069_v51 }
  0x53   : > { %696 = vmatpush2.bf16.msra.mxu0 %v1071_v52 }
  0x54   : > { %697 = vmatprep.subr.bf16.mxu0 %v1072_v53 }
  0x57   : > { %698 = vmatpush2.bf16.msra.mxu0 %v1074_v54 }
  0x58   : > { %699 = vmatprep.subr.bf16.mxu0 %v1075_v55 }
  0x5b   : > { %700 = vmatpush2.bf16.msra.mxu0 %v1077_v56 }
  0x5c   : > { %701 = vmatprep.subr.bf16.mxu0 %v1078_v57 }
  0x5f   : > { %702 = vmatpush2.bf16.msra.mxu0 %v1080_v58 }
  0x60   : > { %703 = vmatprep.subr.bf16.mxu0 %v1081_v59 }
  0x63   : > { %704 = vmatpush2.bf16.msra.mxu0 %v1083_v60 }
  0x64   : > { %705 = vmatprep.subr.bf16.mxu0 %v1084_v61 }
  0x67   : > { %706 = vmatpush2.bf16.msra.mxu0 %v1086_v62 }
  0x68   : > { %707 = vmatprep.subr.bf16.mxu0 %v1087_v63 }
  0x6b   : > { %708 = vmatpush2.bf16.msra.mxu0 %v1089_v0 }
  0x6e   : > { %710 = vmatmul.mubr.bf16.vlgmr.msra.gmra.mxu0 %v1090_v1 }
 0x12e   : > { %v711_v10 = vpop.f32.mrf.mxu0 }
 0x12f   : > { %v747_v11 = vmul.f32 %v740_v7, %v711_v10 }
 0x130   : > { %v713_v14 = vpop.f32.mrf.mxu0 }
 0x131   : > { %v748_v15 = vmul.f32 %v744_v9, %v713_v14  ;;  %v763_v17 = vadd.f32 %v756_v12, %v747_v11 }
 0x132   : > { %v715_v16 = vpop.f32.mrf.mxu0 }
 0x133   : > { %v764_v18 = vadd.f32 %v760_v13, %v748_v15  ;;  %v749_v19 = vmul.f32 %v740_v7, %v715_v16 }
 0x134   : > { %v717_v20 = vpop.f32.mrf.mxu0 }
 0x135   : > { %v999_v21 = vpack.c.bf16 %v764_v18, %v763_v17  ;;  %v750_v22 = vmul.f32 %v744_v9, %v717_v20  ;;  %v765_v23 = vadd.f32 %v756_v12, %v749_v19 }
 0x137   : > { %779 = vst [vmem:[%s434_s30] sm:$0xff] %v999_v21  ;;  %v766_v24 = vadd.f32 %v760_v13, %v750_v22  ;;  %787 = sbr.rel (!%p1193_p6) target bundleno = 324 (0x144), region = 86 }
 0x139   : > { %v1000_v25 = vpack.c.bf16 %v766_v24, %v765_v23 }
 0x13b   : > { %780 = vst [vmem:[%s434_s30 + $0x8] sm:$0xff] %v1000_v25 }
 0x13e   : > { %v824_v26 = vld [vmem:[%s434_s30] sm:$0xff] }
 0x13f   : > { %825 = vst [vmem:[%s793_s7] sm:$0xff] %v824_v26 }
 0x142   : > { %v826_v27 = vld [vmem:[%s434_s30 + $0x8] sm:$0xff] }
 0x143   : > { %827 = vst [vmem:[%s793_s7 + $0x10] sm:$0xff] %v826_v27 }
 0x144 PF: > { %s14_s19 = sadd.s32 1, %s1131_s19   ;;  %s1355_s15 = smov %s1119_s16 }
 0x145   : > { %p11_p12 = scmp.ge.s32.totalorder %s14_s19, 4   ;;  %s1356_s16 = smov %s1198_s25 }
 0x146   : > { %s1357_s17 = smov %s1127_s18  ;;  %s1358_s18 = smov %s1360_s20 }
 0x147   :  { %13 = sbr.rel (!%p11_p12) target bundleno = 3 (0x3), region = 164 }

// kernel: encoder_forward.43
= control target key start
LH: loop header
LB: loop body
LE: loop exit
PB: predicated region body
PF: predicated region fallthrough
CT: control target
= control target key end

     0   :  { %s1298_s15 = smov 0   ;;  %s1300_s16 = smov 0   ;;  %s1594_s0 = inlined_call_operand.vmem [shape: bf16[16,4608], index: 0, kind: input, shape index: {}]   ;;  %s1595_s1 = inlined_call_operand.vmem [shape: bf16[4608,512], index: 1, kind: input, shape index: {}]   ;;  %s1596_s2 = inlined_call_operand.vmem [shape: f32[1,512], index: 2, kind: input, shape index: {}]   ;;  %s1597_s3 = inlined_call_operand.vmem [shape: f32[1,512], index: 3, kind: input, shape index: {}]   ;;  %s1598_s4 = inlined_call_operand.vmem [shape: bf16[16,512], index: 4, kind: output, shape index: {}]  }
   0x1   :  { %s1302_s17 = smov 0   ;;  %s1304_s18 = smov 0  }
   0x2   :  { %s1306_s19 = smov 0   ;;  %s1308_s20 = smov 0  }
   0x3   :  { %s1310_s21 = smov 0   ;;  %s1312_s22 = smov 0  }
   0x4   :  { %s1314_s23 = smov 0   ;;  %s1316_s24 = smov 0  }
   0x5   :  { %s1318_s25 = smov 0  }
   0x6 LB: > { %1602 = sst [smem:[#allocation6_spill]] %s1250_s20  ;;  %s978_s26 = sadd.s32 4294967295, %s1270_s25   ;;  %s1270_s25 = sphi %s1318_s25, %s14_s25   ;;  %s1266_s24 = sphi %s1316_s24, %s1620_s24   ;;  %s1262_s23 = sphi %s1314_s23, %s1619_s23   ;;  %s1258_s22 = sphi %s1312_s22, %s1618_s22   ;;  %s1254_s21 = sphi %s1310_s21, %s1617_s21   ;;  %s1250_s20 = sphi %s1308_s20, %s1610_s20   ;;  %s1246_s19 = sphi %s1306_s19, %s1609_s19   ;;  %s1242_s18 = sphi %s1304_s18, %s1616_s18   ;;  %s1238_s17 = sphi %s1302_s17, %s1615_s17   ;;  %s1234_s16 = sphi %s1300_s16, %s1614_s16   ;;  %s1230_s15 = sphi %s1298_s15, %s1613_s15  }
   0x7   : > { %s26_s27 = sadd.s32 1, %s1262_s23  ;;  %s29_s28 = sadd.s32 1, %s1266_s24 }
   0x8   : > { %p27_p0 = scmp.ge.s32.totalorder %s26_s27, 18  ;;  %s42_s29 = sadd.s32 1, %s1250_s20 }
   0x9   : > { %p49_p1 = scmp.ne.s32.totalorder %s1250_s20, %s1246_s19  ;;  %p50_p2 = scmp.eq.s32.totalorder %s1270_s25, 0 }
   0xa   : > { %s1622_s27 = smov (%p27_p0, %s26_s27), 0  ;;  %s1624_s28 = smov (!%p27_p0, %s29_s28), %s1266_s24 }
   0xb   : > { %1603 = sst [smem:[#allocation7_spill]] %s1622_s27  ;;  %s38_s30 = ssub.s32 %s1262_s23, %s1622_s27 }
   0xc   : > { %p31_p3 = scmp.ge.s32.totalorder %s1624_s28, 2  ;;  %p40_p4 = scmp.eq.s32.totalorder %s38_s30, 0 }
   0xd   : > { %p1365_p5 = por %p50_p2, %p49_p1  ;;  %s70_s6 = sadd.s32 1, %s1242_s18 }
   0xe   : > { %s1626_s28 = smov (%p31_p3, %s1624_s28), 0  ;;  %p77_p6 = scmp.ne.s32.totalorder %s1242_s18, %s1238_s17 }
   0xf   : > { %1605 = sst [smem:[#allocation8_spill]] %s1626_s28  ;;  %s66_s8 = ssub.s32 %s1266_s24, %s1626_s28 }
  0x10   : > { %s1373_s7 = scalar_select %p40_p4, %s1250_s20, %s42_s29  }
  0x11   : > { %s67_s9 = sor.u32 %s66_s8, %s38_s30  ;;  %p148_p7 = scmp.eq.s32.totalorder %s66_s8, 0 }
  0x12   : > { %1606 = sst [smem:[#allocation9_spill]] %s1373_s7  ;;  %p68_p8 = scmp.eq.s32.totalorder %s67_s9, 0 }
  0x13   : > { %p1379_p9 = por %p77_p6, %p50_p2  ;;  %s150_s11 = sadd.s32 1, %s1234_s16 }
  0x14   : > { %p160_p10 = scmp.ne.s32.totalorder %s1234_s16, %s1230_s15  ;;  %p161_p11 = scmp.eq.s32.totalorder %s978_s26, 35 }
  0x15   : > { %s1387_s12 = scalar_select %p68_p8, %s1242_s18, %s70_s6  }
  0x16   : > { %s1390_s13 = scalar_select %p148_p7, %s1234_s16, %s150_s11  }
  0x17   : > { %p1392_p12 = por %p161_p11, %p160_p10  ;;  %p981_p13 = scmp.ge.s32.totalorder %s1270_s25, 36 }
  0x19   : > { %183 = sbr.rel (%p981_p13) target bundleno = 58 (0x3a), region = 16 }
  0x1e   : > { %186 = sbr.rel (!%p1365_p5) target bundleno = 35 (0x23), region = 20  ;;  %s188_s29 = sand.u32 (%p1365_p5), 1, %s1250_s20  }
  0x1f   : > { %s1039_s30 = sshll.u32 (%p1365_p5), %s1262_s23, 3  ;;  %s982_s8 = sshll.u32 (%p1365_p5), %s188_s29, 4 }
  0x20   : > { %s196_s11 = scalar_lea.vmem (%p1365_p5), %s1594_s0, %s1039_s30  ;;  %s190_s26 = scalar_lea.vmem (%p1365_p5), [#allocation3], %s982_s8 }
  0x21   : > { %v227_v0 = vld [vmem:[%s196_s11] sm:$0xff] (%p1365_p5)  ;;  %v229_v1 = vld [vmem:[%s196_s11 + $0x90] sm:$0xff] (%p1365_p5) }
  0x22   : > { %228 = vst [vmem:[%s190_s26] sm:$0xff] (%p1365_p5), %v227_v0  ;;  %230 = vst [vmem:[%s190_s26 + $0x8] sm:$0xff] (%p1365_p5), %v229_v1 }
  0x23 PF: > { %236 = sbr.rel (!%p1379_p9) target bundleno = 58 (0x3a), region = 58  ;;  %s238_s5 = sand.u32 (%p1379_p9), 1, %s1242_s18  }
  0x24   : > { %s987_s28 = sshll.u32 (%p1379_p9), %s1266_s24, 1  ;;  %s985_s27 = sshll.u32 (%p1379_p9), %s238_s5, 8 }
  0x25   : > { %s1040_s29 = sshll.u32 (%p1379_p9), %s1262_s23, 7  ;;  %s1417_s10 = scalar_lea.vmem (%p1379_p9), [#allocation4], %s985_s27 }
  0x26   : > { %s244_s7 = sadd.s32 (%p1379_p9), %s1040_s29, %s987_s28 }
  0x27   : > { %s989_s20 = sshll.u32 (%p1379_p9), %s244_s7, 2 }
  0x28   : > { %s1412_s9 = scalar_lea.vmem %s1595_s1, %s989_s20 }
  0x29   : > { %v337_v2 = vld [vmem:[%s1412_s9] sm:$0xff]  ;;  %v339_v3 = vld [vmem:[%s1412_s9 + $0x10] sm:$0xff] }
  0x2a   : > { %v341_v4 = vld [vmem:[%s1412_s9 + $0x20] sm:$0xff]  ;;  %338 = vst [vmem:[%s1417_s10] sm:$0xff] %v337_v2  ;;  %340 = vst [vmem:[%s1417_s10 + $0x8] sm:$0xff] %v339_v3  ;;  %v343_v5 = vld [vmem:[%s1412_s9 + $0x30] sm:$0xff] }
  0x2b   : > { %342 = vst [vmem:[%s1417_s10 + $0x10] sm:$0xff] %v341_v4  ;;  %v345_v6 = vld [vmem:[%s1412_s9 + $0x40] sm:$0xff]  ;;  %v347_v7 = vld [vmem:[%s1412_s9 + $0x50] sm:$0xff]  ;;  %344 = vst [vmem:[%s1417_s10 + $0x18] sm:$0xff] %v343_v5 }
  0x2c   : > { %346 = vst [vmem:[%s1417_s10 + $0x20] sm:$0xff] %v345_v6  ;;  %348 = vst [vmem:[%s1417_s10 + $0x28] sm:$0xff] %v347_v7  ;;  %v349_v8 = vld [vmem:[%s1412_s9 + $0x60] sm:$0xff]  ;;  %v351_v9 = vld [vmem:[%s1412_s9 + $0x70] sm:$0xff] }
  0x2d   : > { %v353_v10 = vld [vmem:[%s1412_s9 + $0x80] sm:$0xff]  ;;  %350 = vst [vmem:[%s1417_s10 + $0x30] sm:$0xff] %v349_v8  ;;  %352 = vst [vmem:[%s1417_s10 + $0x38] sm:$0xff] %v351_v9  ;;  %v355_v11 = vld [vmem:[%s1412_s9 + $0x90] sm:$0xff] }
  0x2e   : > { %354 = vst [vmem:[%s1417_s10 + $0x40] sm:$0xff] %v353_v10  ;;  %v357_v12 = vld [vmem:[%s1412_s9 + $0xa0] sm:$0xff]  ;;  %v359_v13 = vld [vmem:[%s1412_s9 + $0xb0] sm:$0xff]  ;;  %356 = vst [vmem:[%s1417_s10 + $0x48] sm:$0xff] %v355_v11 }
  0x2f   : > { %358 = vst [vmem:[%s1417_s10 + $0x50] sm:$0xff] %v357_v12  ;;  %360 = vst [vmem:[%s1417_s10 + $0x58] sm:$0xff] %v359_v13  ;;  %v361_v14 = vld [vmem:[%s1412_s9 + $0xc0] sm:$0xff]  ;;  %v363_v15 = vld [vmem:[%s1412_s9 + $0xd0] sm:$0xff] }
  0x30   : > { %v365_v16 = vld [vmem:[%s1412_s9 + $0xe0] sm:$0xff]  ;;  %362 = vst [vmem:[%s1417_s10 + $0x60] sm:$0xff] %v361_v14  ;;  %364 = vst [vmem:[%s1417_s10 + $0x68] sm:$0xff] %v363_v15  ;;  %v367_v17 = vld [vmem:[%s1412_s9 + $0xf0] sm:$0xff] }
  0x31   : > { %366 = vst [vmem:[%s1417_s10 + $0x70] sm:$0xff] %v365_v16  ;;  %v369_v18 = vld [vmem:[%s1412_s9 + $0x100] sm:$0xff]  ;;  %v371_v19 = vld [vmem:[%s1412_s9 + $0x110] sm:$0xff]  ;;  %368 = vst [vmem:[%s1417_s10 + $0x78] sm:$0xff] %v367_v17 }
  0x32   : > { %370 = vst [vmem:[%s1417_s10 + $0x80] sm:$0xff] %v369_v18  ;;  %372 = vst [vmem:[%s1417_s10 + $0x88] sm:$0xff] %v371_v19  ;;  %v373_v20 = vld [vmem:[%s1412_s9 + $0x120] sm:$0xff]  ;;  %v375_v21 = vld [vmem:[%s1412_s9 + $0x130] sm:$0xff] }
  0x33   : > { %v377_v22 = vld [vmem:[%s1412_s9 + $0x140] sm:$0xff]  ;;  %374 = vst [vmem:[%s1417_s10 + $0x90] sm:$0xff] %v373_v20  ;;  %376 = vst [vmem:[%s1417_s10 + $0x98] sm:$0xff] %v375_v21  ;;  %v379_v23 = vld [vmem:[%s1412_s9 + $0x150] sm:$0xff] }
  0x34   : > { %378 = vst [vmem:[%s1417_s10 + $0xa0] sm:$0xff] %v377_v22  ;;  %v381_v24 = vld [vmem:[%s1412_s9 + $0x160] sm:$0xff]  ;;  %v383_v25 = vld [vmem:[%s1412_s9 + $0x170] sm:$0xff]  ;;  %380 = vst [vmem:[%s1417_s10 + $0xa8] sm:$0xff] %v379_v23 }
  0x35   : > { %382 = vst [vmem:[%s1417_s10 + $0xb0] sm:$0xff] %v381_v24  ;;  %384 = vst [vmem:[%s1417_s10 + $0xb8] sm:$0xff] %v383_v25  ;;  %v385_v26 = vld [vmem:[%s1412_s9 + $0x180] sm:$0xff]  ;;  %v387_v27 = vld [vmem:[%s1412_s9 + $0x190] sm:$0xff] }
  0x36   : > { %v389_v28 = vld [vmem:[%s1412_s9 + $0x1a0] sm:$0xff]  ;;  %386 = vst [vmem:[%s1417_s10 + $0xc0] sm:$0xff] %v385_v26  ;;  %388 = vst [vmem:[%s1417_s10 + $0xc8] sm:$0xff] %v387_v27  ;;  %v391_v29 = vld [vmem:[%s1412_s9 + $0x1b0] sm:$0xff] }
  0x37   : > { %390 = vst [vmem:[%s1417_s10 + $0xd0] sm:$0xff] %v389_v28  ;;  %v393_v30 = vld [vmem:[%s1412_s9 + $0x1c0] sm:$0xff]  ;;  %v395_v31 = vld [vmem:[%s1412_s9 + $0x1d0] sm:$0xff]  ;;  %392 = vst [vmem:[%s1417_s10 + $0xd8] sm:$0xff] %v391_v29 }
  0x38   : > { %394 = vst [vmem:[%s1417_s10 + $0xe0] sm:$0xff] %v393_v30  ;;  %396 = vst [vmem:[%s1417_s10 + $0xe8] sm:$0xff] %v395_v31  ;;  %v397_v32 = vld [vmem:[%s1412_s9 + $0x1e0] sm:$0xff]  ;;  %v399_v33 = vld [vmem:[%s1412_s9 + $0x1f0] sm:$0xff] }
  0x39   : > { %398 = vst [vmem:[%s1417_s10 + $0xf0] sm:$0xff] %v397_v32  ;;  %400 = vst [vmem:[%s1417_s10 + $0xf8] sm:$0xff] %v399_v33 }
  0x3a PF: > { %p990_p0 = scmp.ge.s32.totalorder %s1270_s25, 1  ;;  %p421_p1 = scmp.lt.s32.totalorder %s1270_s25, 37 }
  0x3c   : > { %p422_p2 = pnand %p990_p0, %p421_p1 }
  0x3d   : > { %s428_s20 = sand.u32 (!%p422_p2), 1, %s1246_s19   ;;  %s435_s27 = sand.u32 (!%p422_p2), 1, %s1238_s17  }
  0x3e   : > { %425 = sbr.rel (%p422_p2) target bundleno = 369 (0x171), region = 104  ;;  %s1484_s28 = sshll.u32 (!%p422_p2), %s428_s20, 4 }
  0x3f   : > { %s992_s7 = sshll.u32 (!%p422_p2), %s435_s27, 8  ;;  %s468_s8 = sand.u32 (!%p422_p2), 1, %s1230_s15  }
  0x40   : > { %s994_s11 = sshll.u32 (!%p422_p2), %s1258_s22, 1  ;;  %s993_s26 = sshll.u32 (!%p422_p2), %s468_s8, 4 }
  0x41   : > { %p476_p3 = scmp.lt.s32.totalorder (!%p422_p2), %s994_s11, 3  ;;  %s430_s19 = scalar_lea.vmem (!%p422_p2), [#allocation3], %s1484_s28 }
  0x42   : > { %s1499_s10 = scalar_lea.vmem (!%p422_p2), [#allocation4], %s992_s7  ;;  %s1501_s20 = scalar_lea.vmem (!%p422_p2), [#allocation5], %s993_s26 }
  0x43   : > { %s1628_s11 = smov (!%p476_p3, %s994_s11), 3  ;;  %p996_p4 = scmp.ne.s32.totalorder %s1254_s21, 0 }
  0x44   : > { %s478_s6 = scalar_lea.vmem %s1596_s2, %s1628_s11  ;;  %s483_s17 = scalar_lea.vmem %s1597_s3, %s1628_s11 }
  0x45   : > { %490 = sbr.rel (%p996_p4) target bundleno = 77 (0x4d), region = 116 }
  0x4a   : > { %v1272_v34 = vmov 0.0  }
  0x4b   : > { %491 = vst [vmem:[#allocation2 + $0x10] sm:$0xff] %v1272_v34  ;;  %492 = vst [vmem:[#allocation2] sm:$0xff] %v1272_v34 }
  0x4c   : > { %493 = vst [vmem:[#allocation2 + $0x18] sm:$0xff] %v1272_v34  ;;  %494 = vst [vmem:[#allocation2 + $0x8] sm:$0xff] %v1272_v34 }
  0x4d PF: > { %v1133_v35 = vld [vmem:[%s1499_s10 + $0x74] ss:$8 sps:$4 sm:$0xff]   ;;  %v1135_v36 = vld [vmem:[%s1499_s10 + $0x70] ss:$8 sps:$4 sm:$0xff]   ;;  %v1136_v37 = vld [vmem:[%s1499_s10 + $0x64] ss:$8 sps:$4 sm:$0xff]  }
  0x4e   : > { %703 = vmatprep.subr.bf16.mxu0 %v1133_v35  ;;  %v1138_v38 = vld [vmem:[%s1499_s10 + $0x60] ss:$8 sps:$4 sm:$0xff]   ;;  %v1139_v39 = vld [vmem:[%s1499_s10 + $0x54] ss:$8 sps:$4 sm:$0xff]   ;;  %v1141_v40 = vld [vmem:[%s1499_s10 + $0x50] ss:$8 sps:$4 sm:$0xff]  }
  0x4f   : > { %704 = vmatpush1.bf16.msra.mxu0 %v1135_v36  ;;  %v1142_v41 = vld [vmem:[%s1499_s10 + $0x44] ss:$8 sps:$4 sm:$0xff]   ;;  %v1144_v42 = vld [vmem:[%s1499_s10 + $0x40] ss:$8 sps:$4 sm:$0xff]   ;;  %v1145_v43 = vld [vmem:[%s1499_s10 + $0x34] ss:$8 sps:$4 sm:$0xff]  }
  0x50   : > { %705 = vmatprep.subr.bf16.mxu0 %v1136_v37  ;;  %v1147_v44 = vld [vmem:[%s1499_s10 + $0x30] ss:$8 sps:$4 sm:$0xff]   ;;  %v1148_v45 = vld [vmem:[%s1499_s10 + $0x24] ss:$8 sps:$4 sm:$0xff]   ;;  %v1150_v46 = vld [vmem:[%s1499_s10 + $0x20] ss:$8 sps:$4 sm:$0xff]  }
  0x51   : > { %v1151_v47 = vld [vmem:[%s1499_s10 + $0x14] ss:$8 sps:$4 sm:$0xff]   ;;  %v1153_v49 = vld [vmem:[%s1499_s10 + $0x10] ss:$8 sps:$4 sm:$0xff]   ;;  %v1154_v50 = vld [vmem:[%s1499_s10 + $0x4] ss:$8 sps:$4 sm:$0xff]  }
  0x52   : > { %v1183_v48 = vld [vmem:[%s430_s19 + $0x4] ss:$8 sps:$4 sm:$0xff]   ;;  %v1156_v51 = vld [vmem:[%s1499_s10] ss:$8 sps:$4 sm:$0xff]   ;;  %v1159_v53 = vld [vmem:[%s1499_s10 + $0xf0] ss:$8 sps:$4 sm:$0xff]  }
  0x53   : > { %706 = vmatpush1.bf16.msra.mxu0 %v1138_v38  ;;  %735 = vmatprep.mubr.bf16.mxu0 %v1183_v48  ;;  %v1157_v52 = vld [vmem:[%s1499_s10 + $0xf4] ss:$8 sps:$4 sm:$0xff]   ;;  %v1160_v54 = vld [vmem:[%s1499_s10 + $0xe4] ss:$8 sps:$4 sm:$0xff]   ;;  %v1162_v55 = vld [vmem:[%s1499_s10 + $0xe0] ss:$8 sps:$4 sm:$0xff]  }
  0x54   : > { %707 = vmatprep.subr.bf16.mxu0 %v1139_v39  ;;  %v1163_v56 = vld [vmem:[%s1499_s10 + $0xd4] ss:$8 sps:$4 sm:$0xff]   ;;  %v1165_v57 = vld [vmem:[%s1499_s10 + $0xd0] ss:$8 sps:$4 sm:$0xff]   ;;  %v1166_v58 = vld [vmem:[%s1499_s10 + $0xc4] ss:$8 sps:$4 sm:$0xff]  }
  0x55   : > { %v1168_v59 = vld [vmem:[%s1499_s10 + $0xc0] ss:$8 sps:$4 sm:$0xff]   ;;  %v1169_v60 = vld [vmem:[%s1499_s10 + $0xb4] ss:$8 sps:$4 sm:$0xff]   ;;  %v1171_v61 = vld [vmem:[%s1499_s10 + $0xb0] ss:$8 sps:$4 sm:$0xff]  }
  0x56   : > { %v1172_v62 = vld [vmem:[%s1499_s10 + $0xa4] ss:$8 sps:$4 sm:$0xff]   ;;  %v1174_v63 = vld [vmem:[%s1499_s10 + $0xa0] ss:$8 sps:$4 sm:$0xff]   ;;  %v1175_v0 = vld [vmem:[%s1499_s10 + $0x94] ss:$8 sps:$4 sm:$0xff]  }
  0x57   : > { %708 = vmatpush1.bf16.msra.mxu0 %v1141_v40  ;;  %v1177_v1 = vld [vmem:[%s1499_s10 + $0x90] ss:$8 sps:$4 sm:$0xff]   ;;  %v1178_v2 = vld [vmem:[%s1499_s10 + $0x84] ss:$8 sps:$4 sm:$0xff]   ;;  %v1180_v3 = vld [vmem:[%s1499_s10 + $0x80] ss:$8 sps:$4 sm:$0xff]  }
  0x58   : > { %709 = vmatprep.subr.bf16.mxu0 %v1142_v41  ;;  %v1181_v4 = vld [vmem:[%s430_s19] ss:$8 sps:$4 sm:$0xff]   ;;  %p1031_p5 = scmp.ne.s32.totalorder %s1254_s21, 17 }
  0x59   : > { %v495_v5 = vld [vmem:[#allocation2 + $0x10] sm:$0xff]  ;;  %v496_v7 = vld [vmem:[#allocation2] sm:$0xff]  ;;  %v497_v10 = vld [vmem:[#allocation2 + $0x18] sm:$0xff] }
  0x5a   : > { %v498_v13 = vld [vmem:[#allocation2 + $0x8] sm:$0xff] }
  0x5b   : > { %710 = vmatpush1.bf16.msra.mxu0 %v1144_v42 }
  0x5c   : > { %711 = vmatprep.subr.bf16.mxu0 %v1145_v43 }
  0x5f   : > { %712 = vmatpush1.bf16.msra.mxu0 %v1147_v44 }
  0x60   : > { %713 = vmatprep.subr.bf16.mxu0 %v1148_v45 }
  0x63   : > { %714 = vmatpush1.bf16.msra.mxu0 %v1150_v46 }
  0x64   : > { %715 = vmatprep.subr.bf16.mxu0 %v1151_v47 }
  0x67   : > { %716 = vmatpush1.bf16.msra.mxu0 %v1153_v49 }
  0x68   : > { %717 = vmatprep.subr.bf16.mxu0 %v1154_v50 }
  0x6b   : > { %718 = vmatpush1.bf16.msra.mxu0 %v1156_v51 }
  0x6c   : > { %719 = vmatprep.subr.bf16.mxu0 %v1157_v52 }
  0x6f   : > { %720 = vmatpush2.bf16.msra.mxu0 %v1159_v53 }
  0x70   : > { %721 = vmatprep.subr.bf16.mxu0 %v1160_v54 }
  0x73   : > { %722 = vmatpush2.bf16.msra.mxu0 %v1162_v55 }
  0x74   : > { %723 = vmatprep.subr.bf16.mxu0 %v1163_v56 }
  0x77   : > { %724 = vmatpush2.bf16.msra.mxu0 %v1165_v57 }
  0x78   : > { %725 = vmatprep.subr.bf16.mxu0 %v1166_v58 }
  0x7b   : > { %726 = vmatpush2.bf16.msra.mxu0 %v1168_v59 }
  0x7c   : > { %727 = vmatprep.subr.bf16.mxu0 %v1169_v60 }
  0x7f   : > { %728 = vmatpush2.bf16.msra.mxu0 %v1171_v61 }
  0x80   : > { %729 = vmatprep.subr.bf16.mxu0 %v1172_v62 }
  0x83   : > { %730 = vmatpush2.bf16.msra.mxu0 %v1174_v63 }
  0x84   : > { %731 = vmatprep.subr.bf16.mxu0 %v1175_v0 }
  0x87   : > { %732 = vmatpush2.bf16.msra.mxu0 %v1177_v1 }
  0x88   : > { %733 = vmatprep.subr.bf16.mxu0 %v1178_v2 }
  0x8b   : > { %734 = vmatpush2.bf16.msra.mxu0 %v1180_v3 }
  0x8e   : > { %736 = vmatmul.mubr.bf16.vlgmr.msra.gmra.mxu0 %v1181_v4 }
 0x14e   : > { %v737_v6 = vpop.f32.mrf.mxu0 }
 0x14f   : > { %v746_v8 = vadd.f32 %v737_v6, %v495_v5 }
 0x150   : > { %v739_v9 = vpop.f32.mrf.mxu0 }
 0x151   : > { %750 = vst [vmem:[#allocation2 + $0x10] sm:$0xff] %v746_v8  ;;  %v747_v11 = vadd.f32 %v739_v9, %v496_v7 }
 0x152   : > { %v741_v12 = vpop.f32.mrf.mxu0 }
 0x153   : > { %751 = vst [vmem:[#allocation2] sm:$0xff] %v747_v11  ;;  %v748_v14 = vadd.f32 %v741_v12, %v497_v10  ;;  %757 = sbr.rel (%p1031_p5) target bundleno = 361 (0x169), region = 120 }
 0x154   : > { %v743_v15 = vpop.f32.mrf.mxu0 }
 0x155   : > { %752 = vst [vmem:[#allocation2 + $0x18] sm:$0xff] %v748_v14  ;;  %v749_v16 = vadd.f32 %v743_v15, %v498_v13 }
 0x157   : > { %753 = vst [vmem:[#allocation2 + $0x8] sm:$0xff] %v749_v16 }
 0x158   : > { %v764_v17 = vlaneseq  ;;  %v762_v19 = vld [vmem:[%s478_s6] sm:$0x3]  ;;  %v758_v21 = vld [vmem:[#allocation2 + $0x10] sm:$0xff] }
 0x159   : > { %v778_v20 = vld [vmem:[%s483_s17] sm:$0x3] }
 0x15a   : > { %v765_v18 = vshrl.u32 %v764_v17, 7  ;;  %v759_v24 = vld [vmem:[#allocation2] sm:$0xff] }
 0x15c   : > { %v766_v22 = vsub.s32 0, %v765_v18  ;;  %v770_v23 = vsub.s32 1, %v765_v18  ;;  %v760_v25 = vld [vmem:[#allocation2 + $0x18] sm:$0xff] }
 0x15e   : > { %v761_v26 = vld [vmem:[#allocation2 + $0x8] sm:$0xff]  ;;  %v767_v27 = vrot.slane %v762_v19, %v766_v22  ;;  %v771_v28 = vrot.slane %v762_v19, %v770_v23  ;;  %v783_v29 = vrot.slane %v778_v20, %v766_v22  ;;  %v787_v30 = vrot.slane %v778_v20, %v770_v23 }
 0x160   : > { %v774_v31 = vmul.f32 %v767_v27, %v758_v21  ;;  %v775_v32 = vmul.f32 %v771_v28, %v759_v24  ;;  %v776_v33 = vmul.f32 %v767_v27, %v760_v25  ;;  %v777_v34 = vmul.f32 %v771_v28, %v761_v26 }
 0x162   : > { %v790_v35 = vadd.f32 %v783_v29, %v774_v31  ;;  %v791_v36 = vadd.f32 %v787_v30, %v775_v32  ;;  %v792_v37 = vadd.f32 %v783_v29, %v776_v33  ;;  %v793_v38 = vadd.f32 %v787_v30, %v777_v34 }
 0x164   : > { %v794_v39 = vmax.f32 %v790_v35, 0.0  ;;  %v795_v40 = vmax.f32 %v791_v36, 0.0  ;;  %v796_v41 = vmax.f32 %v792_v37, 0.0  ;;  %v797_v42 = vmax.f32 %v793_v38, 0.0 }
 0x166   : > { %v1041_v43 = vpack.c.bf16 %v795_v40, %v794_v39  ;;  %v1042_v44 = vpack.c.bf16 %v797_v42, %v796_v41 }
 0x168   : > { %810 = vst [vmem:[%s1501_s20] sm:$0xff] %v1041_v43  ;;  %811 = vst [vmem:[%s1501_s20 + $0x8] sm:$0xff] %v1042_v44 }
 0x169 PF: > { %818 = sbr.rel (!%p1392_p12) target bundleno = 369 (0x171), region = 124  ;;  %s1043_s21 = sshll.u32 (%p1392_p12), %s1258_s22, 3 }
 0x16a   : > { %s824_s26 = scalar_lea.vmem (%p1392_p12), %s1598_s4, %s1043_s21 }
 0x16f   : > { %v855_v45 = vld [vmem:[%s1501_s20] sm:$0xff]  ;;  %v857_v46 = vld [vmem:[%s1501_s20 + $0x8] sm:$0xff] }
 0x170   : > { %856 = vst [vmem:[%s824_s26] sm:$0xff] %v855_v45  ;;  %858 = vst [vmem:[%s824_s26 + $0x10] sm:$0xff] %v857_v46 }
 0x171 PF: > { %s14_s25 = sadd.s32 1, %s1270_s25   ;;  %s1609_s19 = sld [smem:[#allocation6_spill]] }
 0x172   : > { %p11_p6 = scmp.ge.s32.totalorder %s14_s25, 38   ;;  %s1610_s20 = sld [smem:[#allocation9_spill]] }
 0x173   : > { %s1611_s14 = sld [smem:[#allocation7_spill]]  ;;  %s1613_s15 = smov %s1234_s16 }
 0x174   : > { %s1612_s5 = sld [smem:[#allocation8_spill]]  ;;  %s1614_s16 = smov %s1390_s13 }
 0x175   : > { %s1615_s17 = smov %s1242_s18  ;;  %s1616_s18 = smov %s1387_s12 }
 0x176   : > { %s1617_s21 = smov %s1262_s23  ;;  %s1618_s22 = smov %s1266_s24 }
 0x177   :  { %13 = sbr.rel (!%p11_p6) target bundleno = 6 (0x6), region = 207 }
 0x179   : > { %s1619_s23 = smov %s1611_s14 }
 0x17a   : > { %s1620_s24 = smov %s1612_s5 }

// kernel: encoder_forward.42
= control target key start
LH: loop header
LB: loop body
LE: loop exit
PB: predicated region body
PF: predicated region fallthrough
CT: control target
= control target key end

     0   :  { %s1433_s18 = smov 0   ;;  %s1435_s19 = smov 0   ;;  %s1754_s0 = inlined_call_operand.vmem [shape: bf16[16,4608], index: 0, kind: input, shape index: {}]   ;;  %s1755_s1 = inlined_call_operand.vmem [shape: bf16[4608,512], index: 1, kind: input, shape index: {}]   ;;  %s1756_s2 = inlined_call_operand.vmem [shape: f32[1,512], index: 2, kind: input, shape index: {}]   ;;  %s1757_s3 = inlined_call_operand.vmem [shape: f32[1,512], index: 3, kind: input, shape index: {}]   ;;  %s1758_s4 = inlined_call_operand.vmem [shape: bf16[16,512], index: 4, kind: input, shape index: {}]   ;;  %s1759_s5 = inlined_call_operand.vmem [shape: bf16[16,512], index: 5, kind: output, shape index: {}]  }
   0x1   :  { %s1437_s20 = smov 0   ;;  %s1439_s21 = smov 0  }
   0x2   :  { %s1441_s22 = smov 0   ;;  %s1443_s23 = smov 0  }
   0x3   :  { %s1445_s24 = smov 0   ;;  %s1447_s25 = smov 0  }
   0x4   :  { %s1449_s26 = smov 0   ;;  %s1451_s27 = smov 0  }
   0x5   :  { %s1453_s28 = smov 0  }
   0x6 LB: > { %1763 = sst [smem:[#allocation7_spill]] %s1380_s23  ;;  %s1103_s29 = sadd.s32 4294967295, %s1400_s28   ;;  %s1400_s28 = sphi %s1453_s28, %s15_s28   ;;  %s1396_s27 = sphi %s1451_s27, %s1787_s27   ;;  %s1392_s26 = sphi %s1449_s26, %s1786_s26   ;;  %s1388_s25 = sphi %s1447_s25, %s1785_s25   ;;  %s1384_s24 = sphi %s1445_s24, %s1784_s24   ;;  %s1380_s23 = sphi %s1443_s23, %s1783_s23   ;;  %s1376_s22 = sphi %s1441_s22, %s1775_s22   ;;  %s1372_s21 = sphi %s1439_s21, %s1782_s21   ;;  %s1368_s20 = sphi %s1437_s20, %s1781_s20   ;;  %s1364_s19 = sphi %s1435_s19, %s1780_s19   ;;  %s1360_s18 = sphi %s1433_s18, %s1779_s18  }
   0x7   : > { %s27_s30 = sadd.s32 1, %s1392_s26  ;;  %s30_s6 = sadd.s32 1, %s1396_s27 }
   0x8   : > { %p28_p0 = scmp.ge.s32.totalorder %s27_s30, 18  ;;  %s43_s7 = sadd.s32 1, %s1380_s23 }
   0x9   : > { %p50_p1 = scmp.ne.s32.totalorder %s1380_s23, %s1376_s22  ;;  %p51_p2 = scmp.eq.s32.totalorder %s1400_s28, 0 }
   0xa   : > { %s1789_s30 = smov (%p28_p0, %s27_s30), 0  ;;  %s1791_s6 = smov (!%p28_p0, %s30_s6), %s1396_s27 }
   0xb   : > { %1764 = sst [smem:[#allocation8_spill]] %s1789_s30  ;;  %s39_s8 = ssub.s32 %s1392_s26, %s1789_s30 }
   0xc   : > { %p32_p3 = scmp.ge.s32.totalorder %s1791_s6, 2  ;;  %p41_p4 = scmp.eq.s32.totalorder %s39_s8, 0 }
   0xd   : > { %p1502_p5 = por %p51_p2, %p50_p1  ;;  %s71_s10 = sadd.s32 1, %s1372_s21 }
   0xe   : > { %s1793_s6 = smov (%p32_p3, %s1791_s6), 0  ;;  %p78_p6 = scmp.ne.s32.totalorder %s1372_s21, %s1368_s20 }
   0xf   : > { %1766 = sst [smem:[#allocation9_spill]] %s1793_s6  ;;  %s67_s12 = ssub.s32 %s1396_s27, %s1793_s6 }
  0x10   : > { %s1510_s11 = scalar_select %p41_p4, %s1380_s23, %s43_s7  }
  0x11   : > { %s68_s13 = sor.u32 %s67_s12, %s39_s8  ;;  %p149_p7 = scmp.eq.s32.totalorder %s67_s12, 0 }
  0x12   : > { %1767 = sst [smem:[#allocation10_spill]] %s1510_s11  ;;  %p69_p8 = scmp.eq.s32.totalorder %s68_s13, 0 }
  0x13   : > { %p1518_p9 = por %p78_p6, %p51_p2  ;;  %s151_s15 = sadd.s32 1, %s1364_s19 }
  0x14   : > { %p158_p10 = scmp.ne.s32.totalorder %s1364_s19, %s1360_s18  ;;  %p190_p12 = scmp.eq.s32.totalorder %s1103_s29, 35 }
  0x15   : > { %s1526_s16 = scalar_select %p69_p8, %s1372_s21, %s71_s10  }
  0x16   : > { %s1529_s17 = scalar_select %p149_p7, %s1364_s19, %s151_s15  }
  0x17   : > { %1769 = sst [smem:[#allocation11_spill]] %s1526_s16  ;;  %p1533_p11 = por %p158_p10, %p51_p2 }
  0x18   : > { %1770 = sst [smem:[#allocation12_spill]] %s1529_s17  ;;  %p1537_p13 = por %p190_p12, %p158_p10 }
  0x19   : > { %p1106_p0 = scmp.ge.s32.totalorder %s1400_s28, 36 }
  0x1b   : > { %212 = sbr.rel (%p1106_p0) target bundleno = 65 (0x41), region = 16 }
  0x20   : > { %215 = sbr.rel (!%p1502_p5) target bundleno = 37 (0x25), region = 20  ;;  %s217_s10 = sand.u32 (%p1502_p5), 1, %s1380_s23  }
  0x21   : > { %s1168_s12 = sshll.u32 (%p1502_p5), %s1392_s26, 3  ;;  %s1107_s13 = sshll.u32 (%p1502_p5), %s217_s10, 4 }
  0x22   : > { %s225_s30 = scalar_lea.vmem (%p1502_p5), %s1754_s0, %s1168_s12  ;;  %s219_s29 = scalar_lea.vmem (%p1502_p5), [#allocation3], %s1107_s13 }
  0x23   : > { %v256_v0 = vld [vmem:[%s225_s30] sm:$0xff] (%p1502_p5)  ;;  %v258_v1 = vld [vmem:[%s225_s30 + $0x90] sm:$0xff] (%p1502_p5) }
  0x24   : > { %257 = vst [vmem:[%s219_s29] sm:$0xff] (%p1502_p5), %v256_v0  ;;  %259 = vst [vmem:[%s219_s29 + $0x8] sm:$0xff] (%p1502_p5), %v258_v1 }
  0x25 PF: > { %265 = sbr.rel (!%p1518_p9) target bundleno = 60 (0x3c), region = 58  ;;  %s267_s9 = sand.u32 (%p1518_p9), 1, %s1372_s21  }
  0x26   : > { %s1112_s11 = sshll.u32 (%p1518_p9), %s1396_s27, 1  ;;  %s1110_s23 = sshll.u32 (%p1518_p9), %s267_s9, 8 }
  0x27   : > { %s1169_s10 = sshll.u32 (%p1518_p9), %s1392_s26, 7  ;;  %s1562_s14 = scalar_lea.vmem (%p1518_p9), [#allocation4], %s1110_s23 }
  0x28   : > { %s273_s16 = sadd.s32 (%p1518_p9), %s1169_s10, %s1112_s11 }
  0x29   : > { %s1114_s17 = sshll.u32 (%p1518_p9), %s273_s16, 2 }
  0x2a   : > { %s1557_s30 = scalar_lea.vmem %s1755_s1, %s1114_s17 }
  0x2b   : > { %v366_v2 = vld [vmem:[%s1557_s30] sm:$0xff]  ;;  %v368_v3 = vld [vmem:[%s1557_s30 + $0x10] sm:$0xff] }
  0x2c   : > { %v370_v4 = vld [vmem:[%s1557_s30 + $0x20] sm:$0xff]  ;;  %367 = vst [vmem:[%s1562_s14] sm:$0xff] %v366_v2  ;;  %369 = vst [vmem:[%s1562_s14 + $0x8] sm:$0xff] %v368_v3  ;;  %v372_v5 = vld [vmem:[%s1557_s30 + $0x30] sm:$0xff] }
  0x2d   : > { %371 = vst [vmem:[%s1562_s14 + $0x10] sm:$0xff] %v370_v4  ;;  %v374_v6 = vld [vmem:[%s1557_s30 + $0x40] sm:$0xff]  ;;  %v376_v7 = vld [vmem:[%s1557_s30 + $0x50] sm:$0xff]  ;;  %373 = vst [vmem:[%s1562_s14 + $0x18] sm:$0xff] %v372_v5 }
  0x2e   : > { %375 = vst [vmem:[%s1562_s14 + $0x20] sm:$0xff] %v374_v6  ;;  %377 = vst [vmem:[%s1562_s14 + $0x28] sm:$0xff] %v376_v7  ;;  %v378_v8 = vld [vmem:[%s1557_s30 + $0x60] sm:$0xff]  ;;  %v380_v9 = vld [vmem:[%s1557_s30 + $0x70] sm:$0xff] }
  0x2f   : > { %v382_v10 = vld [vmem:[%s1557_s30 + $0x80] sm:$0xff]  ;;  %379 = vst [vmem:[%s1562_s14 + $0x30] sm:$0xff] %v378_v8  ;;  %381 = vst [vmem:[%s1562_s14 + $0x38] sm:$0xff] %v380_v9  ;;  %v384_v11 = vld [vmem:[%s1557_s30 + $0x90] sm:$0xff] }
  0x30   : > { %383 = vst [vmem:[%s1562_s14 + $0x40] sm:$0xff] %v382_v10  ;;  %v386_v12 = vld [vmem:[%s1557_s30 + $0xa0] sm:$0xff]  ;;  %v388_v13 = vld [vmem:[%s1557_s30 + $0xb0] sm:$0xff]  ;;  %385 = vst [vmem:[%s1562_s14 + $0x48] sm:$0xff] %v384_v11 }
  0x31   : > { %387 = vst [vmem:[%s1562_s14 + $0x50] sm:$0xff] %v386_v12  ;;  %389 = vst [vmem:[%s1562_s14 + $0x58] sm:$0xff] %v388_v13  ;;  %v390_v14 = vld [vmem:[%s1557_s30 + $0xc0] sm:$0xff]  ;;  %v392_v15 = vld [vmem:[%s1557_s30 + $0xd0] sm:$0xff] }
  0x32   : > { %v394_v16 = vld [vmem:[%s1557_s30 + $0xe0] sm:$0xff]  ;;  %391 = vst [vmem:[%s1562_s14 + $0x60] sm:$0xff] %v390_v14  ;;  %393 = vst [vmem:[%s1562_s14 + $0x68] sm:$0xff] %v392_v15  ;;  %v396_v17 = vld [vmem:[%s1557_s30 + $0xf0] sm:$0xff] }
  0x33   : > { %395 = vst [vmem:[%s1562_s14 + $0x70] sm:$0xff] %v394_v16  ;;  %v398_v18 = vld [vmem:[%s1557_s30 + $0x100] sm:$0xff]  ;;  %v400_v19 = vld [vmem:[%s1557_s30 + $0x110] sm:$0xff]  ;;  %397 = vst [vmem:[%s1562_s14 + $0x78] sm:$0xff] %v396_v17 }
  0x34   : > { %399 = vst [vmem:[%s1562_s14 + $0x80] sm:$0xff] %v398_v18  ;;  %401 = vst [vmem:[%s1562_s14 + $0x88] sm:$0xff] %v400_v19  ;;  %v402_v20 = vld [vmem:[%s1557_s30 + $0x120] sm:$0xff]  ;;  %v404_v21 = vld [vmem:[%s1557_s30 + $0x130] sm:$0xff] }
  0x35   : > { %v406_v22 = vld [vmem:[%s1557_s30 + $0x140] sm:$0xff]  ;;  %403 = vst [vmem:[%s1562_s14 + $0x90] sm:$0xff] %v402_v20  ;;  %405 = vst [vmem:[%s1562_s14 + $0x98] sm:$0xff] %v404_v21  ;;  %v408_v23 = vld [vmem:[%s1557_s30 + $0x150] sm:$0xff] }
  0x36   : > { %407 = vst [vmem:[%s1562_s14 + $0xa0] sm:$0xff] %v406_v22  ;;  %v410_v24 = vld [vmem:[%s1557_s30 + $0x160] sm:$0xff]  ;;  %v412_v25 = vld [vmem:[%s1557_s30 + $0x170] sm:$0xff]  ;;  %409 = vst [vmem:[%s1562_s14 + $0xa8] sm:$0xff] %v408_v23 }
  0x37   : > { %411 = vst [vmem:[%s1562_s14 + $0xb0] sm:$0xff] %v410_v24  ;;  %413 = vst [vmem:[%s1562_s14 + $0xb8] sm:$0xff] %v412_v25  ;;  %v414_v26 = vld [vmem:[%s1557_s30 + $0x180] sm:$0xff]  ;;  %v416_v27 = vld [vmem:[%s1557_s30 + $0x190] sm:$0xff] }
  0x38   : > { %v418_v28 = vld [vmem:[%s1557_s30 + $0x1a0] sm:$0xff]  ;;  %415 = vst [vmem:[%s1562_s14 + $0xc0] sm:$0xff] %v414_v26  ;;  %417 = vst [vmem:[%s1562_s14 + $0xc8] sm:$0xff] %v416_v27  ;;  %v420_v29 = vld [vmem:[%s1557_s30 + $0x1b0] sm:$0xff] }
  0x39   : > { %419 = vst [vmem:[%s1562_s14 + $0xd0] sm:$0xff] %v418_v28  ;;  %v422_v30 = vld [vmem:[%s1557_s30 + $0x1c0] sm:$0xff]  ;;  %v424_v31 = vld [vmem:[%s1557_s30 + $0x1d0] sm:$0xff]  ;;  %421 = vst [vmem:[%s1562_s14 + $0xd8] sm:$0xff] %v420_v29 }
  0x3a   : > { %423 = vst [vmem:[%s1562_s14 + $0xe0] sm:$0xff] %v422_v30  ;;  %425 = vst [vmem:[%s1562_s14 + $0xe8] sm:$0xff] %v424_v31  ;;  %v426_v32 = vld [vmem:[%s1557_s30 + $0x1e0] sm:$0xff]  ;;  %v428_v33 = vld [vmem:[%s1557_s30 + $0x1f0] sm:$0xff] }
  0x3b   : > { %427 = vst [vmem:[%s1562_s14 + $0xf0] sm:$0xff] %v426_v32  ;;  %429 = vst [vmem:[%s1562_s14 + $0xf8] sm:$0xff] %v428_v33 }
  0x3c PF: > { %451 = sbr.rel (!%p1533_p11) target bundleno = 65 (0x41), region = 104  ;;  %s453_s23 = sand.u32 (%p1533_p11), 1, %s1364_s19  }
  0x3d   : > { %s1170_s11 = sshll.u32 (%p1533_p11), %s1396_s27, 3  ;;  %s1115_s16 = sshll.u32 (%p1533_p11), %s453_s23, 4 }
  0x3e   : > { %s461_s15 = scalar_lea.vmem (%p1533_p11), %s1758_s4, %s1170_s11  ;;  %s455_s29 = scalar_lea.vmem (%p1533_p11), [#allocation5], %s1115_s16 }
  0x3f   : > { %v492_v34 = vld [vmem:[%s461_s15] sm:$0xff] (%p1533_p11)  ;;  %v494_v35 = vld [vmem:[%s461_s15 + $0x10] sm:$0xff] (%p1533_p11) }
  0x40   : > { %493 = vst [vmem:[%s455_s29] sm:$0xff] (%p1533_p11), %v492_v34  ;;  %495 = vst [vmem:[%s455_s29 + $0x8] sm:$0xff] (%p1533_p11), %v494_v35 }
  0x41 PF: > { %p1118_p1 = scmp.ge.s32.totalorder %s1400_s28, 1  ;;  %p500_p2 = scmp.lt.s32.totalorder %s1400_s28, 37 }
  0x43   : > { %p501_p3 = pnand %p1118_p1, %p500_p2 }
  0x44   : > { %s507_s7 = sand.u32 (!%p501_p3), 1, %s1376_s22   ;;  %s514_s9 = sand.u32 (!%p501_p3), 1, %s1368_s20  }
  0x45   : > { %504 = sbr.rel (%p501_p3) target bundleno = 380 (0x17c), region = 142  ;;  %s1636_s10 = sshll.u32 (!%p501_p3), %s507_s7, 4 }
  0x46   : > { %s1120_s6 = sshll.u32 (!%p501_p3), %s514_s9, 8  ;;  %s521_s12 = sand.u32 (!%p501_p3), 1, %s1360_s18  }
  0x47   : > { %s1123_s30 = sshll.u32 (!%p501_p3), %s1388_s25, 1  ;;  %s1640_s14 = sshll.u32 (!%p501_p3), %s521_s12, 4 }
  0x48   : > { %p568_p4 = scmp.lt.s32.totalorder (!%p501_p3), %s1123_s30, 3  ;;  %s509_s13 = scalar_lea.vmem (!%p501_p3), [#allocation3], %s1636_s10 }
  0x49   : > { %s1653_s18 = scalar_lea.vmem (!%p501_p3), [#allocation4], %s1120_s6  ;;  %s523_s15 = scalar_lea.vmem (!%p501_p3), [#allocation5], %s1640_s14 }
  0x4a   : > { %s1795_s30 = smov (!%p568_p4, %s1123_s30), 3  ;;  %s1657_s29 = scalar_lea.vmem [#allocation6], %s1640_s14 }
  0x4b   : > { %s570_s22 = scalar_lea.vmem %s1756_s2, %s1795_s30  ;;  %s575_s17 = scalar_lea.vmem %s1757_s3, %s1795_s30 }
  0x4c   : > { %p1125_p5 = scmp.ne.s32.totalorder %s1384_s24, 0 }
  0x4e   : > { %584 = sbr.rel (%p1125_p5) target bundleno = 86 (0x56), region = 158 }
  0x53   : > { %v1402_v36 = vmov 0.0  }
  0x54   : > { %585 = vst [vmem:[#allocation2 + $0x10] sm:$0xff] %v1402_v36  ;;  %586 = vst [vmem:[#allocation2] sm:$0xff] %v1402_v36 }
  0x55   : > { %587 = vst [vmem:[#allocation2 + $0x18] sm:$0xff] %v1402_v36  ;;  %588 = vst [vmem:[#allocation2 + $0x8] sm:$0xff] %v1402_v36 }
  0x56 PF: > { %v1263_v37 = vld [vmem:[%s1653_s18 + $0x74] ss:$8 sps:$4 sm:$0xff]   ;;  %v1265_v38 = vld [vmem:[%s1653_s18 + $0x70] ss:$8 sps:$4 sm:$0xff]   ;;  %v1266_v39 = vld [vmem:[%s1653_s18 + $0x64] ss:$8 sps:$4 sm:$0xff]  }
  0x57   : > { %797 = vmatprep.subr.bf16.mxu0 %v1263_v37  ;;  %v1268_v40 = vld [vmem:[%s1653_s18 + $0x60] ss:$8 sps:$4 sm:$0xff]   ;;  %v1269_v41 = vld [vmem:[%s1653_s18 + $0x54] ss:$8 sps:$4 sm:$0xff]   ;;  %v1271_v42 = vld [vmem:[%s1653_s18 + $0x50] ss:$8 sps:$4 sm:$0xff]  }
  0x58   : > { %798 = vmatpush1.bf16.msra.mxu0 %v1265_v38  ;;  %v1272_v43 = vld [vmem:[%s1653_s18 + $0x44] ss:$8 sps:$4 sm:$0xff]   ;;  %v1274_v44 = vld [vmem:[%s1653_s18 + $0x40] ss:$8 sps:$4 sm:$0xff]   ;;  %v1275_v45 = vld [vmem:[%s1653_s18 + $0x34] ss:$8 sps:$4 sm:$0xff]  }
  0x59   : > { %799 = vmatprep.subr.bf16.mxu0 %v1266_v39  ;;  %v1277_v46 = vld [vmem:[%s1653_s18 + $0x30] ss:$8 sps:$4 sm:$0xff]   ;;  %v1278_v47 = vld [vmem:[%s1653_s18 + $0x24] ss:$8 sps:$4 sm:$0xff]   ;;  %v1280_v48 = vld [vmem:[%s1653_s18 + $0x20] ss:$8 sps:$4 sm:$0xff]  }
  0x5a   : > { %v1281_v49 = vld [vmem:[%s1653_s18 + $0x14] ss:$8 sps:$4 sm:$0xff]   ;;  %v1283_v51 = vld [vmem:[%s1653_s18 + $0x10] ss:$8 sps:$4 sm:$0xff]   ;;  %v1284_v52 = vld [vmem:[%s1653_s18 + $0x4] ss:$8 sps:$4 sm:$0xff]  }
  0x5b   : > { %v1313_v50 = vld [vmem:[%s509_s13 + $0x4] ss:$8 sps:$4 sm:$0xff]   ;;  %v1286_v53 = vld [vmem:[%s1653_s18] ss:$8 sps:$4 sm:$0xff]   ;;  %v1289_v55 = vld [vmem:[%s1653_s18 + $0xf0] ss:$8 sps:$4 sm:$0xff]  }
  0x5c   : > { %800 = vmatpush1.bf16.msra.mxu0 %v1268_v40  ;;  %829 = vmatprep.mubr.bf16.mxu0 %v1313_v50  ;;  %v1287_v54 = vld [vmem:[%s1653_s18 + $0xf4] ss:$8 sps:$4 sm:$0xff]   ;;  %v1290_v56 = vld [vmem:[%s1653_s18 + $0xe4] ss:$8 sps:$4 sm:$0xff]   ;;  %v1292_v57 = vld [vmem:[%s1653_s18 + $0xe0] ss:$8 sps:$4 sm:$0xff]  }
  0x5d   : > { %801 = vmatprep.subr.bf16.mxu0 %v1269_v41  ;;  %v1293_v58 = vld [vmem:[%s1653_s18 + $0xd4] ss:$8 sps:$4 sm:$0xff]   ;;  %v1295_v59 = vld [vmem:[%s1653_s18 + $0xd0] ss:$8 sps:$4 sm:$0xff]   ;;  %v1296_v60 = vld [vmem:[%s1653_s18 + $0xc4] ss:$8 sps:$4 sm:$0xff]  }
  0x5e   : > { %v1298_v61 = vld [vmem:[%s1653_s18 + $0xc0] ss:$8 sps:$4 sm:$0xff]   ;;  %v1299_v62 = vld [vmem:[%s1653_s18 + $0xb4] ss:$8 sps:$4 sm:$0xff]   ;;  %v1301_v63 = vld [vmem:[%s1653_s18 + $0xb0] ss:$8 sps:$4 sm:$0xff]  }
  0x5f   : > { %v1302_v0 = vld [vmem:[%s1653_s18 + $0xa4] ss:$8 sps:$4 sm:$0xff]   ;;  %v1304_v1 = vld [vmem:[%s1653_s18 + $0xa0] ss:$8 sps:$4 sm:$0xff]   ;;  %v1305_v2 = vld [vmem:[%s1653_s18 + $0x94] ss:$8 sps:$4 sm:$0xff]  }
  0x60   : > { %802 = vmatpush1.bf16.msra.mxu0 %v1271_v42  ;;  %v1307_v3 = vld [vmem:[%s1653_s18 + $0x90] ss:$8 sps:$4 sm:$0xff]   ;;  %v1308_v4 = vld [vmem:[%s1653_s18 + $0x84] ss:$8 sps:$4 sm:$0xff]   ;;  %v1310_v5 = vld [vmem:[%s1653_s18 + $0x80] ss:$8 sps:$4 sm:$0xff]  }
  0x61   : > { %803 = vmatprep.subr.bf16.mxu0 %v1272_v43  ;;  %v1311_v6 = vld [vmem:[%s509_s13] ss:$8 sps:$4 sm:$0xff]   ;;  %p1160_p6 = scmp.ne.s32.totalorder %s1384_s24, 17 }
  0x62   : > { %v589_v7 = vld [vmem:[#allocation2 + $0x10] sm:$0xff]  ;;  %v590_v9 = vld [vmem:[#allocation2] sm:$0xff]  ;;  %v591_v12 = vld [vmem:[#allocation2 + $0x18] sm:$0xff] }
  0x63   : > { %v592_v15 = vld [vmem:[#allocation2 + $0x8] sm:$0xff] }
  0x64   : > { %804 = vmatpush1.bf16.msra.mxu0 %v1274_v44 }
  0x65   : > { %805 = vmatprep.subr.bf16.mxu0 %v1275_v45 }
  0x68   : > { %806 = vmatpush1.bf16.msra.mxu0 %v1277_v46 }
  0x69   : > { %807 = vmatprep.subr.bf16.mxu0 %v1278_v47 }
  0x6c   : > { %808 = vmatpush1.bf16.msra.mxu0 %v1280_v48 }
  0x6d   : > { %809 = vmatprep.subr.bf16.mxu0 %v1281_v49 }
  0x70   : > { %810 = vmatpush1.bf16.msra.mxu0 %v1283_v51 }
  0x71   : > { %811 = vmatprep.subr.bf16.mxu0 %v1284_v52 }
  0x74   : > { %812 = vmatpush1.bf16.msra.mxu0 %v1286_v53 }
  0x75   : > { %813 = vmatprep.subr.bf16.mxu0 %v1287_v54 }
  0x78   : > { %814 = vmatpush2.bf16.msra.mxu0 %v1289_v55 }
  0x79   : > { %815 = vmatprep.subr.bf16.mxu0 %v1290_v56 }
  0x7c   : > { %816 = vmatpush2.bf16.msra.mxu0 %v1292_v57 }
  0x7d   : > { %817 = vmatprep.subr.bf16.mxu0 %v1293_v58 }
  0x80   : > { %818 = vmatpush2.bf16.msra.mxu0 %v1295_v59 }
  0x81   : > { %819 = vmatprep.subr.bf16.mxu0 %v1296_v60 }
  0x84   : > { %820 = vmatpush2.bf16.msra.mxu0 %v1298_v61 }
  0x85   : > { %821 = vmatprep.subr.bf16.mxu0 %v1299_v62 }
  0x88   : > { %822 = vmatpush2.bf16.msra.mxu0 %v1301_v63 }
  0x89   : > { %823 = vmatprep.subr.bf16.mxu0 %v1302_v0 }
  0x8c   : > { %824 = vmatpush2.bf16.msra.mxu0 %v1304_v1 }
  0x8d   : > { %825 = vmatprep.subr.bf16.mxu0 %v1305_v2 }
  0x90   : > { %826 = vmatpush2.bf16.msra.mxu0 %v1307_v3 }
  0x91   : > { %827 = vmatprep.subr.bf16.mxu0 %v1308_v4 }
  0x94   : > { %828 = vmatpush2.bf16.msra.mxu0 %v1310_v5 }
  0x97   : > { %830 = vmatmul.mubr.bf16.vlgmr.msra.gmra.mxu0 %v1311_v6 }
 0x157   : > { %v831_v8 = vpop.f32.mrf.mxu0 }
 0x158   : > { %v840_v10 = vadd.f32 %v831_v8, %v589_v7 }
 0x159   : > { %v833_v11 = vpop.f32.mrf.mxu0 }
 0x15a   : > { %844 = vst [vmem:[#allocation2 + $0x10] sm:$0xff] %v840_v10  ;;  %v841_v13 = vadd.f32 %v833_v11, %v590_v9 }
 0x15b   : > { %v835_v14 = vpop.f32.mrf.mxu0 }
 0x15c   : > { %845 = vst [vmem:[#allocation2] sm:$0xff] %v841_v13  ;;  %v842_v16 = vadd.f32 %v835_v14, %v591_v12  ;;  %851 = sbr.rel (%p1160_p6) target bundleno = 372 (0x174), region = 162 }
 0x15d   : > { %v837_v17 = vpop.f32.mrf.mxu0 }
 0x15e   : > { %846 = vst [vmem:[#allocation2 + $0x18] sm:$0xff] %v842_v16  ;;  %v843_v18 = vadd.f32 %v837_v17, %v592_v15 }
 0x160   : > { %847 = vst [vmem:[#allocation2 + $0x8] sm:$0xff] %v843_v18 }
 0x161   : > { %v858_v19 = vlaneseq  ;;  %v856_v21 = vld [vmem:[%s570_s22] sm:$0x3]  ;;  %v852_v23 = vld [vmem:[#allocation2 + $0x10] sm:$0xff]  ;;  %v889_v27 = vld [vmem:[%s523_s15 + $0x8] sm:$0xff] }
 0x162   : > { %v872_v22 = vld [vmem:[%s575_s17] sm:$0x3]  ;;  %v892_v37 = vunpack.c.l.bf16 %v889_v27  ;;  %v893_v38 = vunpack.c.h.bf16 %v889_v27 }
 0x163   : > { %v859_v20 = vshrl.u32 %v858_v19, 7  ;;  %v888_v26 = vld [vmem:[%s523_s15] sm:$0xff] }
 0x164   : > { %v853_v28 = vld [vmem:[#allocation2] sm:$0xff]  ;;  %v890_v35 = vunpack.c.l.bf16 %v888_v26  ;;  %v891_v36 = vunpack.c.h.bf16 %v888_v26 }
 0x165   : > { %v860_v24 = vsub.s32 0, %v859_v20  ;;  %v864_v25 = vsub.s32 1, %v859_v20  ;;  %v854_v29 = vld [vmem:[#allocation2 + $0x18] sm:$0xff] }
 0x167   : > { %v855_v30 = vld [vmem:[#allocation2 + $0x8] sm:$0xff]  ;;  %v861_v31 = vrot.slane %v856_v21, %v860_v24  ;;  %v865_v32 = vrot.slane %v856_v21, %v864_v25  ;;  %v877_v33 = vrot.slane %v872_v22, %v860_v24  ;;  %v881_v34 = vrot.slane %v872_v22, %v864_v25 }
 0x169   : > { %v868_v39 = vmul.f32 %v861_v31, %v852_v23  ;;  %v869_v40 = vmul.f32 %v865_v32, %v853_v28  ;;  %v870_v41 = vmul.f32 %v861_v31, %v854_v29  ;;  %v871_v42 = vmul.f32 %v865_v32, %v855_v30 }
 0x16b   : > { %v884_v43 = vadd.f32 %v877_v33, %v868_v39  ;;  %v885_v44 = vadd.f32 %v881_v34, %v869_v40  ;;  %v886_v45 = vadd.f32 %v877_v33, %v870_v41  ;;  %v887_v46 = vadd.f32 %v881_v34, %v871_v42 }
 0x16d   : > { %v894_v47 = vadd.f32 %v890_v35, %v884_v43  ;;  %v895_v48 = vadd.f32 %v891_v36, %v885_v44  ;;  %v896_v49 = vadd.f32 %v892_v37, %v886_v45  ;;  %v897_v50 = vadd.f32 %v893_v38, %v887_v46 }
 0x16f   : > { %v898_v51 = vmax.f32 %v894_v47, 0.0  ;;  %v899_v52 = vmax.f32 %v895_v48, 0.0  ;;  %v900_v53 = vmax.f32 %v896_v49, 0.0  ;;  %v901_v54 = vmax.f32 %v897_v50, 0.0 }
 0x171   : > { %v1171_v55 = vpack.c.bf16 %v899_v52, %v898_v51  ;;  %v1172_v56 = vpack.c.bf16 %v901_v54, %v900_v53 }
 0x173   : > { %914 = vst [vmem:[%s1657_s29] sm:$0xff] %v1171_v55  ;;  %915 = vst [vmem:[%s1657_s29 + $0x8] sm:$0xff] %v1172_v56 }
 0x174 PF: > { %922 = sbr.rel (!%p1537_p13) target bundleno = 380 (0x17c), region = 166  ;;  %s1173_s24 = sshll.u32 (%p1537_p13), %s1388_s25, 3 }
 0x175   : > { %s928_s14 = scalar_lea.vmem (%p1537_p13), %s1759_s5, %s1173_s24 }
 0x17a   : > { %v959_v57 = vld [vmem:[%s1657_s29] sm:$0xff]  ;;  %v961_v58 = vld [vmem:[%s1657_s29 + $0x8] sm:$0xff] }
 0x17b   : > { %960 = vst [vmem:[%s928_s14] sm:$0xff] %v959_v57  ;;  %962 = vst [vmem:[%s928_s14 + $0x10] sm:$0xff] %v961_v58 }
 0x17c PF: > { %s15_s28 = sadd.s32 1, %s1400_s28   ;;  %s1773_s8 = sld [smem:[#allocation12_spill]] }
 0x17d   : > { %p12_p7 = scmp.ge.s32.totalorder %s15_s28, 38   ;;  %s1774_s23 = sld [smem:[#allocation11_spill]] }
 0x17e   : > { %s1775_s22 = sld [smem:[#allocation7_spill]]  ;;  %s1779_s18 = smov %s1364_s19 }
 0x17f   : > { %s1776_s11 = sld [smem:[#allocation10_spill]]  ;;  %s1781_s20 = smov %s1372_s21 }
 0x180   : > { %s1777_s16 = sld [smem:[#allocation8_spill]]  ;;  %s1784_s24 = smov %s1392_s26 }
 0x181   : > { %s1778_s17 = sld [smem:[#allocation9_spill]]  ;;  %s1785_s25 = smov %s1396_s27 }
 0x182   : > { %s1780_s19 = smov %s1773_s8 }
 0x183   : > { %s1782_s21 = smov %s1774_s23  ;;  %14 = sbr.rel (!%p12_p7) target bundleno = 6 (0x6), region = 257 }
 0x185   : > { %s1783_s23 = smov %s1776_s11 }
 0x186   : > { %s1786_s26 = smov %s1777_s16 }
 0x187   : > { %s1787_s27 = smov %s1778_s17 }

// kernel: encoder_forward.45
= control target key start
LH: loop header
LB: loop body
LE: loop exit
PB: predicated region body
PF: predicated region fallthrough
CT: control target
= control target key end

     0   :  { %vm21_vm0 = vcmask 1041409   ;;  %vm23_vm1 = vcmask 1043459   ;;  %vm25_vm2 = vcmask 1045509   ;;  %vm27_vm3 = vcmask 1047559   ;;  %s55_s0 = inlined_call_operand.vmem [shape: bf16[2,1,512], index: 0, kind: input, shape index: {}]   ;;  %s56_s1 = inlined_call_operand.vmem [shape: f32[2,512], index: 1, kind: output, shape index: {}]  }
   0x1   :  { %v36_v0 = vld [vmem:[%s55_s0] sm:$0xff]  }
   0x2   :  { %v37_v1 = vunpack.c.l.bf16 %v36_v0  ;;  %v38_v2 = vunpack.c.h.bf16 %v36_v0 }
   0x4   :  { %v20_v3 = vrot.slane %v38_v2, 7 }
   0x6   :  { %v22_v4 = vsel %vm21_vm0, %v20_v3, %v37_v1 }
   0x7   :  { %v24_v5 = vsel %vm23_vm1, %v20_v3, %v22_v4 }
   0x8   :  { %v26_v6 = vsel %vm25_vm2, %v20_v3, %v24_v5 }
   0x9   :  { %v28_v7 = vsel %vm27_vm3, %v20_v3, %v26_v6 }
   0xa   :  { %30 = vst [vmem:[%s56_s1] sm:$0xff] %v28_v7 }

// kernel: encoder_forward.46
= control target key start
LH: loop header
LB: loop body
LE: loop exit
PB: predicated region body
PF: predicated region fallthrough
CT: control target
= control target key end

     0   :  { %s1020_s15 = smov 0   ;;  %s1022_s16 = smov 0   ;;  %s1146_s0 = inlined_call_operand.vmem [shape: bf16[16,512], index: 0, kind: input, shape index: {}]   ;;  %s1147_s1 = inlined_call_operand.vmem [shape: bf16[512,256], index: 1, kind: input, shape index: {}]   ;;  %s1148_s2 = inlined_call_operand.vmem [shape: f32[1,256], index: 2, kind: input, shape index: {}]   ;;  %s1149_s3 = inlined_call_operand.vmem [shape: f32[1,256], index: 3, kind: input, shape index: {}]   ;;  %s1150_s4 = inlined_call_operand.vmem [shape: f32[16,256], index: 4, kind: output, shape index: {}]  }
   0x1   :  { %s1024_s17 = smov 0   ;;  %s1026_s18 = smov 0  }
   0x2   :  { %s1028_s19 = smov 0  }
   0x3 LB: > { %s26_s20 = sadd.s32 1, %s988_s18  ;;  %p49_p1 = scmp.ne.s32.totalorder %s980_s16, %s976_s15  ;;  %s992_s19 = sphi %s1028_s19, %s14_s19   ;;  %s988_s18 = sphi %s1026_s18, %s1154_s18   ;;  %s984_s17 = sphi %s1024_s17, %s1153_s17   ;;  %s980_s16 = sphi %s1022_s16, %s1152_s16   ;;  %s976_s15 = sphi %s1020_s15, %s1151_s15  }
   0x4   : > { %p27_p0 = scmp.ge.s32.totalorder %s26_s20, 2  ;;  %p50_p2 = scmp.eq.s32.totalorder %s992_s19, 0 }
   0x5   : > { %s42_s22 = sadd.s32 1, %s980_s16  ;;  %p811_p5 = scmp.ge.s32.totalorder %s992_s19, 2 }
   0x6   : > { %s1156_s20 = smov (%p27_p0, %s26_s20), 0  ;;  %p51_p3 = por %p50_p2, %p49_p1 }
   0x7   : > { %s38_s21 = ssub.s32 %s988_s18, %s1156_s20  ;;  %199 = sbr.rel (%p811_p5) target bundleno = 17 (0x11), region = 24 }
   0x8   : > { %p40_p4 = scmp.eq.s32.totalorder %s38_s21, 0 }
   0xa   : > { %s1055_s23 = scalar_select %p40_p4, %s980_s16, %s42_s22  }
   0xc   : > { %202 = sbr.rel (!%p51_p3) target bundleno = 17 (0x11), region = 28  ;;  %s204_s24 = sand.u32 (%p51_p3), 1, %s980_s16  }
   0xd   : > { %s860_s25 = sshll.u32 (%p51_p3), %s988_s18, 3  ;;  %s812_s26 = sshll.u32 (%p51_p3), %s204_s24, 4 }
   0xe   : > { %s212_s29 = scalar_lea.vmem (%p51_p3), %s1146_s0, %s860_s25  ;;  %s206_s30 = scalar_lea.vmem (%p51_p3), [#allocation3], %s812_s26 }
   0xf   : > { %v243_v0 = vld [vmem:[%s212_s29] sm:$0xff] (%p51_p3)  ;;  %v245_v1 = vld [vmem:[%s212_s29 + $0x10] sm:$0xff] (%p51_p3) }
  0x10   : > { %244 = vst [vmem:[%s206_s30] sm:$0xff] (%p51_p3), %v243_v0  ;;  %246 = vst [vmem:[%s206_s30 + $0x8] sm:$0xff] (%p51_p3), %v245_v1 }
  0x11 PF: > { %p815_p6 = scmp.ge.s32.totalorder %s992_s19, 1  ;;  %p266_p7 = scmp.lt.s32.totalorder %s992_s19, 3 }
  0x13   : > { %p267_p8 = pnand %p815_p6, %p266_p7 }
  0x14   : > { %s273_s5 = sand.u32 (!%p267_p8), 1, %s976_s15   ;;  %s817_s6 = sshll.u32 (!%p267_p8), %s984_s17, 5 }
  0x15   : > { %270 = sbr.rel (%p267_p8) target bundleno = 317 (0x13d), region = 70  ;;  %s1067_s7 = sshll.u32 (!%p267_p8), %s273_s5, 4 }
  0x16   : > { %p325_p9 = scmp.lt.s32.totalorder (!%p267_p8), %s817_s6, 63  ;;  %s275_s12 = scalar_lea.vmem (!%p267_p8), [#allocation3], %s1067_s7 }
  0x17   : > { %p820_p10 = scmp.ne.s32.totalorder (!%p267_p8), %s984_s17, 0 }
  0x1a   : > { %s1158_s6 = smov (!%p325_p9, %s817_s6), 63  ;;  %360 = sbr.rel (%p820_p10) target bundleno = 34 (0x22), region = 78 }
  0x1b   : > { %s861_s8 = sshll.u32 %s1158_s6, 3 }
  0x1c   : > { %s1072_s11 = scalar_lea.vmem %s1147_s1, %s861_s8 }
  0x1f   : > { %v994_v2 = vmov 0.0  }
  0x20   : > { %361 = vst [vmem:[#allocation2 + $0x10] sm:$0xff] %v994_v2  ;;  %362 = vst [vmem:[#allocation2] sm:$0xff] %v994_v2 }
  0x21   : > { %363 = vst [vmem:[#allocation2 + $0x18] sm:$0xff] %v994_v2  ;;  %364 = vst [vmem:[#allocation2 + $0x8] sm:$0xff] %v994_v2 }
  0x22 PF: > { %v903_v3 = vld [vmem:[%s1072_s11 + $0x74] ss:$8 sps:$4 sm:$0xff]   ;;  %v905_v4 = vld [vmem:[%s1072_s11 + $0x70] ss:$8 sps:$4 sm:$0xff]   ;;  %v906_v5 = vld [vmem:[%s1072_s11 + $0x64] ss:$8 sps:$4 sm:$0xff]  }
  0x23   : > { %573 = vmatprep.subr.bf16.mxu0 %v903_v3  ;;  %v908_v6 = vld [vmem:[%s1072_s11 + $0x60] ss:$8 sps:$4 sm:$0xff]   ;;  %v909_v7 = vld [vmem:[%s1072_s11 + $0x54] ss:$8 sps:$4 sm:$0xff]   ;;  %v911_v8 = vld [vmem:[%s1072_s11 + $0x50] ss:$8 sps:$4 sm:$0xff]  }
  0x24   : > { %574 = vmatpush1.bf16.msra.mxu0 %v905_v4  ;;  %v912_v9 = vld [vmem:[%s1072_s11 + $0x44] ss:$8 sps:$4 sm:$0xff]   ;;  %v914_v10 = vld [vmem:[%s1072_s11 + $0x40] ss:$8 sps:$4 sm:$0xff]   ;;  %v915_v11 = vld [vmem:[%s1072_s11 + $0x34] ss:$8 sps:$4 sm:$0xff]  }
  0x25   : > { %575 = vmatprep.subr.bf16.mxu0 %v906_v5  ;;  %v917_v12 = vld [vmem:[%s1072_s11 + $0x30] ss:$8 sps:$4 sm:$0xff]   ;;  %v918_v13 = vld [vmem:[%s1072_s11 + $0x24] ss:$8 sps:$4 sm:$0xff]   ;;  %v920_v14 = vld [vmem:[%s1072_s11 + $0x20] ss:$8 sps:$4 sm:$0xff]  }
  0x26   : > { %v921_v15 = vld [vmem:[%s1072_s11 + $0x14] ss:$8 sps:$4 sm:$0xff]   ;;  %v923_v17 = vld [vmem:[%s1072_s11 + $0x10] ss:$8 sps:$4 sm:$0xff]   ;;  %v924_v18 = vld [vmem:[%s1072_s11 + $0x4] ss:$8 sps:$4 sm:$0xff]  }
  0x27   : > { %v953_v16 = vld [vmem:[%s275_s12 + $0x4] ss:$8 sps:$4 sm:$0xff]   ;;  %v926_v19 = vld [vmem:[%s1072_s11] ss:$8 sps:$4 sm:$0xff]   ;;  %v929_v21 = vld [vmem:[%s1072_s11 + $0xf0] ss:$8 sps:$4 sm:$0xff]  }
  0x28   : > { %576 = vmatpush1.bf16.msra.mxu0 %v908_v6  ;;  %605 = vmatprep.mubr.bf16.mxu0 %v953_v16  ;;  %v927_v20 = vld [vmem:[%s1072_s11 + $0xf4] ss:$8 sps:$4 sm:$0xff]   ;;  %v930_v22 = vld [vmem:[%s1072_s11 + $0xe4] ss:$8 sps:$4 sm:$0xff]   ;;  %v932_v23 = vld [vmem:[%s1072_s11 + $0xe0] ss:$8 sps:$4 sm:$0xff]  }
  0x29   : > { %577 = vmatprep.subr.bf16.mxu0 %v909_v7  ;;  %v933_v24 = vld [vmem:[%s1072_s11 + $0xd4] ss:$8 sps:$4 sm:$0xff]   ;;  %v935_v25 = vld [vmem:[%s1072_s11 + $0xd0] ss:$8 sps:$4 sm:$0xff]   ;;  %v936_v26 = vld [vmem:[%s1072_s11 + $0xc4] ss:$8 sps:$4 sm:$0xff]  }
  0x2a   : > { %v938_v27 = vld [vmem:[%s1072_s11 + $0xc0] ss:$8 sps:$4 sm:$0xff]   ;;  %v939_v28 = vld [vmem:[%s1072_s11 + $0xb4] ss:$8 sps:$4 sm:$0xff]   ;;  %v941_v29 = vld [vmem:[%s1072_s11 + $0xb0] ss:$8 sps:$4 sm:$0xff]  }
  0x2b   : > { %v942_v30 = vld [vmem:[%s1072_s11 + $0xa4] ss:$8 sps:$4 sm:$0xff]   ;;  %v944_v31 = vld [vmem:[%s1072_s11 + $0xa0] ss:$8 sps:$4 sm:$0xff]   ;;  %v945_v32 = vld [vmem:[%s1072_s11 + $0x94] ss:$8 sps:$4 sm:$0xff]  }
  0x2c   : > { %578 = vmatpush1.bf16.msra.mxu0 %v911_v8  ;;  %v947_v33 = vld [vmem:[%s1072_s11 + $0x90] ss:$8 sps:$4 sm:$0xff]   ;;  %v948_v34 = vld [vmem:[%s1072_s11 + $0x84] ss:$8 sps:$4 sm:$0xff]   ;;  %v950_v35 = vld [vmem:[%s1072_s11 + $0x80] ss:$8 sps:$4 sm:$0xff]  }
  0x2d   : > { %579 = vmatprep.subr.bf16.mxu0 %v912_v9  ;;  %v951_v36 = vld [vmem:[%s275_s12] ss:$8 sps:$4 sm:$0xff]   ;;  %p855_p11 = scmp.ne.s32.totalorder %s984_s17, 1 }
  0x2e   : > { %v365_v37 = vld [vmem:[#allocation2 + $0x10] sm:$0xff]  ;;  %v366_v39 = vld [vmem:[#allocation2] sm:$0xff]  ;;  %v367_v42 = vld [vmem:[#allocation2 + $0x18] sm:$0xff] }
  0x2f   : > { %v368_v45 = vld [vmem:[#allocation2 + $0x8] sm:$0xff] }
  0x30   : > { %580 = vmatpush1.bf16.msra.mxu0 %v914_v10 }
  0x31   : > { %581 = vmatprep.subr.bf16.mxu0 %v915_v11 }
  0x34   : > { %582 = vmatpush1.bf16.msra.mxu0 %v917_v12 }
  0x35   : > { %583 = vmatprep.subr.bf16.mxu0 %v918_v13 }
  0x38   : > { %584 = vmatpush1.bf16.msra.mxu0 %v920_v14 }
  0x39   : > { %585 = vmatprep.subr.bf16.mxu0 %v921_v15 }
  0x3c   : > { %586 = vmatpush1.bf16.msra.mxu0 %v923_v17 }
  0x3d   : > { %587 = vmatprep.subr.bf16.mxu0 %v924_v18 }
  0x40   : > { %588 = vmatpush1.bf16.msra.mxu0 %v926_v19 }
  0x41   : > { %589 = vmatprep.subr.bf16.mxu0 %v927_v20 }
  0x44   : > { %590 = vmatpush2.bf16.msra.mxu0 %v929_v21 }
  0x45   : > { %591 = vmatprep.subr.bf16.mxu0 %v930_v22 }
  0x48   : > { %592 = vmatpush2.bf16.msra.mxu0 %v932_v23 }
  0x49   : > { %593 = vmatprep.subr.bf16.mxu0 %v933_v24 }
  0x4c   : > { %594 = vmatpush2.bf16.msra.mxu0 %v935_v25 }
  0x4d   : > { %595 = vmatprep.subr.bf16.mxu0 %v936_v26 }
  0x50   : > { %596 = vmatpush2.bf16.msra.mxu0 %v938_v27 }
  0x51   : > { %597 = vmatprep.subr.bf16.mxu0 %v939_v28 }
  0x54   : > { %598 = vmatpush2.bf16.msra.mxu0 %v941_v29 }
  0x55   : > { %599 = vmatprep.subr.bf16.mxu0 %v942_v30 }
  0x58   : > { %600 = vmatpush2.bf16.msra.mxu0 %v944_v31 }
  0x59   : > { %601 = vmatprep.subr.bf16.mxu0 %v945_v32 }
  0x5c   : > { %602 = vmatpush2.bf16.msra.mxu0 %v947_v33 }
  0x5d   : > { %603 = vmatprep.subr.bf16.mxu0 %v948_v34 }
  0x60   : > { %604 = vmatpush2.bf16.msra.mxu0 %v950_v35 }
  0x63   : > { %606 = vmatmul.mubr.bf16.vlgmr.msra.gmra.mxu0 %v951_v36 }
 0x123   : > { %v607_v38 = vpop.f32.mrf.mxu0 }
 0x124   : > { %v616_v40 = vadd.f32 %v607_v38, %v365_v37 }
 0x125   : > { %v609_v41 = vpop.f32.mrf.mxu0 }
 0x126   : > { %620 = vst [vmem:[#allocation2 + $0x10] sm:$0xff] %v616_v40  ;;  %v617_v43 = vadd.f32 %v609_v41, %v366_v39 }
 0x127   : > { %v611_v44 = vpop.f32.mrf.mxu0 }
 0x128   : > { %621 = vst [vmem:[#allocation2] sm:$0xff] %v617_v43  ;;  %v618_v46 = vadd.f32 %v611_v44, %v367_v42  ;;  %627 = sbr.rel (%p855_p11) target bundleno = 317 (0x13d), region = 82 }
 0x129   : > { %v613_v47 = vpop.f32.mrf.mxu0 }
 0x12a   : > { %622 = vst [vmem:[#allocation2 + $0x18] sm:$0xff] %v618_v46  ;;  %v619_v48 = vadd.f32 %v613_v47, %v368_v45 }
 0x12c   : > { %623 = vst [vmem:[#allocation2 + $0x8] sm:$0xff] %v619_v48 }
 0x12d   : > { %v634_v49 = vlaneseq  ;;  %v632_v51 = vld [vmem:[%s1148_s2] sm:$0x3]  ;;  %v628_v53 = vld [vmem:[#allocation2 + $0x10] sm:$0xff] }
 0x12e   : > { %v648_v52 = vld [vmem:[%s1149_s3] sm:$0x3] }
 0x12f   : > { %v635_v50 = vshrl.u32 %v634_v49, 7  ;;  %v629_v56 = vld [vmem:[#allocation2] sm:$0xff] }
 0x131   : > { %v636_v54 = vsub.s32 0, %v635_v50  ;;  %v640_v55 = vsub.s32 1, %v635_v50  ;;  %v630_v57 = vld [vmem:[#allocation2 + $0x18] sm:$0xff] }
 0x133   : > { %v631_v58 = vld [vmem:[#allocation2 + $0x8] sm:$0xff]  ;;  %v637_v59 = vrot.slane %v632_v51, %v636_v54  ;;  %v653_v60 = vrot.slane %v648_v52, %v636_v54  ;;  %v641_v61 = vrot.slane %v632_v51, %v640_v55  ;;  %v657_v62 = vrot.slane %v648_v52, %v640_v55 }
 0x135   : > { %v644_v63 = vmul.f32 %v637_v59, %v628_v53  ;;  %v645_v0 = vmul.f32 %v641_v61, %v629_v56  ;;  %v646_v1 = vmul.f32 %v637_v59, %v630_v57  ;;  %v647_v2 = vmul.f32 %v641_v61, %v631_v58 }
 0x137   : > { %v660_v3 = vadd.f32 %v653_v60, %v644_v63  ;;  %v661_v4 = vadd.f32 %v657_v62, %v645_v0  ;;  %v662_v5 = vadd.f32 %v653_v60, %v646_v1  ;;  %v663_v6 = vadd.f32 %v657_v62, %v647_v2 }
 0x139   : > { %v664_v7 = vmax.f32 %v660_v3, 0.0  ;;  %v665_v8 = vmax.f32 %v661_v4, 0.0  ;;  %v666_v9 = vmax.f32 %v662_v5, 0.0  ;;  %v667_v10 = vmax.f32 %v663_v6, 0.0 }
 0x13b   : > { %668 = vst [vmem:[%s1150_s4] sm:$0xff] %v664_v7  ;;  %669 = vst [vmem:[%s1150_s4 + $0x8] sm:$0xff] %v665_v8 }
 0x13c   : > { %670 = vst [vmem:[%s1150_s4 + $0x10] sm:$0xff] %v666_v9  ;;  %671 = vst [vmem:[%s1150_s4 + $0x18] sm:$0xff] %v667_v10 }
 0x13d PF: > { %s14_s19 = sadd.s32 1, %s992_s19   ;;  %s1151_s15 = smov %s980_s16 }
 0x13e   : > { %p11_p12 = scmp.ge.s32.totalorder %s14_s19, 4   ;;  %s1152_s16 = smov %s1055_s23 }
 0x13f   : > { %s1153_s17 = smov %s988_s18  ;;  %s1154_s18 = smov %s1156_s20 }
 0x140   :  { %13 = sbr.rel (!%p11_p12) target bundleno = 3 (0x3), region = 126 }

// kernel: encoder_forward.47
= control target key start
LH: loop header
LB: loop body
LE: loop exit
PB: predicated region body
PF: predicated region fallthrough
CT: control target
= control target key end

     0   :  { %s392_s1 = inlined_call_operand.vmem [shape: bf16[256,128], index: 1, kind: input, shape index: {}]   ;;  %s393_s0 = inlined_call_operand.vmem [shape: bf16[16,256], index: 0, kind: input, shape index: {}]   ;;  %s394_s2 = inlined_call_operand.vmem [shape: f32[1,128], index: 2, kind: input, shape index: {}]   ;;  %s395_s3 = inlined_call_operand.vmem [shape: f32[1,128], index: 3, kind: input, shape index: {}]   ;;  %s396_s4 = inlined_call_operand.vmem [shape: f32[16,128], index: 4, kind: output, shape index: {}]  }
   0x1   :  { %v282_v0 = vld [vmem:[%s392_s1 + $0x78] sm:$0xff]   ;;  %v284_v2 = vld [vmem:[%s392_s1 + $0x70] sm:$0xff]   ;;  %v286_v4 = vld [vmem:[%s392_s1 + $0x68] sm:$0xff]  }
   0x2   :  { %v283_v1 = vld [vmem:[%s392_s1 + $0x38] sm:$0xff]   ;;  %260 = vmatprep.subr.bf16.mxu0 %v282_v0  ;;  %v285_v3 = vld [vmem:[%s392_s1 + $0x30] sm:$0xff]   ;;  %v287_v5 = vld [vmem:[%s392_s1 + $0x28] sm:$0xff]  }
   0x3   :  { %261 = vmatpush3.bf16.msra.mxu0 %v283_v1  ;;  %v288_v6 = vld [vmem:[%s392_s1 + $0x60] sm:$0xff]   ;;  %v290_v8 = vld [vmem:[%s392_s1 + $0x58] sm:$0xff]   ;;  %v292_v10 = vld [vmem:[%s392_s1 + $0x50] sm:$0xff]  }
   0x4   :  { %262 = vmatprep.subr.bf16.mxu0 %v284_v2  ;;  %v289_v7 = vld [vmem:[%s392_s1 + $0x20] sm:$0xff]   ;;  %v291_v9 = vld [vmem:[%s392_s1 + $0x18] sm:$0xff]   ;;  %v293_v12 = vld [vmem:[%s392_s1 + $0x10] sm:$0xff]  }
   0x5   :  { %v300_v11 = vld [vmem:[%s393_s0 + $0x4] ss:$8 sps:$4 sm:$0xff]   ;;  %v298_v17 = vld [vmem:[%s393_s0] ss:$8 sps:$4 sm:$0xff]  }
   0x6   :  { %198 = vmatprep.mubr.bf16.mxu0 %v300_v11  ;;  %v294_v13 = vld [vmem:[%s392_s1 + $0x48] sm:$0xff]   ;;  %v296_v15 = vld [vmem:[%s392_s1 + $0x40] sm:$0xff]  }
   0x7   :  { %263 = vmatpush3.bf16.msra.mxu0 %v285_v3  ;;  %v295_v14 = vld [vmem:[%s392_s1 + $0x8] sm:$0xff]   ;;  %v297_v16 = vld [vmem:[%s392_s1] sm:$0xff]  }
   0x8   :  { %264 = vmatprep.subr.bf16.mxu0 %v286_v4  ;;  %v258_v20 = vld [vmem:[%s394_s2] ss:$0 sm:$0xff] }
   0x9   :  { %v259_v22 = vld [vmem:[%s395_s3] ss:$0 sm:$0xff] }
   0xb   :  { %265 = vmatpush3.bf16.msra.mxu0 %v287_v5 }
   0xc   :  { %266 = vmatprep.subr.bf16.mxu0 %v288_v6 }
   0xf   :  { %267 = vmatpush3.bf16.msra.mxu0 %v289_v7 }
  0x10   :  { %268 = vmatprep.subr.bf16.mxu0 %v290_v8 }
  0x13   :  { %269 = vmatpush3.bf16.msra.mxu0 %v291_v9 }
  0x14   :  { %270 = vmatprep.subr.bf16.mxu0 %v292_v10 }
  0x17   :  { %271 = vmatpush3.bf16.msra.mxu0 %v293_v12 }
  0x18   :  { %272 = vmatprep.subr.bf16.mxu0 %v294_v13 }
  0x1b   :  { %273 = vmatpush3.bf16.msra.mxu0 %v295_v14 }
  0x1c   :  { %274 = vmatprep.subr.bf16.mxu0 %v296_v15 }
  0x1f   :  { %275 = vmatpush3.bf16.msra.mxu0 %v297_v16 }
  0x22   :  { %199 = vmatmul.mubr.bf16.vlgmr.msra.gmra.mxu0 %v298_v17 }
  0xe2   :  { %v276_v18 = vpop.f32.mrf.mxu0 }
  0xe4   :  { %v277_v19 = vpop.f32.mrf.mxu0 }
  0xe5   :  { %v278_v21 = vadd.f32 %v277_v19, %v276_v18 }
  0xe6   :  { %v279_v23 = vpop.f32.mrf.mxu0 }
  0xe7   :  { %v223_v24 = vmul.f32 %v278_v21, %v258_v20 }
  0xe8   :  { %v280_v25 = vpop.f32.mrf.mxu0 }
  0xe9   :  { %v232_v26 = vadd.f32 %v259_v22, %v223_v24  ;;  %v281_v27 = vadd.f32 %v280_v25, %v279_v23 }
  0xeb   :  { %234 = vst [vmem:[%s396_s4] sm:$0xff] %v232_v26  ;;  %v224_v28 = vmul.f32 %v281_v27, %v258_v20 }
  0xed   :  { %v233_v29 = vadd.f32 %v259_v22, %v224_v28 }
  0xef   :  { %235 = vst [vmem:[%s396_s4 + $0x8] sm:$0xff] %v233_v29 }

</bundles_post_ra>
